<compile_context>
chip_gen: v6e
topology: v6e:2x2x1
jax: 0.10.0
libtpu: 0.0.40
codegen_flags: <defaults>
</compile_context>

<pallas_src>
import functools

import jax
import jax.numpy as jnp
from jax import lax
from jax.experimental import pallas as pl
from jax.experimental.pallas import tpu as pltpu


# ----------------------------------------------------------------------------
# Fused kernel: feature -> shrink -> map x3 -> expand -> sub-pixel deconv
# ----------------------------------------------------------------------------
def _fsrcnn_fused_kernel(x_ref, yx_ref, wf_ref, bf_ref, ws_ref, bs_ref,
                         wm_ref, bm_ref, we_ref, be_ref, wd_ref, bd_ref,
                         o_ref, fcol_ref, mcol_ref, dcol_ref, *, H, W):
    # x_ref  : (1, 3, HW)    input image, channel-major, flattened spatially
    # yx_ref : (2, HW)       row / col index of every flattened pixel (int32)
    # wf_ref : (56, 75)      feature 5x5 weights      bf_ref: (56, 1)
    # ws_ref : (12, 56)      shrink 1x1               bs_ref: (12, 1)
    # wm_ref : (3, 12, 108)  3 mapping layers, fused-tap layout  bm: (3,12,1)
    # we_ref : (56, 12)      expand 1x1               be_ref: (56, 1)
    # wd_ref : (5, 12, 280)  deconv taps grouped by tap-row      bd: (12, 1)
    # o_ref  : (1, 12, HW)   4 sub-pixel phases x 3 channels
    # fcol_ref/mcol_ref/dcol_ref : VMEM im2col staging buffers
    HW = H * W
    f32 = jnp.float32

    yi = yx_ref[0:1, :]                       # (1, HW) pixel row index
    xi = yx_ref[1:2, :]                       # (1, HW) pixel col index

    def tap_mask(dy, dx):
        return ((yi >= -dy) & (yi < H - dy) &
                (xi >= -dx) & (xi < W - dx))

    def shift2d(a, dy, dx, mask):
        """a[c, y*W+x] -> a[c, (y+dy)*W + (x+dx)], zero outside the image."""
        s = dy * W + dx
        out = a if s == 0 else pltpu.roll(a, (-s) % HW, axis=1)
        if dy == 0 and dx == 0:
            return out
        return jnp.where(mask, out, 0.0)

    # Hoisted tap offsets / border masks (shared by feature + deconv, maps).
    off5 = [(dy, dx) for dy in range(-2, 3) for dx in range(-2, 3)]
    off3 = [(dy, dx) for dy in range(-1, 2) for dx in range(-1, 2)]
    mask5 = [tap_mask(dy, dx) for dy, dx in off5]
    mask3 = [tap_mask(dy, dx) for dy, dx in off3]

    # ---- feature extraction: 5x5 conv as one (56,75) x (75,HW) GEMM ---------
    x = x_ref[0]                                               # (3, HW)
    for t, (dy, dx) in enumerate(off5):
        fcol_ref[3 * t:3 * t + 3, :] = shift2d(x, dy, dx, mask5[t])
    feat = jnp.dot(wf_ref[...], fcol_ref[...], preferred_element_type=f32)
    feat = jnp.maximum(feat + bf_ref[...], 0.0)                # (56, HW)

    # ---- shrinking (1x1) -----------------------------------------------------
    act = jnp.dot(ws_ref[...], feat, preferred_element_type=f32)
    act = jnp.maximum(act + bs_ref[...], 0.0)                  # (12, HW)

    # ---- mapping: three 3x3 convs, each one (12,108) x (108,HW) GEMM ---------
    for l in range(3):
        for t, (dy, dx) in enumerate(off3):
            mcol_ref[12 * t:12 * t + 12, :] = shift2d(act, dy, dx, mask3[t])
        act = jnp.dot(wm_ref[l], mcol_ref[...], preferred_element_type=f32)
        act = act + bm_ref[l]
        if l < 2:                              # ReLU after map1 / map2 only
            act = jnp.maximum(act, 0.0)

    # ---- expanding (1x1) ------------------------------------------------------
    exp = jnp.dot(we_ref[...], act, preferred_element_type=f32)
    exp = jnp.maximum(exp + be_ref[...], 0.0)                  # (56, HW)

    # ---- deconv as sub-pixel conv: 5 tap-row groups, K = 5*56 = 280 each -----
    dacc = None
    for ry in range(5):
        for rx in range(5):
            t = ry * 5 + rx
            dcol_ref[56 * rx:56 * rx + 56, :] = shift2d(
                exp, ry - 2, rx - 2, mask5[t])
        part = jnp.dot(wd_ref[ry], dcol_ref[...], preferred_element_type=f32)
        dacc = part if dacc is None else dacc + part
    o_ref[0] = (dacc + bd_ref[...]).astype(o_ref.dtype)        # (12, HW)


# ----------------------------------------------------------------------------
# Wrapper: flatten input, run the fused pallas_call, pixel-shuffle epilogue
# ----------------------------------------------------------------------------
def fsrcnn_forward(x_nchw, pp):
    N, C, H, W = x_nchw.shape
    assert C == 3, "FSRCNN expects 3 input channels"
    HW = H * W
    assert HW % 128 == 0, "H*W should be a multiple of 128 (lane-dense layout)"

    x_flat = x_nchw.reshape(N, C, HW)                          # channel-major
    idx = jnp.arange(HW, dtype=jnp.int32)
    yx = jnp.stack([idx // W, idx % W]).astype(jnp.int32)      # (2, HW)

    kernel = functools.partial(_fsrcnn_fused_kernel, H=H, W=W)
    phases = pl.pallas_call(
        kernel,
        out_shape=jax.ShapeDtypeStruct((N, 12, HW), jnp.float32),
        grid=(N,),
        in_specs=[
            pl.BlockSpec((1, 3, HW), lambda n: (n, 0, 0)),     # input image
            pl.BlockSpec((2, HW), lambda n: (0, 0)),           # y/x indices
            pl.BlockSpec((56, 75), lambda n: (0, 0)),          # feature w
            pl.BlockSpec((56, 1), lambda n: (0, 0)),           # feature b
            pl.BlockSpec((12, 56), lambda n: (0, 0)),          # shrink w
            pl.BlockSpec((12, 1), lambda n: (0, 0)),           # shrink b
            pl.BlockSpec((3, 12, 108), lambda n: (0, 0, 0)),   # mapping w
            pl.BlockSpec((3, 12, 1), lambda n: (0, 0, 0)),     # mapping b
            pl.BlockSpec((56, 12), lambda n: (0, 0)),          # expand w
            pl.BlockSpec((56, 1), lambda n: (0, 0)),           # expand b
            pl.BlockSpec((5, 12, 280), lambda n: (0, 0, 0)),   # deconv taps
            pl.BlockSpec((12, 1), lambda n: (0, 0)),           # deconv b (x4)
        ],
        out_specs=pl.BlockSpec((1, 12, HW), lambda n: (n, 0, 0)),
        scratch_shapes=[
            pltpu.VMEM((75, HW), jnp.float32),                 # feature im2col
            pltpu.VMEM((108, HW), jnp.float32),                # mapping im2col
            pltpu.VMEM((280, HW), jnp.float32),                # deconv im2col
        ],
        compiler_params=pltpu.CompilerParams(
            dimension_semantics=("parallel",)),
    )(x_flat, yx, pp["wf"], pp["bf"], pp["ws"], pp["bs"],
      pp["wm"], pp["bm"], pp["we"], pp["be"], pp["wd"], pp["bd"])

    # Pixel-shuffle: (N, 12=py*px*c, H, W) -> (N, 3, 2H, 2W) -> crop to 2H-1.
    ph = phases.reshape(N, 2, 2, 3, H, W)                      # (n,py,px,c,y,x)
    up = jnp.transpose(ph, (0, 3, 4, 1, 5, 2)).reshape(N, 3, 2 * H, 2 * W)
    return up[:, :, :2 * H - 1, :2 * W - 1]                    # NCHW


# ----------------------------------------------------------------------------
# Parameters (HWIO conv layouts; deconv in PyTorch ConvTranspose2d layout)
# ----------------------------------------------------------------------------
def init_params(key):
    shapes = {
        "w_feat":   (5, 5, 3, 56),  "b_feat":   (56,),
        "w_shrink": (1, 1, 56, 12), "b_shrink": (12,),
        "w_map1":   (3, 3, 12, 12), "b_map1":   (12,),
        "w_map2":   (3, 3, 12, 12), "b_map2":   (12,),
        "w_map3":   (3, 3, 12, 12), "b_map3":   (12,),
        "w_expand": (1, 1, 12, 56), "b_expand": (56,),
        "w_deconv": (56, 3, 9, 9),  "b_deconv": (3,),
    }
    params = {}
    for name, shape in shapes.items():
        key, sub = jax.random.split(key)
        scale = 0.05 if name.startswith("w") else 0.01
        params[name] = scale * jax.random.normal(sub, shape, dtype=jnp.float32)
    return params


def pack_params(p):
    """Repack weights into the channel-major fused-GEMM layouts."""
    f32 = jnp.float32
    # Feature: (ky,kx,ic,o) -> (o, ky,kx,ic) -> (56, 75); column = tap*3 + ic.
    wf = jnp.transpose(p["w_feat"], (3, 0, 1, 2)).reshape(56, 75)
    ws = p["w_shrink"].reshape(56, 12).T                       # (12, 56)
    # Mapping: (ky,kx,i,o) -> (o, ky,kx,i) -> (12, 108); column = tap*12 + i.
    wm = jnp.stack([jnp.transpose(p[f"w_map{i}"], (3, 0, 1, 2)).reshape(12, 108)
                    for i in (1, 2, 3)])                       # (3, 12, 108)
    bm = jnp.stack([p[f"b_map{i}"] for i in (1, 2, 3)]).reshape(3, 12, 1)
    we = p["w_expand"].reshape(12, 56).T                       # (56, 12)

    # Sub-pixel deconv taps: for window offset (ry, rx) in the 5x5 tap grid,
    # phase (py, px) uses ConvTranspose weight index (8+py-2ry, 8+px-2rx).
    wt = p["w_deconv"]                                         # (56, 3, 9, 9)
    wd25 = jnp.zeros((25, 56, 12), f32)
    for ry in range(5):
        for rx in range(5):
            for py in range(2):
                iy = 8 + py - 2 * ry
                if not 0 <= iy <= 8:
                    continue
                for px in range(2):
                    ix = 8 + px - 2 * rx
                    if not 0 <= ix <= 8:
                        continue
                    ph = 2 * py + px
                    wd25 = wd25.at[ry * 5 + rx, :, 3 * ph:3 * ph + 3].set(
                        wt[:, :, iy, ix])
    # Group by tap-row: (25,56,12) -> (5,5,56,12) -> (5, 12, 5*56=280).
    wd = jnp.transpose(wd25.reshape(5, 5, 56, 12), (0, 3, 1, 2)).reshape(
        5, 12, 280)

    return {
        "wf": wf, "bf": p["b_feat"].reshape(56, 1),
        "ws": ws, "bs": p["b_shrink"].reshape(12, 1),
        "wm": wm, "bm": bm,
        "we": we, "be": p["b_expand"].reshape(56, 1),
        "wd": wd, "bd": jnp.tile(p["b_deconv"], 4).reshape(12, 1),
    }


# ----------------------------------------------------------------------------
# Pure-JAX reference (correctness check)
# ----------------------------------------------------------------------------
def _conv_ref(x, w, b, padding, relu, lhs_dilation=(1, 1)):
    out = lax.conv_general_dilated(
        x, w, window_strides=(1, 1),
        padding=[(padding, padding), (padding, padding)],
        lhs_dilation=lhs_dilation,
        dimension_numbers=("NHWC", "HWIO", "NHWC")) + b
    return jnp.maximum(out, 0.0) if relu else out


def fsrcnn_ref(x_nchw, p):
    x = jnp.transpose(x_nchw, (0, 2, 3, 1))
    x = _conv_ref(x, p["w_feat"], p["b_feat"], 2, True)
    x = _conv_ref(x, p["w_shrink"], p["b_shrink"], 0, True)
    x = _conv_ref(x, p["w_map1"], p["b_map1"], 1, True)
    x = _conv_ref(x, p["w_map2"], p["b_map2"], 1, True)
    x = _conv_ref(x, p["w_map3"], p["b_map3"], 1, False)
    x = _conv_ref(x, p["w_expand"], p["b_expand"], 0, True)
    w_dec = jnp.transpose(p["w_deconv"], (2, 3, 0, 1))[::-1, ::-1]  # (9,9,56,3)
    x = _conv_ref(x, w_dec, p["b_deconv"], 4, False, lhs_dilation=(2, 2))
    return jnp.transpose(x, (0, 3, 1, 2))


if __name__ == "__main__":
    key = jax.random.PRNGKey(0)
    k_param, k_x = jax.random.split(key)
    params = init_params(k_param)
    packed = pack_params(params)

    # Small NCHW input, 3 channels as required by FSRCNN's first conv.
    x = jax.random.normal(k_x, (2, 3, 16, 16), dtype=jnp.float32)

    fwd = jax.jit(fsrcnn_forward)
    out = jax.block_until_ready(fwd(x, packed))
    ref = jax.block_until_ready(fsrcnn_ref(x, params))

    # ConvTranspose2d(k=9, s=2, p=4) on 16x16 -> 31x31
    assert out.shape == (2, 3, 31, 31), out.shape
    assert jnp.allclose(out, ref, atol=1e-3, rtol=1e-3), \
        float(jnp.max(jnp.abs(out - ref)))

    print("KERNEL_OK")
</pallas_src>

<mosaic_0001>
module attributes {stable_mosaic.version = 11 : i64} {
  func.func @_fsrcnn_fused_kernel(%arg0: i32, %arg1: memref<1x3x256xf32, #tpu.memory_space<vmem>>, %arg2: memref<2x256xi32, #tpu.memory_space<vmem>>, %arg3: memref<56x75xf32, #tpu.memory_space<vmem>>, %arg4: memref<56x1xf32, #tpu.memory_space<vmem>>, %arg5: memref<12x56xf32, #tpu.memory_space<vmem>>, %arg6: memref<12x1xf32, #tpu.memory_space<vmem>>, %arg7: memref<3x12x108xf32, #tpu.memory_space<vmem>>, %arg8: memref<3x12x1xf32, #tpu.memory_space<vmem>>, %arg9: memref<56x12xf32, #tpu.memory_space<vmem>>, %arg10: memref<56x1xf32, #tpu.memory_space<vmem>>, %arg11: memref<5x12x280xf32, #tpu.memory_space<vmem>>, %arg12: memref<12x1xf32, #tpu.memory_space<vmem>>, %arg13: memref<1x12x256xf32, #tpu.memory_space<vmem>>, %arg14: memref<75x256xf32, #tpu.memory_space<vmem>>, %arg15: memref<108x256xf32, #tpu.memory_space<vmem>>, %arg16: memref<280x256xf32, #tpu.memory_space<vmem>>) attributes {dimension_semantics = [#tpu.dimension_semantics<parallel>], iteration_bounds = array<i64: 2>, scalar_prefetch = 0 : i64, scratch_operands = 3 : i64, tpu.core_type = #tpu.core_type<tc>, window_params = [{transform_indices = @transform_0, window_bounds = array<i64: 1, 3, 256>}, {pipeline_mode = #tpu.pipeline_mode<synchronous>, transform_indices = @transform_1, window_bounds = array<i64: 2, 256>}, {pipeline_mode = #tpu.pipeline_mode<synchronous>, transform_indices = @transform_2, window_bounds = array<i64: 56, 75>}, {pipeline_mode = #tpu.pipeline_mode<synchronous>, transform_indices = @transform_3, window_bounds = array<i64: 56, 1>}, {pipeline_mode = #tpu.pipeline_mode<synchronous>, transform_indices = @transform_4, window_bounds = array<i64: 12, 56>}, {pipeline_mode = #tpu.pipeline_mode<synchronous>, transform_indices = @transform_5, window_bounds = array<i64: 12, 1>}, {pipeline_mode = #tpu.pipeline_mode<synchronous>, transform_indices = @transform_6, window_bounds = array<i64: 3, 12, 108>}, {pipeline_mode = #tpu.pipeline_mode<synchronous>, transform_indices = @transform_7, window_bounds = array<i64: 3, 12, 1>}, {pipeline_mode = #tpu.pipeline_mode<synchronous>, transform_indices = @transform_8, window_bounds = array<i64: 56, 12>}, {pipeline_mode = #tpu.pipeline_mode<synchronous>, transform_indices = @transform_9, window_bounds = array<i64: 56, 1>}, {pipeline_mode = #tpu.pipeline_mode<synchronous>, transform_indices = @transform_10, window_bounds = array<i64: 5, 12, 280>}, {pipeline_mode = #tpu.pipeline_mode<synchronous>, transform_indices = @transform_11, window_bounds = array<i64: 12, 1>}, {transform_indices = @transform_12, window_bounds = array<i64: 1, 12, 256>}]} {
    %c0 = arith.constant 0 : index
    %c0_0 = arith.constant 0 : index
    %0 = vector.load %arg2[%c0, %c0_0] : memref<2x256xi32, #tpu.memory_space<vmem>>, vector<1x256xi32>
    %c1 = arith.constant 1 : index
    %c0_1 = arith.constant 0 : index
    %1 = vector.load %arg2[%c1, %c0_1] : memref<2x256xi32, #tpu.memory_space<vmem>>, vector<1x256xi32>
    %c2_i32 = arith.constant 2 : i32
    %2 = vector.broadcast %c2_i32 : i32 to vector<1x256xi32>
    %3 = arith.cmpi sge, %0, %2 : vector<1x256xi32>
    %c18_i32 = arith.constant 18 : i32
    %4 = vector.broadcast %c18_i32 : i32 to vector<1x256xi32>
    %5 = arith.cmpi slt, %0, %4 : vector<1x256xi32>
    %6 = arith.andi %3, %5 : vector<1x256xi1>
    %c2_i32_2 = arith.constant 2 : i32
    %7 = vector.broadcast %c2_i32_2 : i32 to vector<1x256xi32>
    %8 = arith.cmpi sge, %1, %7 : vector<1x256xi32>
    %9 = arith.andi %6, %8 : vector<1x256xi1>
    %c18_i32_3 = arith.constant 18 : i32
    %10 = vector.broadcast %c18_i32_3 : i32 to vector<1x256xi32>
    %11 = arith.cmpi slt, %1, %10 : vector<1x256xi32>
    %12 = arith.andi %9, %11 : vector<1x256xi1>
    %c2_i32_4 = arith.constant 2 : i32
    %13 = vector.broadcast %c2_i32_4 : i32 to vector<1x256xi32>
    %14 = arith.cmpi sge, %0, %13 : vector<1x256xi32>
    %c18_i32_5 = arith.constant 18 : i32
    %15 = vector.broadcast %c18_i32_5 : i32 to vector<1x256xi32>
    %16 = arith.cmpi slt, %0, %15 : vector<1x256xi32>
    %17 = arith.andi %14, %16 : vector<1x256xi1>
    %c1_i32 = arith.constant 1 : i32
    %18 = vector.broadcast %c1_i32 : i32 to vector<1x256xi32>
    %19 = arith.cmpi sge, %1, %18 : vector<1x256xi32>
    %20 = arith.andi %17, %19 : vector<1x256xi1>
    %c17_i32 = arith.constant 17 : i32
    %21 = vector.broadcast %c17_i32 : i32 to vector<1x256xi32>
    %22 = arith.cmpi slt, %1, %21 : vector<1x256xi32>
    %23 = arith.andi %20, %22 : vector<1x256xi1>
    %c2_i32_6 = arith.constant 2 : i32
    %24 = vector.broadcast %c2_i32_6 : i32 to vector<1x256xi32>
    %25 = arith.cmpi sge, %0, %24 : vector<1x256xi32>
    %c18_i32_7 = arith.constant 18 : i32
    %26 = vector.broadcast %c18_i32_7 : i32 to vector<1x256xi32>
    %27 = arith.cmpi slt, %0, %26 : vector<1x256xi32>
    %28 = arith.andi %25, %27 : vector<1x256xi1>
    %c0_i32 = arith.constant 0 : i32
    %29 = vector.broadcast %c0_i32 : i32 to vector<1x256xi32>
    %30 = arith.cmpi sge, %1, %29 : vector<1x256xi32>
    %31 = arith.andi %28, %30 : vector<1x256xi1>
    %c16_i32 = arith.constant 16 : i32
    %32 = vector.broadcast %c16_i32 : i32 to vector<1x256xi32>
    %33 = arith.cmpi slt, %1, %32 : vector<1x256xi32>
    %34 = arith.andi %31, %33 : vector<1x256xi1>
    %c2_i32_8 = arith.constant 2 : i32
    %35 = vector.broadcast %c2_i32_8 : i32 to vector<1x256xi32>
    %36 = arith.cmpi sge, %0, %35 : vector<1x256xi32>
    %c18_i32_9 = arith.constant 18 : i32
    %37 = vector.broadcast %c18_i32_9 : i32 to vector<1x256xi32>
    %38 = arith.cmpi slt, %0, %37 : vector<1x256xi32>
    %39 = arith.andi %36, %38 : vector<1x256xi1>
    %c-1_i32 = arith.constant -1 : i32
    %40 = vector.broadcast %c-1_i32 : i32 to vector<1x256xi32>
    %41 = arith.cmpi sge, %1, %40 : vector<1x256xi32>
    %42 = arith.andi %39, %41 : vector<1x256xi1>
    %c15_i32 = arith.constant 15 : i32
    %43 = vector.broadcast %c15_i32 : i32 to vector<1x256xi32>
    %44 = arith.cmpi slt, %1, %43 : vector<1x256xi32>
    %45 = arith.andi %42, %44 : vector<1x256xi1>
    %c2_i32_10 = arith.constant 2 : i32
    %46 = vector.broadcast %c2_i32_10 : i32 to vector<1x256xi32>
    %47 = arith.cmpi sge, %0, %46 : vector<1x256xi32>
    %c18_i32_11 = arith.constant 18 : i32
    %48 = vector.broadcast %c18_i32_11 : i32 to vector<1x256xi32>
    %49 = arith.cmpi slt, %0, %48 : vector<1x256xi32>
    %50 = arith.andi %47, %49 : vector<1x256xi1>
    %c-2_i32 = arith.constant -2 : i32
    %51 = vector.broadcast %c-2_i32 : i32 to vector<1x256xi32>
    %52 = arith.cmpi sge, %1, %51 : vector<1x256xi32>
    %53 = arith.andi %50, %52 : vector<1x256xi1>
    %c14_i32 = arith.constant 14 : i32
    %54 = vector.broadcast %c14_i32 : i32 to vector<1x256xi32>
    %55 = arith.cmpi slt, %1, %54 : vector<1x256xi32>
    %56 = arith.andi %53, %55 : vector<1x256xi1>
    %c1_i32_12 = arith.constant 1 : i32
    %57 = vector.broadcast %c1_i32_12 : i32 to vector<1x256xi32>
    %58 = arith.cmpi sge, %0, %57 : vector<1x256xi32>
    %c17_i32_13 = arith.constant 17 : i32
    %59 = vector.broadcast %c17_i32_13 : i32 to vector<1x256xi32>
    %60 = arith.cmpi slt, %0, %59 : vector<1x256xi32>
    %61 = arith.andi %58, %60 : vector<1x256xi1>
    %c2_i32_14 = arith.constant 2 : i32
    %62 = vector.broadcast %c2_i32_14 : i32 to vector<1x256xi32>
    %63 = arith.cmpi sge, %1, %62 : vector<1x256xi32>
    %64 = arith.andi %61, %63 : vector<1x256xi1>
    %c18_i32_15 = arith.constant 18 : i32
    %65 = vector.broadcast %c18_i32_15 : i32 to vector<1x256xi32>
    %66 = arith.cmpi slt, %1, %65 : vector<1x256xi32>
    %67 = arith.andi %64, %66 : vector<1x256xi1>
    %c1_i32_16 = arith.constant 1 : i32
    %68 = vector.broadcast %c1_i32_16 : i32 to vector<1x256xi32>
    %69 = arith.cmpi sge, %0, %68 : vector<1x256xi32>
    %c17_i32_17 = arith.constant 17 : i32
    %70 = vector.broadcast %c17_i32_17 : i32 to vector<1x256xi32>
    %71 = arith.cmpi slt, %0, %70 : vector<1x256xi32>
    %72 = arith.andi %69, %71 : vector<1x256xi1>
    %c1_i32_18 = arith.constant 1 : i32
    %73 = vector.broadcast %c1_i32_18 : i32 to vector<1x256xi32>
    %74 = arith.cmpi sge, %1, %73 : vector<1x256xi32>
    %75 = arith.andi %72, %74 : vector<1x256xi1>
    %c17_i32_19 = arith.constant 17 : i32
    %76 = vector.broadcast %c17_i32_19 : i32 to vector<1x256xi32>
    %77 = arith.cmpi slt, %1, %76 : vector<1x256xi32>
    %78 = arith.andi %75, %77 : vector<1x256xi1>
    %c1_i32_20 = arith.constant 1 : i32
    %79 = vector.broadcast %c1_i32_20 : i32 to vector<1x256xi32>
    %80 = arith.cmpi sge, %0, %79 : vector<1x256xi32>
    %c17_i32_21 = arith.constant 17 : i32
    %81 = vector.broadcast %c17_i32_21 : i32 to vector<1x256xi32>
    %82 = arith.cmpi slt, %0, %81 : vector<1x256xi32>
    %83 = arith.andi %80, %82 : vector<1x256xi1>
    %c0_i32_22 = arith.constant 0 : i32
    %84 = vector.broadcast %c0_i32_22 : i32 to vector<1x256xi32>
    %85 = arith.cmpi sge, %1, %84 : vector<1x256xi32>
    %86 = arith.andi %83, %85 : vector<1x256xi1>
    %c16_i32_23 = arith.constant 16 : i32
    %87 = vector.broadcast %c16_i32_23 : i32 to vector<1x256xi32>
    %88 = arith.cmpi slt, %1, %87 : vector<1x256xi32>
    %89 = arith.andi %86, %88 : vector<1x256xi1>
    %c1_i32_24 = arith.constant 1 : i32
    %90 = vector.broadcast %c1_i32_24 : i32 to vector<1x256xi32>
    %91 = arith.cmpi sge, %0, %90 : vector<1x256xi32>
    %c17_i32_25 = arith.constant 17 : i32
    %92 = vector.broadcast %c17_i32_25 : i32 to vector<1x256xi32>
    %93 = arith.cmpi slt, %0, %92 : vector<1x256xi32>
    %94 = arith.andi %91, %93 : vector<1x256xi1>
    %c-1_i32_26 = arith.constant -1 : i32
    %95 = vector.broadcast %c-1_i32_26 : i32 to vector<1x256xi32>
    %96 = arith.cmpi sge, %1, %95 : vector<1x256xi32>
    %97 = arith.andi %94, %96 : vector<1x256xi1>
    %c15_i32_27 = arith.constant 15 : i32
    %98 = vector.broadcast %c15_i32_27 : i32 to vector<1x256xi32>
    %99 = arith.cmpi slt, %1, %98 : vector<1x256xi32>
    %100 = arith.andi %97, %99 : vector<1x256xi1>
    %c1_i32_28 = arith.constant 1 : i32
    %101 = vector.broadcast %c1_i32_28 : i32 to vector<1x256xi32>
    %102 = arith.cmpi sge, %0, %101 : vector<1x256xi32>
    %c17_i32_29 = arith.constant 17 : i32
    %103 = vector.broadcast %c17_i32_29 : i32 to vector<1x256xi32>
    %104 = arith.cmpi slt, %0, %103 : vector<1x256xi32>
    %105 = arith.andi %102, %104 : vector<1x256xi1>
    %c-2_i32_30 = arith.constant -2 : i32
    %106 = vector.broadcast %c-2_i32_30 : i32 to vector<1x256xi32>
    %107 = arith.cmpi sge, %1, %106 : vector<1x256xi32>
    %108 = arith.andi %105, %107 : vector<1x256xi1>
    %c14_i32_31 = arith.constant 14 : i32
    %109 = vector.broadcast %c14_i32_31 : i32 to vector<1x256xi32>
    %110 = arith.cmpi slt, %1, %109 : vector<1x256xi32>
    %111 = arith.andi %108, %110 : vector<1x256xi1>
    %c0_i32_32 = arith.constant 0 : i32
    %112 = vector.broadcast %c0_i32_32 : i32 to vector<1x256xi32>
    %113 = arith.cmpi sge, %0, %112 : vector<1x256xi32>
    %c16_i32_33 = arith.constant 16 : i32
    %114 = vector.broadcast %c16_i32_33 : i32 to vector<1x256xi32>
    %115 = arith.cmpi slt, %0, %114 : vector<1x256xi32>
    %116 = arith.andi %113, %115 : vector<1x256xi1>
    %c2_i32_34 = arith.constant 2 : i32
    %117 = vector.broadcast %c2_i32_34 : i32 to vector<1x256xi32>
    %118 = arith.cmpi sge, %1, %117 : vector<1x256xi32>
    %119 = arith.andi %116, %118 : vector<1x256xi1>
    %c18_i32_35 = arith.constant 18 : i32
    %120 = vector.broadcast %c18_i32_35 : i32 to vector<1x256xi32>
    %121 = arith.cmpi slt, %1, %120 : vector<1x256xi32>
    %122 = arith.andi %119, %121 : vector<1x256xi1>
    %c0_i32_36 = arith.constant 0 : i32
    %123 = vector.broadcast %c0_i32_36 : i32 to vector<1x256xi32>
    %124 = arith.cmpi sge, %0, %123 : vector<1x256xi32>
    %c16_i32_37 = arith.constant 16 : i32
    %125 = vector.broadcast %c16_i32_37 : i32 to vector<1x256xi32>
    %126 = arith.cmpi slt, %0, %125 : vector<1x256xi32>
    %127 = arith.andi %124, %126 : vector<1x256xi1>
    %c1_i32_38 = arith.constant 1 : i32
    %128 = vector.broadcast %c1_i32_38 : i32 to vector<1x256xi32>
    %129 = arith.cmpi sge, %1, %128 : vector<1x256xi32>
    %130 = arith.andi %127, %129 : vector<1x256xi1>
    %c17_i32_39 = arith.constant 17 : i32
    %131 = vector.broadcast %c17_i32_39 : i32 to vector<1x256xi32>
    %132 = arith.cmpi slt, %1, %131 : vector<1x256xi32>
    %133 = arith.andi %130, %132 : vector<1x256xi1>
    %c0_i32_40 = arith.constant 0 : i32
    %134 = vector.broadcast %c0_i32_40 : i32 to vector<1x256xi32>
    %135 = arith.cmpi sge, %0, %134 : vector<1x256xi32>
    %c16_i32_41 = arith.constant 16 : i32
    %136 = vector.broadcast %c16_i32_41 : i32 to vector<1x256xi32>
    %137 = arith.cmpi slt, %0, %136 : vector<1x256xi32>
    %138 = arith.andi %135, %137 : vector<1x256xi1>
    %c-1_i32_42 = arith.constant -1 : i32
    %139 = vector.broadcast %c-1_i32_42 : i32 to vector<1x256xi32>
    %140 = arith.cmpi sge, %1, %139 : vector<1x256xi32>
    %141 = arith.andi %138, %140 : vector<1x256xi1>
    %c15_i32_43 = arith.constant 15 : i32
    %142 = vector.broadcast %c15_i32_43 : i32 to vector<1x256xi32>
    %143 = arith.cmpi slt, %1, %142 : vector<1x256xi32>
    %144 = arith.andi %141, %143 : vector<1x256xi1>
    %c0_i32_44 = arith.constant 0 : i32
    %145 = vector.broadcast %c0_i32_44 : i32 to vector<1x256xi32>
    %146 = arith.cmpi sge, %0, %145 : vector<1x256xi32>
    %c16_i32_45 = arith.constant 16 : i32
    %147 = vector.broadcast %c16_i32_45 : i32 to vector<1x256xi32>
    %148 = arith.cmpi slt, %0, %147 : vector<1x256xi32>
    %149 = arith.andi %146, %148 : vector<1x256xi1>
    %c-2_i32_46 = arith.constant -2 : i32
    %150 = vector.broadcast %c-2_i32_46 : i32 to vector<1x256xi32>
    %151 = arith.cmpi sge, %1, %150 : vector<1x256xi32>
    %152 = arith.andi %149, %151 : vector<1x256xi1>
    %c14_i32_47 = arith.constant 14 : i32
    %153 = vector.broadcast %c14_i32_47 : i32 to vector<1x256xi32>
    %154 = arith.cmpi slt, %1, %153 : vector<1x256xi32>
    %155 = arith.andi %152, %154 : vector<1x256xi1>
    %c-1_i32_48 = arith.constant -1 : i32
    %156 = vector.broadcast %c-1_i32_48 : i32 to vector<1x256xi32>
    %157 = arith.cmpi sge, %0, %156 : vector<1x256xi32>
    %c15_i32_49 = arith.constant 15 : i32
    %158 = vector.broadcast %c15_i32_49 : i32 to vector<1x256xi32>
    %159 = arith.cmpi slt, %0, %158 : vector<1x256xi32>
    %160 = arith.andi %157, %159 : vector<1x256xi1>
    %c2_i32_50 = arith.constant 2 : i32
    %161 = vector.broadcast %c2_i32_50 : i32 to vector<1x256xi32>
    %162 = arith.cmpi sge, %1, %161 : vector<1x256xi32>
    %163 = arith.andi %160, %162 : vector<1x256xi1>
    %c18_i32_51 = arith.constant 18 : i32
    %164 = vector.broadcast %c18_i32_51 : i32 to vector<1x256xi32>
    %165 = arith.cmpi slt, %1, %164 : vector<1x256xi32>
    %166 = arith.andi %163, %165 : vector<1x256xi1>
    %c-1_i32_52 = arith.constant -1 : i32
    %167 = vector.broadcast %c-1_i32_52 : i32 to vector<1x256xi32>
    %168 = arith.cmpi sge, %0, %167 : vector<1x256xi32>
    %c15_i32_53 = arith.constant 15 : i32
    %169 = vector.broadcast %c15_i32_53 : i32 to vector<1x256xi32>
    %170 = arith.cmpi slt, %0, %169 : vector<1x256xi32>
    %171 = arith.andi %168, %170 : vector<1x256xi1>
    %c1_i32_54 = arith.constant 1 : i32
    %172 = vector.broadcast %c1_i32_54 : i32 to vector<1x256xi32>
    %173 = arith.cmpi sge, %1, %172 : vector<1x256xi32>
    %174 = arith.andi %171, %173 : vector<1x256xi1>
    %c17_i32_55 = arith.constant 17 : i32
    %175 = vector.broadcast %c17_i32_55 : i32 to vector<1x256xi32>
    %176 = arith.cmpi slt, %1, %175 : vector<1x256xi32>
    %177 = arith.andi %174, %176 : vector<1x256xi1>
    %c-1_i32_56 = arith.constant -1 : i32
    %178 = vector.broadcast %c-1_i32_56 : i32 to vector<1x256xi32>
    %179 = arith.cmpi sge, %0, %178 : vector<1x256xi32>
    %c15_i32_57 = arith.constant 15 : i32
    %180 = vector.broadcast %c15_i32_57 : i32 to vector<1x256xi32>
    %181 = arith.cmpi slt, %0, %180 : vector<1x256xi32>
    %182 = arith.andi %179, %181 : vector<1x256xi1>
    %c0_i32_58 = arith.constant 0 : i32
    %183 = vector.broadcast %c0_i32_58 : i32 to vector<1x256xi32>
    %184 = arith.cmpi sge, %1, %183 : vector<1x256xi32>
    %185 = arith.andi %182, %184 : vector<1x256xi1>
    %c16_i32_59 = arith.constant 16 : i32
    %186 = vector.broadcast %c16_i32_59 : i32 to vector<1x256xi32>
    %187 = arith.cmpi slt, %1, %186 : vector<1x256xi32>
    %188 = arith.andi %185, %187 : vector<1x256xi1>
    %c-1_i32_60 = arith.constant -1 : i32
    %189 = vector.broadcast %c-1_i32_60 : i32 to vector<1x256xi32>
    %190 = arith.cmpi sge, %0, %189 : vector<1x256xi32>
    %c15_i32_61 = arith.constant 15 : i32
    %191 = vector.broadcast %c15_i32_61 : i32 to vector<1x256xi32>
    %192 = arith.cmpi slt, %0, %191 : vector<1x256xi32>
    %193 = arith.andi %190, %192 : vector<1x256xi1>
    %c-1_i32_62 = arith.constant -1 : i32
    %194 = vector.broadcast %c-1_i32_62 : i32 to vector<1x256xi32>
    %195 = arith.cmpi sge, %1, %194 : vector<1x256xi32>
    %196 = arith.andi %193, %195 : vector<1x256xi1>
    %c15_i32_63 = arith.constant 15 : i32
    %197 = vector.broadcast %c15_i32_63 : i32 to vector<1x256xi32>
    %198 = arith.cmpi slt, %1, %197 : vector<1x256xi32>
    %199 = arith.andi %196, %198 : vector<1x256xi1>
    %c-1_i32_64 = arith.constant -1 : i32
    %200 = vector.broadcast %c-1_i32_64 : i32 to vector<1x256xi32>
    %201 = arith.cmpi sge, %0, %200 : vector<1x256xi32>
    %c15_i32_65 = arith.constant 15 : i32
    %202 = vector.broadcast %c15_i32_65 : i32 to vector<1x256xi32>
    %203 = arith.cmpi slt, %0, %202 : vector<1x256xi32>
    %204 = arith.andi %201, %203 : vector<1x256xi1>
    %c-2_i32_66 = arith.constant -2 : i32
    %205 = vector.broadcast %c-2_i32_66 : i32 to vector<1x256xi32>
    %206 = arith.cmpi sge, %1, %205 : vector<1x256xi32>
    %207 = arith.andi %204, %206 : vector<1x256xi1>
    %c14_i32_67 = arith.constant 14 : i32
    %208 = vector.broadcast %c14_i32_67 : i32 to vector<1x256xi32>
    %209 = arith.cmpi slt, %1, %208 : vector<1x256xi32>
    %210 = arith.andi %207, %209 : vector<1x256xi1>
    %c-2_i32_68 = arith.constant -2 : i32
    %211 = vector.broadcast %c-2_i32_68 : i32 to vector<1x256xi32>
    %212 = arith.cmpi sge, %0, %211 : vector<1x256xi32>
    %c14_i32_69 = arith.constant 14 : i32
    %213 = vector.broadcast %c14_i32_69 : i32 to vector<1x256xi32>
    %214 = arith.cmpi slt, %0, %213 : vector<1x256xi32>
    %215 = arith.andi %212, %214 : vector<1x256xi1>
    %c2_i32_70 = arith.constant 2 : i32
    %216 = vector.broadcast %c2_i32_70 : i32 to vector<1x256xi32>
    %217 = arith.cmpi sge, %1, %216 : vector<1x256xi32>
    %218 = arith.andi %215, %217 : vector<1x256xi1>
    %c18_i32_71 = arith.constant 18 : i32
    %219 = vector.broadcast %c18_i32_71 : i32 to vector<1x256xi32>
    %220 = arith.cmpi slt, %1, %219 : vector<1x256xi32>
    %221 = arith.andi %218, %220 : vector<1x256xi1>
    %c-2_i32_72 = arith.constant -2 : i32
    %222 = vector.broadcast %c-2_i32_72 : i32 to vector<1x256xi32>
    %223 = arith.cmpi sge, %0, %222 : vector<1x256xi32>
    %c14_i32_73 = arith.constant 14 : i32
    %224 = vector.broadcast %c14_i32_73 : i32 to vector<1x256xi32>
    %225 = arith.cmpi slt, %0, %224 : vector<1x256xi32>
    %226 = arith.andi %223, %225 : vector<1x256xi1>
    %c1_i32_74 = arith.constant 1 : i32
    %227 = vector.broadcast %c1_i32_74 : i32 to vector<1x256xi32>
    %228 = arith.cmpi sge, %1, %227 : vector<1x256xi32>
    %229 = arith.andi %226, %228 : vector<1x256xi1>
    %c17_i32_75 = arith.constant 17 : i32
    %230 = vector.broadcast %c17_i32_75 : i32 to vector<1x256xi32>
    %231 = arith.cmpi slt, %1, %230 : vector<1x256xi32>
    %232 = arith.andi %229, %231 : vector<1x256xi1>
    %c-2_i32_76 = arith.constant -2 : i32
    %233 = vector.broadcast %c-2_i32_76 : i32 to vector<1x256xi32>
    %234 = arith.cmpi sge, %0, %233 : vector<1x256xi32>
    %c14_i32_77 = arith.constant 14 : i32
    %235 = vector.broadcast %c14_i32_77 : i32 to vector<1x256xi32>
    %236 = arith.cmpi slt, %0, %235 : vector<1x256xi32>
    %237 = arith.andi %234, %236 : vector<1x256xi1>
    %c0_i32_78 = arith.constant 0 : i32
    %238 = vector.broadcast %c0_i32_78 : i32 to vector<1x256xi32>
    %239 = arith.cmpi sge, %1, %238 : vector<1x256xi32>
    %240 = arith.andi %237, %239 : vector<1x256xi1>
    %c16_i32_79 = arith.constant 16 : i32
    %241 = vector.broadcast %c16_i32_79 : i32 to vector<1x256xi32>
    %242 = arith.cmpi slt, %1, %241 : vector<1x256xi32>
    %243 = arith.andi %240, %242 : vector<1x256xi1>
    %c-2_i32_80 = arith.constant -2 : i32
    %244 = vector.broadcast %c-2_i32_80 : i32 to vector<1x256xi32>
    %245 = arith.cmpi sge, %0, %244 : vector<1x256xi32>
    %c14_i32_81 = arith.constant 14 : i32
    %246 = vector.broadcast %c14_i32_81 : i32 to vector<1x256xi32>
    %247 = arith.cmpi slt, %0, %246 : vector<1x256xi32>
    %248 = arith.andi %245, %247 : vector<1x256xi1>
    %c-1_i32_82 = arith.constant -1 : i32
    %249 = vector.broadcast %c-1_i32_82 : i32 to vector<1x256xi32>
    %250 = arith.cmpi sge, %1, %249 : vector<1x256xi32>
    %251 = arith.andi %248, %250 : vector<1x256xi1>
    %c15_i32_83 = arith.constant 15 : i32
    %252 = vector.broadcast %c15_i32_83 : i32 to vector<1x256xi32>
    %253 = arith.cmpi slt, %1, %252 : vector<1x256xi32>
    %254 = arith.andi %251, %253 : vector<1x256xi1>
    %c-2_i32_84 = arith.constant -2 : i32
    %255 = vector.broadcast %c-2_i32_84 : i32 to vector<1x256xi32>
    %256 = arith.cmpi sge, %0, %255 : vector<1x256xi32>
    %c14_i32_85 = arith.constant 14 : i32
    %257 = vector.broadcast %c14_i32_85 : i32 to vector<1x256xi32>
    %258 = arith.cmpi slt, %0, %257 : vector<1x256xi32>
    %259 = arith.andi %256, %258 : vector<1x256xi1>
    %c-2_i32_86 = arith.constant -2 : i32
    %260 = vector.broadcast %c-2_i32_86 : i32 to vector<1x256xi32>
    %261 = arith.cmpi sge, %1, %260 : vector<1x256xi32>
    %262 = arith.andi %259, %261 : vector<1x256xi1>
    %c14_i32_87 = arith.constant 14 : i32
    %263 = vector.broadcast %c14_i32_87 : i32 to vector<1x256xi32>
    %264 = arith.cmpi slt, %1, %263 : vector<1x256xi32>
    %265 = arith.andi %262, %264 : vector<1x256xi1>
    %c1_i32_88 = arith.constant 1 : i32
    %266 = vector.broadcast %c1_i32_88 : i32 to vector<1x256xi32>
    %267 = arith.cmpi sge, %0, %266 : vector<1x256xi32>
    %c17_i32_89 = arith.constant 17 : i32
    %268 = vector.broadcast %c17_i32_89 : i32 to vector<1x256xi32>
    %269 = arith.cmpi slt, %0, %268 : vector<1x256xi32>
    %270 = arith.andi %267, %269 : vector<1x256xi1>
    %c1_i32_90 = arith.constant 1 : i32
    %271 = vector.broadcast %c1_i32_90 : i32 to vector<1x256xi32>
    %272 = arith.cmpi sge, %1, %271 : vector<1x256xi32>
    %273 = arith.andi %270, %272 : vector<1x256xi1>
    %c17_i32_91 = arith.constant 17 : i32
    %274 = vector.broadcast %c17_i32_91 : i32 to vector<1x256xi32>
    %275 = arith.cmpi slt, %1, %274 : vector<1x256xi32>
    %276 = arith.andi %273, %275 : vector<1x256xi1>
    %c1_i32_92 = arith.constant 1 : i32
    %277 = vector.broadcast %c1_i32_92 : i32 to vector<1x256xi32>
    %278 = arith.cmpi sge, %0, %277 : vector<1x256xi32>
    %c17_i32_93 = arith.constant 17 : i32
    %279 = vector.broadcast %c17_i32_93 : i32 to vector<1x256xi32>
    %280 = arith.cmpi slt, %0, %279 : vector<1x256xi32>
    %281 = arith.andi %278, %280 : vector<1x256xi1>
    %c0_i32_94 = arith.constant 0 : i32
    %282 = vector.broadcast %c0_i32_94 : i32 to vector<1x256xi32>
    %283 = arith.cmpi sge, %1, %282 : vector<1x256xi32>
    %284 = arith.andi %281, %283 : vector<1x256xi1>
    %c16_i32_95 = arith.constant 16 : i32
    %285 = vector.broadcast %c16_i32_95 : i32 to vector<1x256xi32>
    %286 = arith.cmpi slt, %1, %285 : vector<1x256xi32>
    %287 = arith.andi %284, %286 : vector<1x256xi1>
    %c1_i32_96 = arith.constant 1 : i32
    %288 = vector.broadcast %c1_i32_96 : i32 to vector<1x256xi32>
    %289 = arith.cmpi sge, %0, %288 : vector<1x256xi32>
    %c17_i32_97 = arith.constant 17 : i32
    %290 = vector.broadcast %c17_i32_97 : i32 to vector<1x256xi32>
    %291 = arith.cmpi slt, %0, %290 : vector<1x256xi32>
    %292 = arith.andi %289, %291 : vector<1x256xi1>
    %c-1_i32_98 = arith.constant -1 : i32
    %293 = vector.broadcast %c-1_i32_98 : i32 to vector<1x256xi32>
    %294 = arith.cmpi sge, %1, %293 : vector<1x256xi32>
    %295 = arith.andi %292, %294 : vector<1x256xi1>
    %c15_i32_99 = arith.constant 15 : i32
    %296 = vector.broadcast %c15_i32_99 : i32 to vector<1x256xi32>
    %297 = arith.cmpi slt, %1, %296 : vector<1x256xi32>
    %298 = arith.andi %295, %297 : vector<1x256xi1>
    %c0_i32_100 = arith.constant 0 : i32
    %299 = vector.broadcast %c0_i32_100 : i32 to vector<1x256xi32>
    %300 = arith.cmpi sge, %0, %299 : vector<1x256xi32>
    %c16_i32_101 = arith.constant 16 : i32
    %301 = vector.broadcast %c16_i32_101 : i32 to vector<1x256xi32>
    %302 = arith.cmpi slt, %0, %301 : vector<1x256xi32>
    %303 = arith.andi %300, %302 : vector<1x256xi1>
    %c1_i32_102 = arith.constant 1 : i32
    %304 = vector.broadcast %c1_i32_102 : i32 to vector<1x256xi32>
    %305 = arith.cmpi sge, %1, %304 : vector<1x256xi32>
    %306 = arith.andi %303, %305 : vector<1x256xi1>
    %c17_i32_103 = arith.constant 17 : i32
    %307 = vector.broadcast %c17_i32_103 : i32 to vector<1x256xi32>
    %308 = arith.cmpi slt, %1, %307 : vector<1x256xi32>
    %309 = arith.andi %306, %308 : vector<1x256xi1>
    %c0_i32_104 = arith.constant 0 : i32
    %310 = vector.broadcast %c0_i32_104 : i32 to vector<1x256xi32>
    %311 = arith.cmpi sge, %0, %310 : vector<1x256xi32>
    %c16_i32_105 = arith.constant 16 : i32
    %312 = vector.broadcast %c16_i32_105 : i32 to vector<1x256xi32>
    %313 = arith.cmpi slt, %0, %312 : vector<1x256xi32>
    %314 = arith.andi %311, %313 : vector<1x256xi1>
    %c-1_i32_106 = arith.constant -1 : i32
    %315 = vector.broadcast %c-1_i32_106 : i32 to vector<1x256xi32>
    %316 = arith.cmpi sge, %1, %315 : vector<1x256xi32>
    %317 = arith.andi %314, %316 : vector<1x256xi1>
    %c15_i32_107 = arith.constant 15 : i32
    %318 = vector.broadcast %c15_i32_107 : i32 to vector<1x256xi32>
    %319 = arith.cmpi slt, %1, %318 : vector<1x256xi32>
    %320 = arith.andi %317, %319 : vector<1x256xi1>
    %c-1_i32_108 = arith.constant -1 : i32
    %321 = vector.broadcast %c-1_i32_108 : i32 to vector<1x256xi32>
    %322 = arith.cmpi sge, %0, %321 : vector<1x256xi32>
    %c15_i32_109 = arith.constant 15 : i32
    %323 = vector.broadcast %c15_i32_109 : i32 to vector<1x256xi32>
    %324 = arith.cmpi slt, %0, %323 : vector<1x256xi32>
    %325 = arith.andi %322, %324 : vector<1x256xi1>
    %c1_i32_110 = arith.constant 1 : i32
    %326 = vector.broadcast %c1_i32_110 : i32 to vector<1x256xi32>
    %327 = arith.cmpi sge, %1, %326 : vector<1x256xi32>
    %328 = arith.andi %325, %327 : vector<1x256xi1>
    %c17_i32_111 = arith.constant 17 : i32
    %329 = vector.broadcast %c17_i32_111 : i32 to vector<1x256xi32>
    %330 = arith.cmpi slt, %1, %329 : vector<1x256xi32>
    %331 = arith.andi %328, %330 : vector<1x256xi1>
    %c-1_i32_112 = arith.constant -1 : i32
    %332 = vector.broadcast %c-1_i32_112 : i32 to vector<1x256xi32>
    %333 = arith.cmpi sge, %0, %332 : vector<1x256xi32>
    %c15_i32_113 = arith.constant 15 : i32
    %334 = vector.broadcast %c15_i32_113 : i32 to vector<1x256xi32>
    %335 = arith.cmpi slt, %0, %334 : vector<1x256xi32>
    %336 = arith.andi %333, %335 : vector<1x256xi1>
    %c0_i32_114 = arith.constant 0 : i32
    %337 = vector.broadcast %c0_i32_114 : i32 to vector<1x256xi32>
    %338 = arith.cmpi sge, %1, %337 : vector<1x256xi32>
    %339 = arith.andi %336, %338 : vector<1x256xi1>
    %c16_i32_115 = arith.constant 16 : i32
    %340 = vector.broadcast %c16_i32_115 : i32 to vector<1x256xi32>
    %341 = arith.cmpi slt, %1, %340 : vector<1x256xi32>
    %342 = arith.andi %339, %341 : vector<1x256xi1>
    %c-1_i32_116 = arith.constant -1 : i32
    %343 = vector.broadcast %c-1_i32_116 : i32 to vector<1x256xi32>
    %344 = arith.cmpi sge, %0, %343 : vector<1x256xi32>
    %c15_i32_117 = arith.constant 15 : i32
    %345 = vector.broadcast %c15_i32_117 : i32 to vector<1x256xi32>
    %346 = arith.cmpi slt, %0, %345 : vector<1x256xi32>
    %347 = arith.andi %344, %346 : vector<1x256xi1>
    %c-1_i32_118 = arith.constant -1 : i32
    %348 = vector.broadcast %c-1_i32_118 : i32 to vector<1x256xi32>
    %349 = arith.cmpi sge, %1, %348 : vector<1x256xi32>
    %350 = arith.andi %347, %349 : vector<1x256xi1>
    %c15_i32_119 = arith.constant 15 : i32
    %351 = vector.broadcast %c15_i32_119 : i32 to vector<1x256xi32>
    %352 = arith.cmpi slt, %1, %351 : vector<1x256xi32>
    %353 = arith.andi %350, %352 : vector<1x256xi1>
    %c0_120 = arith.constant 0 : index
    %c0_121 = arith.constant 0 : index
    %c0_122 = arith.constant 0 : index
    %354 = vector.load %arg1[%c0_120, %c0_121, %c0_122] : memref<1x3x256xf32, #tpu.memory_space<vmem>>, vector<1x3x256xf32>
    %355 = vector.shape_cast %354 : vector<1x3x256xf32> to vector<3x256xf32>
    %c34_i32 = arith.constant 34 : i32
    %356 = tpu.dynamic_rotate %355 by %c34_i32 dim 1 : vector<3x256xf32>, i32 -> vector<3x256xf32>
    %cst = arith.constant 0.000000e+00 : f32
    %357 = vector.shape_cast %12 : vector<1x256xi1> to vector<1x256xi1>
    %358 = vector.broadcast %357 : vector<1x256xi1> to vector<3x256xi1>
    %359 = vector.broadcast %cst : f32 to vector<3x256xf32>
    %360 = arith.select %358, %356, %359 : vector<3x256xi1>, vector<3x256xf32>
    %c0_123 = arith.constant 0 : index
    %c0_124 = arith.constant 0 : index
    %361 = vector.load %arg14[%c0_123, %c0_124] : memref<75x256xf32, #tpu.memory_space<vmem>>, vector<3x256xf32>
    tpu.vector_store %arg14[%c0_123, %c0_124], %360 {strides = array<i32>} : memref<75x256xf32, #tpu.memory_space<vmem>>, vector<3x256xf32>,
    %c33_i32 = arith.constant 33 : i32
    %362 = tpu.dynamic_rotate %355 by %c33_i32 dim 1 : vector<3x256xf32>, i32 -> vector<3x256xf32>
    %cst_125 = arith.constant 0.000000e+00 : f32
    %363 = vector.shape_cast %23 : vector<1x256xi1> to vector<1x256xi1>
    %364 = vector.broadcast %363 : vector<1x256xi1> to vector<3x256xi1>
    %365 = vector.broadcast %cst_125 : f32 to vector<3x256xf32>
    %366 = arith.select %364, %362, %365 : vector<3x256xi1>, vector<3x256xf32>
    %c3 = arith.constant 3 : index
    %c0_126 = arith.constant 0 : index
    %367 = vector.load %arg14[%c3, %c0_126] : memref<75x256xf32, #tpu.memory_space<vmem>>, vector<3x256xf32>
    tpu.vector_store %arg14[%c3, %c0_126], %366 {strides = array<i32>} : memref<75x256xf32, #tpu.memory_space<vmem>>, vector<3x256xf32>,
    %c32_i32 = arith.constant 32 : i32
    %368 = tpu.dynamic_rotate %355 by %c32_i32 dim 1 : vector<3x256xf32>, i32 -> vector<3x256xf32>
    %cst_127 = arith.constant 0.000000e+00 : f32
    %369 = vector.shape_cast %34 : vector<1x256xi1> to vector<1x256xi1>
    %370 = vector.broadcast %369 : vector<1x256xi1> to vector<3x256xi1>
    %371 = vector.broadcast %cst_127 : f32 to vector<3x256xf32>
    %372 = arith.select %370, %368, %371 : vector<3x256xi1>, vector<3x256xf32>
    %c6 = arith.constant 6 : index
    %c0_128 = arith.constant 0 : index
    %373 = vector.load %arg14[%c6, %c0_128] : memref<75x256xf32, #tpu.memory_space<vmem>>, vector<3x256xf32>
    tpu.vector_store %arg14[%c6, %c0_128], %372 {strides = array<i32>} : memref<75x256xf32, #tpu.memory_space<vmem>>, vector<3x256xf32>,
    %c31_i32 = arith.constant 31 : i32
    %374 = tpu.dynamic_rotate %355 by %c31_i32 dim 1 : vector<3x256xf32>, i32 -> vector<3x256xf32>
    %cst_129 = arith.constant 0.000000e+00 : f32
    %375 = vector.shape_cast %45 : vector<1x256xi1> to vector<1x256xi1>
    %376 = vector.broadcast %375 : vector<1x256xi1> to vector<3x256xi1>
    %377 = vector.broadcast %cst_129 : f32 to vector<3x256xf32>
    %378 = arith.select %376, %374, %377 : vector<3x256xi1>, vector<3x256xf32>
    %c9 = arith.constant 9 : index
    %c0_130 = arith.constant 0 : index
    %379 = vector.load %arg14[%c9, %c0_130] : memref<75x256xf32, #tpu.memory_space<vmem>>, vector<3x256xf32>
    tpu.vector_store %arg14[%c9, %c0_130], %378 {strides = array<i32>} : memref<75x256xf32, #tpu.memory_space<vmem>>, vector<3x256xf32>,
    %c30_i32 = arith.constant 30 : i32
    %380 = tpu.dynamic_rotate %355 by %c30_i32 dim 1 : vector<3x256xf32>, i32 -> vector<3x256xf32>
    %cst_131 = arith.constant 0.000000e+00 : f32
    %381 = vector.shape_cast %56 : vector<1x256xi1> to vector<1x256xi1>
    %382 = vector.broadcast %381 : vector<1x256xi1> to vector<3x256xi1>
    %383 = vector.broadcast %cst_131 : f32 to vector<3x256xf32>
    %384 = arith.select %382, %380, %383 : vector<3x256xi1>, vector<3x256xf32>
    %c12 = arith.constant 12 : index
    %c0_132 = arith.constant 0 : index
    %385 = vector.load %arg14[%c12, %c0_132] : memref<75x256xf32, #tpu.memory_space<vmem>>, vector<3x256xf32>
    tpu.vector_store %arg14[%c12, %c0_132], %384 {strides = array<i32>} : memref<75x256xf32, #tpu.memory_space<vmem>>, vector<3x256xf32>,
    %c18_i32_133 = arith.constant 18 : i32
    %386 = tpu.dynamic_rotate %355 by %c18_i32_133 dim 1 : vector<3x256xf32>, i32 -> vector<3x256xf32>
    %cst_134 = arith.constant 0.000000e+00 : f32
    %387 = vector.shape_cast %67 : vector<1x256xi1> to vector<1x256xi1>
    %388 = vector.broadcast %387 : vector<1x256xi1> to vector<3x256xi1>
    %389 = vector.broadcast %cst_134 : f32 to vector<3x256xf32>
    %390 = arith.select %388, %386, %389 : vector<3x256xi1>, vector<3x256xf32>
    %c15 = arith.constant 15 : index
    %c0_135 = arith.constant 0 : index
    %391 = vector.load %arg14[%c15, %c0_135] : memref<75x256xf32, #tpu.memory_space<vmem>>, vector<3x256xf32>
    tpu.vector_store %arg14[%c15, %c0_135], %390 {strides = array<i32>} : memref<75x256xf32, #tpu.memory_space<vmem>>, vector<3x256xf32>,
    %c17_i32_136 = arith.constant 17 : i32
    %392 = tpu.dynamic_rotate %355 by %c17_i32_136 dim 1 : vector<3x256xf32>, i32 -> vector<3x256xf32>
    %cst_137 = arith.constant 0.000000e+00 : f32
    %393 = vector.shape_cast %78 : vector<1x256xi1> to vector<1x256xi1>
    %394 = vector.broadcast %393 : vector<1x256xi1> to vector<3x256xi1>
    %395 = vector.broadcast %cst_137 : f32 to vector<3x256xf32>
    %396 = arith.select %394, %392, %395 : vector<3x256xi1>, vector<3x256xf32>
    %c18 = arith.constant 18 : index
    %c0_138 = arith.constant 0 : index
    %397 = vector.load %arg14[%c18, %c0_138] : memref<75x256xf32, #tpu.memory_space<vmem>>, vector<3x256xf32>
    tpu.vector_store %arg14[%c18, %c0_138], %396 {strides = array<i32>} : memref<75x256xf32, #tpu.memory_space<vmem>>, vector<3x256xf32>,
    %c16_i32_139 = arith.constant 16 : i32
    %398 = tpu.dynamic_rotate %355 by %c16_i32_139 dim 1 : vector<3x256xf32>, i32 -> vector<3x256xf32>
    %cst_140 = arith.constant 0.000000e+00 : f32
    %399 = vector.shape_cast %89 : vector<1x256xi1> to vector<1x256xi1>
    %400 = vector.broadcast %399 : vector<1x256xi1> to vector<3x256xi1>
    %401 = vector.broadcast %cst_140 : f32 to vector<3x256xf32>
    %402 = arith.select %400, %398, %401 : vector<3x256xi1>, vector<3x256xf32>
    %c21 = arith.constant 21 : index
    %c0_141 = arith.constant 0 : index
    %403 = vector.load %arg14[%c21, %c0_141] : memref<75x256xf32, #tpu.memory_space<vmem>>, vector<3x256xf32>
    tpu.vector_store %arg14[%c21, %c0_141], %402 {strides = array<i32>} : memref<75x256xf32, #tpu.memory_space<vmem>>, vector<3x256xf32>,
    %c15_i32_142 = arith.constant 15 : i32
    %404 = tpu.dynamic_rotate %355 by %c15_i32_142 dim 1 : vector<3x256xf32>, i32 -> vector<3x256xf32>
    %cst_143 = arith.constant 0.000000e+00 : f32
    %405 = vector.shape_cast %100 : vector<1x256xi1> to vector<1x256xi1>
    %406 = vector.broadcast %405 : vector<1x256xi1> to vector<3x256xi1>
    %407 = vector.broadcast %cst_143 : f32 to vector<3x256xf32>
    %408 = arith.select %406, %404, %407 : vector<3x256xi1>, vector<3x256xf32>
    %c24 = arith.constant 24 : index
    %c0_144 = arith.constant 0 : index
    %409 = vector.load %arg14[%c24, %c0_144] : memref<75x256xf32, #tpu.memory_space<vmem>>, vector<3x256xf32>
    tpu.vector_store %arg14[%c24, %c0_144], %408 {strides = array<i32>} : memref<75x256xf32, #tpu.memory_space<vmem>>, vector<3x256xf32>,
    %c14_i32_145 = arith.constant 14 : i32
    %410 = tpu.dynamic_rotate %355 by %c14_i32_145 dim 1 : vector<3x256xf32>, i32 -> vector<3x256xf32>
    %cst_146 = arith.constant 0.000000e+00 : f32
    %411 = vector.shape_cast %111 : vector<1x256xi1> to vector<1x256xi1>
    %412 = vector.broadcast %411 : vector<1x256xi1> to vector<3x256xi1>
    %413 = vector.broadcast %cst_146 : f32 to vector<3x256xf32>
    %414 = arith.select %412, %410, %413 : vector<3x256xi1>, vector<3x256xf32>
    %c27 = arith.constant 27 : index
    %c0_147 = arith.constant 0 : index
    %415 = vector.load %arg14[%c27, %c0_147] : memref<75x256xf32, #tpu.memory_space<vmem>>, vector<3x256xf32>
    tpu.vector_store %arg14[%c27, %c0_147], %414 {strides = array<i32>} : memref<75x256xf32, #tpu.memory_space<vmem>>, vector<3x256xf32>,
    %c2_i32_148 = arith.constant 2 : i32
    %416 = tpu.dynamic_rotate %355 by %c2_i32_148 dim 1 : vector<3x256xf32>, i32 -> vector<3x256xf32>
    %cst_149 = arith.constant 0.000000e+00 : f32
    %417 = vector.shape_cast %122 : vector<1x256xi1> to vector<1x256xi1>
    %418 = vector.broadcast %417 : vector<1x256xi1> to vector<3x256xi1>
    %419 = vector.broadcast %cst_149 : f32 to vector<3x256xf32>
    %420 = arith.select %418, %416, %419 : vector<3x256xi1>, vector<3x256xf32>
    %c30 = arith.constant 30 : index
    %c0_150 = arith.constant 0 : index
    %421 = vector.load %arg14[%c30, %c0_150] : memref<75x256xf32, #tpu.memory_space<vmem>>, vector<3x256xf32>
    tpu.vector_store %arg14[%c30, %c0_150], %420 {strides = array<i32>} : memref<75x256xf32, #tpu.memory_space<vmem>>, vector<3x256xf32>,
    %c1_i32_151 = arith.constant 1 : i32
    %422 = tpu.dynamic_rotate %355 by %c1_i32_151 dim 1 : vector<3x256xf32>, i32 -> vector<3x256xf32>
    %cst_152 = arith.constant 0.000000e+00 : f32
    %423 = vector.shape_cast %133 : vector<1x256xi1> to vector<1x256xi1>
    %424 = vector.broadcast %423 : vector<1x256xi1> to vector<3x256xi1>
    %425 = vector.broadcast %cst_152 : f32 to vector<3x256xf32>
    %426 = arith.select %424, %422, %425 : vector<3x256xi1>, vector<3x256xf32>
    %c33 = arith.constant 33 : index
    %c0_153 = arith.constant 0 : index
    %427 = vector.load %arg14[%c33, %c0_153] : memref<75x256xf32, #tpu.memory_space<vmem>>, vector<3x256xf32>
    tpu.vector_store %arg14[%c33, %c0_153], %426 {strides = array<i32>} : memref<75x256xf32, #tpu.memory_space<vmem>>, vector<3x256xf32>,
    %c36 = arith.constant 36 : index
    %c0_154 = arith.constant 0 : index
    %428 = vector.load %arg14[%c36, %c0_154] : memref<75x256xf32, #tpu.memory_space<vmem>>, vector<3x256xf32>
    tpu.vector_store %arg14[%c36, %c0_154], %355 {strides = array<i32>} : memref<75x256xf32, #tpu.memory_space<vmem>>, vector<3x256xf32>,
    %c255_i32 = arith.constant 255 : i32
    %429 = tpu.dynamic_rotate %355 by %c255_i32 dim 1 : vector<3x256xf32>, i32 -> vector<3x256xf32>
    %cst_155 = arith.constant 0.000000e+00 : f32
    %430 = vector.shape_cast %144 : vector<1x256xi1> to vector<1x256xi1>
    %431 = vector.broadcast %430 : vector<1x256xi1> to vector<3x256xi1>
    %432 = vector.broadcast %cst_155 : f32 to vector<3x256xf32>
    %433 = arith.select %431, %429, %432 : vector<3x256xi1>, vector<3x256xf32>
    %c39 = arith.constant 39 : index
    %c0_156 = arith.constant 0 : index
    %434 = vector.load %arg14[%c39, %c0_156] : memref<75x256xf32, #tpu.memory_space<vmem>>, vector<3x256xf32>
    tpu.vector_store %arg14[%c39, %c0_156], %433 {strides = array<i32>} : memref<75x256xf32, #tpu.memory_space<vmem>>, vector<3x256xf32>,
    %c254_i32 = arith.constant 254 : i32
    %435 = tpu.dynamic_rotate %355 by %c254_i32 dim 1 : vector<3x256xf32>, i32 -> vector<3x256xf32>
    %cst_157 = arith.constant 0.000000e+00 : f32
    %436 = vector.shape_cast %155 : vector<1x256xi1> to vector<1x256xi1>
    %437 = vector.broadcast %436 : vector<1x256xi1> to vector<3x256xi1>
    %438 = vector.broadcast %cst_157 : f32 to vector<3x256xf32>
    %439 = arith.select %437, %435, %438 : vector<3x256xi1>, vector<3x256xf32>
    %c42 = arith.constant 42 : index
    %c0_158 = arith.constant 0 : index
    %440 = vector.load %arg14[%c42, %c0_158] : memref<75x256xf32, #tpu.memory_space<vmem>>, vector<3x256xf32>
    tpu.vector_store %arg14[%c42, %c0_158], %439 {strides = array<i32>} : memref<75x256xf32, #tpu.memory_space<vmem>>, vector<3x256xf32>,
    %c242_i32 = arith.constant 242 : i32
    %441 = tpu.dynamic_rotate %355 by %c242_i32 dim 1 : vector<3x256xf32>, i32 -> vector<3x256xf32>
    %cst_159 = arith.constant 0.000000e+00 : f32
    %442 = vector.shape_cast %166 : vector<1x256xi1> to vector<1x256xi1>
    %443 = vector.broadcast %442 : vector<1x256xi1> to vector<3x256xi1>
    %444 = vector.broadcast %cst_159 : f32 to vector<3x256xf32>
    %445 = arith.select %443, %441, %444 : vector<3x256xi1>, vector<3x256xf32>
    %c45 = arith.constant 45 : index
    %c0_160 = arith.constant 0 : index
    %446 = vector.load %arg14[%c45, %c0_160] : memref<75x256xf32, #tpu.memory_space<vmem>>, vector<3x256xf32>
    tpu.vector_store %arg14[%c45, %c0_160], %445 {strides = array<i32>} : memref<75x256xf32, #tpu.memory_space<vmem>>, vector<3x256xf32>,
    %c241_i32 = arith.constant 241 : i32
    %447 = tpu.dynamic_rotate %355 by %c241_i32 dim 1 : vector<3x256xf32>, i32 -> vector<3x256xf32>
    %cst_161 = arith.constant 0.000000e+00 : f32
    %448 = vector.shape_cast %177 : vector<1x256xi1> to vector<1x256xi1>
    %449 = vector.broadcast %448 : vector<1x256xi1> to vector<3x256xi1>
    %450 = vector.broadcast %cst_161 : f32 to vector<3x256xf32>
    %451 = arith.select %449, %447, %450 : vector<3x256xi1>, vector<3x256xf32>
    %c48 = arith.constant 48 : index
    %c0_162 = arith.constant 0 : index
    %452 = vector.load %arg14[%c48, %c0_162] : memref<75x256xf32, #tpu.memory_space<vmem>>, vector<3x256xf32>
    tpu.vector_store %arg14[%c48, %c0_162], %451 {strides = array<i32>} : memref<75x256xf32, #tpu.memory_space<vmem>>, vector<3x256xf32>,
    %c240_i32 = arith.constant 240 : i32
    %453 = tpu.dynamic_rotate %355 by %c240_i32 dim 1 : vector<3x256xf32>, i32 -> vector<3x256xf32>
    %cst_163 = arith.constant 0.000000e+00 : f32
    %454 = vector.shape_cast %188 : vector<1x256xi1> to vector<1x256xi1>
    %455 = vector.broadcast %454 : vector<1x256xi1> to vector<3x256xi1>
    %456 = vector.broadcast %cst_163 : f32 to vector<3x256xf32>
    %457 = arith.select %455, %453, %456 : vector<3x256xi1>, vector<3x256xf32>
    %c51 = arith.constant 51 : index
    %c0_164 = arith.constant 0 : index
    %458 = vector.load %arg14[%c51, %c0_164] : memref<75x256xf32, #tpu.memory_space<vmem>>, vector<3x256xf32>
    tpu.vector_store %arg14[%c51, %c0_164], %457 {strides = array<i32>} : memref<75x256xf32, #tpu.memory_space<vmem>>, vector<3x256xf32>,
    %c239_i32 = arith.constant 239 : i32
    %459 = tpu.dynamic_rotate %355 by %c239_i32 dim 1 : vector<3x256xf32>, i32 -> vector<3x256xf32>
    %cst_165 = arith.constant 0.000000e+00 : f32
    %460 = vector.shape_cast %199 : vector<1x256xi1> to vector<1x256xi1>
    %461 = vector.broadcast %460 : vector<1x256xi1> to vector<3x256xi1>
    %462 = vector.broadcast %cst_165 : f32 to vector<3x256xf32>
    %463 = arith.select %461, %459, %462 : vector<3x256xi1>, vector<3x256xf32>
    %c54 = arith.constant 54 : index
    %c0_166 = arith.constant 0 : index
    %464 = vector.load %arg14[%c54, %c0_166] : memref<75x256xf32, #tpu.memory_space<vmem>>, vector<3x256xf32>
    tpu.vector_store %arg14[%c54, %c0_166], %463 {strides = array<i32>} : memref<75x256xf32, #tpu.memory_space<vmem>>, vector<3x256xf32>,
    %c238_i32 = arith.constant 238 : i32
    %465 = tpu.dynamic_rotate %355 by %c238_i32 dim 1 : vector<3x256xf32>, i32 -> vector<3x256xf32>
    %cst_167 = arith.constant 0.000000e+00 : f32
    %466 = vector.shape_cast %210 : vector<1x256xi1> to vector<1x256xi1>
    %467 = vector.broadcast %466 : vector<1x256xi1> to vector<3x256xi1>
    %468 = vector.broadcast %cst_167 : f32 to vector<3x256xf32>
    %469 = arith.select %467, %465, %468 : vector<3x256xi1>, vector<3x256xf32>
    %c57 = arith.constant 57 : index
    %c0_168 = arith.constant 0 : index
    %470 = vector.load %arg14[%c57, %c0_168] : memref<75x256xf32, #tpu.memory_space<vmem>>, vector<3x256xf32>
    tpu.vector_store %arg14[%c57, %c0_168], %469 {strides = array<i32>} : memref<75x256xf32, #tpu.memory_space<vmem>>, vector<3x256xf32>,
    %c226_i32 = arith.constant 226 : i32
    %471 = tpu.dynamic_rotate %355 by %c226_i32 dim 1 : vector<3x256xf32>, i32 -> vector<3x256xf32>
    %cst_169 = arith.constant 0.000000e+00 : f32
    %472 = vector.shape_cast %221 : vector<1x256xi1> to vector<1x256xi1>
    %473 = vector.broadcast %472 : vector<1x256xi1> to vector<3x256xi1>
    %474 = vector.broadcast %cst_169 : f32 to vector<3x256xf32>
    %475 = arith.select %473, %471, %474 : vector<3x256xi1>, vector<3x256xf32>
    %c60 = arith.constant 60 : index
    %c0_170 = arith.constant 0 : index
    %476 = vector.load %arg14[%c60, %c0_170] : memref<75x256xf32, #tpu.memory_space<vmem>>, vector<3x256xf32>
    tpu.vector_store %arg14[%c60, %c0_170], %475 {strides = array<i32>} : memref<75x256xf32, #tpu.memory_space<vmem>>, vector<3x256xf32>,
    %c225_i32 = arith.constant 225 : i32
    %477 = tpu.dynamic_rotate %355 by %c225_i32 dim 1 : vector<3x256xf32>, i32 -> vector<3x256xf32>
    %cst_171 = arith.constant 0.000000e+00 : f32
    %478 = vector.shape_cast %232 : vector<1x256xi1> to vector<1x256xi1>
    %479 = vector.broadcast %478 : vector<1x256xi1> to vector<3x256xi1>
    %480 = vector.broadcast %cst_171 : f32 to vector<3x256xf32>
    %481 = arith.select %479, %477, %480 : vector<3x256xi1>, vector<3x256xf32>
    %c63 = arith.constant 63 : index
    %c0_172 = arith.constant 0 : index
    %482 = vector.load %arg14[%c63, %c0_172] : memref<75x256xf32, #tpu.memory_space<vmem>>, vector<3x256xf32>
    tpu.vector_store %arg14[%c63, %c0_172], %481 {strides = array<i32>} : memref<75x256xf32, #tpu.memory_space<vmem>>, vector<3x256xf32>,
    %c224_i32 = arith.constant 224 : i32
    %483 = tpu.dynamic_rotate %355 by %c224_i32 dim 1 : vector<3x256xf32>, i32 -> vector<3x256xf32>
    %cst_173 = arith.constant 0.000000e+00 : f32
    %484 = vector.shape_cast %243 : vector<1x256xi1> to vector<1x256xi1>
    %485 = vector.broadcast %484 : vector<1x256xi1> to vector<3x256xi1>
    %486 = vector.broadcast %cst_173 : f32 to vector<3x256xf32>
    %487 = arith.select %485, %483, %486 : vector<3x256xi1>, vector<3x256xf32>
    %c66 = arith.constant 66 : index
    %c0_174 = arith.constant 0 : index
    %488 = vector.load %arg14[%c66, %c0_174] : memref<75x256xf32, #tpu.memory_space<vmem>>, vector<3x256xf32>
    tpu.vector_store %arg14[%c66, %c0_174], %487 {strides = array<i32>} : memref<75x256xf32, #tpu.memory_space<vmem>>, vector<3x256xf32>,
    %c223_i32 = arith.constant 223 : i32
    %489 = tpu.dynamic_rotate %355 by %c223_i32 dim 1 : vector<3x256xf32>, i32 -> vector<3x256xf32>
    %cst_175 = arith.constant 0.000000e+00 : f32
    %490 = vector.shape_cast %254 : vector<1x256xi1> to vector<1x256xi1>
    %491 = vector.broadcast %490 : vector<1x256xi1> to vector<3x256xi1>
    %492 = vector.broadcast %cst_175 : f32 to vector<3x256xf32>
    %493 = arith.select %491, %489, %492 : vector<3x256xi1>, vector<3x256xf32>
    %c69 = arith.constant 69 : index
    %c0_176 = arith.constant 0 : index
    %494 = vector.load %arg14[%c69, %c0_176] : memref<75x256xf32, #tpu.memory_space<vmem>>, vector<3x256xf32>
    tpu.vector_store %arg14[%c69, %c0_176], %493 {strides = array<i32>} : memref<75x256xf32, #tpu.memory_space<vmem>>, vector<3x256xf32>,
    %c222_i32 = arith.constant 222 : i32
    %495 = tpu.dynamic_rotate %355 by %c222_i32 dim 1 : vector<3x256xf32>, i32 -> vector<3x256xf32>
    %cst_177 = arith.constant 0.000000e+00 : f32
    %496 = vector.shape_cast %265 : vector<1x256xi1> to vector<1x256xi1>
    %497 = vector.broadcast %496 : vector<1x256xi1> to vector<3x256xi1>
    %498 = vector.broadcast %cst_177 : f32 to vector<3x256xf32>
    %499 = arith.select %497, %495, %498 : vector<3x256xi1>, vector<3x256xf32>
    %c72 = arith.constant 72 : index
    %c0_178 = arith.constant 0 : index
    %500 = vector.load %arg14[%c72, %c0_178] : memref<75x256xf32, #tpu.memory_space<vmem>>, vector<3x256xf32>
    tpu.vector_store %arg14[%c72, %c0_178], %499 {strides = array<i32>} : memref<75x256xf32, #tpu.memory_space<vmem>>, vector<3x256xf32>,
    %c0_179 = arith.constant 0 : index
    %c0_180 = arith.constant 0 : index
    %501 = vector.load %arg3[%c0_179, %c0_180] : memref<56x75xf32, #tpu.memory_space<vmem>>, vector<56x75xf32>
    %c0_181 = arith.constant 0 : index
    %c0_182 = arith.constant 0 : index
    %502 = vector.load %arg14[%c0_181, %c0_182] : memref<75x256xf32, #tpu.memory_space<vmem>>, vector<75x256xf32>
    %cst_183 = arith.constant dense<0.000000e+00> : vector<56x256xf32>
    %503 = tpu.matmul %501, %502, %cst_183 {dimension_numbers = #tpu.dot_dimension_numbers<[1], [0], [0], [1], [0, 0, 1, 1], [], []>} : vector<56x75xf32>, vector<75x256xf32>, vector<56x256xf32> -> vector<56x256xf32>
    %c0_184 = arith.constant 0 : index
    %c0_185 = arith.constant 0 : index
    %504 = vector.load %arg4[%c0_184, %c0_185] : memref<56x1xf32, #tpu.memory_space<vmem>>, vector<56x1xf32>
    %505 = vector.broadcast %504 : vector<56x1xf32> to vector<56x256xf32>
    %506 = arith.addf %503, %505 : vector<56x256xf32>
    %cst_186 = arith.constant 0.000000e+00 : f32
    %507 = vector.broadcast %cst_186 : f32 to vector<56x256xf32>
    %508 = arith.maximumf %506, %507 : vector<56x256xf32>
    %c0_187 = arith.constant 0 : index
    %c0_188 = arith.constant 0 : index
    %509 = vector.load %arg5[%c0_187, %c0_188] : memref<12x56xf32, #tpu.memory_space<vmem>>, vector<12x56xf32>
    %cst_189 = arith.constant dense<0.000000e+00> : vector<12x256xf32>
    %510 = tpu.matmul %509, %508, %cst_189 {dimension_numbers = #tpu.dot_dimension_numbers<[1], [0], [0], [1], [0, 0, 1, 1], [], []>} : vector<12x56xf32>, vector<56x256xf32>, vector<12x256xf32> -> vector<12x256xf32>
    %c0_190 = arith.constant 0 : index
    %c0_191 = arith.constant 0 : index
    %511 = vector.load %arg6[%c0_190, %c0_191] : memref<12x1xf32, #tpu.memory_space<vmem>>, vector<12x1xf32>
    %512 = vector.broadcast %511 : vector<12x1xf32> to vector<12x256xf32>
    %513 = arith.addf %510, %512 : vector<12x256xf32>
    %cst_192 = arith.constant 0.000000e+00 : f32
    %514 = vector.broadcast %cst_192 : f32 to vector<12x256xf32>
    %515 = arith.maximumf %513, %514 : vector<12x256xf32>
    %c17_i32_193 = arith.constant 17 : i32
    %516 = tpu.dynamic_rotate %515 by %c17_i32_193 dim 1 : vector<12x256xf32>, i32 -> vector<12x256xf32>
    %cst_194 = arith.constant 0.000000e+00 : f32
    %517 = vector.shape_cast %276 : vector<1x256xi1> to vector<1x256xi1>
    %518 = vector.broadcast %517 : vector<1x256xi1> to vector<12x256xi1>
    %519 = vector.broadcast %cst_194 : f32 to vector<12x256xf32>
    %520 = arith.select %518, %516, %519 : vector<12x256xi1>, vector<12x256xf32>
    %c0_195 = arith.constant 0 : index
    %c0_196 = arith.constant 0 : index
    %521 = vector.load %arg15[%c0_195, %c0_196] : memref<108x256xf32, #tpu.memory_space<vmem>>, vector<12x256xf32>
    tpu.vector_store %arg15[%c0_195, %c0_196], %520 {strides = array<i32>} : memref<108x256xf32, #tpu.memory_space<vmem>>, vector<12x256xf32>,
    %c16_i32_197 = arith.constant 16 : i32
    %522 = tpu.dynamic_rotate %515 by %c16_i32_197 dim 1 : vector<12x256xf32>, i32 -> vector<12x256xf32>
    %cst_198 = arith.constant 0.000000e+00 : f32
    %523 = vector.shape_cast %287 : vector<1x256xi1> to vector<1x256xi1>
    %524 = vector.broadcast %523 : vector<1x256xi1> to vector<12x256xi1>
    %525 = vector.broadcast %cst_198 : f32 to vector<12x256xf32>
    %526 = arith.select %524, %522, %525 : vector<12x256xi1>, vector<12x256xf32>
    %c12_199 = arith.constant 12 : index
    %c0_200 = arith.constant 0 : index
    %527 = vector.load %arg15[%c12_199, %c0_200] : memref<108x256xf32, #tpu.memory_space<vmem>>, vector<12x256xf32>
    tpu.vector_store %arg15[%c12_199, %c0_200], %526 {strides = array<i32>} : memref<108x256xf32, #tpu.memory_space<vmem>>, vector<12x256xf32>,
    %c15_i32_201 = arith.constant 15 : i32
    %528 = tpu.dynamic_rotate %515 by %c15_i32_201 dim 1 : vector<12x256xf32>, i32 -> vector<12x256xf32>
    %cst_202 = arith.constant 0.000000e+00 : f32
    %529 = vector.shape_cast %298 : vector<1x256xi1> to vector<1x256xi1>
    %530 = vector.broadcast %529 : vector<1x256xi1> to vector<12x256xi1>
    %531 = vector.broadcast %cst_202 : f32 to vector<12x256xf32>
    %532 = arith.select %530, %528, %531 : vector<12x256xi1>, vector<12x256xf32>
    %c24_203 = arith.constant 24 : index
    %c0_204 = arith.constant 0 : index
    %533 = vector.load %arg15[%c24_203, %c0_204] : memref<108x256xf32, #tpu.memory_space<vmem>>, vector<12x256xf32>
    tpu.vector_store %arg15[%c24_203, %c0_204], %532 {strides = array<i32>} : memref<108x256xf32, #tpu.memory_space<vmem>>, vector<12x256xf32>,
    %c1_i32_205 = arith.constant 1 : i32
    %534 = tpu.dynamic_rotate %515 by %c1_i32_205 dim 1 : vector<12x256xf32>, i32 -> vector<12x256xf32>
    %cst_206 = arith.constant 0.000000e+00 : f32
    %535 = vector.shape_cast %309 : vector<1x256xi1> to vector<1x256xi1>
    %536 = vector.broadcast %535 : vector<1x256xi1> to vector<12x256xi1>
    %537 = vector.broadcast %cst_206 : f32 to vector<12x256xf32>
    %538 = arith.select %536, %534, %537 : vector<12x256xi1>, vector<12x256xf32>
    %c36_207 = arith.constant 36 : index
    %c0_208 = arith.constant 0 : index
    %539 = vector.load %arg15[%c36_207, %c0_208] : memref<108x256xf32, #tpu.memory_space<vmem>>, vector<12x256xf32>
    tpu.vector_store %arg15[%c36_207, %c0_208], %538 {strides = array<i32>} : memref<108x256xf32, #tpu.memory_space<vmem>>, vector<12x256xf32>,
    %c48_209 = arith.constant 48 : index
    %c0_210 = arith.constant 0 : index
    %540 = vector.load %arg15[%c48_209, %c0_210] : memref<108x256xf32, #tpu.memory_space<vmem>>, vector<12x256xf32>
    tpu.vector_store %arg15[%c48_209, %c0_210], %515 {strides = array<i32>} : memref<108x256xf32, #tpu.memory_space<vmem>>, vector<12x256xf32>,
    %c255_i32_211 = arith.constant 255 : i32
    %541 = tpu.dynamic_rotate %515 by %c255_i32_211 dim 1 : vector<12x256xf32>, i32 -> vector<12x256xf32>
    %cst_212 = arith.constant 0.000000e+00 : f32
    %542 = vector.shape_cast %320 : vector<1x256xi1> to vector<1x256xi1>
    %543 = vector.broadcast %542 : vector<1x256xi1> to vector<12x256xi1>
    %544 = vector.broadcast %cst_212 : f32 to vector<12x256xf32>
    %545 = arith.select %543, %541, %544 : vector<12x256xi1>, vector<12x256xf32>
    %c60_213 = arith.constant 60 : index
    %c0_214 = arith.constant 0 : index
    %546 = vector.load %arg15[%c60_213, %c0_214] : memref<108x256xf32, #tpu.memory_space<vmem>>, vector<12x256xf32>
    tpu.vector_store %arg15[%c60_213, %c0_214], %545 {strides = array<i32>} : memref<108x256xf32, #tpu.memory_space<vmem>>, vector<12x256xf32>,
    %c241_i32_215 = arith.constant 241 : i32
    %547 = tpu.dynamic_rotate %515 by %c241_i32_215 dim 1 : vector<12x256xf32>, i32 -> vector<12x256xf32>
    %cst_216 = arith.constant 0.000000e+00 : f32
    %548 = vector.shape_cast %331 : vector<1x256xi1> to vector<1x256xi1>
    %549 = vector.broadcast %548 : vector<1x256xi1> to vector<12x256xi1>
    %550 = vector.broadcast %cst_216 : f32 to vector<12x256xf32>
    %551 = arith.select %549, %547, %550 : vector<12x256xi1>, vector<12x256xf32>
    %c72_217 = arith.constant 72 : index
    %c0_218 = arith.constant 0 : index
    %552 = vector.load %arg15[%c72_217, %c0_218] : memref<108x256xf32, #tpu.memory_space<vmem>>, vector<12x256xf32>
    tpu.vector_store %arg15[%c72_217, %c0_218], %551 {strides = array<i32>} : memref<108x256xf32, #tpu.memory_space<vmem>>, vector<12x256xf32>,
    %c240_i32_219 = arith.constant 240 : i32
    %553 = tpu.dynamic_rotate %515 by %c240_i32_219 dim 1 : vector<12x256xf32>, i32 -> vector<12x256xf32>
    %cst_220 = arith.constant 0.000000e+00 : f32
    %554 = vector.shape_cast %342 : vector<1x256xi1> to vector<1x256xi1>
    %555 = vector.broadcast %554 : vector<1x256xi1> to vector<12x256xi1>
    %556 = vector.broadcast %cst_220 : f32 to vector<12x256xf32>
    %557 = arith.select %555, %553, %556 : vector<12x256xi1>, vector<12x256xf32>
    %c84 = arith.constant 84 : index
    %c0_221 = arith.constant 0 : index
    %558 = vector.load %arg15[%c84, %c0_221] : memref<108x256xf32, #tpu.memory_space<vmem>>, vector<12x256xf32>
    tpu.vector_store %arg15[%c84, %c0_221], %557 {strides = array<i32>} : memref<108x256xf32, #tpu.memory_space<vmem>>, vector<12x256xf32>,
    %c239_i32_222 = arith.constant 239 : i32
    %559 = tpu.dynamic_rotate %515 by %c239_i32_222 dim 1 : vector<12x256xf32>, i32 -> vector<12x256xf32>
    %cst_223 = arith.constant 0.000000e+00 : f32
    %560 = vector.shape_cast %353 : vector<1x256xi1> to vector<1x256xi1>
    %561 = vector.broadcast %560 : vector<1x256xi1> to vector<12x256xi1>
    %562 = vector.broadcast %cst_223 : f32 to vector<12x256xf32>
    %563 = arith.select %561, %559, %562 : vector<12x256xi1>, vector<12x256xf32>
    %c96 = arith.constant 96 : index
    %c0_224 = arith.constant 0 : index
    %564 = vector.load %arg15[%c96, %c0_224] : memref<108x256xf32, #tpu.memory_space<vmem>>, vector<12x256xf32>
    tpu.vector_store %arg15[%c96, %c0_224], %563 {strides = array<i32>} : memref<108x256xf32, #tpu.memory_space<vmem>>, vector<12x256xf32>,
    %c0_225 = arith.constant 0 : index
    %c0_226 = arith.constant 0 : index
    %c0_227 = arith.constant 0 : index
    %565 = vector.load %arg7[%c0_225, %c0_226, %c0_227] : memref<3x12x108xf32, #tpu.memory_space<vmem>>, vector<1x12x108xf32>
    %566 = vector.shape_cast %565 : vector<1x12x108xf32> to vector<12x108xf32>
    %c0_228 = arith.constant 0 : index
    %c0_229 = arith.constant 0 : index
    %567 = vector.load %arg15[%c0_228, %c0_229] : memref<108x256xf32, #tpu.memory_space<vmem>>, vector<108x256xf32>
    %cst_230 = arith.constant dense<0.000000e+00> : vector<12x256xf32>
    %568 = tpu.matmul %566, %567, %cst_230 {dimension_numbers = #tpu.dot_dimension_numbers<[1], [0], [0], [1], [0, 0, 1, 1], [], []>} : vector<12x108xf32>, vector<108x256xf32>, vector<12x256xf32> -> vector<12x256xf32>
    %c0_231 = arith.constant 0 : index
    %c0_232 = arith.constant 0 : index
    %c0_233 = arith.constant 0 : index
    %569 = vector.load %arg8[%c0_231, %c0_232, %c0_233] : memref<3x12x1xf32, #tpu.memory_space<vmem>>, vector<1x12x1xf32>
    %570 = vector.shape_cast %569 : vector<1x12x1xf32> to vector<12x1xf32>
    %571 = vector.broadcast %570 : vector<12x1xf32> to vector<12x256xf32>
    %572 = arith.addf %568, %571 : vector<12x256xf32>
    %cst_234 = arith.constant 0.000000e+00 : f32
    %573 = vector.broadcast %cst_234 : f32 to vector<12x256xf32>
    %574 = arith.maximumf %572, %573 : vector<12x256xf32>
    %c17_i32_235 = arith.constant 17 : i32
    %575 = tpu.dynamic_rotate %574 by %c17_i32_235 dim 1 : vector<12x256xf32>, i32 -> vector<12x256xf32>
    %cst_236 = arith.constant 0.000000e+00 : f32
    %576 = vector.shape_cast %276 : vector<1x256xi1> to vector<1x256xi1>
    %577 = vector.broadcast %576 : vector<1x256xi1> to vector<12x256xi1>
    %578 = vector.broadcast %cst_236 : f32 to vector<12x256xf32>
    %579 = arith.select %577, %575, %578 : vector<12x256xi1>, vector<12x256xf32>
    %c0_237 = arith.constant 0 : index
    %c0_238 = arith.constant 0 : index
    %580 = vector.load %arg15[%c0_237, %c0_238] : memref<108x256xf32, #tpu.memory_space<vmem>>, vector<12x256xf32>
    tpu.vector_store %arg15[%c0_237, %c0_238], %579 {strides = array<i32>} : memref<108x256xf32, #tpu.memory_space<vmem>>, vector<12x256xf32>,
    %c16_i32_239 = arith.constant 16 : i32
    %581 = tpu.dynamic_rotate %574 by %c16_i32_239 dim 1 : vector<12x256xf32>, i32 -> vector<12x256xf32>
    %cst_240 = arith.constant 0.000000e+00 : f32
    %582 = vector.shape_cast %287 : vector<1x256xi1> to vector<1x256xi1>
    %583 = vector.broadcast %582 : vector<1x256xi1> to vector<12x256xi1>
    %584 = vector.broadcast %cst_240 : f32 to vector<12x256xf32>
    %585 = arith.select %583, %581, %584 : vector<12x256xi1>, vector<12x256xf32>
    %c12_241 = arith.constant 12 : index
    %c0_242 = arith.constant 0 : index
    %586 = vector.load %arg15[%c12_241, %c0_242] : memref<108x256xf32, #tpu.memory_space<vmem>>, vector<12x256xf32>
    tpu.vector_store %arg15[%c12_241, %c0_242], %585 {strides = array<i32>} : memref<108x256xf32, #tpu.memory_space<vmem>>, vector<12x256xf32>,
    %c15_i32_243 = arith.constant 15 : i32
    %587 = tpu.dynamic_rotate %574 by %c15_i32_243 dim 1 : vector<12x256xf32>, i32 -> vector<12x256xf32>
    %cst_244 = arith.constant 0.000000e+00 : f32
    %588 = vector.shape_cast %298 : vector<1x256xi1> to vector<1x256xi1>
    %589 = vector.broadcast %588 : vector<1x256xi1> to vector<12x256xi1>
    %590 = vector.broadcast %cst_244 : f32 to vector<12x256xf32>
    %591 = arith.select %589, %587, %590 : vector<12x256xi1>, vector<12x256xf32>
    %c24_245 = arith.constant 24 : index
    %c0_246 = arith.constant 0 : index
    %592 = vector.load %arg15[%c24_245, %c0_246] : memref<108x256xf32, #tpu.memory_space<vmem>>, vector<12x256xf32>
    tpu.vector_store %arg15[%c24_245, %c0_246], %591 {strides = array<i32>} : memref<108x256xf32, #tpu.memory_space<vmem>>, vector<12x256xf32>,
    %c1_i32_247 = arith.constant 1 : i32
    %593 = tpu.dynamic_rotate %574 by %c1_i32_247 dim 1 : vector<12x256xf32>, i32 -> vector<12x256xf32>
    %cst_248 = arith.constant 0.000000e+00 : f32
    %594 = vector.shape_cast %309 : vector<1x256xi1> to vector<1x256xi1>
    %595 = vector.broadcast %594 : vector<1x256xi1> to vector<12x256xi1>
    %596 = vector.broadcast %cst_248 : f32 to vector<12x256xf32>
    %597 = arith.select %595, %593, %596 : vector<12x256xi1>, vector<12x256xf32>
    %c36_249 = arith.constant 36 : index
    %c0_250 = arith.constant 0 : index
    %598 = vector.load %arg15[%c36_249, %c0_250] : memref<108x256xf32, #tpu.memory_space<vmem>>, vector<12x256xf32>
    tpu.vector_store %arg15[%c36_249, %c0_250], %597 {strides = array<i32>} : memref<108x256xf32, #tpu.memory_space<vmem>>, vector<12x256xf32>,
    %c48_251 = arith.constant 48 : index
    %c0_252 = arith.constant 0 : index
    %599 = vector.load %arg15[%c48_251, %c0_252] : memref<108x256xf32, #tpu.memory_space<vmem>>, vector<12x256xf32>
    tpu.vector_store %arg15[%c48_251, %c0_252], %574 {strides = array<i32>} : memref<108x256xf32, #tpu.memory_space<vmem>>, vector<12x256xf32>,
    %c255_i32_253 = arith.constant 255 : i32
    %600 = tpu.dynamic_rotate %574 by %c255_i32_253 dim 1 : vector<12x256xf32>, i32 -> vector<12x256xf32>
    %cst_254 = arith.constant 0.000000e+00 : f32
    %601 = vector.shape_cast %320 : vector<1x256xi1> to vector<1x256xi1>
    %602 = vector.broadcast %601 : vector<1x256xi1> to vector<12x256xi1>
    %603 = vector.broadcast %cst_254 : f32 to vector<12x256xf32>
    %604 = arith.select %602, %600, %603 : vector<12x256xi1>, vector<12x256xf32>
    %c60_255 = arith.constant 60 : index
    %c0_256 = arith.constant 0 : index
    %605 = vector.load %arg15[%c60_255, %c0_256] : memref<108x256xf32, #tpu.memory_space<vmem>>, vector<12x256xf32>
    tpu.vector_store %arg15[%c60_255, %c0_256], %604 {strides = array<i32>} : memref<108x256xf32, #tpu.memory_space<vmem>>, vector<12x256xf32>,
    %c241_i32_257 = arith.constant 241 : i32
    %606 = tpu.dynamic_rotate %574 by %c241_i32_257 dim 1 : vector<12x256xf32>, i32 -> vector<12x256xf32>
    %cst_258 = arith.constant 0.000000e+00 : f32
    %607 = vector.shape_cast %331 : vector<1x256xi1> to vector<1x256xi1>
    %608 = vector.broadcast %607 : vector<1x256xi1> to vector<12x256xi1>
    %609 = vector.broadcast %cst_258 : f32 to vector<12x256xf32>
    %610 = arith.select %608, %606, %609 : vector<12x256xi1>, vector<12x256xf32>
    %c72_259 = arith.constant 72 : index
    %c0_260 = arith.constant 0 : index
    %611 = vector.load %arg15[%c72_259, %c0_260] : memref<108x256xf32, #tpu.memory_space<vmem>>, vector<12x256xf32>
    tpu.vector_store %arg15[%c72_259, %c0_260], %610 {strides = array<i32>} : memref<108x256xf32, #tpu.memory_space<vmem>>, vector<12x256xf32>,
    %c240_i32_261 = arith.constant 240 : i32
    %612 = tpu.dynamic_rotate %574 by %c240_i32_261 dim 1 : vector<12x256xf32>, i32 -> vector<12x256xf32>
    %cst_262 = arith.constant 0.000000e+00 : f32
    %613 = vector.shape_cast %342 : vector<1x256xi1> to vector<1x256xi1>
    %614 = vector.broadcast %613 : vector<1x256xi1> to vector<12x256xi1>
    %615 = vector.broadcast %cst_262 : f32 to vector<12x256xf32>
    %616 = arith.select %614, %612, %615 : vector<12x256xi1>, vector<12x256xf32>
    %c84_263 = arith.constant 84 : index
    %c0_264 = arith.constant 0 : index
    %617 = vector.load %arg15[%c84_263, %c0_264] : memref<108x256xf32, #tpu.memory_space<vmem>>, vector<12x256xf32>
    tpu.vector_store %arg15[%c84_263, %c0_264], %616 {strides = array<i32>} : memref<108x256xf32, #tpu.memory_space<vmem>>, vector<12x256xf32>,
    %c239_i32_265 = arith.constant 239 : i32
    %618 = tpu.dynamic_rotate %574 by %c239_i32_265 dim 1 : vector<12x256xf32>, i32 -> vector<12x256xf32>
    %cst_266 = arith.constant 0.000000e+00 : f32
    %619 = vector.shape_cast %353 : vector<1x256xi1> to vector<1x256xi1>
    %620 = vector.broadcast %619 : vector<1x256xi1> to vector<12x256xi1>
    %621 = vector.broadcast %cst_266 : f32 to vector<12x256xf32>
    %622 = arith.select %620, %618, %621 : vector<12x256xi1>, vector<12x256xf32>
    %c96_267 = arith.constant 96 : index
    %c0_268 = arith.constant 0 : index
    %623 = vector.load %arg15[%c96_267, %c0_268] : memref<108x256xf32, #tpu.memory_space<vmem>>, vector<12x256xf32>
    tpu.vector_store %arg15[%c96_267, %c0_268], %622 {strides = array<i32>} : memref<108x256xf32, #tpu.memory_space<vmem>>, vector<12x256xf32>,
    %c1_269 = arith.constant 1 : index
    %c0_270 = arith.constant 0 : index
    %c0_271 = arith.constant 0 : index
    %624 = vector.load %arg7[%c1_269, %c0_270, %c0_271] : memref<3x12x108xf32, #tpu.memory_space<vmem>>, vector<1x12x108xf32>
    %625 = vector.shape_cast %624 : vector<1x12x108xf32> to vector<12x108xf32>
    %c0_272 = arith.constant 0 : index
    %c0_273 = arith.constant 0 : index
    %626 = vector.load %arg15[%c0_272, %c0_273] : memref<108x256xf32, #tpu.memory_space<vmem>>, vector<108x256xf32>
    %cst_274 = arith.constant dense<0.000000e+00> : vector<12x256xf32>
    %627 = tpu.matmul %625, %626, %cst_274 {dimension_numbers = #tpu.dot_dimension_numbers<[1], [0], [0], [1], [0, 0, 1, 1], [], []>} : vector<12x108xf32>, vector<108x256xf32>, vector<12x256xf32> -> vector<12x256xf32>
    %c1_275 = arith.constant 1 : index
    %c0_276 = arith.constant 0 : index
    %c0_277 = arith.constant 0 : index
    %628 = vector.load %arg8[%c1_275, %c0_276, %c0_277] : memref<3x12x1xf32, #tpu.memory_space<vmem>>, vector<1x12x1xf32>
    %629 = vector.shape_cast %628 : vector<1x12x1xf32> to vector<12x1xf32>
    %630 = vector.broadcast %629 : vector<12x1xf32> to vector<12x256xf32>
    %631 = arith.addf %627, %630 : vector<12x256xf32>
    %cst_278 = arith.constant 0.000000e+00 : f32
    %632 = vector.broadcast %cst_278 : f32 to vector<12x256xf32>
    %633 = arith.maximumf %631, %632 : vector<12x256xf32>
    %c17_i32_279 = arith.constant 17 : i32
    %634 = tpu.dynamic_rotate %633 by %c17_i32_279 dim 1 : vector<12x256xf32>, i32 -> vector<12x256xf32>
    %cst_280 = arith.constant 0.000000e+00 : f32
    %635 = vector.shape_cast %276 : vector<1x256xi1> to vector<1x256xi1>
    %636 = vector.broadcast %635 : vector<1x256xi1> to vector<12x256xi1>
    %637 = vector.broadcast %cst_280 : f32 to vector<12x256xf32>
    %638 = arith.select %636, %634, %637 : vector<12x256xi1>, vector<12x256xf32>
    %c0_281 = arith.constant 0 : index
    %c0_282 = arith.constant 0 : index
    %639 = vector.load %arg15[%c0_281, %c0_282] : memref<108x256xf32, #tpu.memory_space<vmem>>, vector<12x256xf32>
    tpu.vector_store %arg15[%c0_281, %c0_282], %638 {strides = array<i32>} : memref<108x256xf32, #tpu.memory_space<vmem>>, vector<12x256xf32>,
    %c16_i32_283 = arith.constant 16 : i32
    %640 = tpu.dynamic_rotate %633 by %c16_i32_283 dim 1 : vector<12x256xf32>, i32 -> vector<12x256xf32>
    %cst_284 = arith.constant 0.000000e+00 : f32
    %641 = vector.shape_cast %287 : vector<1x256xi1> to vector<1x256xi1>
    %642 = vector.broadcast %641 : vector<1x256xi1> to vector<12x256xi1>
    %643 = vector.broadcast %cst_284 : f32 to vector<12x256xf32>
    %644 = arith.select %642, %640, %643 : vector<12x256xi1>, vector<12x256xf32>
    %c12_285 = arith.constant 12 : index
    %c0_286 = arith.constant 0 : index
    %645 = vector.load %arg15[%c12_285, %c0_286] : memref<108x256xf32, #tpu.memory_space<vmem>>, vector<12x256xf32>
    tpu.vector_store %arg15[%c12_285, %c0_286], %644 {strides = array<i32>} : memref<108x256xf32, #tpu.memory_space<vmem>>, vector<12x256xf32>,
    %c15_i32_287 = arith.constant 15 : i32
    %646 = tpu.dynamic_rotate %633 by %c15_i32_287 dim 1 : vector<12x256xf32>, i32 -> vector<12x256xf32>
    %cst_288 = arith.constant 0.000000e+00 : f32
    %647 = vector.shape_cast %298 : vector<1x256xi1> to vector<1x256xi1>
    %648 = vector.broadcast %647 : vector<1x256xi1> to vector<12x256xi1>
    %649 = vector.broadcast %cst_288 : f32 to vector<12x256xf32>
    %650 = arith.select %648, %646, %649 : vector<12x256xi1>, vector<12x256xf32>
    %c24_289 = arith.constant 24 : index
    %c0_290 = arith.constant 0 : index
    %651 = vector.load %arg15[%c24_289, %c0_290] : memref<108x256xf32, #tpu.memory_space<vmem>>, vector<12x256xf32>
    tpu.vector_store %arg15[%c24_289, %c0_290], %650 {strides = array<i32>} : memref<108x256xf32, #tpu.memory_space<vmem>>, vector<12x256xf32>,
    %c1_i32_291 = arith.constant 1 : i32
    %652 = tpu.dynamic_rotate %633 by %c1_i32_291 dim 1 : vector<12x256xf32>, i32 -> vector<12x256xf32>
    %cst_292 = arith.constant 0.000000e+00 : f32
    %653 = vector.shape_cast %309 : vector<1x256xi1> to vector<1x256xi1>
    %654 = vector.broadcast %653 : vector<1x256xi1> to vector<12x256xi1>
    %655 = vector.broadcast %cst_292 : f32 to vector<12x256xf32>
    %656 = arith.select %654, %652, %655 : vector<12x256xi1>, vector<12x256xf32>
    %c36_293 = arith.constant 36 : index
    %c0_294 = arith.constant 0 : index
    %657 = vector.load %arg15[%c36_293, %c0_294] : memref<108x256xf32, #tpu.memory_space<vmem>>, vector<12x256xf32>
    tpu.vector_store %arg15[%c36_293, %c0_294], %656 {strides = array<i32>} : memref<108x256xf32, #tpu.memory_space<vmem>>, vector<12x256xf32>,
    %c48_295 = arith.constant 48 : index
    %c0_296 = arith.constant 0 : index
    %658 = vector.load %arg15[%c48_295, %c0_296] : memref<108x256xf32, #tpu.memory_space<vmem>>, vector<12x256xf32>
    tpu.vector_store %arg15[%c48_295, %c0_296], %633 {strides = array<i32>} : memref<108x256xf32, #tpu.memory_space<vmem>>, vector<12x256xf32>,
    %c255_i32_297 = arith.constant 255 : i32
    %659 = tpu.dynamic_rotate %633 by %c255_i32_297 dim 1 : vector<12x256xf32>, i32 -> vector<12x256xf32>
    %cst_298 = arith.constant 0.000000e+00 : f32
    %660 = vector.shape_cast %320 : vector<1x256xi1> to vector<1x256xi1>
    %661 = vector.broadcast %660 : vector<1x256xi1> to vector<12x256xi1>
    %662 = vector.broadcast %cst_298 : f32 to vector<12x256xf32>
    %663 = arith.select %661, %659, %662 : vector<12x256xi1>, vector<12x256xf32>
    %c60_299 = arith.constant 60 : index
    %c0_300 = arith.constant 0 : index
    %664 = vector.load %arg15[%c60_299, %c0_300] : memref<108x256xf32, #tpu.memory_space<vmem>>, vector<12x256xf32>
    tpu.vector_store %arg15[%c60_299, %c0_300], %663 {strides = array<i32>} : memref<108x256xf32, #tpu.memory_space<vmem>>, vector<12x256xf32>,
    %c241_i32_301 = arith.constant 241 : i32
    %665 = tpu.dynamic_rotate %633 by %c241_i32_301 dim 1 : vector<12x256xf32>, i32 -> vector<12x256xf32>
    %cst_302 = arith.constant 0.000000e+00 : f32
    %666 = vector.shape_cast %331 : vector<1x256xi1> to vector<1x256xi1>
    %667 = vector.broadcast %666 : vector<1x256xi1> to vector<12x256xi1>
    %668 = vector.broadcast %cst_302 : f32 to vector<12x256xf32>
    %669 = arith.select %667, %665, %668 : vector<12x256xi1>, vector<12x256xf32>
    %c72_303 = arith.constant 72 : index
    %c0_304 = arith.constant 0 : index
    %670 = vector.load %arg15[%c72_303, %c0_304] : memref<108x256xf32, #tpu.memory_space<vmem>>, vector<12x256xf32>
    tpu.vector_store %arg15[%c72_303, %c0_304], %669 {strides = array<i32>} : memref<108x256xf32, #tpu.memory_space<vmem>>, vector<12x256xf32>,
    %c240_i32_305 = arith.constant 240 : i32
    %671 = tpu.dynamic_rotate %633 by %c240_i32_305 dim 1 : vector<12x256xf32>, i32 -> vector<12x256xf32>
    %cst_306 = arith.constant 0.000000e+00 : f32
    %672 = vector.shape_cast %342 : vector<1x256xi1> to vector<1x256xi1>
    %673 = vector.broadcast %672 : vector<1x256xi1> to vector<12x256xi1>
    %674 = vector.broadcast %cst_306 : f32 to vector<12x256xf32>
    %675 = arith.select %673, %671, %674 : vector<12x256xi1>, vector<12x256xf32>
    %c84_307 = arith.constant 84 : index
    %c0_308 = arith.constant 0 : index
    %676 = vector.load %arg15[%c84_307, %c0_308] : memref<108x256xf32, #tpu.memory_space<vmem>>, vector<12x256xf32>
    tpu.vector_store %arg15[%c84_307, %c0_308], %675 {strides = array<i32>} : memref<108x256xf32, #tpu.memory_space<vmem>>, vector<12x256xf32>,
    %c239_i32_309 = arith.constant 239 : i32
    %677 = tpu.dynamic_rotate %633 by %c239_i32_309 dim 1 : vector<12x256xf32>, i32 -> vector<12x256xf32>
    %cst_310 = arith.constant 0.000000e+00 : f32
    %678 = vector.shape_cast %353 : vector<1x256xi1> to vector<1x256xi1>
    %679 = vector.broadcast %678 : vector<1x256xi1> to vector<12x256xi1>
    %680 = vector.broadcast %cst_310 : f32 to vector<12x256xf32>
    %681 = arith.select %679, %677, %680 : vector<12x256xi1>, vector<12x256xf32>
    %c96_311 = arith.constant 96 : index
    %c0_312 = arith.constant 0 : index
    %682 = vector.load %arg15[%c96_311, %c0_312] : memref<108x256xf32, #tpu.memory_space<vmem>>, vector<12x256xf32>
    tpu.vector_store %arg15[%c96_311, %c0_312], %681 {strides = array<i32>} : memref<108x256xf32, #tpu.memory_space<vmem>>, vector<12x256xf32>,
    %c2 = arith.constant 2 : index
    %c0_313 = arith.constant 0 : index
    %c0_314 = arith.constant 0 : index
    %683 = vector.load %arg7[%c2, %c0_313, %c0_314] : memref<3x12x108xf32, #tpu.memory_space<vmem>>, vector<1x12x108xf32>
    %684 = vector.shape_cast %683 : vector<1x12x108xf32> to vector<12x108xf32>
    %c0_315 = arith.constant 0 : index
    %c0_316 = arith.constant 0 : index
    %685 = vector.load %arg15[%c0_315, %c0_316] : memref<108x256xf32, #tpu.memory_space<vmem>>, vector<108x256xf32>
    %cst_317 = arith.constant dense<0.000000e+00> : vector<12x256xf32>
    %686 = tpu.matmul %684, %685, %cst_317 {dimension_numbers = #tpu.dot_dimension_numbers<[1], [0], [0], [1], [0, 0, 1, 1], [], []>} : vector<12x108xf32>, vector<108x256xf32>, vector<12x256xf32> -> vector<12x256xf32>
    %c2_318 = arith.constant 2 : index
    %c0_319 = arith.constant 0 : index
    %c0_320 = arith.constant 0 : index
    %687 = vector.load %arg8[%c2_318, %c0_319, %c0_320] : memref<3x12x1xf32, #tpu.memory_space<vmem>>, vector<1x12x1xf32>
    %688 = vector.shape_cast %687 : vector<1x12x1xf32> to vector<12x1xf32>
    %689 = vector.broadcast %688 : vector<12x1xf32> to vector<12x256xf32>
    %690 = arith.addf %686, %689 : vector<12x256xf32>
    %c0_321 = arith.constant 0 : index
    %c0_322 = arith.constant 0 : index
    %691 = vector.load %arg9[%c0_321, %c0_322] : memref<56x12xf32, #tpu.memory_space<vmem>>, vector<56x12xf32>
    %cst_323 = arith.constant dense<0.000000e+00> : vector<56x256xf32>
    %692 = tpu.matmul %691, %690, %cst_323 {dimension_numbers = #tpu.dot_dimension_numbers<[1], [0], [0], [1], [0, 0, 1, 1], [], []>} : vector<56x12xf32>, vector<12x256xf32>, vector<56x256xf32> -> vector<56x256xf32>
    %c0_324 = arith.constant 0 : index
    %c0_325 = arith.constant 0 : index
    %693 = vector.load %arg10[%c0_324, %c0_325] : memref<56x1xf32, #tpu.memory_space<vmem>>, vector<56x1xf32>
    %694 = vector.broadcast %693 : vector<56x1xf32> to vector<56x256xf32>
    %695 = arith.addf %692, %694 : vector<56x256xf32>
    %cst_326 = arith.constant 0.000000e+00 : f32
    %696 = vector.broadcast %cst_326 : f32 to vector<56x256xf32>
    %697 = arith.maximumf %695, %696 : vector<56x256xf32>
    %c34_i32_327 = arith.constant 34 : i32
    %698 = tpu.dynamic_rotate %697 by %c34_i32_327 dim 1 : vector<56x256xf32>, i32 -> vector<56x256xf32>
    %cst_328 = arith.constant 0.000000e+00 : f32
    %699 = vector.shape_cast %12 : vector<1x256xi1> to vector<1x256xi1>
    %700 = vector.broadcast %699 : vector<1x256xi1> to vector<56x256xi1>
    %701 = vector.broadcast %cst_328 : f32 to vector<56x256xf32>
    %702 = arith.select %700, %698, %701 : vector<56x256xi1>, vector<56x256xf32>
    %c0_329 = arith.constant 0 : index
    %c0_330 = arith.constant 0 : index
    %703 = vector.load %arg16[%c0_329, %c0_330] : memref<280x256xf32, #tpu.memory_space<vmem>>, vector<56x256xf32>
    tpu.vector_store %arg16[%c0_329, %c0_330], %702 {strides = array<i32>} : memref<280x256xf32, #tpu.memory_space<vmem>>, vector<56x256xf32>,
    %c33_i32_331 = arith.constant 33 : i32
    %704 = tpu.dynamic_rotate %697 by %c33_i32_331 dim 1 : vector<56x256xf32>, i32 -> vector<56x256xf32>
    %cst_332 = arith.constant 0.000000e+00 : f32
    %705 = vector.shape_cast %23 : vector<1x256xi1> to vector<1x256xi1>
    %706 = vector.broadcast %705 : vector<1x256xi1> to vector<56x256xi1>
    %707 = vector.broadcast %cst_332 : f32 to vector<56x256xf32>
    %708 = arith.select %706, %704, %707 : vector<56x256xi1>, vector<56x256xf32>
    %c56 = arith.constant 56 : index
    %c0_333 = arith.constant 0 : index
    %709 = vector.load %arg16[%c56, %c0_333] : memref<280x256xf32, #tpu.memory_space<vmem>>, vector<56x256xf32>
    tpu.vector_store %arg16[%c56, %c0_333], %708 {strides = array<i32>} : memref<280x256xf32, #tpu.memory_space<vmem>>, vector<56x256xf32>,
    %c32_i32_334 = arith.constant 32 : i32
    %710 = tpu.dynamic_rotate %697 by %c32_i32_334 dim 1 : vector<56x256xf32>, i32 -> vector<56x256xf32>
    %cst_335 = arith.constant 0.000000e+00 : f32
    %711 = vector.shape_cast %34 : vector<1x256xi1> to vector<1x256xi1>
    %712 = vector.broadcast %711 : vector<1x256xi1> to vector<56x256xi1>
    %713 = vector.broadcast %cst_335 : f32 to vector<56x256xf32>
    %714 = arith.select %712, %710, %713 : vector<56x256xi1>, vector<56x256xf32>
    %c112 = arith.constant 112 : index
    %c0_336 = arith.constant 0 : index
    %715 = vector.load %arg16[%c112, %c0_336] : memref<280x256xf32, #tpu.memory_space<vmem>>, vector<56x256xf32>
    tpu.vector_store %arg16[%c112, %c0_336], %714 {strides = array<i32>} : memref<280x256xf32, #tpu.memory_space<vmem>>, vector<56x256xf32>,
    %c31_i32_337 = arith.constant 31 : i32
    %716 = tpu.dynamic_rotate %697 by %c31_i32_337 dim 1 : vector<56x256xf32>, i32 -> vector<56x256xf32>
    %cst_338 = arith.constant 0.000000e+00 : f32
    %717 = vector.shape_cast %45 : vector<1x256xi1> to vector<1x256xi1>
    %718 = vector.broadcast %717 : vector<1x256xi1> to vector<56x256xi1>
    %719 = vector.broadcast %cst_338 : f32 to vector<56x256xf32>
    %720 = arith.select %718, %716, %719 : vector<56x256xi1>, vector<56x256xf32>
    %c168 = arith.constant 168 : index
    %c0_339 = arith.constant 0 : index
    %721 = vector.load %arg16[%c168, %c0_339] : memref<280x256xf32, #tpu.memory_space<vmem>>, vector<56x256xf32>
    tpu.vector_store %arg16[%c168, %c0_339], %720 {strides = array<i32>} : memref<280x256xf32, #tpu.memory_space<vmem>>, vector<56x256xf32>,
    %c30_i32_340 = arith.constant 30 : i32
    %722 = tpu.dynamic_rotate %697 by %c30_i32_340 dim 1 : vector<56x256xf32>, i32 -> vector<56x256xf32>
    %cst_341 = arith.constant 0.000000e+00 : f32
    %723 = vector.shape_cast %56 : vector<1x256xi1> to vector<1x256xi1>
    %724 = vector.broadcast %723 : vector<1x256xi1> to vector<56x256xi1>
    %725 = vector.broadcast %cst_341 : f32 to vector<56x256xf32>
    %726 = arith.select %724, %722, %725 : vector<56x256xi1>, vector<56x256xf32>
    %c224 = arith.constant 224 : index
    %c0_342 = arith.constant 0 : index
    %727 = vector.load %arg16[%c224, %c0_342] : memref<280x256xf32, #tpu.memory_space<vmem>>, vector<56x256xf32>
    tpu.vector_store %arg16[%c224, %c0_342], %726 {strides = array<i32>} : memref<280x256xf32, #tpu.memory_space<vmem>>, vector<56x256xf32>,
    %c0_343 = arith.constant 0 : index
    %c0_344 = arith.constant 0 : index
    %c0_345 = arith.constant 0 : index
    %728 = vector.load %arg11[%c0_343, %c0_344, %c0_345] : memref<5x12x280xf32, #tpu.memory_space<vmem>>, vector<1x12x280xf32>
    %729 = vector.shape_cast %728 : vector<1x12x280xf32> to vector<12x280xf32>
    %c0_346 = arith.constant 0 : index
    %c0_347 = arith.constant 0 : index
    %730 = vector.load %arg16[%c0_346, %c0_347] : memref<280x256xf32, #tpu.memory_space<vmem>>, vector<280x256xf32>
    %cst_348 = arith.constant dense<0.000000e+00> : vector<12x256xf32>
    %731 = tpu.matmul %729, %730, %cst_348 {dimension_numbers = #tpu.dot_dimension_numbers<[1], [0], [0], [1], [0, 0, 1, 1], [], []>} : vector<12x280xf32>, vector<280x256xf32>, vector<12x256xf32> -> vector<12x256xf32>
    %c18_i32_349 = arith.constant 18 : i32
    %732 = tpu.dynamic_rotate %697 by %c18_i32_349 dim 1 : vector<56x256xf32>, i32 -> vector<56x256xf32>
    %cst_350 = arith.constant 0.000000e+00 : f32
    %733 = vector.shape_cast %67 : vector<1x256xi1> to vector<1x256xi1>
    %734 = vector.broadcast %733 : vector<1x256xi1> to vector<56x256xi1>
    %735 = vector.broadcast %cst_350 : f32 to vector<56x256xf32>
    %736 = arith.select %734, %732, %735 : vector<56x256xi1>, vector<56x256xf32>
    %c0_351 = arith.constant 0 : index
    %c0_352 = arith.constant 0 : index
    %737 = vector.load %arg16[%c0_351, %c0_352] : memref<280x256xf32, #tpu.memory_space<vmem>>, vector<56x256xf32>
    tpu.vector_store %arg16[%c0_351, %c0_352], %736 {strides = array<i32>} : memref<280x256xf32, #tpu.memory_space<vmem>>, vector<56x256xf32>,
    %c17_i32_353 = arith.constant 17 : i32
    %738 = tpu.dynamic_rotate %697 by %c17_i32_353 dim 1 : vector<56x256xf32>, i32 -> vector<56x256xf32>
    %cst_354 = arith.constant 0.000000e+00 : f32
    %739 = vector.shape_cast %78 : vector<1x256xi1> to vector<1x256xi1>
    %740 = vector.broadcast %739 : vector<1x256xi1> to vector<56x256xi1>
    %741 = vector.broadcast %cst_354 : f32 to vector<56x256xf32>
    %742 = arith.select %740, %738, %741 : vector<56x256xi1>, vector<56x256xf32>
    %c56_355 = arith.constant 56 : index
    %c0_356 = arith.constant 0 : index
    %743 = vector.load %arg16[%c56_355, %c0_356] : memref<280x256xf32, #tpu.memory_space<vmem>>, vector<56x256xf32>
    tpu.vector_store %arg16[%c56_355, %c0_356], %742 {strides = array<i32>} : memref<280x256xf32, #tpu.memory_space<vmem>>, vector<56x256xf32>,
    %c16_i32_357 = arith.constant 16 : i32
    %744 = tpu.dynamic_rotate %697 by %c16_i32_357 dim 1 : vector<56x256xf32>, i32 -> vector<56x256xf32>
    %cst_358 = arith.constant 0.000000e+00 : f32
    %745 = vector.shape_cast %89 : vector<1x256xi1> to vector<1x256xi1>
    %746 = vector.broadcast %745 : vector<1x256xi1> to vector<56x256xi1>
    %747 = vector.broadcast %cst_358 : f32 to vector<56x256xf32>
    %748 = arith.select %746, %744, %747 : vector<56x256xi1>, vector<56x256xf32>
    %c112_359 = arith.constant 112 : index
    %c0_360 = arith.constant 0 : index
    %749 = vector.load %arg16[%c112_359, %c0_360] : memref<280x256xf32, #tpu.memory_space<vmem>>, vector<56x256xf32>
    tpu.vector_store %arg16[%c112_359, %c0_360], %748 {strides = array<i32>} : memref<280x256xf32, #tpu.memory_space<vmem>>, vector<56x256xf32>,
    %c15_i32_361 = arith.constant 15 : i32
    %750 = tpu.dynamic_rotate %697 by %c15_i32_361 dim 1 : vector<56x256xf32>, i32 -> vector<56x256xf32>
    %cst_362 = arith.constant 0.000000e+00 : f32
    %751 = vector.shape_cast %100 : vector<1x256xi1> to vector<1x256xi1>
    %752 = vector.broadcast %751 : vector<1x256xi1> to vector<56x256xi1>
    %753 = vector.broadcast %cst_362 : f32 to vector<56x256xf32>
    %754 = arith.select %752, %750, %753 : vector<56x256xi1>, vector<56x256xf32>
    %c168_363 = arith.constant 168 : index
    %c0_364 = arith.constant 0 : index
    %755 = vector.load %arg16[%c168_363, %c0_364] : memref<280x256xf32, #tpu.memory_space<vmem>>, vector<56x256xf32>
    tpu.vector_store %arg16[%c168_363, %c0_364], %754 {strides = array<i32>} : memref<280x256xf32, #tpu.memory_space<vmem>>, vector<56x256xf32>,
    %c14_i32_365 = arith.constant 14 : i32
    %756 = tpu.dynamic_rotate %697 by %c14_i32_365 dim 1 : vector<56x256xf32>, i32 -> vector<56x256xf32>
    %cst_366 = arith.constant 0.000000e+00 : f32
    %757 = vector.shape_cast %111 : vector<1x256xi1> to vector<1x256xi1>
    %758 = vector.broadcast %757 : vector<1x256xi1> to vector<56x256xi1>
    %759 = vector.broadcast %cst_366 : f32 to vector<56x256xf32>
    %760 = arith.select %758, %756, %759 : vector<56x256xi1>, vector<56x256xf32>
    %c224_367 = arith.constant 224 : index
    %c0_368 = arith.constant 0 : index
    %761 = vector.load %arg16[%c224_367, %c0_368] : memref<280x256xf32, #tpu.memory_space<vmem>>, vector<56x256xf32>
    tpu.vector_store %arg16[%c224_367, %c0_368], %760 {strides = array<i32>} : memref<280x256xf32, #tpu.memory_space<vmem>>, vector<56x256xf32>,
    %c1_369 = arith.constant 1 : index
    %c0_370 = arith.constant 0 : index
    %c0_371 = arith.constant 0 : index
    %762 = vector.load %arg11[%c1_369, %c0_370, %c0_371] : memref<5x12x280xf32, #tpu.memory_space<vmem>>, vector<1x12x280xf32>
    %763 = vector.shape_cast %762 : vector<1x12x280xf32> to vector<12x280xf32>
    %c0_372 = arith.constant 0 : index
    %c0_373 = arith.constant 0 : index
    %764 = vector.load %arg16[%c0_372, %c0_373] : memref<280x256xf32, #tpu.memory_space<vmem>>, vector<280x256xf32>
    %cst_374 = arith.constant dense<0.000000e+00> : vector<12x256xf32>
    %765 = tpu.matmul %763, %764, %cst_374 {dimension_numbers = #tpu.dot_dimension_numbers<[1], [0], [0], [1], [0, 0, 1, 1], [], []>} : vector<12x280xf32>, vector<280x256xf32>, vector<12x256xf32> -> vector<12x256xf32>
    %766 = arith.addf %731, %765 : vector<12x256xf32>
    %c2_i32_375 = arith.constant 2 : i32
    %767 = tpu.dynamic_rotate %697 by %c2_i32_375 dim 1 : vector<56x256xf32>, i32 -> vector<56x256xf32>
    %cst_376 = arith.constant 0.000000e+00 : f32
    %768 = vector.shape_cast %122 : vector<1x256xi1> to vector<1x256xi1>
    %769 = vector.broadcast %768 : vector<1x256xi1> to vector<56x256xi1>
    %770 = vector.broadcast %cst_376 : f32 to vector<56x256xf32>
    %771 = arith.select %769, %767, %770 : vector<56x256xi1>, vector<56x256xf32>
    %c0_377 = arith.constant 0 : index
    %c0_378 = arith.constant 0 : index
    %772 = vector.load %arg16[%c0_377, %c0_378] : memref<280x256xf32, #tpu.memory_space<vmem>>, vector<56x256xf32>
    tpu.vector_store %arg16[%c0_377, %c0_378], %771 {strides = array<i32>} : memref<280x256xf32, #tpu.memory_space<vmem>>, vector<56x256xf32>,
    %c1_i32_379 = arith.constant 1 : i32
    %773 = tpu.dynamic_rotate %697 by %c1_i32_379 dim 1 : vector<56x256xf32>, i32 -> vector<56x256xf32>
    %cst_380 = arith.constant 0.000000e+00 : f32
    %774 = vector.shape_cast %133 : vector<1x256xi1> to vector<1x256xi1>
    %775 = vector.broadcast %774 : vector<1x256xi1> to vector<56x256xi1>
    %776 = vector.broadcast %cst_380 : f32 to vector<56x256xf32>
    %777 = arith.select %775, %773, %776 : vector<56x256xi1>, vector<56x256xf32>
    %c56_381 = arith.constant 56 : index
    %c0_382 = arith.constant 0 : index
    %778 = vector.load %arg16[%c56_381, %c0_382] : memref<280x256xf32, #tpu.memory_space<vmem>>, vector<56x256xf32>
    tpu.vector_store %arg16[%c56_381, %c0_382], %777 {strides = array<i32>} : memref<280x256xf32, #tpu.memory_space<vmem>>, vector<56x256xf32>,
    %c112_383 = arith.constant 112 : index
    %c0_384 = arith.constant 0 : index
    %779 = vector.load %arg16[%c112_383, %c0_384] : memref<280x256xf32, #tpu.memory_space<vmem>>, vector<56x256xf32>
    tpu.vector_store %arg16[%c112_383, %c0_384], %697 {strides = array<i32>} : memref<280x256xf32, #tpu.memory_space<vmem>>, vector<56x256xf32>,
    %c255_i32_385 = arith.constant 255 : i32
    %780 = tpu.dynamic_rotate %697 by %c255_i32_385 dim 1 : vector<56x256xf32>, i32 -> vector<56x256xf32>
    %cst_386 = arith.constant 0.000000e+00 : f32
    %781 = vector.shape_cast %144 : vector<1x256xi1> to vector<1x256xi1>
    %782 = vector.broadcast %781 : vector<1x256xi1> to vector<56x256xi1>
    %783 = vector.broadcast %cst_386 : f32 to vector<56x256xf32>
    %784 = arith.select %782, %780, %783 : vector<56x256xi1>, vector<56x256xf32>
    %c168_387 = arith.constant 168 : index
    %c0_388 = arith.constant 0 : index
    %785 = vector.load %arg16[%c168_387, %c0_388] : memref<280x256xf32, #tpu.memory_space<vmem>>, vector<56x256xf32>
    tpu.vector_store %arg16[%c168_387, %c0_388], %784 {strides = array<i32>} : memref<280x256xf32, #tpu.memory_space<vmem>>, vector<56x256xf32>,
    %c254_i32_389 = arith.constant 254 : i32
    %786 = tpu.dynamic_rotate %697 by %c254_i32_389 dim 1 : vector<56x256xf32>, i32 -> vector<56x256xf32>
    %cst_390 = arith.constant 0.000000e+00 : f32
    %787 = vector.shape_cast %155 : vector<1x256xi1> to vector<1x256xi1>
    %788 = vector.broadcast %787 : vector<1x256xi1> to vector<56x256xi1>
    %789 = vector.broadcast %cst_390 : f32 to vector<56x256xf32>
    %790 = arith.select %788, %786, %789 : vector<56x256xi1>, vector<56x256xf32>
    %c224_391 = arith.constant 224 : index
    %c0_392 = arith.constant 0 : index
    %791 = vector.load %arg16[%c224_391, %c0_392] : memref<280x256xf32, #tpu.memory_space<vmem>>, vector<56x256xf32>
    tpu.vector_store %arg16[%c224_391, %c0_392], %790 {strides = array<i32>} : memref<280x256xf32, #tpu.memory_space<vmem>>, vector<56x256xf32>,
    %c2_393 = arith.constant 2 : index
    %c0_394 = arith.constant 0 : index
    %c0_395 = arith.constant 0 : index
    %792 = vector.load %arg11[%c2_393, %c0_394, %c0_395] : memref<5x12x280xf32, #tpu.memory_space<vmem>>, vector<1x12x280xf32>
    %793 = vector.shape_cast %792 : vector<1x12x280xf32> to vector<12x280xf32>
    %c0_396 = arith.constant 0 : index
    %c0_397 = arith.constant 0 : index
    %794 = vector.load %arg16[%c0_396, %c0_397] : memref<280x256xf32, #tpu.memory_space<vmem>>, vector<280x256xf32>
    %cst_398 = arith.constant dense<0.000000e+00> : vector<12x256xf32>
    %795 = tpu.matmul %793, %794, %cst_398 {dimension_numbers = #tpu.dot_dimension_numbers<[1], [0], [0], [1], [0, 0, 1, 1], [], []>} : vector<12x280xf32>, vector<280x256xf32>, vector<12x256xf32> -> vector<12x256xf32>
    %796 = arith.addf %766, %795 : vector<12x256xf32>
    %c242_i32_399 = arith.constant 242 : i32
    %797 = tpu.dynamic_rotate %697 by %c242_i32_399 dim 1 : vector<56x256xf32>, i32 -> vector<56x256xf32>
    %cst_400 = arith.constant 0.000000e+00 : f32
    %798 = vector.shape_cast %166 : vector<1x256xi1> to vector<1x256xi1>
    %799 = vector.broadcast %798 : vector<1x256xi1> to vector<56x256xi1>
    %800 = vector.broadcast %cst_400 : f32 to vector<56x256xf32>
    %801 = arith.select %799, %797, %800 : vector<56x256xi1>, vector<56x256xf32>
    %c0_401 = arith.constant 0 : index
    %c0_402 = arith.constant 0 : index
    %802 = vector.load %arg16[%c0_401, %c0_402] : memref<280x256xf32, #tpu.memory_space<vmem>>, vector<56x256xf32>
    tpu.vector_store %arg16[%c0_401, %c0_402], %801 {strides = array<i32>} : memref<280x256xf32, #tpu.memory_space<vmem>>, vector<56x256xf32>,
    %c241_i32_403 = arith.constant 241 : i32
    %803 = tpu.dynamic_rotate %697 by %c241_i32_403 dim 1 : vector<56x256xf32>, i32 -> vector<56x256xf32>
    %cst_404 = arith.constant 0.000000e+00 : f32
    %804 = vector.shape_cast %177 : vector<1x256xi1> to vector<1x256xi1>
    %805 = vector.broadcast %804 : vector<1x256xi1> to vector<56x256xi1>
    %806 = vector.broadcast %cst_404 : f32 to vector<56x256xf32>
    %807 = arith.select %805, %803, %806 : vector<56x256xi1>, vector<56x256xf32>
    %c56_405 = arith.constant 56 : index
    %c0_406 = arith.constant 0 : index
    %808 = vector.load %arg16[%c56_405, %c0_406] : memref<280x256xf32, #tpu.memory_space<vmem>>, vector<56x256xf32>
    tpu.vector_store %arg16[%c56_405, %c0_406], %807 {strides = array<i32>} : memref<280x256xf32, #tpu.memory_space<vmem>>, vector<56x256xf32>,
    %c240_i32_407 = arith.constant 240 : i32
    %809 = tpu.dynamic_rotate %697 by %c240_i32_407 dim 1 : vector<56x256xf32>, i32 -> vector<56x256xf32>
    %cst_408 = arith.constant 0.000000e+00 : f32
    %810 = vector.shape_cast %188 : vector<1x256xi1> to vector<1x256xi1>
    %811 = vector.broadcast %810 : vector<1x256xi1> to vector<56x256xi1>
    %812 = vector.broadcast %cst_408 : f32 to vector<56x256xf32>
    %813 = arith.select %811, %809, %812 : vector<56x256xi1>, vector<56x256xf32>
    %c112_409 = arith.constant 112 : index
    %c0_410 = arith.constant 0 : index
    %814 = vector.load %arg16[%c112_409, %c0_410] : memref<280x256xf32, #tpu.memory_space<vmem>>, vector<56x256xf32>
    tpu.vector_store %arg16[%c112_409, %c0_410], %813 {strides = array<i32>} : memref<280x256xf32, #tpu.memory_space<vmem>>, vector<56x256xf32>,
    %c239_i32_411 = arith.constant 239 : i32
    %815 = tpu.dynamic_rotate %697 by %c239_i32_411 dim 1 : vector<56x256xf32>, i32 -> vector<56x256xf32>
    %cst_412 = arith.constant 0.000000e+00 : f32
    %816 = vector.shape_cast %199 : vector<1x256xi1> to vector<1x256xi1>
    %817 = vector.broadcast %816 : vector<1x256xi1> to vector<56x256xi1>
    %818 = vector.broadcast %cst_412 : f32 to vector<56x256xf32>
    %819 = arith.select %817, %815, %818 : vector<56x256xi1>, vector<56x256xf32>
    %c168_413 = arith.constant 168 : index
    %c0_414 = arith.constant 0 : index
    %820 = vector.load %arg16[%c168_413, %c0_414] : memref<280x256xf32, #tpu.memory_space<vmem>>, vector<56x256xf32>
    tpu.vector_store %arg16[%c168_413, %c0_414], %819 {strides = array<i32>} : memref<280x256xf32, #tpu.memory_space<vmem>>, vector<56x256xf32>,
    %c238_i32_415 = arith.constant 238 : i32
    %821 = tpu.dynamic_rotate %697 by %c238_i32_415 dim 1 : vector<56x256xf32>, i32 -> vector<56x256xf32>
    %cst_416 = arith.constant 0.000000e+00 : f32
    %822 = vector.shape_cast %210 : vector<1x256xi1> to vector<1x256xi1>
    %823 = vector.broadcast %822 : vector<1x256xi1> to vector<56x256xi1>
    %824 = vector.broadcast %cst_416 : f32 to vector<56x256xf32>
    %825 = arith.select %823, %821, %824 : vector<56x256xi1>, vector<56x256xf32>
    %c224_417 = arith.constant 224 : index
    %c0_418 = arith.constant 0 : index
    %826 = vector.load %arg16[%c224_417, %c0_418] : memref<280x256xf32, #tpu.memory_space<vmem>>, vector<56x256xf32>
    tpu.vector_store %arg16[%c224_417, %c0_418], %825 {strides = array<i32>} : memref<280x256xf32, #tpu.memory_space<vmem>>, vector<56x256xf32>,
    %c3_419 = arith.constant 3 : index
    %c0_420 = arith.constant 0 : index
    %c0_421 = arith.constant 0 : index
    %827 = vector.load %arg11[%c3_419, %c0_420, %c0_421] : memref<5x12x280xf32, #tpu.memory_space<vmem>>, vector<1x12x280xf32>
    %828 = vector.shape_cast %827 : vector<1x12x280xf32> to vector<12x280xf32>
    %c0_422 = arith.constant 0 : index
    %c0_423 = arith.constant 0 : index
    %829 = vector.load %arg16[%c0_422, %c0_423] : memref<280x256xf32, #tpu.memory_space<vmem>>, vector<280x256xf32>
    %cst_424 = arith.constant dense<0.000000e+00> : vector<12x256xf32>
    %830 = tpu.matmul %828, %829, %cst_424 {dimension_numbers = #tpu.dot_dimension_numbers<[1], [0], [0], [1], [0, 0, 1, 1], [], []>} : vector<12x280xf32>, vector<280x256xf32>, vector<12x256xf32> -> vector<12x256xf32>
    %831 = arith.addf %796, %830 : vector<12x256xf32>
    %c226_i32_425 = arith.constant 226 : i32
    %832 = tpu.dynamic_rotate %697 by %c226_i32_425 dim 1 : vector<56x256xf32>, i32 -> vector<56x256xf32>
    %cst_426 = arith.constant 0.000000e+00 : f32
    %833 = vector.shape_cast %221 : vector<1x256xi1> to vector<1x256xi1>
    %834 = vector.broadcast %833 : vector<1x256xi1> to vector<56x256xi1>
    %835 = vector.broadcast %cst_426 : f32 to vector<56x256xf32>
    %836 = arith.select %834, %832, %835 : vector<56x256xi1>, vector<56x256xf32>
    %c0_427 = arith.constant 0 : index
    %c0_428 = arith.constant 0 : index
    %837 = vector.load %arg16[%c0_427, %c0_428] : memref<280x256xf32, #tpu.memory_space<vmem>>, vector<56x256xf32>
    tpu.vector_store %arg16[%c0_427, %c0_428], %836 {strides = array<i32>} : memref<280x256xf32, #tpu.memory_space<vmem>>, vector<56x256xf32>,
    %c225_i32_429 = arith.constant 225 : i32
    %838 = tpu.dynamic_rotate %697 by %c225_i32_429 dim 1 : vector<56x256xf32>, i32 -> vector<56x256xf32>
    %cst_430 = arith.constant 0.000000e+00 : f32
    %839 = vector.shape_cast %232 : vector<1x256xi1> to vector<1x256xi1>
    %840 = vector.broadcast %839 : vector<1x256xi1> to vector<56x256xi1>
    %841 = vector.broadcast %cst_430 : f32 to vector<56x256xf32>
    %842 = arith.select %840, %838, %841 : vector<56x256xi1>, vector<56x256xf32>
    %c56_431 = arith.constant 56 : index
    %c0_432 = arith.constant 0 : index
    %843 = vector.load %arg16[%c56_431, %c0_432] : memref<280x256xf32, #tpu.memory_space<vmem>>, vector<56x256xf32>
    tpu.vector_store %arg16[%c56_431, %c0_432], %842 {strides = array<i32>} : memref<280x256xf32, #tpu.memory_space<vmem>>, vector<56x256xf32>,
    %c224_i32_433 = arith.constant 224 : i32
    %844 = tpu.dynamic_rotate %697 by %c224_i32_433 dim 1 : vector<56x256xf32>, i32 -> vector<56x256xf32>
    %cst_434 = arith.constant 0.000000e+00 : f32
    %845 = vector.shape_cast %243 : vector<1x256xi1> to vector<1x256xi1>
    %846 = vector.broadcast %845 : vector<1x256xi1> to vector<56x256xi1>
    %847 = vector.broadcast %cst_434 : f32 to vector<56x256xf32>
    %848 = arith.select %846, %844, %847 : vector<56x256xi1>, vector<56x256xf32>
    %c112_435 = arith.constant 112 : index
    %c0_436 = arith.constant 0 : index
    %849 = vector.load %arg16[%c112_435, %c0_436] : memref<280x256xf32, #tpu.memory_space<vmem>>, vector<56x256xf32>
    tpu.vector_store %arg16[%c112_435, %c0_436], %848 {strides = array<i32>} : memref<280x256xf32, #tpu.memory_space<vmem>>, vector<56x256xf32>,
    %c223_i32_437 = arith.constant 223 : i32
    %850 = tpu.dynamic_rotate %697 by %c223_i32_437 dim 1 : vector<56x256xf32>, i32 -> vector<56x256xf32>
    %cst_438 = arith.constant 0.000000e+00 : f32
    %851 = vector.shape_cast %254 : vector<1x256xi1> to vector<1x256xi1>
    %852 = vector.broadcast %851 : vector<1x256xi1> to vector<56x256xi1>
    %853 = vector.broadcast %cst_438 : f32 to vector<56x256xf32>
    %854 = arith.select %852, %850, %853 : vector<56x256xi1>, vector<56x256xf32>
    %c168_439 = arith.constant 168 : index
    %c0_440 = arith.constant 0 : index
    %855 = vector.load %arg16[%c168_439, %c0_440] : memref<280x256xf32, #tpu.memory_space<vmem>>, vector<56x256xf32>
    tpu.vector_store %arg16[%c168_439, %c0_440], %854 {strides = array<i32>} : memref<280x256xf32, #tpu.memory_space<vmem>>, vector<56x256xf32>,
    %c222_i32_441 = arith.constant 222 : i32
    %856 = tpu.dynamic_rotate %697 by %c222_i32_441 dim 1 : vector<56x256xf32>, i32 -> vector<56x256xf32>
    %cst_442 = arith.constant 0.000000e+00 : f32
    %857 = vector.shape_cast %265 : vector<1x256xi1> to vector<1x256xi1>
    %858 = vector.broadcast %857 : vector<1x256xi1> to vector<56x256xi1>
    %859 = vector.broadcast %cst_442 : f32 to vector<56x256xf32>
    %860 = arith.select %858, %856, %859 : vector<56x256xi1>, vector<56x256xf32>
    %c224_443 = arith.constant 224 : index
    %c0_444 = arith.constant 0 : index
    %861 = vector.load %arg16[%c224_443, %c0_444] : memref<280x256xf32, #tpu.memory_space<vmem>>, vector<56x256xf32>
    tpu.vector_store %arg16[%c224_443, %c0_444], %860 {strides = array<i32>} : memref<280x256xf32, #tpu.memory_space<vmem>>, vector<56x256xf32>,
    %c4 = arith.constant 4 : index
    %c0_445 = arith.constant 0 : index
    %c0_446 = arith.constant 0 : index
    %862 = vector.load %arg11[%c4, %c0_445, %c0_446] : memref<5x12x280xf32, #tpu.memory_space<vmem>>, vector<1x12x280xf32>
    %863 = vector.shape_cast %862 : vector<1x12x280xf32> to vector<12x280xf32>
    %c0_447 = arith.constant 0 : index
    %c0_448 = arith.constant 0 : index
    %864 = vector.load %arg16[%c0_447, %c0_448] : memref<280x256xf32, #tpu.memory_space<vmem>>, vector<280x256xf32>
    %cst_449 = arith.constant dense<0.000000e+00> : vector<12x256xf32>
    %865 = tpu.matmul %863, %864, %cst_449 {dimension_numbers = #tpu.dot_dimension_numbers<[1], [0], [0], [1], [0, 0, 1, 1], [], []>} : vector<12x280xf32>, vector<280x256xf32>, vector<12x256xf32> -> vector<12x256xf32>
    %866 = arith.addf %831, %865 : vector<12x256xf32>
    %c0_450 = arith.constant 0 : index
    %c0_451 = arith.constant 0 : index
    %867 = vector.load %arg12[%c0_450, %c0_451] : memref<12x1xf32, #tpu.memory_space<vmem>>, vector<12x1xf32>
    %868 = vector.broadcast %867 : vector<12x1xf32> to vector<12x256xf32>
    %869 = arith.addf %866, %868 : vector<12x256xf32>
    %c0_452 = arith.constant 0 : index
    %c0_453 = arith.constant 0 : index
    %c0_454 = arith.constant 0 : index
    %870 = vector.load %arg13[%c0_452, %c0_453, %c0_454] : memref<1x12x256xf32, #tpu.memory_space<vmem>>, vector<1x12x256xf32>
    %871 = vector.shape_cast %870 : vector<1x12x256xf32> to vector<12x256xf32>
    %872 = vector.shape_cast %869 : vector<12x256xf32> to vector<1x12x256xf32>
    tpu.vector_store %arg13[%c0_452, %c0_453, %c0_454], %872 {strides = array<i32>} : memref<1x12x256xf32, #tpu.memory_space<vmem>>, vector<1x12x256xf32>,
    return
  }
  func.func @transform_0(%arg0: i32) -> (i32, i32, i32) {
    %c0_i32 = arith.constant 0 : i32
    %c0_i32_0 = arith.constant 0 : i32
    %c0_i32_1 = arith.constant 0 : i32
    return %arg0, %c0_i32, %c0_i32_0 : i32, i32, i32
  }
  func.func @transform_1(%arg0: i32) -> (i32, i32) {
    %c0_i32 = arith.constant 0 : i32
    %c0_i32_0 = arith.constant 0 : i32
    %c0_i32_1 = arith.constant 0 : i32
    return %c0_i32, %c0_i32_0 : i32, i32
  }
  func.func @transform_2(%arg0: i32) -> (i32, i32) {
    %c0_i32 = arith.constant 0 : i32
    %c0_i32_0 = arith.constant 0 : i32
    %c0_i32_1 = arith.constant 0 : i32
    return %c0_i32, %c0_i32_0 : i32, i32
  }
  func.func @transform_3(%arg0: i32) -> (i32, i32) {
    %c0_i32 = arith.constant 0 : i32
    %c0_i32_0 = arith.constant 0 : i32
    %c0_i32_1 = arith.constant 0 : i32
    return %c0_i32, %c0_i32_0 : i32, i32
  }
  func.func @transform_4(%arg0: i32) -> (i32, i32) {
    %c0_i32 = arith.constant 0 : i32
    %c0_i32_0 = arith.constant 0 : i32
    %c0_i32_1 = arith.constant 0 : i32
    return %c0_i32, %c0_i32_0 : i32, i32
  }
  func.func @transform_5(%arg0: i32) -> (i32, i32) {
    %c0_i32 = arith.constant 0 : i32
    %c0_i32_0 = arith.constant 0 : i32
    %c0_i32_1 = arith.constant 0 : i32
    return %c0_i32, %c0_i32_0 : i32, i32
  }
  func.func @transform_6(%arg0: i32) -> (i32, i32, i32) {
    %c0_i32 = arith.constant 0 : i32
    %c0_i32_0 = arith.constant 0 : i32
    %c0_i32_1 = arith.constant 0 : i32
    %c0_i32_2 = arith.constant 0 : i32
    return %c0_i32, %c0_i32_0, %c0_i32_1 : i32, i32, i32
  }
  func.func @transform_7(%arg0: i32) -> (i32, i32, i32) {
    %c0_i32 = arith.constant 0 : i32
    %c0_i32_0 = arith.constant 0 : i32
    %c0_i32_1 = arith.constant 0 : i32
    %c0_i32_2 = arith.constant 0 : i32
    return %c0_i32, %c0_i32_0, %c0_i32_1 : i32, i32, i32
  }
  func.func @transform_8(%arg0: i32) -> (i32, i32) {
    %c0_i32 = arith.constant 0 : i32
    %c0_i32_0 = arith.constant 0 : i32
    %c0_i32_1 = arith.constant 0 : i32
    return %c0_i32, %c0_i32_0 : i32, i32
  }
  func.func @transform_9(%arg0: i32) -> (i32, i32) {
    %c0_i32 = arith.constant 0 : i32
    %c0_i32_0 = arith.constant 0 : i32
    %c0_i32_1 = arith.constant 0 : i32
    return %c0_i32, %c0_i32_0 : i32, i32
  }
  func.func @transform_10(%arg0: i32) -> (i32, i32, i32) {
    %c0_i32 = arith.constant 0 : i32
    %c0_i32_0 = arith.constant 0 : i32
    %c0_i32_1 = arith.constant 0 : i32
    %c0_i32_2 = arith.constant 0 : i32
    return %c0_i32, %c0_i32_0, %c0_i32_1 : i32, i32, i32
  }
  func.func @transform_11(%arg0: i32) -> (i32, i32) {
    %c0_i32 = arith.constant 0 : i32
    %c0_i32_0 = arith.constant 0 : i32
    %c0_i32_1 = arith.constant 0 : i32
    return %c0_i32, %c0_i32_0 : i32, i32
  }
  func.func @transform_12(%arg0: i32) -> (i32, i32, i32) {
    %c0_i32 = arith.constant 0 : i32
    %c0_i32_0 = arith.constant 0 : i32
    %c0_i32_1 = arith.constant 0 : i32
    return %arg0, %c0_i32, %c0_i32_0 : i32, i32, i32
  }
}

</mosaic_0001>

<bundles_post_ra>
// kernel: fsrcnn_forward.1
= control target key start
LH: loop header
LB: loop body
LE: loop exit
PB: predicated region body
PF: predicated region fallthrough
CT: control target
= control target key end

     0   :  { %s11750_s0 = inlined_call_operand.vmem [shape: f32[2,3,256], index: 0, kind: input, shape index: {}]   ;;  %s11751_s1 = inlined_call_operand.vmem [shape: s32[2,256], index: 1, kind: input, shape index: {}]   ;;  %s11752_s2 = inlined_call_operand.hbm [shape: f32[56,75], index: 2, kind: input, shape index: {}]   ;;  %s11753_s3 = inlined_call_operand.vmem [shape: f32[56,1], index: 3, kind: input, shape index: {}]   ;;  %s11754_s4 = inlined_call_operand.hbm [shape: f32[12,56], index: 4, kind: input, shape index: {}]   ;;  %s11755_s5 = inlined_call_operand.vmem [shape: f32[12,1], index: 5, kind: input, shape index: {}]   ;;  %s11756_s6 = inlined_call_operand.hbm [shape: f32[3,12,108], index: 6, kind: input, shape index: {}]   ;;  %s11757_s7 = inlined_call_operand.vmem [shape: f32[3,12,1], index: 7, kind: input, shape index: {}]   ;;  %s11758_s8 = inlined_call_operand.vmem [shape: f32[56,12], index: 8, kind: input, shape index: {}]   ;;  %s11759_s9 = inlined_call_operand.vmem [shape: f32[56,1], index: 9, kind: input, shape index: {}]   ;;  %s11760_s10 = inlined_call_operand.hbm [shape: f32[5,12,280], index: 10, kind: input, shape index: {}]   ;;  %s11761_s11 = inlined_call_operand.vmem [shape: f32[12,1], index: 11, kind: input, shape index: {}]   ;;  %s11762_s12 = inlined_call_operand.vmem [shape: f32[2,12,256], index: 12, kind: output, shape index: {}]  }
   0x1   :  { %12219 = sst [smem:[#allocation231_spill]] %s11750_s0 }
   0x2   :  { %12220 = sst [smem:[#allocation232_spill]] %s11751_s1 }
   0x3   :  { %12221 = sst [smem:[#allocation233_spill]] %s11752_s2 }
   0x4   :  { %12222 = sst [smem:[#allocation234_spill]] %s11753_s3 }
   0x5   :  { %17 = vsyncpa [#allocation6], 0 }
   0x6   :  { %18 = vsyncpa [#allocation8], 0 }
   0x7   :  { %19 = vsyncpa [#allocation11], 0  ;;  %s6546_s21 = smov 0  }
   0x8 LB: > { %s6552_s22 = sadd.s32 4294967295, %s6445_s21   ;;  %p5814_p0 = scmp.ge.s32.totalorder %s6445_s21, 1  ;;  %s6445_s21 = sphi %s6546_s21, %s25_s21  }
   0x9   : > { %p313_p1 = scmp.lt.s32.totalorder %s6445_s21, 3  ;;  %p6245_p2 = scmp.eq.s32.totalorder %s6552_s22, 0 }
   0xa   : > { %s6447_s24 = smov [#allocation7]   ;;  %s6448_s26 = smov [#allocation5]  }
   0xb   : > { %p6557_p3 = pnand %p5814_p0, %p313_p1  ;;  %s344_s25 = sshll.u32 %s6447_s24, 4  ;;  %s345_s25 = int_to_ptr.vmem [resolvable:$true] %s344_s25 }
   0xc   : > { %s328_s27 = sshll.u32 %s6448_s26, 4  ;;  %s6449_s29 = smov [#allocation9]   ;;  %s6563_s27 = int_to_ptr.vmem [resolvable:$true] %s328_s27 }
   0xd   : > { %p6232_p4 = pneg %p6557_p3  ;;  %s360_s30 = sshll.u32 %s6449_s29, 4  ;;  %s6571_s30 = int_to_ptr.vmem [resolvable:$true] %s360_s30 }
   0xe   : > { %s6450_s13 = smov [#allocation10]   ;;  %s6334_s15 = scalar_lea.vmem %s345_s25, 256 }
   0xf   : > { %p6567_p5 = pnand %p6245_p2, %p6232_p4  ;;  %s6573_s14 = sshll.u32 %s6450_s13, 4  ;;  %s383_s14 = int_to_ptr.vmem [resolvable:$true] %s6573_s14 }
  0x10   : > { %p6335_p7 = scmp.ne.s32.totalorder %s345_s25, %s6334_s15  ;;  %p6342_p10 = scmp.lt.s32.totalorder %s345_s25, %s345_s25 }
  0x11   : > { %p6325_p6 = pneg %p6567_p5  ;;  %p6343_p11 = scmp.lt.s32.totalorder %s6334_s15, %s6334_s15 }
  0x13   : > { %p6337_p8 = pnand %p6335_p7, %p6325_p6  ;;  %p6344_p12 = por %p6343_p11, %p6342_p10 }
  0x15   : > { %p6338_p9 = pneg %p6337_p8 }
  0x17   : > { %p6345_p13 = pnand %p6344_p12, %p6338_p9 }
  0x19   : > { %6348 = shalt.err (!%p6345_p13)
}
  0x1a   : > { %s6451_s16 = smov 128   ;;  %s6452_s17 = smov 8  }
  0x1b   : > { %6238 = dma.hbm_to_vmem [thread:$0]  (!%p6567_p5), %s11754_s4, 256, %s345_s25, [#allocation8], %s6451_s16, %s6451_s16, %s6452_s17  }
  0x1c   : > { %s6360_s20 = scalar_lea.vmem %s6563_s27, 896  ;;  %p6368_p7 = scmp.lt.s32.totalorder %s6563_s27, %s6563_s27 }
  0x1d   : > { %p6361_p0 = scmp.ne.s32.totalorder %s6563_s27, %s6360_s20  ;;  %p6369_p8 = scmp.lt.s32.totalorder %s6360_s20, %s6360_s20 }
  0x1f   : > { %p6363_p1 = pnand %p6361_p0, %p6325_p6  ;;  %p6370_p9 = por %p6369_p8, %p6368_p7 }
  0x21   : > { %p6364_p4 = pneg %p6363_p1 }
  0x23   : > { %p6371_p10 = pnand %p6370_p9, %p6364_p4 }
  0x25   : > { %6374 = shalt.err (!%p6371_p10)
}
  0x26   : > { %s12225_s2 = sld [smem:[#allocation233_spill]]  ;;  %s6386_s25 = scalar_lea.vmem %s6571_s30, 768 }
  0x27   : > { %p6387_p11 = scmp.ne.s32.totalorder %s6571_s30, %s6386_s25  ;;  %p6394_p0 = scmp.lt.s32.totalorder %s6571_s30, %s6571_s30 }
  0x28   : > { %p6395_p1 = scmp.lt.s32.totalorder %s6386_s25, %s6386_s25 }
  0x29   : > { %p6389_p12 = pnand %p6387_p11, %p6325_p6 }
  0x2a   : > { %p6396_p4 = por %p6395_p1, %p6394_p0 }
  0x2b   : > { %p6390_p13 = pneg %p6389_p12 }
  0x2c   : > { %6235 = dma.hbm_to_vmem [thread:$0]  (!%p6567_p5), %s12225_s2, 896, %s6563_s27, [#allocation6], %s6451_s16, %s6451_s16, %s6452_s17  }
  0x2d   : > { %p6397_p7 = pnand %p6396_p4, %p6390_p13 }
  0x2f   : > { %6400 = shalt.err (!%p6397_p7)
}
  0x30   : > { %6241 = dma.hbm_to_vmem [thread:$0]  (!%p6567_p5), %s11756_s6, 768, %s6571_s30, [#allocation8], %s6451_s16, %s6451_s16, %s6452_s17  }
  0x31   : > { %s6412_s27 = scalar_lea.vmem %s383_s14, 3840  ;;  %p6420_p11 = scmp.lt.s32.totalorder %s383_s14, %s383_s14 }
  0x32   : > { %p6413_p8 = scmp.ne.s32.totalorder %s383_s14, %s6412_s27  ;;  %p6421_p12 = scmp.lt.s32.totalorder %s6412_s27, %s6412_s27 }
  0x34   : > { %p6415_p9 = pnand %p6413_p8, %p6325_p6  ;;  %p6422_p13 = por %p6421_p12, %p6420_p11 }
  0x36   : > { %p6416_p10 = pneg %p6415_p9 }
  0x38   : > { %p6423_p0 = pnand %p6422_p13, %p6416_p10 }
  0x3a   : > { %6426 = shalt.err (!%p6423_p0)
}
  0x3b   : > { %s6453_s15 = smov 384   ;;  %s6454_s18 = smov 24  }
  0x3c   : > { %6244 = dma.hbm_to_vmem [thread:$0]  (!%p6567_p5), %s11760_s10, 3840, %s383_s14, [#allocation11], %s6453_s15, %s6453_s15, %s6454_s18  }
  0x3d   : > { %409 = sbr.rel (%p6557_p3) target bundleno = 3126 (0xc36), region = 68 }
  0x42   : > { %6432 = dma.done.wait (%p6245_p2), [#allocation6], 896  }
  0x43   : > { %6434 = vsyncadd (%p6245_p2), [#allocation6], 4294966400 }
  0x44   : > { %6436 = dma.done.wait (%p6245_p2), [#allocation8], 1024  }
  0x45   : > { %6438 = vsyncadd (%p6245_p2), [#allocation8], 4294966272 }
  0x46   : > { %6440 = dma.done.wait (%p6245_p2), [#allocation11], 3840  }
  0x47   : > { %6442 = vsyncadd (%p6245_p2), [#allocation11], 4294963456  ;;  %p463_p3 = scmp.lt.s32.totalorder %s6552_s22, 1  ;;  %v6455_v0 = vmov 0   ;;  %s12226_s0 = sld [smem:[#allocation231_spill]]  ;;  %v12230_v7 = vmov 0  ;;  %v557_v17 = vlaneseq }
  0x48   : > { %6296 = vset.pattern.permute.xlu1 %v6455_v0  ;;  %6295 = vset.pattern.permute.xlu0 %v6455_v0  ;;  %s11779_s16 = smov 96   ;;  %s11777_s17 = smov 97   ;;  %v12232_v8 = vmov 0  ;;  %v12236_v10 = vmov 0  ;;  %v12238_v11 = vmov 0  ;;  %v12240_v12 = vmov 0 }
  0x49   : > { %s13407_s22 = smov (!%p463_p3, %s6552_s22), 1  ;;  %s11763_s24 = smov 95   ;;  %v12242_v13 = vmov 0  ;;  %v12244_v14 = vmov 0  ;;  %v11867_v15 = vmov 0.0   ;;  %v564_v18 = vshrl.u32 %v557_v17, 7 }
  0x4a   : > { %s5878_s23 = sshll.u32 %s13407_s22, 3  ;;  %s11765_s26 = smov 94   ;;  %1381 = vmatprep.mubr.f32.mxu1 %v11867_v15  ;;  %2237 = vmatprep.mubr.f32.mxu0 %v11867_v15  ;;  %v6893_v24 = vand.u32 127, %v557_v17  ;;  %v12260_v36 = vmov 0  ;;  %v12263_v37 = vmov 0  ;;  %v12266_v43 = vmov 0 }
  0x4b   : > { %s11949_s25 = smov 111   ;;  %s11773_s29 = smov 110   ;;  %v6877_v19 = vsub.s32 0, %v564_v18  ;;  %v6879_v20 = vsub.s32 1, %v564_v18  ;;  %v12269_v49 = vmov 0  ;;  %v12275_v56 = vmov 0 }
  0x4c   : > { %s11768_s13 = smov 98   ;;  %s11953_s27 = smov 112   ;;  %v12278_v57 = vmov 0  ;;  %v12284_v62 = vmov 0  ;;  %v12287_v63 = vmov 0 }
  0x4d   : > { %s467_s14 = scalar_lea.vmem %s12226_s0, %s5878_s23  ;;  %s11955_s15 = smov 127  }
  0x4e   : > { %v6644_v1 = vld [vmem:[%s467_s14] sm:$0x77]  ;;  %s11781_s18 = smov 126   ;;  %s11775_s19 = smov 114  }
  0x4f   : > { %1141 = vrot.lane.b32.xlu1 %v6644_v1, %s11779_s16  ;;  %888 = vst [vmem:[#allocation2 + $0x88] sm:$0x70] %v6644_v1  ;;  %1111 = vrot.lane.b32.xlu0 %v6644_v1, %s11777_s17  ;;  %v6653_v2 = vcombine.high %v6644_v1, %v6644_v1  ;;  %s12227_s1 = sld [smem:[#allocation232_spill]]  ;;  %v885_v5 = vcombine.low %v6644_v1, %v6644_v1  ;;  %s11951_s14 = smov 113  }
  0x50   : > { %s11789_s20 = smov 2   ;;  %s11971_s23 = smov 1  }
  0x51   : > { %887 = vst [vmem:[#allocation2 + $0x8] sm:$0x70] %v885_v5  ;;  %s12072_s28 = smov 14   ;;  %s11791_s30 = smov 18  }
  0x52   : > { %s12256_s3 = sld [smem:[#allocation234_spill]]  ;;  %s12624_s0 = smov 32  }
  0x53   : > { %1169 = vrot.lane.b32.xlu0 %v6644_v1, %s11763_s24  ;;  %1143 = vrot.lane.b32.xlu1 %v6653_v2, %s11779_s16  ;;  %s11973_s16 = smov 33   ;;  %s12628_s2 = smov 1  }
  0x55   : > { %v6698_v3 = vld [vmem:[%s12227_s1] ss:$2 sm:$0x3]  ;;  %v6703_v4 = vld [vmem:[%s12227_s1 + $0x1] ss:$2 sm:$0x3] }
  0x56   : > { %vm499_vm0 = vcmp.ge.s32.totalorder %v6698_v3, 1  ;;  %vm500_vm1 = vcmp.lt.s32.totalorder %v6698_v3, 17  ;;  %vm11786_vm2 = vcmp.ge.s32.totalorder %v6703_v4, 0  ;;  %vm11788_vm4 = vcmp.lt.s32.totalorder %v6703_v4, 16  ;;  %s12627_s1 = smov 33  }
  0x57   : > { %1171 = vrot.lane.b32.xlu1 %v6653_v2, %s11763_s24  ;;  %1113 = vrot.lane.b32.xlu0 %v6653_v2, %s11777_s17  ;;  %vm6714_vm3 = vmand %vm499_vm0, %vm500_vm1  ;;  %vm11787_vm6 = vcmp.ge.s32.totalorder %v6703_v4, 4294967295  ;;  %vm11771_vm8 = vcmp.lt.s32.totalorder %v6703_v4, 15  ;;  %vm476_vm11 = vcmp.ge.s32.totalorder %v6698_v3, 2  ;;  %vm477_vm12 = vcmp.lt.s32.totalorder %v6698_v3, 18  ;;  %s11967_s24 = smov 17   ;;  %s11793_s17 = smov 30  }
  0x58   : > { %vm506_vm5 = vmand %vm6714_vm3, %vm11786_vm2  ;;  %v1251_v33 = vld [vmem:[%s12256_s3 + $0x28] sm:$0xff]  ;;  %v1252_v35 = vld [vmem:[%s12256_s3 + $0x30] sm:$0xff] }
  0x59   : > { %vm6726_vm7 = vmand %vm506_vm5, %vm11788_vm4  ;;  %vm11767_vm5 = vcmp.ge.s32.totalorder %v6703_v4, 4294967294  ;;  %v1250_v40 = vld [vmem:[%s12256_s3 + $0x20] sm:$0xff]  ;;  %v1249_v46 = vld [vmem:[%s12256_s3 + $0x18] sm:$0xff] }
  0x5a   : > { %v12231_v7 = vsel %vm6726_vm7, 4294967295, %v12230_v7  ;;  %vm508_vm9 = vmand %vm6714_vm3, %vm11787_vm6  ;;  %v1248_v59 = vld [vmem:[%s12256_s3 + $0x10] sm:$0xff]  ;;  %v1247_v5 = vld [vmem:[%s12256_s3 + $0x8] sm:$0xff] }
  0x5b   : > { %1199 = vrot.lane.b32.xlu1 %v6653_v2, %s11765_s26  ;;  %1197 = vrot.lane.b32.xlu0 %v6644_v1, %s11765_s26  ;;  %vm6741_vm10 = vmand %vm508_vm9, %vm11771_vm8  ;;  %vm11770_vm9 = vcmp.lt.s32.totalorder %v6703_v4, 14  ;;  %s11959_s26 = smov 16  }
  0x5c   : > { %v12233_v8 = vsel %vm6741_vm10, 4294967295, %v12232_v8  ;;  %vm6755_vm13 = vmand %vm476_vm11, %vm477_vm12  ;;  %vm12294_vm10 = vcmp.lt.s32.totalorder %v6703_v4, 14 }
  0x5d   : > { %vm488_vm14 = vmand %vm6755_vm13, %vm11786_vm2 }
  0x5e   : > { %vm6765_vm15 = vmand %vm488_vm14, %vm11788_vm4  ;;  %vm11772_vm14 = vcmp.ge.s32.totalorder %v6703_v4, 1 }
  0x5f   : > { %1027 = vrot.lane.b32.xlu1 %v6653_v2, %s11949_s25  ;;  %1025 = vrot.lane.b32.xlu0 %v6644_v1, %s11949_s25  ;;  %v12237_v10 = vsel %vm6765_vm15, 4294967295, %v12236_v10  ;;  %vm492_vm0 = vmand %vm6755_vm13, %vm11787_vm6 }
  0x60   : > { %vm6779_vm1 = vmand %vm492_vm0, %vm11771_vm8  ;;  %vm11785_vm0 = vcmp.lt.s32.totalorder %v6703_v4, 17  ;;  %vm11783_vm8 = vcmp.lt.s32.totalorder %v6703_v4, 18 }
  0x61   : > { %v12239_v11 = vsel %vm6779_vm1, 4294967295, %v12238_v11  ;;  %vm496_vm11 = vmand %vm6755_vm13, %vm11767_vm5  ;;  %vm12249_vm1 = vcmp.ge.s32.totalorder %v6703_v4, 1 }
  0x62   : > { %vm6795_vm12 = vmand %vm496_vm11, %vm11770_vm9  ;;  %vm11784_vm9 = vcmp.ge.s32.totalorder %v6703_v4, 2 }
  0x63   : > { %1057 = vrot.lane.b32.xlu1 %v6653_v2, %s11773_s29  ;;  %1055 = vrot.lane.b32.xlu0 %v6644_v1, %s11773_s29  ;;  %v12241_v12 = vsel %vm6795_vm12, 4294967295, %v12240_v12  ;;  %vm484_vm5 = vmand %vm6755_vm13, %vm11772_vm14  ;;  %s11969_s29 = smov 32   ;;  %vm524_vm12 = vcmp.lt.s32.totalorder %v6698_v3, 15 }
  0x64   : > { %vm6811_vm11 = vmand %vm484_vm5, %vm11785_vm0 }
  0x65   : > { %v12243_v13 = vsel %vm6811_vm11, 4294967295, %v12242_v13  ;;  %vm480_vm14 = vmand %vm6755_vm13, %vm11784_vm9  ;;  %vm536_vm13 = vcmp.ge.s32.totalorder %v6698_v3, 4294967294  ;;  %vm523_vm11 = vcmp.ge.s32.totalorder %v6698_v3, 4294967295 }
  0x66   : > { %vm6827_vm5 = vmand %vm480_vm14, %vm11783_vm8  ;;  %vm537_vm14 = vcmp.lt.s32.totalorder %v6698_v3, 14 }
  0x67   : > { %1085 = vrot.lane.b32.xlu1 %v6653_v2, %s11768_s13  ;;  %1083 = vrot.lane.b32.xlu0 %v6644_v1, %s11768_s13  ;;  %s11957_s13 = smov 15   ;;  %v12245_v14 = vsel %vm6827_vm5, 4294967295, %v12244_v14  ;;  %vm6855_vm8 = vmand %vm536_vm13, %vm537_vm14  ;;  %vm12248_vm13 = vcmp.lt.s32.totalorder %v6703_v4, 15 }
  0x68   : > { %vm543_vm9 = vmand %vm6855_vm8, %vm11786_vm2 }
  0x69   : > { %vm545_vm0 = vmand %vm6855_vm8, %vm11787_vm6  ;;  %vm12250_vm6 = vcmp.ge.s32.totalorder %v6703_v4, 4294967294 }
  0x6a   : > { %vm544_vm5 = vmand %vm543_vm9, %vm11788_vm4  ;;  %vm12254_vm4 = vcmp.lt.s32.totalorder %v6703_v4, 14 }
  0x6b   : > { %999 = vrot.lane.b32.xlu1 %v6653_v2, %s11953_s27  ;;  %997 = vrot.lane.b32.xlu0 %v6644_v1, %s11953_s27  ;;  %vm546_vm14 = vmand %vm545_vm0, %vm12248_vm13  ;;  %v1148_v21 = vsel %vm544_vm5, 1, %v6455_v0  ;;  %vm12253_vm13 = vcmp.lt.s32.totalorder %v6703_v4, 17  ;;  %vm12257_vm5 = vcmp.lt.s32.totalorder %v6703_v4, 15 }
  0x6c   : > { %vm541_vm2 = vmand %vm6855_vm8, %vm12249_vm1  ;;  %v1176_v23 = vsel %vm546_vm14, 1, %v6455_v0  ;;  %v1152_v25 = vrot.slane %v1148_v21, %v6877_v19  ;;  %v1156_v26 = vrot.slane %v1148_v21, %v6879_v20 }
  0x6d   : > { %vm547_vm9 = vmand %vm6855_vm8, %vm12250_vm6  ;;  %vm12255_vm6 = vcmp.ge.s32.totalorder %v6703_v4, 4294967295  ;;  %v1180_v29 = vrot.slane %v1176_v23, %v6877_v19  ;;  %v1184_v31 = vrot.slane %v1176_v23, %v6879_v20 }
  0x6e   : > { %vm6886_vm0 = vmand %vm523_vm11, %vm524_vm12 }
  0x6f   : > { %891 = vrot.lane.b32.xlu1 %v6653_v2, %s11955_s15  ;;  %889 = vrot.lane.b32.xlu0 %v6644_v1, %s11955_s15  ;;  %vm542_vm1 = vmand %vm541_vm2, %vm12253_vm13  ;;  %vm11797_vm2 = vcmp.lt.s32.totalorder %v6893_v24, 96  ;;  %vm6935_vm13 = vcmp.eq.s32.totalorder %v1180_v29, 1 }
  0x70   : > { %vm548_vm15 = vmand %vm547_vm9, %vm12254_vm4  ;;  %v1118_v30 = vsel %vm542_vm1, 1, %v6455_v0  ;;  %vm6926_vm9 = vcmp.eq.s32.totalorder %v1156_v26, 1  ;;  %v12267_v43 = vsel %vm6935_vm13, 4294967295, %v12266_v43 }
  0x71   : > { %vm532_vm12 = vmand %vm6886_vm0, %vm12255_vm6  ;;  %v1204_v32 = vsel %vm548_vm15, 1, %v6455_v0  ;;  %vm6922_vm15 = vcmp.eq.s32.totalorder %v1152_v25, 1  ;;  %v12264_v37 = vsel %vm6926_vm9, 4294967295, %v12263_v37  ;;  %v1122_v38 = vrot.slane %v1118_v30, %v6877_v19  ;;  %12268 = vst [vmem:[#allocation17_spill] sm:$0xff] %v12267_v43 }
  0x72   : > { %vm6915_vm14 = vmand %vm532_vm12, %vm12257_vm5  ;;  %v12261_v36 = vsel %vm6922_vm15, 4294967295, %v12260_v36  ;;  %12265 = vst [vmem:[#allocation16_spill] sm:$0xff] %v12264_v37  ;;  %v1126_v39 = vrot.slane %v1118_v30, %v6879_v20  ;;  %v1208_v44 = vrot.slane %v1204_v32, %v6877_v19  ;;  %v1212_v45 = vrot.slane %v1204_v32, %v6879_v20  ;;  %v1246_v32 = vld [vmem:[%s12256_s3] sm:$0xff]  ;;  %s12732_s3 = smov 14  }
  0x73   : > { %921 = vrot.lane.b32.xlu1 %v6653_v2, %s11781_s18  ;;  %919 = vrot.lane.b32.xlu0 %v6644_v1, %s11781_s18  ;;  %s6480_s18 = smov 34   ;;  %12262 = vst [vmem:[#allocation15_spill] sm:$0xff] %v12261_v36  ;;  %vm6949_vm6 = vcmp.eq.s32.totalorder %v1184_v31, 1  ;;  %v1032_v50 = vsel %vm6915_vm14, 1, %v6455_v0  ;;  %vm12272_vm12 = vcmp.ge.s32.totalorder %v6703_v4, 4294967294  ;;  %vm6970_vm14 = vcmp.eq.s32.totalorder %v1122_v38, 1 }
  0x74   : > { %v12270_v49 = vsel %vm6949_vm6, 4294967295, %v12269_v49  ;;  %vm6964_vm5 = vmand %vm6886_vm0, %vm12272_vm12  ;;  %v12276_v56 = vsel %vm6970_vm14, 4294967295, %v12275_v56  ;;  %vm6974_vm11 = vcmp.eq.s32.totalorder %v1126_v39, 1  ;;  %vm12281_vm12 = vcmp.ge.s32.totalorder %v6703_v4, 2  ;;  %v1441_v39 = vld [vmem:[%s11755_s5 + $0x8] sm:$0xf] }
  0x75   : > { %12271 = vst [vmem:[#allocation18_spill] sm:$0xff] %v12270_v49  ;;  %12277 = vst [vmem:[#allocation19_spill] sm:$0xff] %v12276_v56  ;;  %v12279_v57 = vsel %vm6974_vm11, 4294967295, %v12278_v57  ;;  %vm6993_vm1 = vcmp.eq.s32.totalorder %v1212_v45, 1 }
  0x76   : > { %12280 = vst [vmem:[#allocation20_spill] sm:$0xff] %v12279_v57  ;;  %vm6982_vm4 = vmand %vm6855_vm8, %vm12281_vm12  ;;  %v12288_v63 = vsel %vm6993_vm1, 4294967295, %v12287_v63  ;;  %vm12290_vm8 = vcmp.lt.s32.totalorder %v6893_v24, 95 }
  0x77   : > { %949 = vrot.lane.b32.xlu1 %v6653_v2, %s11775_s19  ;;  %947 = vrot.lane.b32.xlu0 %v6644_v1, %s11775_s19  ;;  %s11795_s19 = smov 31   ;;  %12289 = vst [vmem:[#allocation22_spill] sm:$0xff] %v12288_v63  ;;  %vm12291_vm12 = vmmov %vm12290_vm8 }
  0x78   : > { %vm535_vm7 = vmand %vm6964_vm5, %vm12294_vm10  ;;  %vm12298_vm10 = vcmp.ge.s32.totalorder %v6703_v4, 0  ;;  %vm12301_vm5 = vcmp.lt.s32.totalorder %v6893_v24, 94 }
  0x7b   : > { %977 = vrot.lane.b32.xlu1 %v6653_v2, %s11951_s14  ;;  %975 = vrot.lane.b32.xlu0 %v6644_v1, %s11951_s14 }
  0x7f   : > { %829 = vrot.lane.b32.xlu1 %v6653_v2, %s11789_s20  ;;  %827 = vrot.lane.b32.xlu0 %v6644_v1, %s11789_s20  ;;  %s12612_s20 = smov 31  }
  0x83   : > { %859 = vrot.lane.b32.xlu1 %v6653_v2, %s11971_s23  ;;  %857 = vrot.lane.b32.xlu0 %v6644_v1, %s11971_s23 }
  0x87   : > { %801 = vrot.lane.b32.xlu1 %v6653_v2, %s12072_s28  ;;  %799 = vrot.lane.b32.xlu0 %v6644_v1, %s12072_s28 }
  0x8b   : > { %693 = vrot.lane.b32.xlu1 %v6653_v2, %s11791_s30  ;;  %691 = vrot.lane.b32.xlu0 %v6644_v1, %s11791_s30  ;;  %s12613_s30 = smov 30  }
  0x8f   : > { %723 = vrot.lane.b32.xlu1 %v6653_v2, %s11967_s24  ;;  %721 = vrot.lane.b32.xlu0 %v6644_v1, %s11967_s24 }
  0x93   : > { %751 = vrot.lane.b32.xlu1 %v6653_v2, %s11959_s26  ;;  %749 = vrot.lane.b32.xlu0 %v6644_v1, %s11959_s26 }
  0x97   : > { %779 = vrot.lane.b32.xlu1 %v6653_v2, %s11957_s13  ;;  %777 = vrot.lane.b32.xlu0 %v6644_v1, %s11957_s13 }
  0x9b   : > { %607 = vrot.lane.b32.xlu1 %v6653_v2, %s11969_s29  ;;  %605 = vrot.lane.b32.xlu0 %v6644_v1, %s11969_s29 }
  0x9f   : > { %637 = vrot.lane.b32.xlu1 %v6653_v2, %s11795_s19  ;;  %635 = vrot.lane.b32.xlu0 %v6644_v1, %s11795_s19  ;;  %s12621_s19 = smov 96  }
  0xa3   : > { %665 = vrot.lane.b32.xlu1 %v6653_v2, %s11793_s17  ;;  %663 = vrot.lane.b32.xlu0 %v6644_v1, %s11793_s17  ;;  %s12620_s17 = smov 112  }
  0xa7   : > { %579 = vrot.lane.b32.xlu1 %v6653_v2, %s11973_s16  ;;  %577 = vrot.lane.b32.xlu0 %v6644_v1, %s11973_s16 }
  0xab   : > { %555 = vrot.lane.b32.xlu1 %v6653_v2, %s6480_s18  ;;  %553 = vrot.lane.b32.xlu0 %v6644_v1, %s6480_s18  ;;  %v1036_v1 = vrot.slane %v1032_v50, %v6877_v19  ;;  %v1040_v2 = vrot.slane %v1032_v50, %v6879_v20 }
  0xaf   : > { %1280 = vperm.xlu1 %6296, %v1251_v33   ;;  %1285 = vperm.xlu0 %6295, %v1252_v35   ;;  %v1062_v35 = vsel %vm535_vm7, 1, %v6455_v0  ;;  %vm12302_vm7 = vmmov %vm12301_vm5 }
  0xb0   : > { %v1070_v50 = vrot.slane %v1062_v35, %v6879_v20 }
  0xb3   : > { %1275 = vperm.xlu1 %6296, %v1250_v40   ;;  %1270 = vperm.xlu0 %6295, %v1249_v46  }
  0xb7   : > { %1265 = vperm.xlu1 %6296, %v1248_v59   ;;  %1260 = vperm.xlu0 %6295, %v1247_v5  }
  0xbb   : > { %1255 = vperm.xlu1 %6296, %v1246_v32   ;;  %1449 = vperm.xlu0 %6295, %v1441_v39  }
  0xc1   : > { %v1142_v27 = vpop.permute.xlu1 %1141  ;;  %v1112_v28 = vpop.permute.xlu0 %1111 }
  0xc5   : > { %v1170_v41 = vpop.permute.xlu0 %1169  ;;  %v1144_v42 = vpop.permute.xlu1 %1143 }
  0xc6   : > { %v1146_v47 = vsel %vm11797_vm2, %v1142_v27, %v1144_v42  ;;  %v1147_v48 = vsel %vm11797_vm2, %v1144_v42, %v1142_v27  ;;  %vm6989_vm2 = vcmp.eq.s32.totalorder %v1208_v44, 1 }
  0xc7   : > { %v1159_v51 = vsel %vm6922_vm15, %v1146_v47, 0.0  ;;  %v1160_v52 = vsel %vm6926_vm9, %v1147_v48, 0.0  ;;  %v12285_v62 = vsel %vm6989_vm2, 4294967295, %v12284_v62  ;;  %vm12292_vm15 = vcmp.lt.s32.totalorder %v6893_v24, 97 }
  0xc8   : > { %v1163_v54 = vrot.slane %v1159_v51, 6  ;;  %v1164_v55 = vrot.slane %v1160_v52, 6  ;;  %12286 = vst [vmem:[#allocation21_spill] sm:$0xff] %v12285_v62  ;;  %vm12293_vm9 = vmmov %vm12292_vm15  ;;  %v12307_v47 = vmov 0  ;;  %v1066_v48 = vrot.slane %v1062_v35, %v6877_v19  ;;  %v1440_v51 = vld [vmem:[%s11755_s5] sm:$0xff] }
  0xc9   : > { %v1172_v60 = vpop.permute.xlu1 %1171  ;;  %v1114_v61 = vpop.permute.xlu0 %1113  ;;  %1444 = vperm.xlu1 %6296, %v1440_v51   ;;  %v12342_v51 = vmov 0 }
  0xca   : > { %1167 = vst [vmem:[#allocation2 + $0x20] sm:$0x1c] %v1163_v54  ;;  %1168 = vst [vmem:[#allocation2 + $0x48] sm:$0x1c] %v1164_v55  ;;  %v1174_v9 = vsel %vm12290_vm8, %v1170_v41, %v1172_v60  ;;  %v1175_v16 = vsel %vm12291_vm12, %v1172_v60, %v1170_v41  ;;  %v1116_v17 = vsel %vm12292_vm15, %v1112_v28, %v1114_v61  ;;  %vm12295_vm15 = vcmp.lt.s32.totalorder %v6703_v4, 18 }
  0xcb   : > { %v1117_v18 = vsel %vm12293_vm9, %v1114_v61, %v1112_v28  ;;  %v1187_v21 = vsel %vm6935_vm13, %v1174_v9, 0.0  ;;  %v1188_v23 = vsel %vm6949_vm6, %v1175_v16, 0.0  ;;  %v1129_v25 = vsel %vm6970_vm14, %v1116_v17, 0.0  ;;  %vm7026_vm9 = vmand %vm6982_vm4, %vm12295_vm15 }
  0xcc   : > { %v1130_v26 = vsel %vm6974_vm11, %v1117_v18, 0.0  ;;  %v1191_v28 = vrot.slane %v1187_v21, 3  ;;  %v1192_v29 = vrot.slane %v1188_v23, 3  ;;  %v1133_v30 = vrot.slane %v1129_v25, 1  ;;  %vm7038_vm4 = vmand %vm6886_vm0, %vm12298_vm10 }
  0xcd   : > { %v1134_v31 = vrot.slane %v1130_v26, 1  ;;  %v1200_v33 = vpop.permute.xlu1 %1199  ;;  %v1198_v34 = vpop.permute.xlu0 %1197  ;;  %v1090_v42 = vsel %vm7026_vm9, 1, %v6455_v0  ;;  %vm12303_vm8 = vcmp.lt.s32.totalorder %v6698_v3, 16  ;;  %vm12304_vm12 = vcmp.ge.s32.totalorder %v6698_v3, 0 }
  0xce   : > { %1195 = vst [vmem:[#allocation2 + $0x20] sm:$0xe0] %v1191_v28  ;;  %1196 = vst [vmem:[#allocation2 + $0x48] sm:$0xe0] %v1192_v29  ;;  %v1202_v40 = vsel %vm12301_vm5, %v1198_v34, %v1200_v33  ;;  %v1203_v41 = vsel %vm12302_vm7, %v1200_v33, %v1198_v34  ;;  %vm7065_vm9 = vcmp.eq.s32.totalorder %v1036_v1, 1  ;;  %vm7069_vm5 = vcmp.eq.s32.totalorder %v1040_v2, 1 }
  0xcf   : > { %1137 = vst [vmem:[#allocation2 + $0x20] ss:$124 sps:$4 sm:$0x83] %v1133_v30   ;;  %1138 = vst [vmem:[#allocation2 + $0x48] ss:$28 sps:$4 sm:$0x83] %v1134_v31   ;;  %v1094_v54 = vrot.slane %v1090_v42, %v6877_v19  ;;  %v1098_v59 = vrot.slane %v1090_v42, %v6879_v20 }
  0xd0   : > { %vm7056_vm15 = vmand %vm12304_vm12, %vm12303_vm8  ;;  %v1215_v45 = vsel %vm6989_vm2, %v1202_v40, 0.0  ;;  %v1216_v46 = vsel %vm6993_vm1, %v1203_v41, 0.0  ;;  %v12308_v47 = vsel %vm7065_vm9, 4294967295, %v12307_v47  ;;  %v12310_v3 = vmov 0 }
  0xd1   : > { %1217 = vst [vmem:[#allocation2 + $0x70] sm:$0x7] %v1215_v45  ;;  %1218 = vst [vmem:[#allocation2 + $0x90] sm:$0x7] %v1216_v46  ;;  %v12311_v3 = vsel %vm7069_vm5, 4294967295, %v12310_v3  ;;  %vm12313_vm7 = vcmp.lt.s32.totalorder %v6703_v4, 16  ;;  %v1028_v52 = vpop.permute.xlu1 %1027  ;;  %v1026_v53 = vpop.permute.xlu0 %1025 }
  0xd2   : > { %12309 = vst [vmem:[#allocation23_spill] sm:$0xff] %v12308_v47  ;;  %12312 = vst [vmem:[#allocation24_spill] sm:$0xff] %v12311_v3  ;;  %vm12314_vm12 = vcmp.ge.s32.totalorder %v6703_v4, 4294967295  ;;  %vm12315_vm13 = vcmp.lt.s32.totalorder %v6893_v24, 111  ;;  %v12317_v9 = vmov 0  ;;  %v12320_v16 = vmov 0 }
  0xd3   : > { %vm531_vm8 = vmand %vm7038_vm4, %vm12313_vm7  ;;  %v1030_v55 = vsel %vm12315_vm13, %v1026_v53, %v1028_v52  ;;  %vm7098_vm7 = vcmp.eq.s32.totalorder %v1066_v48, 1  ;;  %vm7113_vm2 = vcmp.eq.s32.totalorder %v1094_v54, 1  ;;  %v12326_v23 = vmov 0 }
  0xd4   : > { %vm519_vm10 = vmand %vm7056_vm15, %vm12314_vm12  ;;  %v1043_v60 = vsel %vm7065_vm9, %v1030_v55, 0.0  ;;  %v1004_v1 = vsel %vm531_vm8, 1, %v6455_v0  ;;  %v12318_v9 = vsel %vm7098_vm7, 4294967295, %v12317_v9  ;;  %vm1310_vm8 = vcmask 1042432  }
  0xd5   : > { %vm12316_vm6 = vmmov %vm12315_vm13  ;;  %v1047_v2 = vrot.slane %v1043_v60, 2  ;;  %12319 = vst [vmem:[#allocation25_spill] sm:$0xff] %v12318_v9  ;;  %vm7102_vm13 = vcmp.eq.s32.totalorder %v1070_v50, 1  ;;  %v1058_v18 = vpop.permute.xlu1 %1057  ;;  %v1056_v21 = vpop.permute.xlu0 %1055  ;;  %v12327_v23 = vsel %vm7113_vm2, 4294967295, %v12326_v23  ;;  %vm12329_vm1 = vcmp.ge.s32.totalorder %v6703_v4, 4294967294 }
  0xd6   : > { %v1031_v58 = vsel %vm12316_vm6, %v1028_v52, %v1026_v53  ;;  %v12321_v16 = vsel %vm7102_vm13, 4294967295, %v12320_v16  ;;  %vm12323_vm6 = vcmp.lt.s32.totalorder %v6703_v4, 15  ;;  %12328 = vst [vmem:[#allocation27_spill] sm:$0xff] %v12327_v23  ;;  %vm7121_vm14 = vmand %vm7056_vm15, %vm12329_vm1  ;;  %vm7129_vm4 = vcmp.eq.s32.totalorder %v1098_v59, 1  ;;  %v1243_v45 = vld [vmem:[#allocation2 + $0x48] sm:$0xff]  ;;  %v1242_v50 = vld [vmem:[#allocation2 + $0x20] sm:$0xff] }
  0xd7   : > { %v1044_v61 = vsel %vm7069_vm5, %v1031_v58, 0.0  ;;  %12322 = vst [vmem:[#allocation26_spill] sm:$0xff] %v12321_v16  ;;  %vm7108_vm12 = vmand %vm519_vm10, %vm12323_vm6  ;;  %vm12332_vm10 = vcmp.lt.s32.totalorder %v6893_v24, 110  ;;  %v12334_v28 = vmov 0  ;;  %v1008_v29 = vrot.slane %v1004_v1, %v6877_v19 }
  0xd8   : > { %v1048_v5 = vrot.slane %v1044_v61, 2  ;;  %1051 = vst [vmem:[#allocation2 + $0x98] ss:$-60 sps:$4 sm:$0xc1] %v1047_v2   ;;  %v1060_v26 = vsel %vm12332_vm10, %v1056_v21, %v1058_v18  ;;  %vm12333_vm6 = vmmov %vm12332_vm10  ;;  %v12335_v28 = vsel %vm7129_vm4, 4294967295, %v12334_v28  ;;  %v1012_v38 = vrot.slane %v1004_v1, %v6879_v20 }
  0xd9   : > { %v1061_v27 = vsel %vm12333_vm6, %v1058_v18, %v1056_v21  ;;  %12336 = vst [vmem:[#allocation28_spill] sm:$0xff] %v12335_v28  ;;  %v1073_v30 = vsel %vm7098_vm7, %v1060_v26, 0.0  ;;  %v1245_v32 = vld [vmem:[#allocation2 + $0x90] sm:$0x7]  ;;  %v896_v39 = vsel %vm7108_vm12, 1, %v6455_v0  ;;  %vm12337_vm1 = vcmp.lt.s32.totalorder %v6703_v4, 14  ;;  %v1086_v41 = vpop.permute.xlu1 %1085  ;;  %v1084_v42 = vpop.permute.xlu0 %1083 }
  0xda   : > { %1052 = vst [vmem:[#allocation2 + $0x60] ss:$-76 sps:$4 sm:$0xc1] %v1048_v5   ;;  %v1074_v31 = vsel %vm7102_vm13, %v1061_v27, 0.0  ;;  %v1244_v33 = vld [vmem:[#allocation2 + $0x70] sm:$0x7]  ;;  %5830 = vmatprep.subr.msk.mxu1 %vm1310_vm8, %v1245_v32  ;;  %vm7147_vm10 = vmand %vm7121_vm14, %vm12337_vm1  ;;  %v900_v54 = vrot.slane %v896_v39, %v6877_v19  ;;  %v904_v61 = vrot.slane %v896_v39, %v6879_v20 }
  0xdb   : > { %v1077_v34 = vrot.slane %v1073_v30, 7  ;;  %v1078_v35 = vrot.slane %v1074_v31, 7  ;;  %5831 = vmatpush1.msk.msra.mxu1 %vm1310_vm8, %v1244_v33  ;;  %vm12340_vm6 = vcmp.lt.s32.totalorder %v6893_v24, 98  ;;  %vm11818_vm14 = vcmp.lt.s32.totalorder %v6893_v24, 112 }
  0xdc   : > { %v1088_v46 = vsel %vm12340_vm6, %v1084_v42, %v1086_v41  ;;  %vm12341_vm12 = vmmov %vm12340_vm6  ;;  %1331 = vmatprep.subr.mxu1 %v1243_v45  ;;  %vm7157_vm1 = vcmp.eq.s32.totalorder %v1008_v29, 1  ;;  %vm12345_vm11 = vcmp.ge.s32.totalorder %v6703_v4, 2  ;;  %v926_v55 = vsel %vm7147_vm10, 1, %v6455_v0 }
  0xdd   : > { %1081 = vst [vmem:[#allocation2 + $0x98] sm:$0xe] %v1077_v34  ;;  %1082 = vst [vmem:[#allocation2 + $0x60] sm:$0xe] %v1078_v35  ;;  %v1089_v48 = vsel %vm12341_vm12, %v1086_v41, %v1084_v42  ;;  %v12343_v51 = vsel %vm7157_vm1, 4294967295, %v12342_v51  ;;  %v1101_v52 = vsel %vm7113_vm2, %v1088_v46, 0.0  ;;  %1332 = vmatpush1.msra.mxu1 %v1242_v50  ;;  %v1000_v1 = vpop.permute.xlu1 %999  ;;  %v998_v2 = vpop.permute.xlu0 %997  ;;  %v930_v18 = vrot.slane %v926_v55, %v6877_v19 }
  0xde   : > { %12344 = vst [vmem:[#allocation29_spill] sm:$0xff] %v12343_v51  ;;  %vm526_vm8 = vmand %vm6886_vm0, %vm12345_vm11  ;;  %v1102_v53 = vsel %vm7129_vm4, %v1089_v48, 0.0  ;;  %v1105_v58 = vrot.slane %v1101_v52, 4  ;;  %vm7173_vm6 = vcmp.eq.s32.totalorder %v1012_v38, 1  ;;  %v12346_v60 = vmov 0 }
  0xdf   : > { %v1106_v59 = vrot.slane %v1102_v53, 4  ;;  %v12347_v60 = vsel %vm7173_vm6, 4294967295, %v12346_v60  ;;  %vm12349_vm11 = vcmp.lt.s32.totalorder %v6703_v4, 18  ;;  %v1002_v5 = vsel %vm11818_vm14, %v998_v2, %v1000_v1 }
  0xe0   : > { %12348 = vst [vmem:[#allocation30_spill] sm:$0xff] %v12347_v60  ;;  %vm527_vm12 = vmand %vm526_vm8, %vm12349_vm11  ;;  %v1003_v17 = vsel %vm11818_vm14, %v1000_v1, %v998_v2  ;;  %vm11821_vm10 = vcmp.lt.s32.totalorder %v6893_v24, 127  ;;  %vm12350_vm2 = vcmp.ge.s32.totalorder %v6703_v4, 1  ;;  %v1015_v21 = vsel %vm7157_vm1, %v1002_v5, 0.0 }
  0xe1   : > { %1109 = vst [vmem:[#allocation2 + $0x98] sm:$0x70] %v1105_v58  ;;  %1110 = vst [vmem:[#allocation2 + $0x60] sm:$0x70] %v1106_v59  ;;  %v1016_v25 = vsel %vm7173_vm6, %v1003_v17, 0.0  ;;  %vm7194_vm8 = vcmp.eq.s32.totalorder %v900_v54, 1  ;;  %v934_v27 = vrot.slane %v926_v55, %v6879_v20  ;;  %v892_v32 = vpop.permute.xlu1 %891  ;;  %v890_v33 = vpop.permute.xlu0 %889 }
  0xe2   : > { %vm528_vm4 = vmand %vm6886_vm0, %vm12350_vm2  ;;  %v12351_v26 = vmov 0  ;;  %v1019_v29 = vrot.slane %v1015_v21, 5  ;;  %v1020_v30 = vrot.slane %v1016_v25, 5  ;;  %vm7199_vm11 = vcmp.eq.s32.totalorder %v904_v61, 1 }
  0xe3   : > { %v12352_v26 = vsel %vm7194_vm8, 4294967295, %v12351_v26  ;;  %v12354_v31 = vmov 0  ;;  %v954_v22 = vsel %vm527_vm12, 1, %v6455_v0  ;;  %vm12357_vm0 = vcmp.lt.s32.totalorder %v6703_v4, 17 }
  0xe4   : > { %12353 = vst [vmem:[#allocation31_spill] sm:$0xff] %v12352_v26  ;;  %v12355_v31 = vsel %vm7199_vm11, 4294967295, %v12354_v31  ;;  %vm529_vm2 = vmand %vm528_vm4, %vm12357_vm0  ;;  %v894_v34 = vsel %vm11821_vm10, %v890_v33, %v892_v32  ;;  %v895_v35 = vsel %vm11821_vm10, %v892_v32, %v890_v33  ;;  %vm11822_vm14 = vcmp.lt.s32.totalorder %v6893_v24, 126 }
  0xe5   : > { %12356 = vst [vmem:[#allocation32_spill] sm:$0xff] %v12355_v31  ;;  %1023 = vst [vmem:[#allocation2 + $0x58] sm:$0x38] %v1019_v29  ;;  %vm7211_vm7 = vcmp.eq.s32.totalorder %v930_v18, 1  ;;  %v12358_v38 = vmov 0  ;;  %v907_v39 = vsel %vm7194_vm8, %v894_v34, 0.0  ;;  %v958_v42 = vrot.slane %v954_v22, %v6877_v19  ;;  %v922_v53 = vpop.permute.xlu1 %921  ;;  %v920_v54 = vpop.permute.xlu0 %919 }
  0xe6   : > { %1024 = vst [vmem:[#allocation2 + $0x10] sm:$0x38] %v1020_v30  ;;  %v12359_v38 = vsel %vm7211_vm7, 4294967295, %v12358_v38  ;;  %v908_v40 = vsel %vm7199_vm11, %v895_v35, 0.0  ;;  %vm7219_vm4 = vcmp.eq.s32.totalorder %v934_v27, 1  ;;  %v12361_v41 = vmov 0 }
  0xe7   : > { %12360 = vst [vmem:[#allocation33_spill] sm:$0xff] %v12359_v38  ;;  %v12362_v41 = vsel %vm7219_vm4, 4294967295, %v12361_v41  ;;  %vm12364_vm12 = vcmp.ge.s32.totalorder %v6703_v4, 2  ;;  %v911_v46 = vrot.slane %v907_v39, 1  ;;  %v912_v48 = vrot.slane %v908_v40, 1 }
  0xe8   : > { %12363 = vst [vmem:[#allocation34_spill] sm:$0xff] %v12362_v41  ;;  %vm7228_vm0 = vmand %vm7056_vm15, %vm12364_vm12  ;;  %v962_v50 = vrot.slane %v954_v22, %v6879_v20  ;;  %v982_v52 = vsel %vm529_vm2, 1, %v6455_v0  ;;  %v1241_v55 = vld [vmem:[#allocation2 + $0x60] sm:$0xff]  ;;  %v1240_v58 = vld [vmem:[#allocation2 + $0x98] sm:$0xff]  ;;  %v924_v59 = vsel %vm11822_vm14, %v920_v54, %v922_v53  ;;  %v925_v61 = vsel %vm11822_vm14, %v922_v53, %v920_v54 }
  0xe9   : > { %915 = vst [vmem:[#allocation2 + $0x28] ss:$-28 sps:$4 sm:$0x83] %v911_v46   ;;  %916 = vst [vmem:[#allocation2 + $0x40] ss:$76 sps:$4 sm:$0x83] %v912_v48   ;;  %1333 = vmatprep.subr.mxu1 %v1241_v55  ;;  %v986_v5 = vrot.slane %v982_v52, %v6877_v19  ;;  %v990_v17 = vrot.slane %v982_v52, %v6879_v20  ;;  %v950_v29 = vpop.permute.xlu1 %949  ;;  %v948_v30 = vpop.permute.xlu0 %947 }
  0xea   : > { %vm12367_vm10 = vcmp.lt.s32.totalorder %v6703_v4, 18  ;;  %v937_v1 = vsel %vm7211_vm7, %v924_v59, 0.0  ;;  %v938_v2 = vsel %vm7219_vm4, %v925_v61, 0.0  ;;  %1334 = vmatpush1.msra.mxu1 %v1240_v58  ;;  %vm12368_vm14 = vcmp.ge.s32.totalorder %v6703_v4, 1 }
  0xeb   : > { %vm516_vm2 = vmand %vm7228_vm0, %vm12367_vm10  ;;  %v941_v18 = vrot.slane %v937_v1, 6  ;;  %v942_v21 = vrot.slane %v938_v2, 6  ;;  %vm7253_vm13 = vcmp.eq.s32.totalorder %v958_v42, 1  ;;  %v12369_v25 = vmov 0 }
  0xec   : > { %vm517_vm12 = vmand %vm7056_vm15, %vm12368_vm14  ;;  %v12370_v25 = vsel %vm7253_vm13, 4294967295, %v12369_v25  ;;  %vm7257_vm10 = vcmp.eq.s32.totalorder %v962_v50, 1  ;;  %v12372_v27 = vmov 0  ;;  %v834_v22 = vsel %vm516_vm2, 1, %v6455_v0 }
  0xed   : > { %12371 = vst [vmem:[#allocation35_spill] sm:$0xff] %v12370_v25  ;;  %v12373_v27 = vsel %vm7257_vm10, 4294967295, %v12372_v27  ;;  %vm12375_vm0 = vcmp.ge.s32.totalorder %v6703_v4, 4294967294  ;;  %945 = vst [vmem:[#allocation2 + $0x28] sm:$0x1c] %v941_v18  ;;  %vm12378_vm15 = vcmp.lt.s32.totalorder %v6893_v24, 114  ;;  %v838_v46 = vrot.slane %v834_v22, %v6877_v19  ;;  %v978_v50 = vpop.permute.xlu1 %977  ;;  %v976_v52 = vpop.permute.xlu0 %975 }
  0xee   : > { %12374 = vst [vmem:[#allocation36_spill] sm:$0xff] %v12373_v27  ;;  %vm7266_vm7 = vmand %vm6714_vm3, %vm12375_vm0  ;;  %v952_v32 = vsel %vm12378_vm15, %v948_v30, %v950_v29  ;;  %vm11833_vm4 = vcmp.lt.s32.totalorder %v6893_v24, 113  ;;  %vm12380_vm2 = vcmp.lt.s32.totalorder %v6703_v4, 17  ;;  %vm7281_vm0 = vcmp.eq.s32.totalorder %v986_v5, 1 }
  0xef   : > { %946 = vst [vmem:[#allocation2 + $0x40] sm:$0x1c] %v942_v21  ;;  %vm12379_vm14 = vmmov %vm12378_vm15  ;;  %v965_v34 = vsel %vm7253_vm13, %v952_v32, 0.0  ;;  %v12381_v39 = vmov 0  ;;  %vm7285_vm9 = vcmp.eq.s32.totalorder %v990_v17, 1  ;;  %v12384_v40 = vmov 0 }
  0xf0   : > { %v953_v33 = vsel %vm12379_vm14, %v950_v29, %v948_v30  ;;  %vm518_vm5 = vmand %vm517_vm12, %vm12380_vm2  ;;  %v12382_v39 = vsel %vm7281_vm0, 4294967295, %v12381_v39  ;;  %v12385_v40 = vsel %vm7285_vm9, 4294967295, %v12384_v40  ;;  %v969_v42 = vrot.slane %v965_v34, 3 }
  0xf1   : > { %v966_v35 = vsel %vm7257_vm10, %v953_v33, 0.0  ;;  %12383 = vst [vmem:[#allocation37_spill] sm:$0xff] %v12382_v39  ;;  %12386 = vst [vmem:[#allocation38_spill] sm:$0xff] %v12385_v40  ;;  %v842_v48 = vrot.slane %v834_v22, %v6879_v20  ;;  %vm12387_vm12 = vcmp.lt.s32.totalorder %v6703_v4, 14  ;;  %v864_v53 = vsel %vm518_vm5, 1, %v6455_v0  ;;  %v830_v18 = vpop.permute.xlu1 %829  ;;  %v828_v21 = vpop.permute.xlu0 %827 }
  0xf2   : > { %v970_v45 = vrot.slane %v966_v35, 3  ;;  %vm511_vm15 = vmand %vm7266_vm7, %vm12387_vm12  ;;  %973 = vst [vmem:[#allocation2 + $0x28] sm:$0xe0] %v969_v42  ;;  %v980_v54 = vsel %vm11833_vm4, %v976_v52, %v978_v50  ;;  %v981_v55 = vsel %vm11833_vm4, %v978_v50, %v976_v52  ;;  %vm11838_vm7 = vcmp.lt.s32.totalorder %v6893_v24, 2 }
  0xf3   : > { %v993_v58 = vsel %vm7281_vm0, %v980_v54, 0.0  ;;  %v994_v59 = vsel %vm7285_vm9, %v981_v55, 0.0  ;;  %v806_v61 = vsel %vm511_vm15, 1, %v6455_v0  ;;  %vm12388_vm5 = vcmp.ge.s32.totalorder %v6703_v4, 2 }
  0xf4   : > { %974 = vst [vmem:[#allocation2 + $0x40] sm:$0xe0] %v970_v45  ;;  %vm502_vm14 = vmand %vm6714_vm3, %vm12388_vm5  ;;  %vm7310_vm2 = vcmp.eq.s32.totalorder %v838_v46, 1  ;;  %v12389_v1 = vmov 0  ;;  %vm7314_vm12 = vcmp.eq.s32.totalorder %v842_v48, 1  ;;  %v12392_v2 = vmov 0 }
  0xf5   : > { %995 = vst [vmem:[#allocation2 + $0x58] sm:$0x7] %v993_v58  ;;  %996 = vst [vmem:[#allocation2 + $0x10] sm:$0x7] %v994_v59  ;;  %v12390_v1 = vsel %vm7310_vm2, 4294967295, %v12389_v1  ;;  %v12393_v2 = vsel %vm7314_vm12, 4294967295, %v12392_v2  ;;  %v868_v5 = vrot.slane %v864_v53, %v6877_v19  ;;  %v872_v17 = vrot.slane %v864_v53, %v6879_v20  ;;  %v860_v45 = vpop.permute.xlu1 %859  ;;  %v858_v46 = vpop.permute.xlu0 %857 }
  0xf6   : > { %12391 = vst [vmem:[#allocation39_spill] sm:$0xff] %v12390_v1  ;;  %12394 = vst [vmem:[#allocation40_spill] sm:$0xff] %v12393_v2  ;;  %vm12395_vm15 = vcmp.ge.s32.totalorder %v6703_v4, 1  ;;  %v832_v29 = vsel %vm11838_vm7, %v828_v21, %v830_v18  ;;  %v833_v30 = vsel %vm11838_vm7, %v830_v18, %v828_v21  ;;  %v810_v22 = vrot.slane %v806_v61, %v6877_v19 }
  0xf7   : > { %vm504_vm5 = vmand %vm6714_vm3, %vm12395_vm15  ;;  %vm12396_vm4 = vcmp.lt.s32.totalorder %v6703_v4, 18  ;;  %v845_v44 = vsel %vm7310_vm2, %v833_v30, 0.0  ;;  %v846_v32 = vsel %vm7314_vm12, %v832_v29, 0.0  ;;  %vm11842_vm10 = vcmp.lt.s32.totalorder %v6893_v24, 1 }
  0xf8   : > { %vm503_vm13 = vmand %vm502_vm14, %vm12396_vm4  ;;  %v814_v6 = vrot.slane %v806_v61, %v6879_v20  ;;  %v849_v33 = vrot.slane %v845_v44, 2  ;;  %v850_v34 = vrot.slane %v846_v32, 2  ;;  %vm7337_vm3 = vcmp.eq.s32.totalorder %v868_v5, 1 }
  0xf9   : > { %v12397_v35 = vmov 0  ;;  %vm7341_vm15 = vcmp.eq.s32.totalorder %v872_v17, 1  ;;  %v12400_v42 = vmov 0  ;;  %vm12403_vm4 = vcmp.lt.s32.totalorder %v6703_v4, 17  ;;  %v802_v29 = vpop.permute.xlu1 %801  ;;  %v800_v30 = vpop.permute.xlu0 %799 }
  0xfa   : > { %v12398_v35 = vsel %vm7337_vm3, 4294967295, %v12397_v35  ;;  %v12401_v42 = vsel %vm7341_vm15, 4294967295, %v12400_v42  ;;  %vm505_vm14 = vmand %vm504_vm5, %vm12403_vm4  ;;  %v698_v48 = vsel %vm503_vm13, 1, %v6455_v0  ;;  %853 = vst [vmem:[#allocation2 + $0x8] ss:$116 sps:$4 sm:$0xc1] %v849_v33   ;;  %v862_v50 = vsel %vm11842_vm10, %v858_v46, %v860_v45 }
  0xfb   : > { %12399 = vst [vmem:[#allocation41_spill] sm:$0xff] %v12398_v35  ;;  %12402 = vst [vmem:[#allocation42_spill] sm:$0xff] %v12401_v42  ;;  %v863_v52 = vsel %vm11842_vm10, %v860_v45, %v858_v46  ;;  %vm11841_vm7 = vcmp.lt.s32.totalorder %v6893_v24, 14  ;;  %vm7353_vm2 = vcmp.eq.s32.totalorder %v810_v22, 1  ;;  %v12404_v53 = vmov 0  ;;  %v1237_v22 = vld [vmem:[#allocation2 + $0x40] sm:$0xff] }
  0xfc   : > { %854 = vst [vmem:[#allocation2 + $0x88] ss:$-4 sps:$4 sm:$0xc1] %v850_v34   ;;  %v12405_v53 = vsel %vm7353_vm2, 4294967295, %v12404_v53  ;;  %v875_v4 = vsel %vm7337_vm3, %v863_v52, 0.0  ;;  %v876_v54 = vsel %vm7341_vm15, %v862_v50, 0.0  ;;  %v702_v18 = vrot.slane %v698_v48, %v6877_v19 }
  0xfd   : > { %12406 = vst [vmem:[#allocation43_spill] sm:$0xff] %v12405_v53  ;;  %v1239_v55 = vld [vmem:[#allocation2 + $0x10] sm:$0xff]  ;;  %v728_v58 = vsel %vm505_vm14, 1, %v6455_v0  ;;  %vm7362_vm13 = vcmp.eq.s32.totalorder %v814_v6, 1  ;;  %v12407_v59 = vmov 0  ;;  %v1238_v61 = vld [vmem:[#allocation2 + $0x58] sm:$0xff]  ;;  %v706_v21 = vrot.slane %v698_v48, %v6879_v20 }
  0xfe   : > { %v12408_v59 = vsel %vm7362_vm13, 4294967295, %v12407_v59  ;;  %v879_v5 = vrot.slane %v875_v4, 7  ;;  %v880_v17 = vrot.slane %v876_v54, 7  ;;  %1335 = vmatprep.subr.mxu1 %v1239_v55  ;;  %v732_v44 = vrot.slane %v728_v58, %v6877_v19  ;;  %v1236_v34 = vld [vmem:[#allocation2 + $0x28] sm:$0xff]  ;;  %v694_v55 = vpop.permute.xlu1 %693 }
  0xff   : > { %12409 = vst [vmem:[#allocation44_spill] sm:$0xff] %v12408_v59  ;;  %1336 = vmatpush1.msra.mxu1 %v1238_v61  ;;  %v736_v32 = vrot.slane %v728_v58, %v6879_v20  ;;  %v804_v6 = vsel %vm11841_vm7, %v800_v30, %v802_v29  ;;  %v805_v33 = vsel %vm11841_vm7, %v802_v29, %v800_v30  ;;  %vm7379_vm4 = vcmp.eq.s32.totalorder %v702_v18, 1  ;;  %v692_v58 = vpop.permute.xlu0 %691 }
 0x100   : > { %883 = vst [vmem:[#allocation2 + $0x8] sm:$0xe] %v879_v5  ;;  %884 = vst [vmem:[#allocation2 + $0x88] sm:$0xe] %v880_v17  ;;  %1337 = vmatprep.subr.mxu1 %v1237_v22  ;;  %v817_v45 = vsel %vm7353_vm2, %v805_v33, 0.0  ;;  %v818_v46 = vsel %vm7362_vm13, %v804_v6, 0.0  ;;  %vm12416_vm7 = vnez %v12231_v7 }
 0x101   : > { %1338 = vmatpush1.msra.mxu1 %v1236_v34  ;;  %v821_v48 = vrot.slane %v817_v45, 5  ;;  %v822_v50 = vrot.slane %v818_v46, 5  ;;  %v12410_v52 = vmov 0  ;;  %vm7383_vm14 = vcmp.eq.s32.totalorder %v706_v21, 1 }
 0x102   : > { %v12411_v52 = vsel %vm7379_vm4, 4294967295, %v12410_v52  ;;  %v12413_v4 = vmov 0  ;;  %v756_v54 = vsel %vm12416_vm7, 1, %v6455_v0  ;;  %vm7390_vm10 = vcmp.eq.s32.totalorder %v732_v44, 1  ;;  %v724_v6 = vpop.permute.xlu1 %723 }
 0x103   : > { %12412 = vst [vmem:[#allocation45_spill] sm:$0xff] %v12411_v52  ;;  %v12414_v4 = vsel %vm7383_vm14, 4294967295, %v12413_v4  ;;  %v12417_v61 = vmov 0  ;;  %vm7394_vm5 = vcmp.eq.s32.totalorder %v736_v32, 1  ;;  %v12419_v5 = vmov 0  ;;  %v722_v33 = vpop.permute.xlu0 %721 }
 0x104   : > { %12415 = vst [vmem:[#allocation46_spill] sm:$0xff] %v12414_v4  ;;  %v12418_v61 = vsel %vm7390_vm10, 4294967295, %v12417_v61  ;;  %v12420_v5 = vsel %vm7394_vm5, 4294967295, %v12419_v5  ;;  %825 = vst [vmem:[#allocation2 + $0x78] sm:$0x38] %v821_v48  ;;  %vm12421_vm12 = vcmp.lt.s32.totalorder %v6893_v24, 18  ;;  %vm12423_vm7 = vnez %v12233_v8 }
 0x105   : > { %826 = vst [vmem:[#allocation2 + $0x80] sm:$0x38] %v822_v50  ;;  %v696_v17 = vsel %vm12421_vm12, %v692_v58, %v694_v55  ;;  %vm12422_vm2 = vmmov %vm12421_vm12  ;;  %v784_v7 = vsel %vm12423_vm7, 1, %v6455_v0  ;;  %vm11849_vm13 = vcmp.lt.s32.totalorder %v6893_v24, 17  ;;  %v760_v30 = vrot.slane %v756_v54, %v6877_v19 }
 0x106   : > { %v697_v18 = vsel %vm12422_vm2, %v694_v55, %v692_v58  ;;  %v710_v29 = vsel %vm7383_vm14, %v696_v17, 0.0  ;;  %v764_v22 = vrot.slane %v756_v54, %v6879_v20  ;;  %v788_v8 = vrot.slane %v784_v7, %v6877_v19 }
 0x107   : > { %v709_v21 = vsel %vm7379_vm4, %v697_v18, 0.0  ;;  %v714_v32 = vrot.slane %v710_v29, 1  ;;  %v1235_v34 = vld [vmem:[#allocation2 + $0x88] sm:$0xff]  ;;  %v792_v46 = vrot.slane %v784_v7, %v6879_v20  ;;  %v726_v48 = vsel %vm11849_vm13, %v722_v33, %v724_v6  ;;  %v750_v29 = vpop.permute.xlu0 %749 }
 0x108   : > { %v713_v44 = vrot.slane %v709_v21, 1  ;;  %v1234_v45 = vld [vmem:[#allocation2 + $0x8] sm:$0xff]  ;;  %v727_v50 = vsel %vm11849_vm13, %v724_v6, %v722_v33  ;;  %1339 = vmatprep.subr.mxu1 %v1235_v34  ;;  %v740_v55 = vsel %vm7394_vm5, %v726_v48, 0.0  ;;  %vm7423_vm12 = vcmp.eq.s32.totalorder %v760_v30, 1  ;;  %v752_v21 = vpop.permute.xlu1 %751 }
 0x109   : > { %718 = vst [vmem:[#allocation2 + $0x68] ss:$-76 sps:$4 sm:$0x83] %v714_v32   ;;  %v739_v54 = vsel %vm7390_vm10, %v727_v50, 0.0  ;;  %1340 = vmatpush1.msra.mxu1 %v1234_v45  ;;  %v12424_v58 = vmov 0  ;;  %vm7427_vm7 = vcmp.eq.s32.totalorder %v764_v22, 1  ;;  %vm12430_vm13 = vnez %v12237_v10 }
 0x10a   : > { %717 = vst [vmem:[#allocation2 + $0x30] ss:$36 sps:$4 sm:$0x83] %v713_v44   ;;  %v12425_v58 = vsel %vm7423_vm12, 4294967295, %v12424_v58  ;;  %v12427_v17 = vmov 0  ;;  %v743_v18 = vrot.slane %v739_v54, 6  ;;  %vm12439_vm10 = vnez %v12239_v11 }
 0x10b   : > { %12426 = vst [vmem:[#allocation47_spill] sm:$0xff] %v12425_v58  ;;  %v12428_v17 = vsel %vm7427_vm7, 4294967295, %v12427_v17  ;;  %v744_v7 = vrot.slane %v740_v55, 6  ;;  %v612_v44 = vsel %vm12430_vm13, 1, %v6455_v0  ;;  %vm7434_vm4 = vcmp.eq.s32.totalorder %v788_v8, 1  ;;  %v778_v54 = vpop.permute.xlu0 %777 }
 0x10c   : > { %12429 = vst [vmem:[#allocation48_spill] sm:$0xff] %v12428_v17  ;;  %v12431_v32 = vmov 0  ;;  %vm7438_vm2 = vcmp.eq.s32.totalorder %v792_v46, 1  ;;  %v12434_v30 = vmov 0  ;;  %747 = vst [vmem:[#allocation2 + $0x30] sm:$0x1c] %v743_v18  ;;  %v616_v46 = vrot.slane %v612_v44, %v6877_v19  ;;  %v780_v50 = vpop.permute.xlu1 %779 }
 0x10d   : > { %v12432_v32 = vsel %vm7434_vm4, 4294967295, %v12431_v32  ;;  %v12435_v30 = vsel %vm7438_vm2, 4294967295, %v12434_v30  ;;  %748 = vst [vmem:[#allocation2 + $0x68] sm:$0x1c] %v744_v7  ;;  %vm12437_vm14 = vcmp.lt.s32.totalorder %v6893_v24, 16  ;;  %vm11858_vm13 = vcmp.lt.s32.totalorder %v6893_v24, 15 }
 0x10e   : > { %12433 = vst [vmem:[#allocation49_spill] sm:$0xff] %v12432_v32  ;;  %12436 = vst [vmem:[#allocation50_spill] sm:$0xff] %v12435_v30  ;;  %v754_v22 = vsel %vm12437_vm14, %v750_v29, %v752_v21  ;;  %v642_v34 = vsel %vm12439_vm10, 1, %v6455_v0  ;;  %v620_v48 = vrot.slane %v612_v44, %v6879_v20  ;;  %v782_v55 = vsel %vm11858_vm13, %v778_v54, %v780_v50 }
 0x10f   : > { %vm12438_vm5 = vmmov %vm12437_vm14  ;;  %v768_v33 = vsel %vm7427_vm7, %v754_v22, 0.0  ;;  %v783_v18 = vsel %vm11858_vm13, %v780_v50, %v778_v54  ;;  %v646_v7 = vrot.slane %v642_v34, %v6877_v19  ;;  %vm11863_vm10 = vcmp.lt.s32.totalorder %v6893_v24, 32 }
 0x110   : > { %v755_v6 = vsel %vm12438_vm5, %v752_v21, %v750_v29  ;;  %v772_v8 = vrot.slane %v768_v33, 3  ;;  %v795_v11 = vsel %vm7434_vm4, %v783_v18, 0.0  ;;  %v796_v21 = vsel %vm7438_vm2, %v782_v55, 0.0  ;;  %v606_v33 = vpop.permute.xlu0 %605 }
 0x111   : > { %v767_v10 = vsel %vm7423_vm12, %v755_v6, 0.0  ;;  %v650_v29 = vrot.slane %v642_v34, %v6879_v20  ;;  %797 = vst [vmem:[#allocation2 + $0x78] sm:$0x7] %v795_v11  ;;  %798 = vst [vmem:[#allocation2 + $0x80] sm:$0x7] %v796_v21  ;;  %vm7467_vm5 = vcmp.eq.s32.totalorder %v616_v46, 1  ;;  %vm12446_vm13 = vnez %v12241_v12 }
 0x112   : > { %v771_v45 = vrot.slane %v767_v10, 3  ;;  %776 = vst [vmem:[#allocation2 + $0x68] sm:$0xe0] %v772_v8  ;;  %v12440_v44 = vmov 0  ;;  %vm7471_vm14 = vcmp.eq.s32.totalorder %v620_v48, 1  ;;  %v12443_v22 = vmov 0  ;;  %v608_v10 = vpop.permute.xlu1 %607 }
 0x113   : > { %v12441_v44 = vsel %vm7467_vm5, 4294967295, %v12440_v44  ;;  %v12444_v22 = vsel %vm7471_vm14, 4294967295, %v12443_v22  ;;  %v670_v6 = vsel %vm12446_vm13, 1, %v6455_v0  ;;  %v611_v34 = vsel %vm11863_vm10, %v608_v10, %v606_v33 }
 0x114   : > { %775 = vst [vmem:[#allocation2 + $0x30] sm:$0xe0] %v771_v45  ;;  %12442 = vst [vmem:[#allocation51_spill] sm:$0xff] %v12441_v44  ;;  %v610_v45 = vsel %vm11863_vm10, %v606_v33, %v608_v10  ;;  %vm11866_vm2 = vcmp.lt.s32.totalorder %v6893_v24, 31  ;;  %vm7483_vm4 = vcmp.eq.s32.totalorder %v646_v7, 1  ;;  %v12447_v8 = vmov 0  ;;  %v636_v21 = vpop.permute.xlu0 %635 }
 0x115   : > { %12445 = vst [vmem:[#allocation52_spill] sm:$0xff] %v12444_v22  ;;  %v12448_v8 = vsel %vm7483_vm4, 4294967295, %v12447_v8  ;;  %v623_v46 = vsel %vm7467_vm5, %v611_v34, 0.0  ;;  %v624_v12 = vsel %vm7471_vm14, %v610_v45, 0.0  ;;  %vm7491_vm13 = vcmp.eq.s32.totalorder %v650_v29, 1 }
 0x116   : > { %12449 = vst [vmem:[#allocation53_spill] sm:$0xff] %v12448_v8  ;;  %v12450_v48 = vmov 0  ;;  %v674_v50 = vrot.slane %v670_v6, %v6877_v19  ;;  %v627_v54 = vrot.slane %v623_v46, 2  ;;  %v628_v55 = vrot.slane %v624_v12, 2  ;;  %v638_v11 = vpop.permute.xlu1 %637 }
 0x117   : > { %v12451_v48 = vsel %vm7491_vm13, 4294967295, %v12450_v48  ;;  %v678_v18 = vrot.slane %v670_v6, %v6879_v20  ;;  %vm12453_vm10 = vnez %v12243_v13  ;;  %v640_v29 = vsel %vm11866_vm2, %v636_v21, %v638_v11 }
 0x118   : > { %12452 = vst [vmem:[#allocation54_spill] sm:$0xff] %v12451_v48  ;;  %v584_v7 = vsel %vm12453_vm10, 1, %v6455_v0  ;;  %631 = vst [vmem:[#allocation2 + $0x50] ss:$-76 sps:$4 sm:$0xc1] %v627_v54   ;;  %v641_v10 = vsel %vm11866_vm2, %v638_v11, %v636_v21  ;;  %v654_v6 = vsel %vm7491_vm13, %v640_v29, 0.0  ;;  %vm12459_vm5 = vnez %v12245_v14 }
 0x119   : > { %632 = vst [vmem:[#allocation2 + $0x18] ss:$36 sps:$4 sm:$0xc1] %v628_v55   ;;  %v653_v33 = vsel %vm7483_vm4, %v641_v10, 0.0  ;;  %v1233_v13 = vld [vmem:[#allocation2 + $0x80] sm:$0xff]  ;;  %v1232_v45 = vld [vmem:[#allocation2 + $0x78] sm:$0xff]  ;;  %v588_v34 = vrot.slane %v584_v7, %v6877_v19  ;;  %v592_v46 = vrot.slane %v584_v7, %v6879_v20  ;;  %v664_v10 = vpop.permute.xlu0 %663 }
 0x11a   : > { %v657_v12 = vrot.slane %v653_v33, 7  ;;  %v658_v54 = vrot.slane %v654_v6, 7  ;;  %1341 = vmatprep.subr.mxu1 %v1233_v13  ;;  %vm7511_vm10 = vcmp.eq.s32.totalorder %v674_v50, 1  ;;  %v12454_v55 = vmov 0  ;;  %v666_v21 = vpop.permute.xlu1 %665  ;;  %v1231_v29 = vld [vmem:[#allocation2 + $0x68] sm:$0xff] }
 0x11b   : > { %v12455_v55 = vsel %vm7511_vm10, 4294967295, %v12454_v55  ;;  %vm7515_vm2 = vcmp.eq.s32.totalorder %v678_v18, 1  ;;  %v12457_v11 = vmov 0  ;;  %1342 = vmatpush1.msra.mxu1 %v1232_v45  ;;  %v562_v15 = vsel %vm12459_vm5, 1, %v6455_v0  ;;  %v1230_v18 = vld [vmem:[#allocation2 + $0x30] sm:$0xff] }
 0x11c   : > { %12456 = vst [vmem:[#allocation55_spill] sm:$0xff] %v12455_v55  ;;  %v12458_v11 = vsel %vm7515_vm2, 4294967295, %v12457_v11  ;;  %661 = vst [vmem:[#allocation2 + $0x50] sm:$0xe] %v657_v12  ;;  %vm12460_vm4 = vcmp.lt.s32.totalorder %v6893_v24, 30  ;;  %1343 = vmatprep.subr.mxu1 %v1231_v29  ;;  %vm11879_vm14 = vcmp.lt.s32.totalorder %v6893_v24, 33  ;;  %v566_v12 = vrot.slane %v562_v15, %v6877_v19 }
 0x11d   : > { %662 = vst [vmem:[#allocation2 + $0x18] sm:$0xe] %v658_v54  ;;  %v668_v50 = vsel %vm12460_vm4, %v664_v10, %v666_v21  ;;  %vm12461_vm13 = vmmov %vm12460_vm4  ;;  %1344 = vmatpush1.msra.mxu1 %v1230_v18  ;;  %vm7531_vm5 = vcmp.eq.s32.totalorder %v588_v34, 1  ;;  %v12462_v0 = vmov 0  ;;  %vm7535_vm7 = vcmp.eq.s32.totalorder %v592_v46, 1 }
 0x11e   : > { %v669_v7 = vsel %vm12461_vm13, %v666_v21, %v664_v10  ;;  %v682_v6 = vsel %vm7515_vm2, %v668_v50, 0.0  ;;  %v12463_v0 = vsel %vm7531_vm5, 4294967295, %v12462_v0  ;;  %v12464_v14 = vmov 0  ;;  %v580_v21 = vpop.permute.xlu1 %579  ;;  %v578_v10 = vpop.permute.xlu0 %577 }
 0x11f   : > { %v681_v33 = vsel %vm7511_vm10, %v669_v7, 0.0  ;;  %v12465_v14 = vsel %vm7535_vm7, 4294967295, %v12464_v14  ;;  %v686_v45 = vrot.slane %v682_v6, 4  ;;  %v570_v54 = vrot.slane %v562_v15, %v6879_v20 }
 0x120   : > { %v685_v13 = vrot.slane %v681_v33, 4  ;;  %v582_v34 = vsel %vm11879_vm14, %v578_v10, %v580_v21  ;;  %v583_v29 = vsel %vm11879_vm14, %v580_v21, %v578_v10  ;;  %vm11922_vm4 = vcmp.lt.s32.totalorder %v6893_v24, 34 }
 0x121   : > { %690 = vst [vmem:[#allocation2 + $0x18] sm:$0x70] %v686_v45  ;;  %v595_v46 = vsel %vm7531_vm5, %v583_v29, 0.0  ;;  %v596_v50 = vsel %vm7535_vm7, %v582_v34, 0.0  ;;  %vm7550_vm13 = vcmp.eq.s32.totalorder %v566_v12, 1  ;;  %v12466_v20 = vmov 0 }
 0x122   : > { %689 = vst [vmem:[#allocation2 + $0x50] sm:$0x70] %v685_v13  ;;  %v599_v19 = vrot.slane %v595_v46, 5  ;;  %v600_v15 = vrot.slane %v596_v50, 5  ;;  %v12467_v20 = vsel %vm7550_vm13, 4294967295, %v12466_v20  ;;  %vm7554_vm10 = vcmp.eq.s32.totalorder %v570_v54, 1  ;;  %v556_v18 = vpop.permute.xlu1 %555  ;;  %v554_v33 = vpop.permute.xlu0 %553 }
 0x123   : > { %v12468_v7 = vmov 0  ;;  %v560_v6 = vsel %vm11922_vm4, %v554_v33, %v556_v18  ;;  %v561_v13 = vsel %vm11922_vm4, %v556_v18, %v554_v33  ;;  %v1219_v29 = vld [vmem:[#allocation5] sm:$0xff]  ;;  %vm1288_vm14 = vcmask 613376   ;;  %v1220_v50 = vld [vmem:[#allocation5 + $0x8] sm:$0xff] }
 0x124   : > { %v12469_v7 = vsel %vm7554_vm10, 4294967295, %v12468_v7  ;;  %603 = vst [vmem:[#allocation2] sm:$0x38] %v599_v19  ;;  %604 = vst [vmem:[#allocation2 + $0x38] sm:$0x38] %v600_v15  ;;  %v573_v45 = vsel %vm7550_vm13, %v561_v13, 0.0  ;;  %vm12479_vm2 = vnez %v12308_v47  ;;  %vm12480_vm13 = vnez %v12311_v3 }
 0x125   : > { %v574_v12 = vsel %vm7554_vm10, %v560_v6, 0.0  ;;  %575 = vst [vmem:[#allocation2] sm:$0x7] %v573_v45  ;;  %v12470_v46 = vmov 0.0   ;;  %v1221_v19 = vld [vmem:[#allocation5 + $0x10] sm:$0xff]  ;;  %v1222_v15 = vld [vmem:[#allocation5 + $0x18] sm:$0xff] }
 0x126   : > { %576 = vst [vmem:[#allocation2 + $0x38] sm:$0x7] %v574_v12  ;;  %v1223_v18 = vld [vmem:[#allocation5 + $0x20] sm:$0xff]  ;;  %v1224_v33 = vld [vmem:[#allocation5 + $0x28] sm:$0xff]  ;;  %v1225_v6 = vld [vmem:[#allocation5 + $0x30] sm:$0xff]  ;;  %vm12481_vm10 = vcmp.lt.s32.totalorder %v6893_v24, 112 }
 0x127   : > { %vm12482_vm5 = vmmov %vm12481_vm10  ;;  %vm12483_vm7 = vcmp.lt.s32.totalorder %v6893_v24, 113 }
 0x128   : > { %v1229_v54 = vld [vmem:[#allocation2 + $0x18] sm:$0xff] }
 0x129   : > { %v1228_v21 = vld [vmem:[#allocation2 + $0x50] sm:$0xff]  ;;  %1345 = vmatprep.subr.mxu1 %v1229_v54 }
 0x12a   : > { %1346 = vmatpush1.msra.mxu1 %v1228_v21 }
 0x12c   : > { %v1226_v34 = vld [vmem:[#allocation2] sm:$0xff] }
 0x12d   : > { %v1227_v10 = vld [vmem:[#allocation2 + $0x38] sm:$0xff] }
 0x12e   : > { %1347 = vmatprep.subr.mxu1 %v1227_v10 }
 0x12f   : > { %1348 = vmatpush1.msra.mxu1 %v1226_v34 }
 0x130   : > { %5832 = vmatmul.mubr.msk.f32.vlgmr.msra.gmra.mxu1 %vm1288_vm14, %v1219_v29 }
 0x131   : > { %1387 = vmatprep.mubr.f32.mxu1 %v12470_v46 }
 0x134   : > { %5833 = vmatmul.mubr.msk.f32.gmra.mxu1 %vm1288_vm14, %v1220_v50 }
 0x135   : > { %1393 = vmatprep.mubr.f32.mxu1 %v12470_v46 }
 0x138   : > { %5834 = vmatmul.mubr.msk.f32.gmra.mxu1 %vm1288_vm14, %v1221_v19  ;;  %v1281_v19 = vpop.permute.xlu1 %1280 }
 0x139   : > { %1399 = vmatprep.mubr.f32.mxu1 %v12470_v46 }
 0x13c   : > { %5835 = vmatmul.mubr.msk.f32.gmra.mxu1 %vm1288_vm14, %v1222_v15  ;;  %v1276_v49 = vpop.permute.xlu1 %1275 }
 0x13d   : > { %1405 = vmatprep.mubr.f32.mxu1 %v12470_v46 }
 0x140   : > { %5836 = vmatmul.mubr.msk.f32.gmra.mxu1 %vm1288_vm14, %v1223_v18  ;;  %v1266_v56 = vpop.permute.xlu1 %1265 }
 0x141   : > { %1411 = vmatprep.mubr.f32.mxu1 %v12470_v46 }
 0x144   : > { %5837 = vmatmul.mubr.msk.f32.gmra.mxu1 %vm1288_vm14, %v1224_v33  ;;  %v1286_v33 = vpop.permute.xlu0 %1285 }
 0x145   : > { %1417 = vmatprep.mubr.f32.mxu1 %v12470_v46 }
 0x148   : > { %5838 = vmatmul.mubr.msk.f32.gmra.mxu1 %vm1288_vm14, %v1225_v6  ;;  %v1271_v23 = vpop.permute.xlu0 %1270  ;;  %vm1452_vm14 = vcmask 457728  }
 0x149   : > { %1523 = vmatprep.mubr.f32.mxu1 %v12470_v46 }
 0x14c   : > { %v1261_v2 = vpop.permute.xlu0 %1260 }
 0x1f0   : > { %v1383_v13 = vpop.f32.mrf.mxu1 }
 0x1f2   : > { %v1385_v45 = vpop.f32.mrf.mxu1 }
 0x1f4   : > { %v1389_v12 = vpop.f32.mrf.mxu1 }
 0x1f6   : > { %v1391_v54 = vpop.f32.mrf.mxu1 }
 0x1f8   : > { %v1395_v21 = vpop.f32.mrf.mxu1 }
 0x1fa   : > { %v1397_v10 = vpop.f32.mrf.mxu1 }
 0x1fb   : > { %v1398_v53 = vadd.f32 %v1397_v10, %v1266_v56 }
 0x1fc   : > { %v1401_v34 = vpop.f32.mrf.mxu1 }
 0x1fd   : > { %v1402_v41 = vadd.f32 %v1401_v34, %v1271_v23 }
 0x1fe   : > { %v1403_v29 = vpop.f32.mrf.mxu1 }
 0x1ff   : > { %v1404_v16 = vadd.f32 %v1403_v29, %v1271_v23  ;;  %v1792_v29 = vld [vmem:[%s11757_s7 + $0x8] sm:$0xf] }
 0x200   : > { %v1407_v50 = vpop.f32.mrf.mxu1 }
 0x201   : > { %v1408_v37 = vadd.f32 %v1407_v50, %v1276_v49  ;;  %v1791_v50 = vld [vmem:[%s11757_s7] sm:$0xff] }
 0x202   : > { %v1409_v15 = vpop.f32.mrf.mxu1 }
 0x203   : > { %v1410_v57 = vadd.f32 %v1409_v15, %v1276_v49  ;;  %v1432_v8 = vmax.f32 %v1408_v37, 0.0  ;;  %v1430_v49 = vmax.f32 %v1402_v41, 0.0 }
 0x204   : > { %v1413_v18 = vpop.f32.mrf.mxu1 }
 0x205   : > { %v1414_v27 = vadd.f32 %v1413_v18, %v1281_v19  ;;  %v1433_v59 = vmax.f32 %v1410_v57, 0.0  ;;  %v1431_v18 = vmax.f32 %v1404_v16, 0.0  ;;  %v1439_v16 = vld [vmem:[#allocation7 + $0x8] sm:$0xf] }
 0x206   : > { %v1415_v43 = vpop.f32.mrf.mxu1 }
 0x207   : > { %v1416_v28 = vadd.f32 %v1415_v43, %v1281_v19  ;;  %v1434_v1 = vmax.f32 %v1414_v27, 0.0  ;;  %v1256_v43 = vpop.permute.xlu1 %1255  ;;  %v1392_v19 = vadd.f32 %v1391_v54, %v1261_v2 }
 0x208   : > { %v1419_v62 = vpop.f32.mrf.mxu1 }
 0x209   : > { %v1420_v63 = vadd.f32 %v1419_v62, %v1286_v33  ;;  %v1435_v38 = vmax.f32 %v1416_v28, 0.0  ;;  %v1396_v62 = vadd.f32 %v1395_v21, %v1266_v56  ;;  %v1429_v28 = vmax.f32 %v1398_v53, 0.0 }
 0x20a   : > { %v1421_v6 = vpop.f32.mrf.mxu1 }
 0x20b   : > { %v1422_v25 = vadd.f32 %v1421_v6, %v1286_v33  ;;  %v1436_v9 = vmax.f32 %v1420_v63, 0.0  ;;  %v1386_v63 = vadd.f32 %v1385_v45, %v1256_v43  ;;  %v1428_v23 = vmax.f32 %v1396_v62, 0.0  ;;  %v1445_v41 = vpop.permute.xlu1 %1444 }
 0x20d   : > { %v1437_v36 = vmax.f32 %v1422_v25, 0.0  ;;  %v1390_v25 = vadd.f32 %v1389_v12, %v1261_v2  ;;  %v1425_v56 = vmax.f32 %v1386_v63, 0.0 }
 0x20f   : > { %1477 = vmatprep.subr.mxu1 %v1437_v36  ;;  %v1384_v36 = vadd.f32 %v1383_v13, %v1256_v43  ;;  %v1426_v57 = vmax.f32 %v1390_v25, 0.0 }
 0x210   : > { %1478 = vmatpush1.msra.mxu1 %v1436_v9  ;;  %v1427_v9 = vmax.f32 %v1392_v19, 0.0 }
 0x211   : > { %1479 = vmatprep.subr.mxu1 %v1435_v38  ;;  %v1424_v37 = vmax.f32 %v1384_v36, 0.0  ;;  %v1438_v38 = vld [vmem:[#allocation7] sm:$0xff] }
 0x212   : > { %1480 = vmatpush1.msra.mxu1 %v1434_v1 }
 0x213   : > { %1481 = vmatprep.subr.mxu1 %v1433_v59 }
 0x214   : > { %1482 = vmatpush1.msra.mxu1 %v1432_v8  ;;  %v1450_v8 = vpop.permute.xlu0 %1449 }
 0x215   : > { %1483 = vmatprep.subr.mxu1 %v1431_v18 }
 0x216   : > { %1484 = vmatpush1.msra.mxu1 %v1430_v49 }
 0x217   : > { %1485 = vmatprep.subr.mxu1 %v1429_v28 }
 0x218   : > { %1486 = vmatpush1.msra.mxu1 %v1428_v23 }
 0x219   : > { %1487 = vmatprep.subr.mxu1 %v1427_v9 }
 0x21a   : > { %1488 = vmatpush1.msra.mxu1 %v1426_v57 }
 0x21b   : > { %1489 = vmatprep.subr.mxu1 %v1425_v56 }
 0x21c   : > { %1490 = vmatpush1.msra.mxu1 %v1424_v37 }
 0x21d   : > { %5839 = vmatmul.mubr.msk.f32.vlgmr.msra.gmra.mxu1 %vm1452_vm14, %v1438_v38 }
 0x21e   : > { %1529 = vmatprep.mubr.f32.mxu1 %v12470_v46 }
 0x221   : > { %5840 = vmatmul.mubr.msk.f32.gmra.mxu1 %vm1452_vm14, %v1439_v16  ;;  %vm12471_vm14 = vcmp.lt.s32.totalorder %v6893_v24, 112 }
 0x222   : > { %1880 = vmatprep.mubr.f32.mxu1 %v12470_v46  ;;  %vm12472_vm4 = vmmov %vm12471_vm14 }
 0x2dd   : > { %v1525_v27 = vpop.f32.mrf.mxu1 }
 0x2de   : > { %v1526_v1 = vadd.f32 %v1525_v27, %v1445_v41 }
 0x2df   : > { %v1527_v2 = vpop.f32.mrf.mxu1 }
 0x2e0   : > { %v7582_v53 = vmax.f32 %v1526_v1, 0.0  ;;  %v1528_v59 = vadd.f32 %v1527_v2, %v1445_v41 }
 0x2e1   : > { %v1531_v13 = vpop.f32.mrf.mxu1 }
 0x2e2   : > { %v7584_v45 = vmax.f32 %v1528_v59, 0.0  ;;  %v1532_v12 = vadd.f32 %v1531_v13, %v1450_v8  ;;  %1707 = vrot.lane.b32.xlu0 %v7582_v53, %s11953_s27 }
 0x2e3   : > { %v1533_v54 = vpop.f32.mrf.mxu1 }
 0x2e4   : > { %v1538_v21 = vmax.f32 %v1532_v12, 0.0  ;;  %v1534_v10 = vadd.f32 %v1533_v54, %v1450_v8  ;;  %1745 = vrot.lane.b32.xlu1 %v7584_v45, %s11949_s25 }
 0x2e6   : > { %1651 = vst [vmem:[#allocation3 + $0x70] sm:$0xf] %v1538_v21  ;;  %v1539_v34 = vmax.f32 %v1534_v10, 0.0  ;;  %1741 = vrot.lane.b32.xlu0 %v7582_v53, %s11949_s25 }
 0x2e8   : > { %1652 = vst [vmem:[#allocation3 + $0x58] sm:$0xf] %v1539_v34  ;;  %1691 = vrot.lane.b32.xlu1 %v7584_v45, %s11951_s14 }
 0x2ea   : > { %1653 = vrot.lane.b32.xlu0 %v7582_v53, %s11955_s15 }
 0x2ec   : > { %1709 = vrot.lane.b32.xlu1 %v1538_v21, %s11953_s27 }
 0x2ee   : > { %1687 = vrot.lane.b32.xlu0 %v7582_v53, %s11951_s14 }
 0x2f0   : > { %1599 = vrot.lane.b32.xlu1 %v7584_v45, %s11957_s13 }
 0x2f2   : > { %1615 = vrot.lane.b32.xlu0 %v7582_v53, %s11971_s23 }
 0x2f4   : > { %1655 = vrot.lane.b32.xlu1 %v1538_v21, %s11955_s15 }
 0x2f6   : > { %1711 = vrot.lane.b32.xlu0 %v7584_v45, %s11953_s27 }
 0x2f8   : > { %1617 = vrot.lane.b32.xlu1 %v1538_v21, %s11971_s23 }
 0x2fa   : > { %1657 = vrot.lane.b32.xlu0 %v7584_v45, %s11955_s15 }
 0x2fc   : > { %1562 = vrot.lane.b32.xlu1 %v1538_v21, %s11959_s26 }
 0x2fe   : > { %1619 = vrot.lane.b32.xlu0 %v7584_v45, %s11971_s23 }
 0x300   : > { %1747 = vrot.lane.b32.xlu1 %v1539_v34, %s11949_s25 }
 0x302   : > { %1743 = vrot.lane.b32.xlu0 %v1538_v21, %s11949_s25 }
 0x304   : > { %1713 = vrot.lane.b32.xlu1 %v1539_v34, %s11953_s27 }
 0x306   : > { %1560 = vrot.lane.b32.xlu0 %v7582_v53, %s11959_s26 }
 0x308   : > { %1693 = vrot.lane.b32.xlu1 %v1539_v34, %s11951_s14 }
 0x30a   : > { %1689 = vrot.lane.b32.xlu0 %v1538_v21, %s11951_s14 }
 0x30c   : > { %1659 = vrot.lane.b32.xlu1 %v1539_v34, %s11955_s15 }
 0x30e   : > { %1564 = vrot.lane.b32.xlu0 %v7584_v45, %s11959_s26 }
 0x310   : > { %1621 = vrot.lane.b32.xlu1 %v1539_v34, %s11971_s23 }
 0x312   : > { %1595 = vrot.lane.b32.xlu0 %v7582_v53, %s11957_s13 }
 0x314   : > { %1601 = vrot.lane.b32.xlu1 %v1539_v34, %s11957_s13 }
 0x316   : > { %1597 = vrot.lane.b32.xlu0 %v1538_v21, %s11957_s13 }
 0x318   : > { %1566 = vrot.lane.b32.xlu1 %v1539_v34, %s11959_s26 }
 0x31a   : > { %1542 = vrot.lane.b32.xlu0 %v1538_v21, %s11967_s24 }
 0x31c   : > { %1546 = vrot.lane.b32.xlu1 %v1539_v34, %s11967_s24 }
 0x31e   : > { %1540 = vrot.lane.b32.xlu0 %v7582_v53, %s11967_s24 }
 0x320   : > { %1544 = vrot.lane.b32.xlu1 %v7584_v45, %s11967_s24 }
 0x322   : > { %1800 = vperm.xlu0 %6295, %v1792_v29  }
 0x324   : > { %1795 = vperm.xlu1 %6296, %v1791_v50  }
 0x354   : > { %v1708_v15 = vpop.permute.xlu0 %1707 }
 0x356   : > { %v1746_v33 = vpop.permute.xlu1 %1745 }
 0x358   : > { %v1742_v6 = vpop.permute.xlu0 %1741 }
 0x35a   : > { %v7640_v62 = vpop.permute.xlu1 %1691 }
 0x35c   : > { %v1654_v43 = vpop.permute.xlu0 %1653 }
 0x35e   : > { %v1710_v19 = vpop.permute.xlu1 %1709 }
 0x360   : > { %v7642_v18 = vpop.permute.xlu0 %1687 }
 0x362   : > { %v7644_v25 = vpop.permute.xlu1 %1599 }
 0x364   : > { %v1616_v49 = vpop.permute.xlu0 %1615 }
 0x366   : > { %v7646_v63 = vpop.permute.xlu1 %1655 }
 0x368   : > { %v1712_v28 = vpop.permute.xlu0 %1711 }
 0x369   : > { %v1715_v36 = vsel %vm12471_vm14, %v1708_v15, %v1712_v28  ;;  %v1717_v23 = vsel %vm12472_vm4, %v1712_v28, %v1708_v15  ;;  %vm12473_vm14 = vcmp.lt.s32.totalorder %v6893_v24, 127 }
 0x36a   : > { %v1719_v9 = vsel %vm7157_vm1, %v1715_v36, 0.0  ;;  %v1720_v57 = vsel %vm7173_vm6, %v1717_v23, 0.0  ;;  %v7656_v56 = vpop.permute.xlu1 %1617  ;;  %vm12474_vm4 = vmmov %vm12473_vm14 }
 0x36b   : > { %v7658_v37 = vrot.slane %v1719_v9, 4  ;;  %v1728_v38 = vrot.slane %v1720_v57, 4 }
 0x36c   : > { %v1658_v16 = vpop.permute.xlu0 %1657 }
 0x36d   : > { %1737 = vst [vmem:[#allocation3 + $0xc8] sm:$0xf0] %v7658_v37  ;;  %1738 = vst [vmem:[#allocation3 + $0x68] sm:$0xf0] %v1728_v38  ;;  %v1661_v41 = vsel %vm12473_vm14, %v1654_v43, %v1658_v16  ;;  %v1663_v27 = vsel %vm12474_vm4, %v1658_v16, %v1654_v43  ;;  %vm12475_vm14 = vcmp.lt.s32.totalorder %v6893_v24, 1 }
 0x36e   : > { %v1665_v1 = vsel %vm7194_vm8, %v1661_v41, 0.0  ;;  %v1666_v2 = vsel %vm7199_vm11, %v1663_v27, 0.0  ;;  %v7669_v59 = vpop.permute.xlu1 %1562  ;;  %vm12476_vm4 = vmmov %vm12475_vm14 }
 0x36f   : > { %v7671_v8 = vrot.slane %v1665_v1, 4  ;;  %v7673_v13 = vrot.slane %v1666_v2, 4 }
 0x370   : > { %v1620_v12 = vpop.permute.xlu0 %1619 }
 0x371   : > { %1683 = vst [vmem:[#allocation3 + $0x70] sm:$0xf0] %v7671_v8  ;;  %1684 = vst [vmem:[#allocation3 + $0x58] sm:$0xf0] %v7673_v13  ;;  %v1623_v54 = vsel %vm12475_vm14, %v1616_v49, %v1620_v12  ;;  %v1625_v21 = vsel %vm12476_vm4, %v1620_v12, %v1616_v49  ;;  %vm12477_vm14 = vcmp.lt.s32.totalorder %v6893_v24, 111 }
 0x372   : > { %v1627_v10 = vsel %vm7337_vm3, %v1625_v21, 0.0  ;;  %v1628_v34 = vsel %vm7341_vm15, %v1623_v54, 0.0  ;;  %v1748_v29 = vpop.permute.xlu1 %1747  ;;  %vm12478_vm4 = vmmov %vm12477_vm14 }
 0x373   : > { %v7685_v50 = vrot.slane %v1627_v10, 4  ;;  %v7687_v15 = vrot.slane %v1628_v34, 4  ;;  %v1751_v54 = vsel %vm12478_vm4, %v1746_v33, %v1742_v6 }
 0x374   : > { %v1744_v43 = vpop.permute.xlu0 %1743 }
 0x375   : > { %1645 = vst [vmem:[#allocation3 + $0x10] sm:$0xf0] %v7685_v50  ;;  %1646 = vst [vmem:[#allocation3 + $0x90] sm:$0xf0] %v7687_v15  ;;  %v1750_v28 = vsel %vm12477_vm14, %v1744_v43, %v1748_v29  ;;  %v1752_v49 = vsel %vm12478_vm4, %v1748_v29, %v1744_v43  ;;  %vm11933_vm14 = vcmask 1043456  }
 0x376   : > { %v1755_v36 = vsel %vm12479_vm2, %v1750_v28, 0.0  ;;  %v1756_v23 = vsel %vm12480_vm13, %v1752_v49, 0.0  ;;  %v1714_v9 = vpop.permute.xlu1 %1713 }
 0x377   : > { %1759 = vst [vmem:[#allocation3 + $0x28] sm:$0xf] %v1755_v36  ;;  %1760 = vst [vmem:[#allocation3 + $0xa0] sm:$0xf] %v1756_v23  ;;  %v1718_v57 = vsel %vm12481_vm10, %v1714_v9, %v1710_v19  ;;  %v1716_v41 = vsel %vm12482_vm5, %v1710_v19, %v1714_v9 }
 0x378   : > { %v1561_v16 = vpop.permute.xlu0 %1560  ;;  %v1722_v27 = vsel %vm7173_vm6, %v1718_v57, 0.0  ;;  %v1721_v2 = vsel %vm7157_vm1, %v1716_v41, 0.0  ;;  %vm12484_vm10 = vmmov %vm12483_vm7 }
 0x379   : > { %v1731_v21 = vrot.slane %v1722_v27, 4  ;;  %vm12485_vm5 = vmmov %vm12478_vm4  ;;  %v1729_v23 = vrot.slane %v1721_v2, 4 }
 0x37a   : > { %v1694_v1 = vpop.permute.xlu1 %1693  ;;  %v1749_v19 = vsel %vm12485_vm5, %v1742_v6, %v1746_v33 }
 0x37b   : > { %v1732_v27 = vsel %vm11933_vm14, %v1728_v38, %v1731_v21 }
 0x37c   : > { %v1690_v12 = vpop.permute.xlu0 %1689 }
 0x37d   : > { %v1696_v10 = vsel %vm12483_vm7, %v1690_v12, %v1694_v1  ;;  %v1698_v34 = vsel %vm12484_vm10, %v1694_v1, %v1690_v12  ;;  %vm12486_vm7 = vcmp.lt.s32.totalorder %v6893_v24, 127  ;;  %vm12488_vm10 = vcmp.lt.s32.totalorder %v6893_v24, 16 }
 0x37e   : > { %v1701_v29 = vsel %vm7281_vm0, %v1696_v10, 0.0  ;;  %v1702_v43 = vsel %vm7285_vm9, %v1698_v34, 0.0  ;;  %v1660_v28 = vpop.permute.xlu1 %1659  ;;  %v1790_v49 = vld [vmem:[#allocation3 + $0xa0] sm:$0xf]  ;;  %v1789_v36 = vld [vmem:[#allocation3 + $0x28] sm:$0xf]  ;;  %vm12487_vm4 = vmmov %vm12486_vm7 }
 0x37f   : > { %1705 = vst [vmem:[#allocation3 + $0xc8] sm:$0xf] %v1701_v29  ;;  %1706 = vst [vmem:[#allocation3 + $0x68] sm:$0xf] %v1702_v43  ;;  %5841 = vmatprep.subr.msk.mxu1 %vm11933_vm14, %v1790_v49  ;;  %v1664_v9 = vsel %vm12486_vm7, %v1660_v28, %v7646_v63  ;;  %v1662_v6 = vsel %vm12487_vm4, %v7646_v63, %v1660_v28  ;;  %vm12490_vm7 = vnez %v12428_v17  ;;  %vm12491_vm4 = vcmp.lt.s32.totalorder %v6893_v24, 113 }
 0x380   : > { %5842 = vmatpush1.msk.msra.mxu1 %vm11933_vm14, %v1789_v36  ;;  %v1565_v33 = vpop.permute.xlu0 %1564  ;;  %vm12489_vm5 = vmmov %vm12488_vm10  ;;  %v1730_v63 = vsel %vm11933_vm14, %v7658_v37, %v1729_v23  ;;  %v1667_v38 = vsel %vm7194_vm8, %v1662_v6, 0.0  ;;  %v1697_v34 = vsel %vm12491_vm4, %v7640_v62, %v7642_v18 }
 0x381   : > { %v1568_v57 = vsel %vm12488_vm10, %v1561_v16, %v1565_v33  ;;  %v1570_v41 = vsel %vm12489_vm5, %v1565_v33, %v1561_v16  ;;  %6299 = vmatprep.subr.msk.mxu1 %vm12480_vm13, %v1751_v54  ;;  %v1668_v16 = vsel %vm7199_vm11, %v1664_v9, 0.0  ;;  %vm12492_vm10 = vmmov %vm12491_vm4  ;;  %vm12493_vm5 = vcmp.lt.s32.totalorder %v6893_v24, 1 }
 0x382   : > { %v1572_v1 = vsel %vm7423_vm12, %v1570_v41, 0.0  ;;  %v1573_v2 = vsel %vm12490_vm7, %v1568_v57, 0.0  ;;  %v1622_v12 = vpop.permute.xlu1 %1621  ;;  %6300 = vmatpush1.msk.msra.mxu1 %vm12479_vm2, %v1749_v19  ;;  %v1695_v37 = vsel %vm12492_vm10, %v7642_v18, %v7640_v62  ;;  %v1677_v19 = vrot.slane %v1668_v16, 4  ;;  %vm12494_vm4 = vmmov %vm12493_vm5 }
 0x383   : > { %v7744_v10 = vrot.slane %v1572_v1, 4  ;;  %v7746_v54 = vrot.slane %v1573_v2, 4  ;;  %1824 = vmatprep.subr.mxu1 %v1732_v27  ;;  %v1624_v29 = vsel %vm12493_vm5, %v7656_v56, %v1622_v12  ;;  %v1675_v36 = vrot.slane %v1667_v38, 4  ;;  %v1777_v38 = vld [vmem:[#allocation3 + $0x70] sm:$0xff] }
 0x384   : > { %v1596_v21 = vpop.permute.xlu0 %1595  ;;  %1825 = vmatpush1.msra.mxu1 %v1730_v63  ;;  %v1626_v23 = vsel %vm12494_vm4, %v1622_v12, %v7656_v56  ;;  %v1630_v33 = vsel %vm7341_vm15, %v1624_v29, 0.0  ;;  %vm12495_vm10 = vcmp.lt.s32.totalorder %v6893_v24, 15  ;;  %vm12497_vm5 = vcmask 1043456   ;;  %v1778_v12 = vld [vmem:[#allocation3 + $0x58] sm:$0xff] }
 0x385   : > { %1591 = vst [vmem:[#allocation3 + $0x40] sm:$0xf0] %v7744_v10  ;;  %1592 = vst [vmem:[#allocation3 + $0xd8] sm:$0xf0] %v7746_v54  ;;  %v1678_v6 = vsel %vm12497_vm5, %v7673_v13, %v1677_v19  ;;  %v1629_v56 = vsel %vm7337_vm3, %v1626_v23, 0.0  ;;  %vm12498_vm4 = vnez %v12432_v32  ;;  %vm12499_vm13 = vnez %v12435_v30 }
 0x386   : > { %v1602_v43 = vpop.permute.xlu1 %1601  ;;  %v1784_v28 = vld [vmem:[#allocation3 + $0x68] sm:$0xff]  ;;  %vm12496_vm14 = vmmov %vm12495_vm10  ;;  %v1639_v13 = vrot.slane %v1630_v33, 4  ;;  %v1637_v63 = vrot.slane %v1629_v56, 4 }
 0x387   : > { %v1783_v49 = vld [vmem:[#allocation3 + $0xc8] sm:$0xff]  ;;  %1826 = vmatprep.subr.mxu1 %v1784_v28 }
 0x388   : > { %1827 = vmatpush1.msra.mxu1 %v1783_v49  ;;  %v1598_v9 = vpop.permute.xlu0 %1597 }
 0x389   : > { %v1604_v62 = vsel %vm12495_vm10, %v1598_v9, %v1602_v43  ;;  %v1606_v18 = vsel %vm12496_vm14, %v1602_v43, %v1598_v9  ;;  %6301 = vmatprep.subr.msk.mxu1 %vm7285_vm9, %v1697_v34  ;;  %vm12500_vm14 = vmmov %vm12497_vm5  ;;  %vm12501_vm10 = vcmp.lt.s32.totalorder %v6893_v24, 16  ;;  %vm12505_vm9 = vcmask 1043456  }
 0x38a   : > { %v1609_v57 = vsel %vm12498_vm4, %v1606_v18, 0.0  ;;  %v1610_v41 = vsel %vm12499_vm13, %v1604_v62, 0.0  ;;  %v1567_v27 = vpop.permute.xlu1 %1566  ;;  %6302 = vmatpush1.msk.msra.mxu1 %vm7281_vm0, %v1695_v37  ;;  %v1676_v1 = vsel %vm12500_vm14, %v7671_v8, %v1675_v36  ;;  %vm12502_vm5 = vmmov %vm12501_vm10  ;;  %vm12503_vm14 = vcmp.lt.s32.totalorder %v6893_v24, 17 }
 0x38b   : > { %1613 = vst [vmem:[#allocation3 + $0x10] sm:$0xf] %v1609_v57  ;;  %1614 = vst [vmem:[#allocation3 + $0x90] sm:$0xf] %v1610_v41  ;;  %1830 = vmatprep.subr.mxu1 %v1678_v6  ;;  %v1569_v2 = vsel %vm12501_vm10, %v7669_v59, %v1567_v27  ;;  %v1571_v16 = vsel %vm12502_vm5, %v1567_v27, %v7669_v59  ;;  %v1640_v43 = vsel %vm12505_vm9, %v7687_v15, %v1639_v13 }
 0x38c   : > { %1831 = vmatpush1.msra.mxu1 %v1676_v1  ;;  %v1543_v34 = vpop.permute.xlu0 %1542  ;;  %v1575_v8 = vsel %vm12490_vm7, %v1569_v2, 0.0  ;;  %vm12504_vm10 = vmmov %vm12503_vm14  ;;  %v1574_v59 = vsel %vm7423_vm12, %v1571_v16, 0.0  ;;  %vm12506_vm5 = vnez %v12418_v61  ;;  %vm12507_vm0 = vnez %v12420_v5 }
 0x38d   : > { %1832 = vmatprep.subr.mxu1 %v1778_v12  ;;  %v1585_v23 = vrot.slane %v1575_v8, 4  ;;  %v1583_v62 = vrot.slane %v1574_v59, 4  ;;  %v5845_v59 = vld [vmem:[%s11757_s7 + $0x10] sm:$0xff] }
 0x38e   : > { %v1547_v37 = vpop.permute.xlu1 %1546  ;;  %1833 = vmatpush1.msra.mxu1 %v1777_v38 }
 0x38f   : > { %v1549_v19 = vsel %vm12503_vm14, %v1543_v34, %v1547_v37  ;;  %v1551_v29 = vsel %vm12504_vm10, %v1547_v37, %v1543_v34  ;;  %1834 = vmatprep.subr.mxu1 %v7584_v45  ;;  %vm12508_vm14 = vmmov %vm12505_vm9  ;;  %vm12509_vm10 = vcmp.lt.s32.totalorder %v6893_v24, 15 }
 0x390   : > { %v1554_v28 = vsel %vm12506_vm5, %v1551_v29, 0.0  ;;  %v1555_v49 = vsel %vm12507_vm0, %v1549_v19, 0.0  ;;  %1835 = vmatpush1.msra.mxu1 %v7582_v53  ;;  %v1638_v36 = vsel %vm12508_vm14, %v7685_v50, %v1637_v63  ;;  %v1603_v45 = vsel %vm12509_vm10, %v1596_v21, %v7644_v25  ;;  %vm12510_vm9 = vmmov %vm12509_vm10  ;;  %v1541_v18 = vpop.permute.xlu0 %1540 }
 0x391   : > { %1558 = vst [vmem:[#allocation3 + $0x40] sm:$0xf] %v1554_v28  ;;  %1559 = vst [vmem:[#allocation3 + $0xd8] sm:$0xf] %v1555_v49  ;;  %1836 = vmatprep.subr.mxu1 %v1640_v43  ;;  %v1605_v15 = vsel %vm12510_vm9, %v7644_v25, %v1596_v21  ;;  %v1586_v50 = vsel %vm12508_vm14, %v7746_v54, %v1585_v23  ;;  %vm12512_vm9 = vcmp.lt.s32.totalorder %v6893_v24, 17  ;;  %v1761_v54 = vld [vmem:[#allocation9] sm:$0xff] }
 0x392   : > { %1837 = vmatpush1.msra.mxu1 %v1638_v36  ;;  %v1772_v9 = vld [vmem:[#allocation3 + $0x90] sm:$0xff]  ;;  %v1545_v53 = vpop.permute.xlu1 %1544  ;;  %vm12511_vm10 = vmmov %vm12508_vm14  ;;  %vm11940_vm14 = vcmask 883712   ;;  %v5846_v43 = vld [vmem:[%s11757_s7 + $0x18] sm:$0xf] }
 0x393   : > { %v1771_v33 = vld [vmem:[#allocation3 + $0x10] sm:$0xff]  ;;  %1838 = vmatprep.subr.mxu1 %v1772_v9  ;;  %v1584_v25 = vsel %vm12511_vm10, %v7744_v10, %v1583_v62  ;;  %v1548_v21 = vsel %vm12512_vm9, %v1541_v18, %v1545_v53  ;;  %vm12513_vm7 = vmmov %vm12512_vm9  ;;  %vm12516_vm9 = vcmp.lt.s32.totalorder %v6893_v24, 127 }
 0x394   : > { %1839 = vmatpush1.msra.mxu1 %v1771_v33  ;;  %v1550_v6 = vsel %vm12513_vm7, %v1545_v53, %v1541_v18  ;;  %v1762_v10 = vld [vmem:[#allocation9 + $0x8] sm:$0xf]  ;;  %vm12514_vm7 = vcmp.lt.s32.totalorder %v6893_v24, 112 }
 0x395   : > { %6303 = vmatprep.subr.msk.mxu1 %vm12499_vm13, %v1603_v45  ;;  %vm12515_vm10 = vmmov %vm12514_vm7 }
 0x396   : > { %6304 = vmatpush1.msk.msra.mxu1 %vm12498_vm4, %v1605_v15 }
 0x397   : > { %1842 = vmatprep.subr.mxu1 %v1586_v50 }
 0x398   : > { %1843 = vmatpush1.msra.mxu1 %v1584_v25  ;;  %v1766_v56 = vld [vmem:[#allocation3 + $0xd8] sm:$0xff]  ;;  %v1765_v57 = vld [vmem:[#allocation3 + $0x40] sm:$0xff] }
 0x399   : > { %1844 = vmatprep.subr.mxu1 %v1766_v56 }
 0x39a   : > { %1845 = vmatpush1.msra.mxu1 %v1765_v57 }
 0x39b   : > { %6305 = vmatprep.subr.msk.mxu1 %vm12507_vm0, %v1548_v21 }
 0x39c   : > { %6306 = vmatpush1.msk.msra.mxu1 %vm12506_vm5, %v1550_v6  ;;  %vm12529_vm5 = vnez %v12385_v40 }
 0x39d   : > { %5843 = vmatmul.mubr.msk.f32.vlgmr.msra.gmra.mxu1 %vm11940_vm14, %v1761_v54  ;;  %v1801_v63 = vpop.permute.xlu0 %1800 }
 0x39e   : > { %1886 = vmatprep.mubr.f32.mxu1 %v12470_v46 }
 0x39f   : > { %v1796_v41 = vpop.permute.xlu1 %1795 }
 0x3a1   : > { %5844 = vmatmul.mubr.msk.f32.gmra.mxu1 %vm11940_vm14, %v1762_v10  ;;  %vm12523_vm14 = vcmp.lt.s32.totalorder %v6893_v24, 112 }
 0x3a2   : > { %2594 = vmatprep.mubr.f32.mxu1 %v12470_v46  ;;  %vm12524_vm0 = vmmov %vm12523_vm14 }
 0x45d   : > { %v1882_v27 = vpop.f32.mrf.mxu1 }
 0x45e   : > { %v1883_v1 = vadd.f32 %v1882_v27, %v1796_v41 }
 0x45f   : > { %v1884_v13 = vpop.f32.mrf.mxu1 }
 0x460   : > { %v7836_v2 = vmax.f32 %v1883_v1, 0.0  ;;  %v1885_v12 = vadd.f32 %v1884_v13, %v1796_v41 }
 0x461   : > { %v1888_v16 = vpop.f32.mrf.mxu1 }
 0x462   : > { %v7838_v38 = vmax.f32 %v1885_v12, 0.0  ;;  %v1889_v34 = vadd.f32 %v1888_v16, %v1801_v63  ;;  %2063 = vrot.lane.b32.xlu0 %v7836_v2, %s11953_s27 }
 0x463   : > { %v1890_v37 = vpop.f32.mrf.mxu1 }
 0x464   : > { %v1895_v8 = vmax.f32 %v1889_v34, 0.0  ;;  %v1891_v19 = vadd.f32 %v1890_v37, %v1801_v63  ;;  %2101 = vrot.lane.b32.xlu1 %v7838_v38, %s11949_s25 }
 0x466   : > { %2007 = vst [vmem:[#allocation3 + $0x70] sm:$0xf] %v1895_v8  ;;  %v1896_v29 = vmax.f32 %v1891_v19, 0.0  ;;  %2097 = vrot.lane.b32.xlu0 %v7836_v2, %s11949_s25 }
 0x468   : > { %2008 = vst [vmem:[#allocation3 + $0x58] sm:$0xf] %v1896_v29  ;;  %2047 = vrot.lane.b32.xlu1 %v7838_v38, %s11951_s14 }
 0x46a   : > { %2009 = vrot.lane.b32.xlu0 %v7836_v2, %s11955_s15 }
 0x46c   : > { %2065 = vrot.lane.b32.xlu1 %v1895_v8, %s11953_s27 }
 0x46e   : > { %2043 = vrot.lane.b32.xlu0 %v7836_v2, %s11951_s14 }
 0x470   : > { %1955 = vrot.lane.b32.xlu1 %v7838_v38, %s11957_s13 }
 0x472   : > { %1971 = vrot.lane.b32.xlu0 %v7836_v2, %s11971_s23 }
 0x474   : > { %2011 = vrot.lane.b32.xlu1 %v1895_v8, %s11955_s15 }
 0x476   : > { %2067 = vrot.lane.b32.xlu0 %v7838_v38, %s11953_s27 }
 0x478   : > { %1973 = vrot.lane.b32.xlu1 %v1895_v8, %s11971_s23 }
 0x47a   : > { %2013 = vrot.lane.b32.xlu0 %v7838_v38, %s11955_s15 }
 0x47c   : > { %1919 = vrot.lane.b32.xlu1 %v1895_v8, %s11959_s26 }
 0x47e   : > { %1975 = vrot.lane.b32.xlu0 %v7838_v38, %s11971_s23 }
 0x480   : > { %2103 = vrot.lane.b32.xlu1 %v1896_v29, %s11949_s25 }
 0x482   : > { %2099 = vrot.lane.b32.xlu0 %v1895_v8, %s11949_s25 }
 0x484   : > { %2069 = vrot.lane.b32.xlu1 %v1896_v29, %s11953_s27 }
 0x486   : > { %1917 = vrot.lane.b32.xlu0 %v7836_v2, %s11959_s26 }
 0x488   : > { %2049 = vrot.lane.b32.xlu1 %v1896_v29, %s11951_s14 }
 0x48a   : > { %2045 = vrot.lane.b32.xlu0 %v1895_v8, %s11951_s14 }
 0x48c   : > { %2015 = vrot.lane.b32.xlu1 %v1896_v29, %s11955_s15 }
 0x48e   : > { %1921 = vrot.lane.b32.xlu0 %v7838_v38, %s11959_s26 }
 0x490   : > { %1977 = vrot.lane.b32.xlu1 %v1896_v29, %s11971_s23 }
 0x492   : > { %1951 = vrot.lane.b32.xlu0 %v7836_v2, %s11957_s13 }
 0x494   : > { %1957 = vrot.lane.b32.xlu1 %v1896_v29, %s11957_s13 }
 0x496   : > { %1953 = vrot.lane.b32.xlu0 %v1895_v8, %s11957_s13 }
 0x498   : > { %1923 = vrot.lane.b32.xlu1 %v1896_v29, %s11959_s26 }
 0x49a   : > { %1899 = vrot.lane.b32.xlu0 %v1895_v8, %s11967_s24 }
 0x49c   : > { %1903 = vrot.lane.b32.xlu1 %v1896_v29, %s11967_s24 }
 0x49e   : > { %1897 = vrot.lane.b32.xlu0 %v7836_v2, %s11967_s24 }
 0x4a0   : > { %1901 = vrot.lane.b32.xlu1 %v7838_v38, %s11967_s24 }
 0x4a2   : > { %2158 = vperm.xlu0 %6295, %v5846_v43  }
 0x4a4   : > { %2153 = vperm.xlu1 %6296, %v5845_v59  }
 0x4d4   : > { %v2064_v28 = vpop.permute.xlu0 %2063 }
 0x4d6   : > { %v2102_v49 = vpop.permute.xlu1 %2101 }
 0x4d8   : > { %v2098_v36 = vpop.permute.xlu0 %2097 }
 0x4da   : > { %v7894_v45 = vpop.permute.xlu1 %2047 }
 0x4dc   : > { %v2010_v15 = vpop.permute.xlu0 %2009 }
 0x4de   : > { %v2066_v23 = vpop.permute.xlu1 %2065 }
 0x4e0   : > { %v7896_v9 = vpop.permute.xlu0 %2043 }
 0x4e2   : > { %v7898_v33 = vpop.permute.xlu1 %1955 }
 0x4e4   : > { %v1972_v62 = vpop.permute.xlu0 %1971 }
 0x4e6   : > { %v7900_v53 = vpop.permute.xlu1 %2011 }
 0x4e8   : > { %v2068_v50 = vpop.permute.xlu0 %2067 }
 0x4e9   : > { %v2071_v18 = vsel %vm12514_vm7, %v2064_v28, %v2068_v50  ;;  %v2073_v25 = vsel %vm12515_vm10, %v2068_v50, %v2064_v28  ;;  %vm12517_vm7 = vmmov %vm12516_vm9  ;;  %vm12518_vm10 = vcmp.lt.s32.totalorder %v6893_v24, 1 }
 0x4ea   : > { %v2075_v21 = vsel %vm7157_vm1, %v2071_v18, 0.0  ;;  %v2076_v6 = vsel %vm7173_vm6, %v2073_v25, 0.0  ;;  %v7910_v56 = vpop.permute.xlu1 %1973 }
 0x4eb   : > { %v7912_v57 = vrot.slane %v2075_v21, 4  ;;  %v2084_v54 = vrot.slane %v2076_v6, 4 }
 0x4ec   : > { %v2014_v10 = vpop.permute.xlu0 %2013 }
 0x4ed   : > { %2093 = vst [vmem:[#allocation3 + $0xc8] sm:$0xf0] %v7912_v57  ;;  %2094 = vst [vmem:[#allocation3 + $0x68] sm:$0xf0] %v2084_v54  ;;  %v2017_v41 = vsel %vm12516_vm9, %v2010_v15, %v2014_v10  ;;  %v2019_v27 = vsel %vm12517_vm7, %v2014_v10, %v2010_v15  ;;  %vm12520_vm7 = vcmp.lt.s32.totalorder %v6893_v24, 111 }
 0x4ee   : > { %v2021_v1 = vsel %vm7194_vm8, %v2017_v41, 0.0  ;;  %v2022_v13 = vsel %vm7199_vm11, %v2019_v27, 0.0  ;;  %v7923_v12 = vpop.permute.xlu1 %1919  ;;  %vm12519_vm9 = vmmov %vm12518_vm10 }
 0x4ef   : > { %v7925_v63 = vrot.slane %v2021_v1, 4  ;;  %v7927_v16 = vrot.slane %v2022_v13, 4 }
 0x4f0   : > { %v1976_v34 = vpop.permute.xlu0 %1975 }
 0x4f1   : > { %2039 = vst [vmem:[#allocation3 + $0x70] sm:$0xf0] %v7925_v63  ;;  %2040 = vst [vmem:[#allocation3 + $0x58] sm:$0xf0] %v7927_v16  ;;  %v1979_v37 = vsel %vm12518_vm10, %v1972_v62, %v1976_v34  ;;  %v1981_v8 = vsel %vm12519_vm9, %v1976_v34, %v1972_v62  ;;  %vm12522_vm9 = vnez %v12311_v3 }
 0x4f2   : > { %v1983_v19 = vsel %vm7337_vm3, %v1981_v8, 0.0  ;;  %v1984_v29 = vsel %vm7341_vm15, %v1979_v37, 0.0  ;;  %v2104_v43 = vpop.permute.xlu1 %2103  ;;  %vm12521_vm10 = vmmov %vm12520_vm7  ;;  %v2107_v37 = vsel %vm12520_vm7, %v2102_v49, %v2098_v36 }
 0x4f3   : > { %v7939_v59 = vrot.slane %v1983_v19, 4  ;;  %v7941_v28 = vrot.slane %v1984_v29, 4 }
 0x4f4   : > { %v2100_v15 = vpop.permute.xlu0 %2099 }
 0x4f5   : > { %2001 = vst [vmem:[#allocation3 + $0x10] sm:$0xf0] %v7939_v59  ;;  %2002 = vst [vmem:[#allocation3 + $0x90] sm:$0xf0] %v7941_v28  ;;  %v2106_v50 = vsel %vm12520_vm7, %v2100_v15, %v2104_v43  ;;  %v2108_v62 = vsel %vm12521_vm10, %v2104_v43, %v2100_v15  ;;  %vm12525_vm10 = vcmp.lt.s32.totalorder %v6893_v24, 113 }
 0x4f6   : > { %v2111_v18 = vsel %vm12479_vm2, %v2106_v50, 0.0  ;;  %v2112_v25 = vsel %vm12522_vm9, %v2108_v62, 0.0  ;;  %v2070_v21 = vpop.permute.xlu1 %2069 }
 0x4f7   : > { %2115 = vst [vmem:[#allocation3 + $0x28] sm:$0xf] %v2111_v18  ;;  %2116 = vst [vmem:[#allocation3 + $0xa0] sm:$0xf] %v2112_v25  ;;  %v2074_v6 = vsel %vm12523_vm14, %v2070_v21, %v2066_v23  ;;  %v2072_v41 = vsel %vm12524_vm0, %v2066_v23, %v2070_v21 }
 0x4f8   : > { %v1918_v10 = vpop.permute.xlu0 %1917  ;;  %v2078_v27 = vsel %vm7173_vm6, %v2074_v6, 0.0  ;;  %v2077_v13 = vsel %vm7157_vm1, %v2072_v41, 0.0  ;;  %vm12526_vm14 = vmmov %vm12525_vm10  ;;  %vm12528_vm6 = vnez %v12382_v39  ;;  %vm12534_vm1 = vcmp.lt.s32.totalorder %v6893_v24, 16 }
 0x4f9   : > { %v2087_v8 = vrot.slane %v2078_v27, 4  ;;  %vm12527_vm0 = vmmov %vm12520_vm7  ;;  %v2085_v25 = vrot.slane %v2077_v13, 4  ;;  %vm12530_vm7 = vcmask 1043456  }
 0x4fa   : > { %v2050_v1 = vpop.permute.xlu1 %2049  ;;  %v2105_v23 = vsel %vm12527_vm0, %v2098_v36, %v2102_v49 }
 0x4fb   : > { %v2088_v27 = vsel %vm12530_vm7, %v2084_v54, %v2087_v8 }
 0x4fc   : > { %v2046_v34 = vpop.permute.xlu0 %2045 }
 0x4fd   : > { %v2052_v19 = vsel %vm12525_vm10, %v2046_v34, %v2050_v1  ;;  %v2054_v29 = vsel %vm12526_vm14, %v2050_v1, %v2046_v34  ;;  %vm12531_vm10 = vcmp.lt.s32.totalorder %v6893_v24, 127  ;;  %vm12532_vm14 = vmmov %vm12530_vm7 }
 0x4fe   : > { %v2057_v43 = vsel %vm12528_vm6, %v2052_v19, 0.0  ;;  %v2058_v15 = vsel %vm12529_vm5, %v2054_v29, 0.0  ;;  %v2016_v50 = vpop.permute.xlu1 %2015  ;;  %v2147_v62 = vld [vmem:[#allocation3 + $0xa0] sm:$0xf]  ;;  %v2146_v18 = vld [vmem:[#allocation3 + $0x28] sm:$0xf]  ;;  %vm12533_vm0 = vmmov %vm12531_vm10 }
 0x4ff   : > { %2061 = vst [vmem:[#allocation3 + $0xc8] sm:$0xf] %v2057_v43  ;;  %2062 = vst [vmem:[#allocation3 + $0x68] sm:$0xf] %v2058_v15  ;;  %5847 = vmatprep.subr.msk.mxu0 %vm12530_vm7, %v2147_v62  ;;  %v2020_v21 = vsel %vm12531_vm10, %v2016_v50, %v7900_v53  ;;  %v2018_v36 = vsel %vm12533_vm0, %v7900_v53, %v2016_v50  ;;  %vm12536_vm10 = vnez %v12428_v17  ;;  %vm12540_vm0 = vcmp.lt.s32.totalorder %v6893_v24, 1 }
 0x500   : > { %5848 = vmatpush1.msk.msra.mxu0 %vm12532_vm14, %v2146_v18  ;;  %v1922_v49 = vpop.permute.xlu0 %1921  ;;  %vm12535_vm6 = vmmov %vm12534_vm1  ;;  %v2023_v54 = vsel %vm7194_vm8, %v2018_v36, 0.0 }
 0x501   : > { %v1925_v6 = vsel %vm12534_vm1, %v1918_v10, %v1922_v49  ;;  %v1927_v41 = vsel %vm12535_vm6, %v1922_v49, %v1918_v10  ;;  %6307 = vmatprep.subr.msk.mxu0 %vm12522_vm9, %v2107_v37  ;;  %vm12537_vm1 = vmmov %vm12530_vm7  ;;  %v2024_v10 = vsel %vm7199_vm11, %v2020_v21, 0.0  ;;  %vm12538_vm6 = vcmp.lt.s32.totalorder %v6893_v24, 113 }
 0x502   : > { %v1929_v1 = vsel %vm7423_vm12, %v1927_v41, 0.0  ;;  %v1930_v13 = vsel %vm12536_vm10, %v1925_v6, 0.0  ;;  %v1978_v34 = vpop.permute.xlu1 %1977  ;;  %6308 = vmatpush1.msk.msra.mxu0 %vm12479_vm2, %v2105_v23  ;;  %v2086_v53 = vsel %vm12537_vm1, %v7912_v57, %v2085_v25  ;;  %v2053_v29 = vsel %vm12538_vm6, %v7894_v45, %v7896_v9  ;;  %vm12539_vm14 = vmmov %vm12538_vm6 }
 0x503   : > { %v7998_v19 = vrot.slane %v1929_v1, 4  ;;  %v8000_v37 = vrot.slane %v1930_v13, 4  ;;  %2181 = vmatprep.subr.mxu0 %v2088_v27  ;;  %v2051_v57 = vsel %vm12539_vm14, %v7896_v9, %v7894_v45  ;;  %v2033_v23 = vrot.slane %v2024_v10, 4  ;;  %vm12541_vm7 = vmmov %vm12540_vm0 }
 0x504   : > { %v1952_v8 = vpop.permute.xlu0 %1951  ;;  %2182 = vmatpush1.msra.mxu0 %v2086_v53  ;;  %v1980_v43 = vsel %vm12540_vm0, %v7910_v56, %v1978_v34  ;;  %v2031_v18 = vrot.slane %v2023_v54, 4  ;;  %v1982_v25 = vsel %vm12541_vm7, %v1978_v34, %v7910_v56  ;;  %vm12542_vm1 = vcmp.lt.s32.totalorder %v6893_v24, 15  ;;  %v2135_v34 = vld [vmem:[#allocation3 + $0x58] sm:$0xff]  ;;  %v2134_v54 = vld [vmem:[#allocation3 + $0x70] sm:$0xff] }
 0x505   : > { %1947 = vst [vmem:[#allocation3 + $0x40] sm:$0xf0] %v7998_v19  ;;  %1948 = vst [vmem:[#allocation3 + $0xd8] sm:$0xf0] %v8000_v37  ;;  %v1986_v49 = vsel %vm7341_vm15, %v1980_v43, 0.0  ;;  %vm12544_vm14 = vcmask 1043456   ;;  %vm12545_vm0 = vnez %v12382_v39 }
 0x506   : > { %v1958_v15 = vpop.permute.xlu1 %1957  ;;  %v2141_v50 = vld [vmem:[#allocation3 + $0x68] sm:$0xff]  ;;  %vm12543_vm6 = vmmov %vm12542_vm1  ;;  %v2034_v36 = vsel %vm12544_vm14, %v7927_v16, %v2033_v23  ;;  %v1985_v56 = vsel %vm7337_vm3, %v1982_v25, 0.0  ;;  %v1995_v16 = vrot.slane %v1986_v49, 4 }
 0x507   : > { %v2140_v62 = vld [vmem:[#allocation3 + $0xc8] sm:$0xff]  ;;  %2183 = vmatprep.subr.mxu0 %v2141_v50  ;;  %vm12546_vm7 = vmmov %vm12544_vm14  ;;  %v1993_v53 = vrot.slane %v1985_v56, 4  ;;  %vm12549_vm14 = vcmp.lt.s32.totalorder %v6893_v24, 17 }
 0x508   : > { %2184 = vmatpush1.msra.mxu0 %v2140_v62  ;;  %v1954_v21 = vpop.permute.xlu0 %1953  ;;  %v2032_v1 = vsel %vm12546_vm7, %v7925_v63, %v2031_v18  ;;  %vm12550_vm7 = vmmov %vm12549_vm14 }
 0x509   : > { %v1960_v45 = vsel %vm12542_vm1, %v1954_v21, %v1958_v15  ;;  %v1962_v9 = vsel %vm12543_vm6, %v1958_v15, %v1954_v21  ;;  %6309 = vmatprep.subr.msk.mxu0 %vm12529_vm5, %v2053_v29  ;;  %vm12547_vm1 = vcmp.lt.s32.totalorder %v6893_v24, 16  ;;  %vm12553_vm5 = vnez %v12420_v5 }
 0x50a   : > { %v1965_v6 = vsel %vm12498_vm4, %v1962_v9, 0.0  ;;  %v1966_v41 = vsel %vm12499_vm13, %v1960_v45, 0.0  ;;  %v1924_v27 = vpop.permute.xlu1 %1923  ;;  %6310 = vmatpush1.msk.msra.mxu0 %vm12545_vm0, %v2051_v57  ;;  %vm12548_vm6 = vmmov %vm12547_vm1 }
 0x50b   : > { %1969 = vst [vmem:[#allocation3 + $0x10] sm:$0xf] %v1965_v6  ;;  %1970 = vst [vmem:[#allocation3 + $0x90] sm:$0xf] %v1966_v41  ;;  %2187 = vmatprep.subr.mxu0 %v2034_v36  ;;  %v1926_v13 = vsel %vm12547_vm1, %v7923_v12, %v1924_v27  ;;  %v1928_v10 = vsel %vm12548_vm6, %v1924_v27, %v7923_v12  ;;  %vm12551_vm1 = vcmask 1043456   ;;  %vm12552_vm6 = vnez %v12418_v61 }
 0x50c   : > { %2188 = vmatpush1.msra.mxu0 %v2032_v1  ;;  %v1900_v29 = vpop.permute.xlu0 %1899  ;;  %v1932_v63 = vsel %vm12536_vm10, %v1926_v13, 0.0  ;;  %v1996_v15 = vsel %vm12551_vm1, %v7941_v28, %v1995_v16  ;;  %v1931_v12 = vsel %vm7423_vm12, %v1928_v10, 0.0 }
 0x50d   : > { %2189 = vmatprep.subr.mxu0 %v2135_v34  ;;  %v1941_v25 = vrot.slane %v1932_v63, 4  ;;  %v1939_v45 = vrot.slane %v1931_v12, 4  ;;  %v5851_v12 = vld [vmem:[%s11757_s7 + $0x20] sm:$0xff] }
 0x50e   : > { %v1904_v57 = vpop.permute.xlu1 %1903  ;;  %2190 = vmatpush1.msra.mxu0 %v2134_v54 }
 0x50f   : > { %v1906_v23 = vsel %vm12549_vm14, %v1900_v29, %v1904_v57  ;;  %v1908_v43 = vsel %vm12550_vm7, %v1904_v57, %v1900_v29  ;;  %2191 = vmatprep.subr.mxu0 %v7838_v38  ;;  %vm12554_vm14 = vmmov %vm12551_vm1  ;;  %vm12555_vm7 = vcmp.lt.s32.totalorder %v6893_v24, 15 }
 0x510   : > { %v1911_v50 = vsel %vm12552_vm6, %v1908_v43, 0.0  ;;  %v1912_v62 = vsel %vm12553_vm5, %v1906_v23, 0.0  ;;  %2192 = vmatpush1.msra.mxu0 %v7836_v2  ;;  %v1994_v18 = vsel %vm12554_vm14, %v7939_v59, %v1993_v53  ;;  %v1959_v38 = vsel %vm12555_vm7, %v1952_v8, %v7898_v33  ;;  %vm12556_vm1 = vmmov %vm12555_vm7  ;;  %v1898_v9 = vpop.permute.xlu0 %1897 }
 0x511   : > { %1915 = vst [vmem:[#allocation3 + $0x40] sm:$0xf] %v1911_v50  ;;  %1916 = vst [vmem:[#allocation3 + $0xd8] sm:$0xf] %v1912_v62  ;;  %2193 = vmatprep.subr.mxu0 %v1996_v15  ;;  %v1961_v28 = vsel %vm12556_vm1, %v7898_v33, %v1952_v8  ;;  %v1942_v59 = vsel %vm12554_vm14, %v8000_v37, %v1941_v25  ;;  %vm12558_vm1 = vcmp.lt.s32.totalorder %v6893_v24, 17  ;;  %v2118_v37 = vld [vmem:[#allocation9 + $0x10] sm:$0xff] }
 0x512   : > { %2194 = vmatpush1.msra.mxu0 %v1994_v18  ;;  %v2129_v21 = vld [vmem:[#allocation3 + $0x90] sm:$0xff]  ;;  %v1902_v2 = vpop.permute.xlu1 %1901  ;;  %vm12557_vm7 = vmmov %vm12554_vm14  ;;  %vm12560_vm14 = vcmask 883712   ;;  %v5852_v15 = vld [vmem:[%s11757_s7 + $0x28] sm:$0xf] }
 0x513   : > { %v2128_v49 = vld [vmem:[#allocation3 + $0x10] sm:$0xff]  ;;  %2195 = vmatprep.subr.mxu0 %v2129_v21  ;;  %v1940_v33 = vsel %vm12557_vm7, %v7998_v19, %v1939_v45  ;;  %v1905_v8 = vsel %vm12558_vm1, %v1898_v9, %v1902_v2  ;;  %vm12559_vm10 = vmmov %vm12558_vm1  ;;  %v2119_v19 = vld [vmem:[#allocation9 + $0x18] sm:$0xf] }
 0x514   : > { %2196 = vmatpush1.msra.mxu0 %v2128_v49  ;;  %v1907_v36 = vsel %vm12559_vm10, %v1902_v2, %v1898_v9  ;;  %vm12561_vm7 = vmmov %vm12560_vm14  ;;  %v2614_v50 = vld [vmem:[%s11759_s9] sm:$0xff]  ;;  %v2615_v62 = vld [vmem:[%s11759_s9 + $0x8] sm:$0xff]  ;;  %vm12562_vm10 = vcmp.lt.s32.totalorder %v6893_v24, 111 }
 0x515   : > { %6311 = vmatprep.subr.msk.mxu0 %vm12499_vm13, %v1959_v38  ;;  %v2616_v18 = vld [vmem:[%s11759_s9 + $0x10] sm:$0xff]  ;;  %v2617_v38 = vld [vmem:[%s11759_s9 + $0x18] sm:$0xff]  ;;  %v2619_v25 = vld [vmem:[%s11759_s9 + $0x28] sm:$0xff] }
 0x516   : > { %6312 = vmatpush1.msk.msra.mxu0 %vm12498_vm4, %v1961_v28  ;;  %v2618_v28 = vld [vmem:[%s11759_s9 + $0x20] sm:$0xff]  ;;  %v2620_v21 = vld [vmem:[%s11759_s9 + $0x30] sm:$0xff]  ;;  %vm12563_vm1 = vmmov %vm12562_vm10 }
 0x517   : > { %2199 = vmatprep.subr.mxu0 %v1942_v59 }
 0x518   : > { %2200 = vmatpush1.msra.mxu0 %v1940_v33  ;;  %v2123_v56 = vld [vmem:[#allocation3 + $0xd8] sm:$0xff]  ;;  %v2122_v6 = vld [vmem:[#allocation3 + $0x40] sm:$0xff] }
 0x519   : > { %2201 = vmatprep.subr.mxu0 %v2123_v56 }
 0x51a   : > { %2202 = vmatpush1.msra.mxu0 %v2122_v6 }
 0x51b   : > { %6313 = vmatprep.subr.msk.mxu0 %vm12553_vm5, %v1905_v8  ;;  %vm12568_vm5 = vnez %v12343_v51 }
 0x51c   : > { %6314 = vmatpush1.msk.msra.mxu0 %vm12552_vm6, %v1907_v36 }
 0x51d   : > { %5849 = vmatmul.mubr.msk.f32.vlgmr.msra.gmra.mxu0 %vm12560_vm14, %v2118_v37  ;;  %v2159_v53 = vpop.permute.xlu0 %2158  ;;  %vm12564_vm14 = vcmp.lt.s32.totalorder %v6893_v24, 113 }
 0x51e   : > { %2243 = vmatprep.mubr.f32.mxu0 %v12470_v46 }
 0x51f   : > { %v2154_v41 = vpop.permute.xlu1 %2153 }
 0x521   : > { %5850 = vmatmul.mubr.msk.f32.gmra.mxu0 %vm12561_vm7, %v2119_v19  ;;  %vm12565_vm7 = vmmov %vm12564_vm14 }
 0x522   : > { %2748 = vmatprep.mubr.f32.mxu0 %v12470_v46 }
 0x5dd   : > { %v2239_v27 = vpop.f32.mrf.mxu0 }
 0x5de   : > { %v2240_v1 = vadd.f32 %v2239_v27, %v2154_v41 }
 0x5df   : > { %v2241_v16 = vpop.f32.mrf.mxu0 }
 0x5e0   : > { %v8090_v13 = vmax.f32 %v2240_v1, 0.0  ;;  %v2242_v34 = vadd.f32 %v2241_v16, %v2154_v41 }
 0x5e1   : > { %v2245_v10 = vpop.f32.mrf.mxu0 }
 0x5e2   : > { %v8092_v54 = vmax.f32 %v2242_v34, 0.0  ;;  %v2246_v29 = vadd.f32 %v2245_v10, %v2159_v53  ;;  %2420 = vrot.lane.b32.xlu0 %v8090_v13, %s11953_s27 }
 0x5e3   : > { %v2247_v57 = vpop.f32.mrf.mxu0 }
 0x5e4   : > { %v2252_v63 = vmax.f32 %v2246_v29, 0.0  ;;  %v2248_v23 = vadd.f32 %v2247_v57, %v2159_v53  ;;  %2458 = vrot.lane.b32.xlu1 %v8092_v54, %s11949_s25 }
 0x5e6   : > { %2364 = vst [vmem:[#allocation3 + $0x70] sm:$0xf] %v2252_v63  ;;  %v2253_v43 = vmax.f32 %v2248_v23, 0.0  ;;  %2454 = vrot.lane.b32.xlu0 %v8090_v13, %s11949_s25 }
 0x5e8   : > { %2365 = vst [vmem:[#allocation3 + $0x58] sm:$0xf] %v2253_v43  ;;  %2404 = vrot.lane.b32.xlu1 %v8092_v54, %s11951_s14 }
 0x5ea   : > { %2366 = vrot.lane.b32.xlu0 %v8090_v13, %s11955_s15 }
 0x5ec   : > { %2422 = vrot.lane.b32.xlu1 %v2252_v63, %s11953_s27 }
 0x5ee   : > { %2400 = vrot.lane.b32.xlu0 %v8090_v13, %s11951_s14 }
 0x5f0   : > { %2312 = vrot.lane.b32.xlu1 %v8092_v54, %s11957_s13 }
 0x5f2   : > { %2328 = vrot.lane.b32.xlu0 %v8090_v13, %s11971_s23 }
 0x5f4   : > { %2368 = vrot.lane.b32.xlu1 %v2252_v63, %s11955_s15 }
 0x5f6   : > { %2424 = vrot.lane.b32.xlu0 %v8092_v54, %s11953_s27 }
 0x5f8   : > { %2330 = vrot.lane.b32.xlu1 %v2252_v63, %s11971_s23 }
 0x5fa   : > { %2370 = vrot.lane.b32.xlu0 %v8092_v54, %s11955_s15 }
 0x5fc   : > { %2276 = vrot.lane.b32.xlu1 %v2252_v63, %s11959_s26 }
 0x5fe   : > { %2332 = vrot.lane.b32.xlu0 %v8092_v54, %s11971_s23 }
 0x600   : > { %2460 = vrot.lane.b32.xlu1 %v2253_v43, %s11949_s25 }
 0x602   : > { %2456 = vrot.lane.b32.xlu0 %v2252_v63, %s11949_s25  ;;  %s12614_s25 = smov 18  }
 0x604   : > { %2426 = vrot.lane.b32.xlu1 %v2253_v43, %s11953_s27  ;;  %s12616_s27 = smov 15  }
 0x606   : > { %2274 = vrot.lane.b32.xlu0 %v8090_v13, %s11959_s26 }
 0x608   : > { %2406 = vrot.lane.b32.xlu1 %v2253_v43, %s11951_s14 }
 0x60a   : > { %2402 = vrot.lane.b32.xlu0 %v2252_v63, %s11951_s14  ;;  %s12615_s14 = smov 16  }
 0x60c   : > { %2372 = vrot.lane.b32.xlu1 %v2253_v43, %s11955_s15  ;;  %s12617_s15 = smov 2  }
 0x60e   : > { %2278 = vrot.lane.b32.xlu0 %v8092_v54, %s11959_s26 }
 0x610   : > { %2334 = vrot.lane.b32.xlu1 %v2253_v43, %s11971_s23 }
 0x612   : > { %2308 = vrot.lane.b32.xlu0 %v8090_v13, %s11957_s13 }
 0x614   : > { %2314 = vrot.lane.b32.xlu1 %v2253_v43, %s11957_s13 }
 0x616   : > { %2310 = vrot.lane.b32.xlu0 %v2252_v63, %s11957_s13  ;;  %s12619_s13 = smov 127  }
 0x618   : > { %2280 = vrot.lane.b32.xlu1 %v2253_v43, %s11959_s26  ;;  %s12618_s26 = smov 126  }
 0x61a   : > { %2256 = vrot.lane.b32.xlu0 %v2252_v63, %s11967_s24 }
 0x61c   : > { %2260 = vrot.lane.b32.xlu1 %v2253_v43, %s11967_s24 }
 0x61e   : > { %2254 = vrot.lane.b32.xlu0 %v8090_v13, %s11967_s24 }
 0x620   : > { %2258 = vrot.lane.b32.xlu1 %v8092_v54, %s11967_s24 }
 0x622   : > { %2515 = vperm.xlu0 %6295, %v5852_v15  }
 0x624   : > { %2510 = vperm.xlu1 %6296, %v5851_v12  }
 0x626   : > { %2623 = vperm.xlu0 %6295, %v2614_v50  }
 0x628   : > { %2628 = vperm.xlu1 %6296, %v2615_v62  }
 0x62a   : > { %2633 = vperm.xlu0 %6295, %v2616_v18  }
 0x62c   : > { %2638 = vperm.xlu1 %6296, %v2617_v38  }
 0x62e   : > { %2643 = vperm.xlu0 %6295, %v2618_v28  }
 0x630   : > { %2648 = vperm.xlu1 %6296, %v2619_v25  }
 0x632   : > { %2653 = vperm.xlu0 %6295, %v2620_v21  }
 0x654   : > { %v2421_v49 = vpop.permute.xlu0 %2420 }
 0x656   : > { %v2459_v45 = vpop.permute.xlu1 %2458 }
 0x658   : > { %v2455_v2 = vpop.permute.xlu0 %2454 }
 0x659   : > { %v8171_v59 = vsel %vm12562_vm10, %v2455_v2, %v2459_v45  ;;  %v8175_v9 = vsel %vm12563_vm1, %v2459_v45, %v2455_v2  ;;  %vm12566_vm10 = vcmp.lt.s32.totalorder %v6893_v24, 112 }
 0x65a   : > { %v2405_v33 = vpop.permute.xlu1 %2404  ;;  %vm12567_vm1 = vmmov %vm12566_vm10 }
 0x65c   : > { %v2367_v8 = vpop.permute.xlu0 %2366 }
 0x65e   : > { %v2423_v36 = vpop.permute.xlu1 %2422 }
 0x660   : > { %v2401_v56 = vpop.permute.xlu0 %2400 }
 0x661   : > { %v8179_v6 = vsel %vm12564_vm14, %v2401_v56, %v2405_v33  ;;  %v8183_v37 = vsel %vm12565_vm7, %v2405_v33, %v2401_v56  ;;  %vm12569_vm14 = vnez %v12347_v60  ;;  %vm12570_vm7 = vcmp.lt.s32.totalorder %v6893_v24, 127 }
 0x662   : > { %v8185_v19 = vpop.permute.xlu1 %2312 }
 0x664   : > { %v2329_v41 = vpop.permute.xlu0 %2328 }
 0x666   : > { %v2369_v27 = vpop.permute.xlu1 %2368 }
 0x668   : > { %v2425_v1 = vpop.permute.xlu0 %2424 }
 0x669   : > { %v2428_v16 = vsel %vm12566_vm10, %v2421_v49, %v2425_v1  ;;  %v2430_v34 = vsel %vm12567_vm1, %v2425_v1, %v2421_v49  ;;  %vm12571_vm10 = vmmov %vm12570_vm7  ;;  %vm12572_vm1 = vcmp.lt.s32.totalorder %v6893_v24, 1 }
 0x66a   : > { %v2432_v53 = vsel %vm12568_vm5, %v2428_v16, 0.0  ;;  %v2433_v10 = vsel %vm12569_vm14, %v2430_v34, 0.0  ;;  %v8195_v29 = vpop.permute.xlu1 %2330 }
 0x66b   : > { %v2440_v57 = vrot.slane %v2432_v53, 4  ;;  %v2441_v63 = vrot.slane %v2433_v10, 4 }
 0x66c   : > { %v2371_v23 = vpop.permute.xlu0 %2370 }
 0x66d   : > { %2450 = vst [vmem:[#allocation3 + $0xc8] sm:$0xf0] %v2440_v57  ;;  %2451 = vst [vmem:[#allocation3 + $0x68] sm:$0xf0] %v2441_v63  ;;  %v2374_v43 = vsel %vm12570_vm7, %v2367_v8, %v2371_v23  ;;  %v2376_v15 = vsel %vm12571_vm10, %v2371_v23, %v2367_v8  ;;  %vm12574_vm10 = vcmp.lt.s32.totalorder %v6893_v24, 111 }
 0x66e   : > { %v2378_v12 = vsel %vm7194_vm8, %v2374_v43, 0.0  ;;  %v2379_v50 = vsel %vm7199_vm11, %v2376_v15, 0.0  ;;  %v8205_v62 = vpop.permute.xlu1 %2276  ;;  %vm12573_vm7 = vmmov %vm12572_vm1 }
 0x66f   : > { %v2386_v18 = vrot.slane %v2378_v12, 4  ;;  %v2387_v38 = vrot.slane %v2379_v50, 4 }
 0x670   : > { %v2333_v28 = vpop.permute.xlu0 %2332 }
 0x671   : > { %2396 = vst [vmem:[#allocation3 + $0x70] sm:$0xf0] %v2386_v18  ;;  %2397 = vst [vmem:[#allocation3 + $0x58] sm:$0xf0] %v2387_v38  ;;  %v2336_v25 = vsel %vm12572_vm1, %v2329_v41, %v2333_v28  ;;  %v2338_v21 = vsel %vm12573_vm7, %v2333_v28, %v2329_v41  ;;  %vm12576_vm7 = vcmp.lt.s32.totalorder %v6893_v24, 112 }
 0x672   : > { %v2340_v49 = vsel %vm7337_vm3, %v2338_v21, 0.0  ;;  %v2341_v45 = vsel %vm7341_vm15, %v2336_v25, 0.0  ;;  %v2461_v2 = vpop.permute.xlu1 %2460  ;;  %vm12575_vm1 = vmmov %vm12574_vm10 }
 0x673   : > { %v8215_v33 = vrot.slane %v2340_v49, 4  ;;  %v8217_v8 = vrot.slane %v2341_v45, 4  ;;  %vm12577_vm6 = vmmov %vm12576_vm7 }
 0x674   : > { %v2457_v56 = vpop.permute.xlu0 %2456 }
 0x675   : > { %2358 = vst [vmem:[#allocation3 + $0x10] sm:$0xf0] %v8215_v33  ;;  %2359 = vst [vmem:[#allocation3 + $0x90] sm:$0xf0] %v8217_v8  ;;  %v2463_v1 = vsel %vm12574_vm10, %v2457_v56, %v2461_v2  ;;  %v2465_v41 = vsel %vm12575_vm1, %v2461_v2, %v2457_v56  ;;  %vm12578_vm10 = vcmask 1043456  }
 0x676   : > { %v2468_v16 = vsel %vm12479_vm2, %v2463_v1, 0.0  ;;  %v2469_v34 = vsel %vm12522_vm9, %v2465_v41, 0.0  ;;  %v2427_v53 = vpop.permute.xlu1 %2426  ;;  %vm12579_vm1 = vmmov %vm12578_vm10 }
 0x677   : > { %2472 = vst [vmem:[#allocation3 + $0x28] sm:$0xf] %v2468_v16  ;;  %2473 = vst [vmem:[#allocation3 + $0xa0] sm:$0xf] %v2469_v34  ;;  %v2429_v10 = vsel %vm12576_vm7, %v2423_v36, %v2427_v53  ;;  %v2431_v23 = vsel %vm12577_vm6, %v2427_v53, %v2423_v36  ;;  %vm12580_vm7 = vcmp.lt.s32.totalorder %v6893_v24, 113 }
 0x678   : > { %v2434_v43 = vsel %vm12568_vm5, %v2429_v10, 0.0  ;;  %v2435_v15 = vsel %vm12569_vm14, %v2431_v23, 0.0  ;;  %v2275_v12 = vpop.permute.xlu0 %2274  ;;  %vm12581_vm6 = vmmov %vm12580_vm7  ;;  %vm12582_vm5 = vnez %v12385_v40  ;;  %vm12587_vm14 = vcmp.lt.s32.totalorder %v6893_v24, 16 }
 0x679   : > { %v2442_v50 = vrot.slane %v2434_v43, 4  ;;  %v2444_v28 = vrot.slane %v2435_v15, 4 }
 0x67a   : > { %v2407_v25 = vpop.permute.xlu1 %2406 }
 0x67b   : > { %v2443_v21 = vsel %vm12578_vm10, %v2440_v57, %v2442_v50  ;;  %v2445_v49 = vsel %vm12579_vm1, %v2441_v63, %v2444_v28  ;;  %vm12583_vm10 = vcmp.lt.s32.totalorder %v6893_v24, 127 }
 0x67c   : > { %v2403_v45 = vpop.permute.xlu0 %2402  ;;  %vm12584_vm1 = vmmov %vm12583_vm10 }
 0x67d   : > { %v2409_v2 = vsel %vm12580_vm7, %v2403_v45, %v2407_v25  ;;  %v2411_v36 = vsel %vm12581_vm6, %v2407_v25, %v2403_v45  ;;  %vm12585_vm7 = vcmask 1043456  }
 0x67e   : > { %v2414_v56 = vsel %vm12545_vm0, %v2409_v2, 0.0  ;;  %v2415_v1 = vsel %vm12582_vm5, %v2411_v36, 0.0  ;;  %v2373_v41 = vpop.permute.xlu1 %2372  ;;  %v2504_v16 = vld [vmem:[#allocation3 + $0xa0] sm:$0xf]  ;;  %v2503_v34 = vld [vmem:[#allocation3 + $0x28] sm:$0xf]  ;;  %vm12586_vm6 = vmmov %vm12585_vm7 }
 0x67f   : > { %2418 = vst [vmem:[#allocation3 + $0xc8] sm:$0xf] %v2414_v56  ;;  %2419 = vst [vmem:[#allocation3 + $0x68] sm:$0xf] %v2415_v1  ;;  %v2375_v57 = vsel %vm12583_vm10, %v2369_v27, %v2373_v41  ;;  %v2377_v63 = vsel %vm12584_vm1, %v2373_v41, %v2369_v27  ;;  %5853 = vmatprep.subr.msk.mxu1 %vm12585_vm7, %v2504_v16  ;;  %vm12589_vm1 = vnez %v12428_v17 }
 0x680   : > { %v2380_v53 = vsel %vm7194_vm8, %v2375_v57, 0.0  ;;  %v2381_v10 = vsel %vm7199_vm11, %v2377_v63, 0.0  ;;  %5854 = vmatpush1.msk.msra.mxu1 %vm12586_vm6, %v2503_v34  ;;  %v2279_v23 = vpop.permute.xlu0 %2278  ;;  %vm12588_vm10 = vmmov %vm12587_vm14 }
 0x681   : > { %v2388_v43 = vrot.slane %v2380_v53, 4  ;;  %v2390_v15 = vrot.slane %v2381_v10, 4  ;;  %v2282_v50 = vsel %vm12587_vm14, %v2275_v12, %v2279_v23  ;;  %v2284_v28 = vsel %vm12588_vm10, %v2279_v23, %v2275_v12  ;;  %6315 = vmatprep.subr.msk.mxu1 %vm12522_vm9, %v8175_v9  ;;  %vm12590_vm7 = vmmov %vm12586_vm6 }
 0x682   : > { %v2286_v27 = vsel %vm7423_vm12, %v2284_v28, 0.0  ;;  %v2287_v25 = vsel %vm12589_vm1, %v2282_v50, 0.0  ;;  %v2335_v45 = vpop.permute.xlu1 %2334  ;;  %6316 = vmatpush1.msk.msra.mxu1 %vm12479_vm2, %v8171_v59  ;;  %vm12591_vm14 = vmmov %vm12586_vm6  ;;  %vm12592_vm6 = vcmp.lt.s32.totalorder %v6893_v24, 1  ;;  %vm12605_vm9 = vnez %v12420_v5 }
 0x683   : > { %v2389_v2 = vsel %vm12590_vm7, %v2386_v18, %v2388_v43  ;;  %v2391_v36 = vsel %vm12591_vm14, %v2387_v38, %v2390_v15  ;;  %v2294_v12 = vrot.slane %v2286_v27, 4  ;;  %v2295_v56 = vrot.slane %v2287_v25, 4  ;;  %2538 = vmatprep.subr.mxu1 %v2445_v49  ;;  %vm12593_vm10 = vmmov %vm12592_vm6 }
 0x684   : > { %v2337_v9 = vsel %vm12592_vm6, %v8195_v29, %v2335_v45  ;;  %v2339_v1 = vsel %vm12593_vm10, %v2335_v45, %v8195_v29  ;;  %v2309_v41 = vpop.permute.xlu0 %2308  ;;  %2539 = vmatpush1.msra.mxu1 %v2443_v21  ;;  %vm12594_vm7 = vcmp.lt.s32.totalorder %v6893_v24, 15  ;;  %vm12596_vm6 = vcmask 1043456  }
 0x685   : > { %2304 = vst [vmem:[#allocation3 + $0x40] sm:$0xf0] %v2294_v12  ;;  %2305 = vst [vmem:[#allocation3 + $0xd8] sm:$0xf0] %v2295_v56  ;;  %v2342_v59 = vsel %vm7337_vm3, %v2339_v1, 0.0  ;;  %v2343_v18 = vsel %vm7341_vm15, %v2337_v9, 0.0  ;;  %v2316_v38 = vsel %vm12594_vm7, %v2309_v41, %v8185_v19 }
 0x686   : > { %vm12595_vm14 = vmmov %vm12594_vm7  ;;  %v2350_v16 = vrot.slane %v2342_v59, 4  ;;  %v2352_v29 = vrot.slane %v2343_v18, 4  ;;  %v2315_v34 = vpop.permute.xlu1 %2314  ;;  %v2498_v21 = vld [vmem:[#allocation3 + $0x68] sm:$0xff]  ;;  %v2491_v9 = vld [vmem:[#allocation3 + $0x70] sm:$0xff] }
 0x687   : > { %v2318_v49 = vsel %vm12595_vm14, %v8185_v19, %v2309_v41  ;;  %v2497_v57 = vld [vmem:[#allocation3 + $0xc8] sm:$0xff]  ;;  %2540 = vmatprep.subr.mxu1 %v2498_v21  ;;  %vm12597_vm10 = vmmov %vm12596_vm6 }
 0x688   : > { %v2351_v63 = vsel %vm12596_vm6, %v8215_v33, %v2350_v16  ;;  %v2353_v53 = vsel %vm12597_vm10, %v8217_v8, %v2352_v29  ;;  %2541 = vmatpush1.msra.mxu1 %v2497_v57  ;;  %v2311_v10 = vpop.permute.xlu0 %2310  ;;  %vm12598_vm2 = vmmov %vm12594_vm7  ;;  %v2475_v57 = vld [vmem:[#allocation9 + $0x20] sm:$0xff] }
 0x689   : > { %v2317_v23 = vsel %vm12594_vm7, %v2311_v10, %v2315_v34  ;;  %v2319_v19 = vsel %vm12598_vm2, %v2315_v34, %v2311_v10  ;;  %6317 = vmatprep.subr.msk.mxu1 %vm12582_vm5, %v8183_v37  ;;  %vm12599_vm2 = vcmp.lt.s32.totalorder %v6893_v24, 16  ;;  %vm12601_vm10 = vmmov %vm12596_vm6  ;;  %vm12602_vm7 = vcmp.lt.s32.totalorder %v6893_v24, 17 }
 0x68a   : > { %v2322_v43 = vsel %vm12498_vm4, %v2319_v19, 0.0  ;;  %v2323_v33 = vsel %vm12499_vm13, %v2317_v23, 0.0  ;;  %v2281_v15 = vpop.permute.xlu1 %2280  ;;  %6318 = vmatpush1.msk.msra.mxu1 %vm12545_vm0, %v8179_v6  ;;  %vm12600_vm14 = vmmov %vm12599_vm2  ;;  %v2492_v6 = vld [vmem:[#allocation3 + $0x58] sm:$0xff]  ;;  %vm12678_vm0 = vcmp.lt.s32.totalorder %v6893_v24, 16 }
 0x68b   : > { %2326 = vst [vmem:[#allocation3 + $0x10] sm:$0xf] %v2322_v43  ;;  %2327 = vst [vmem:[#allocation3 + $0x90] sm:$0xf] %v2323_v33  ;;  %v2283_v8 = vsel %vm12599_vm2, %v8205_v62, %v2281_v15  ;;  %v2285_v37 = vsel %vm12600_vm14, %v2281_v15, %v8205_v62  ;;  %2544 = vmatprep.subr.mxu1 %v2391_v36  ;;  %vm12604_vm14 = vnez %v12418_v61 }
 0x68c   : > { %v2288_v50 = vsel %vm7423_vm12, %v2285_v37, 0.0  ;;  %v2289_v28 = vsel %vm12589_vm1, %v2283_v8, 0.0  ;;  %v2257_v27 = vpop.permute.xlu0 %2256  ;;  %2545 = vmatpush1.msra.mxu1 %v2389_v2  ;;  %vm12603_vm2 = vmmov %vm12602_vm7  ;;  %v2607_v37 = vld [vmem:[%s11758_s8] sm:$0xff] }
 0x68d   : > { %v2296_v25 = vrot.slane %v2288_v50, 4  ;;  %v2298_v45 = vrot.slane %v2289_v28, 4  ;;  %2546 = vmatprep.subr.mxu1 %v2492_v6  ;;  %v2608_v50 = vld [vmem:[%s11758_s8 + $0x8] sm:$0xff]  ;;  %v2609_v28 = vld [vmem:[%s11758_s8 + $0x10] sm:$0xff]  ;;  %v2611_v6 = vld [vmem:[%s11758_s8 + $0x20] sm:$0xff] }
 0x68e   : > { %v2261_v1 = vpop.permute.xlu1 %2260  ;;  %2547 = vmatpush1.msra.mxu1 %v2491_v9  ;;  %vm12679_vm5 = vmmov %vm12678_vm0 }
 0x68f   : > { %v2297_v41 = vsel %vm12596_vm6, %v2294_v12, %v2296_v25  ;;  %v2299_v62 = vsel %vm12601_vm10, %v2295_v56, %v2298_v45  ;;  %v2263_v36 = vsel %vm12602_vm7, %v2257_v27, %v2261_v1  ;;  %v2265_v59 = vsel %vm12603_vm2, %v2261_v1, %v2257_v27  ;;  %2548 = vmatprep.subr.mxu1 %v8092_v54  ;;  %vm12606_vm6 = vmmov %vm12603_vm2  ;;  %v2610_v27 = vld [vmem:[%s11758_s8 + $0x18] sm:$0xff]  ;;  %v2612_v25 = vld [vmem:[%s11758_s8 + $0x28] sm:$0xff] }
 0x690   : > { %v2268_v2 = vsel %vm12604_vm14, %v2265_v59, 0.0  ;;  %v2269_v18 = vsel %vm12605_vm9, %v2263_v36, 0.0  ;;  %2549 = vmatpush1.msra.mxu1 %v8090_v13  ;;  %v2255_v12 = vpop.permute.xlu0 %2254  ;;  %vm12607_vm10 = vmmov %vm12603_vm2  ;;  %vm12608_vm7 = vcmask 883712   ;;  %v2613_v45 = vld [vmem:[%s11758_s8 + $0x30] sm:$0xff] }
 0x691   : > { %2272 = vst [vmem:[#allocation3 + $0x40] sm:$0xf] %v2268_v2  ;;  %2273 = vst [vmem:[#allocation3 + $0xd8] sm:$0xf] %v2269_v18  ;;  %2550 = vmatprep.subr.mxu1 %v2353_v53 }
 0x692   : > { %v2259_v56 = vpop.permute.xlu1 %2258  ;;  %2551 = vmatpush1.msra.mxu1 %v2351_v63  ;;  %v2486_v16 = vld [vmem:[#allocation3 + $0x90] sm:$0xff]  ;;  %vm12609_vm2 = vmmov %vm12608_vm7 }
 0x693   : > { %v2485_v29 = vld [vmem:[#allocation3 + $0x10] sm:$0xff]  ;;  %v2262_v34 = vsel %vm12606_vm6, %v2255_v12, %v2259_v56  ;;  %v2264_v54 = vsel %vm12607_vm10, %v2259_v56, %v2255_v12  ;;  %2552 = vmatprep.subr.mxu1 %v2486_v16  ;;  %vm12610_vm6 = vcmask 1043456  }
 0x694   : > { %2553 = vmatpush1.msra.mxu1 %v2485_v29  ;;  %vm12611_vm10 = vmmov %vm12610_vm6 }
 0x695   : > { %6319 = vmatprep.subr.msk.mxu1 %vm12499_vm13, %v2316_v38  ;;  %v2476_v38 = vld [vmem:[#allocation9 + $0x28] sm:$0xf] }
 0x696   : > { %6320 = vmatpush1.msk.msra.mxu1 %vm12498_vm4, %v2318_v49 }
 0x697   : > { %2556 = vmatprep.subr.mxu1 %v2299_v62 }
 0x698   : > { %2557 = vmatpush1.msra.mxu1 %v2297_v41  ;;  %v2480_v13 = vld [vmem:[#allocation3 + $0xd8] sm:$0xff]  ;;  %v2479_v21 = vld [vmem:[#allocation3 + $0x40] sm:$0xff] }
 0x699   : > { %2558 = vmatprep.subr.mxu1 %v2480_v13 }
 0x69a   : > { %2559 = vmatpush1.msra.mxu1 %v2479_v21 }
 0x69b   : > { %6321 = vmatprep.subr.msk.mxu1 %vm12605_vm9, %v2262_v34 }
 0x69c   : > { %6322 = vmatpush1.msk.msra.mxu1 %vm12604_vm14, %v2264_v54 }
 0x69d   : > { %5855 = vmatmul.mubr.msk.f32.vlgmr.msra.gmra.mxu1 %vm12608_vm7, %v2475_v57  ;;  %v2516_v10 = vpop.permute.xlu0 %2515  ;;  %vm2656_vm7 = vcmask 97280  }
 0x69e   : > { %2600 = vmatprep.mubr.f32.mxu1 %v12470_v46 }
 0x69f   : > { %v2511_v43 = vpop.permute.xlu1 %2510 }
 0x6a1   : > { %5856 = vmatmul.mubr.msk.f32.gmra.mxu1 %vm12609_vm2, %v2476_v38  ;;  %v2624_v9 = vpop.permute.xlu0 %2623  ;;  %vm12672_vm2 = vcmp.lt.s32.totalorder %v6893_v24, 32 }
 0x6a3   : > { %v2629_v12 = vpop.permute.xlu1 %2628 }
 0x6a5   : > { %v2634_v34 = vpop.permute.xlu0 %2633 }
 0x6a7   : > { %v8492_v21 = vpop.permute.xlu1 %2638 }
 0x6a9   : > { %v8494_v57 = vpop.permute.xlu0 %2643 }
 0x6ab   : > { %v8504_v38 = vpop.permute.xlu1 %2648 }
 0x75d   : > { %v2596_v49 = vpop.f32.mrf.mxu1 }
 0x75e   : > { %v2597_v8 = vadd.f32 %v2596_v49, %v2511_v43  ;;  %v8506_v49 = vpop.permute.xlu0 %2653 }
 0x75f   : > { %v2598_v63 = vpop.f32.mrf.mxu1 }
 0x760   : > { %v2599_v15 = vadd.f32 %v2598_v63, %v2511_v43 }
 0x761   : > { %v2602_v53 = vpop.f32.mrf.mxu1 }
 0x762   : > { %v2603_v33 = vadd.f32 %v2602_v53, %v2516_v10 }
 0x763   : > { %v2604_v23 = vpop.f32.mrf.mxu1 }
 0x764   : > { %v2605_v19 = vadd.f32 %v2604_v23, %v2516_v10 }
 0x766   : > { %5857 = vmatprep.subr.msk.mxu0 %vm12610_vm6, %v2605_v19  ;;  %vm12673_vm6 = vmmov %vm12672_vm2 }
 0x767   : > { %5858 = vmatpush1.msk.msra.mxu0 %vm12611_vm10, %v2603_v33  ;;  %vm12674_vm10 = vnez %v12444_v22 }
 0x768   : > { %2714 = vmatprep.subr.mxu0 %v2599_v15 }
 0x769   : > { %2715 = vmatpush1.msra.mxu0 %v2597_v8 }
 0x76a   : > { %5859 = vmatmul.mubr.msk.f32.vlgmr.msra.gmra.mxu0 %vm2656_vm7, %v2607_v37 }
 0x76b   : > { %2754 = vmatprep.mubr.f32.mxu0 %v12470_v46 }
 0x76e   : > { %5860 = vmatmul.mubr.msk.f32.gmra.mxu0 %vm2656_vm7, %v2608_v50 }
 0x76f   : > { %2760 = vmatprep.mubr.f32.mxu0 %v12470_v46 }
 0x772   : > { %5861 = vmatmul.mubr.msk.f32.gmra.mxu0 %vm2656_vm7, %v2609_v28 }
 0x773   : > { %2766 = vmatprep.mubr.f32.mxu0 %v12470_v46 }
 0x776   : > { %5862 = vmatmul.mubr.msk.f32.gmra.mxu0 %vm2656_vm7, %v2610_v27 }
 0x777   : > { %2772 = vmatprep.mubr.f32.mxu0 %v12470_v46 }
 0x77a   : > { %5863 = vmatmul.mubr.msk.f32.gmra.mxu0 %vm2656_vm7, %v2611_v6 }
 0x77b   : > { %2778 = vmatprep.mubr.f32.mxu0 %v12470_v46 }
 0x77e   : > { %5864 = vmatmul.mubr.msk.f32.gmra.mxu0 %vm2656_vm7, %v2612_v25 }
 0x77f   : > { %2784 = vmatprep.mubr.f32.mxu0 %v12470_v46 }
 0x782   : > { %5865 = vmatmul.mubr.msk.f32.gmra.mxu0 %vm2656_vm7, %v2613_v45  ;;  %vm12675_vm7 = vnez %v12441_v44 }
 0x82a   : > { %v2750_v1 = vpop.f32.mrf.mxu0 }
 0x82b   : > { %v2751_v41 = vadd.f32 %v2750_v1, %v2624_v9 }
 0x82c   : > { %v2752_v36 = vpop.f32.mrf.mxu0 }
 0x82d   : > { %v8380_v62 = vmax.f32 %v2751_v41, 0.0  ;;  %v2753_v59 = vadd.f32 %v2752_v36, %v2624_v9 }
 0x82e   : > { %v2756_v18 = vpop.f32.mrf.mxu0 }
 0x82f   : > { %3511 = vrot.lane.b32.xlu0 %v8380_v62, %s12072_s28  ;;  %2805 = vrot.lane.b32.xlu1 %v8380_v62, %s6480_s18  ;;  %v8390_v2 = vmax.f32 %v2753_v59, 0.0  ;;  %v2757_v56 = vadd.f32 %v2756_v18, %v2629_v12 }
 0x830   : > { %v2758_v29 = vpop.f32.mrf.mxu0 }
 0x831   : > { %v8452_v16 = vmax.f32 %v2757_v56, 0.0  ;;  %v2759_v54 = vadd.f32 %v2758_v29, %v2629_v12 }
 0x832   : > { %v2762_v27 = vpop.f32.mrf.mxu0 }
 0x833   : > { %4049 = vrot.lane.b32.xlu0 %v8380_v62, %s11971_s23  ;;  %2875 = vrot.lane.b32.xlu1 %v8380_v62, %s11973_s16  ;;  %v8490_v13 = vmax.f32 %v2759_v54, 0.0  ;;  %v2763_v6 = vadd.f32 %v2762_v27, %v2634_v34 }
 0x834   : > { %v2764_v36 = vpop.f32.mrf.mxu0 }
 0x835   : > { %v8568_v9 = vmax.f32 %v2763_v6, 0.0  ;;  %v2765_v59 = vadd.f32 %v2764_v36, %v2634_v34 }
 0x837   : > { %2819 = vrot.lane.b32.xlu0 %v8390_v2, %s6480_s18  ;;  %2945 = vrot.lane.b32.xlu1 %v8380_v62, %s11969_s29  ;;  %v8586_v56 = vmax.f32 %v2765_v59, 0.0 }
 0x83b   : > { %2889 = vrot.lane.b32.xlu0 %v8390_v2, %s11973_s16  ;;  %3015 = vrot.lane.b32.xlu1 %v8380_v62, %s12612_s20 }
 0x83f   : > { %2959 = vrot.lane.b32.xlu0 %v8390_v2, %s11969_s29  ;;  %3085 = vrot.lane.b32.xlu1 %v8380_v62, %s12613_s30  ;;  %s12623_s29 = smov 97  }
 0x843   : > { %3029 = vrot.lane.b32.xlu0 %v8390_v2, %s12612_s20  ;;  %3231 = vrot.lane.b32.xlu1 %v8380_v62, %s12614_s25 }
 0x847   : > { %3099 = vrot.lane.b32.xlu0 %v8390_v2, %s12613_s30  ;;  %3301 = vrot.lane.b32.xlu1 %v8380_v62, %s11967_s24 }
 0x84b   : > { %3245 = vrot.lane.b32.xlu0 %v8390_v2, %s12614_s25  ;;  %3371 = vrot.lane.b32.xlu1 %v8380_v62, %s12615_s14 }
 0x84f   : > { %3315 = vrot.lane.b32.xlu0 %v8390_v2, %s11967_s24  ;;  %3441 = vrot.lane.b32.xlu1 %v8380_v62, %s12616_s27  ;;  %s12622_s24 = smov 113  }
 0x853   : > { %3455 = vrot.lane.b32.xlu0 %v8390_v2, %s12616_s27  ;;  %3979 = vrot.lane.b32.xlu1 %v8380_v62, %s12617_s15 }
 0x857   : > { %3993 = vrot.lane.b32.xlu0 %v8390_v2, %s12617_s15  ;;  %4203 = vrot.lane.b32.xlu1 %v8380_v62, %s12618_s26 }
 0x85b   : > { %4217 = vrot.lane.b32.xlu0 %v8390_v2, %s12618_s26  ;;  %4133 = vrot.lane.b32.xlu1 %v8380_v62, %s12619_s13 }
 0x85f   : > { %4147 = vrot.lane.b32.xlu0 %v8390_v2, %s12619_s13  ;;  %4654 = vrot.lane.b32.xlu1 %v8380_v62, %s12620_s17 }
 0x863   : > { %4668 = vrot.lane.b32.xlu0 %v8390_v2, %s12620_s17  ;;  %5245 = vrot.lane.b32.xlu1 %v8380_v62, %s12621_s19 }
 0x867   : > { %5259 = vrot.lane.b32.xlu0 %v8390_v2, %s12621_s19  ;;  %4584 = vrot.lane.b32.xlu1 %v8380_v62, %s12622_s24 }
 0x86b   : > { %4598 = vrot.lane.b32.xlu0 %v8390_v2, %s12622_s24  ;;  %5175 = vrot.lane.b32.xlu1 %v8380_v62, %s12623_s29 }
 0x86f   : > { %5189 = vrot.lane.b32.xlu0 %v8390_v2, %s12623_s29  ;;  %3385 = vrot.lane.b32.xlu1 %v8390_v2, %s12615_s14 }
 0x873   : > { %2807 = vrot.lane.b32.xlu0 %v8452_v16, %s6480_s18  ;;  %3525 = vrot.lane.b32.xlu1 %v8390_v2, %s12072_s28 }
 0x877   : > { %2877 = vrot.lane.b32.xlu0 %v8452_v16, %s11973_s16  ;;  %4063 = vrot.lane.b32.xlu1 %v8390_v2, %s11971_s23  ;;  %s12625_s23 = smov 17   ;;  %s12626_s16 = smov 114  }
 0x87b   : > { %2947 = vrot.lane.b32.xlu0 %v8452_v16, %s12624_s0  ;;  %4205 = vrot.lane.b32.xlu1 %v8452_v16, %s12618_s26 }
 0x87f   : > { %3017 = vrot.lane.b32.xlu0 %v8452_v16, %s12612_s20  ;;  %4135 = vrot.lane.b32.xlu1 %v8452_v16, %s12619_s13 }
 0x883   : > { %3087 = vrot.lane.b32.xlu0 %v8452_v16, %s12613_s30  ;;  %4656 = vrot.lane.b32.xlu1 %v8452_v16, %s12620_s17 }
 0x887   : > { %3233 = vrot.lane.b32.xlu0 %v8452_v16, %s12614_s25  ;;  %5247 = vrot.lane.b32.xlu1 %v8452_v16, %s12621_s19 }
 0x88b   : > { %3303 = vrot.lane.b32.xlu0 %v8452_v16, %s12625_s23  ;;  %4586 = vrot.lane.b32.xlu1 %v8452_v16, %s12622_s24 }
 0x88f   : > { %3373 = vrot.lane.b32.xlu0 %v8452_v16, %s12615_s14  ;;  %5177 = vrot.lane.b32.xlu1 %v8452_v16, %s12623_s29 }
 0x893   : > { %3443 = vrot.lane.b32.xlu0 %v8452_v16, %s12616_s27  ;;  %4516 = vrot.lane.b32.xlu1 %v8452_v16, %s12626_s16 }
 0x897   : > { %3513 = vrot.lane.b32.xlu0 %v8452_v16, %s12072_s28  ;;  %2821 = vrot.lane.b32.xlu1 %v8490_v13, %s6480_s18 }
 0x89b   : > { %3981 = vrot.lane.b32.xlu0 %v8452_v16, %s12617_s15  ;;  %2891 = vrot.lane.b32.xlu1 %v8490_v13, %s12627_s1 }
 0x89f   : > { %4051 = vrot.lane.b32.xlu0 %v8452_v16, %s12628_s2  ;;  %2961 = vrot.lane.b32.xlu1 %v8490_v13, %s12624_s0 }
 0x8a1   : > { %v8512_v63 = vpop.permute.xlu0 %3511  ;;  %v8514_v53 = vpop.permute.xlu1 %2805 }
 0x8a2   : > { %12629 = vst [vmem:[#allocation56_spill] sm:$0xff] %v8512_v63 }
 0x8a3   : > { %3387 = vrot.lane.b32.xlu0 %v8490_v13, %s12615_s14  ;;  %3031 = vrot.lane.b32.xlu1 %v8490_v13, %s12612_s20 }
 0x8a5   : > { %v8520_v10 = vpop.permute.xlu0 %4049  ;;  %v8522_v23 = vpop.permute.xlu1 %2875 }
 0x8a6   : > { %12630 = vst [vmem:[#allocation57_spill] sm:$0xff] %v8520_v10 }
 0x8a7   : > { %4219 = vrot.lane.b32.xlu0 %v8490_v13, %s12618_s26  ;;  %3101 = vrot.lane.b32.xlu1 %v8490_v13, %s12613_s30 }
 0x8a9   : > { %v8528_v19 = vpop.permute.xlu0 %2819  ;;  %v8530_v43 = vpop.permute.xlu1 %2945 }
 0x8ab   : > { %4149 = vrot.lane.b32.xlu0 %v8490_v13, %s12619_s13  ;;  %3247 = vrot.lane.b32.xlu1 %v8490_v13, %s12614_s25 }
 0x8ad   : > { %v8536_v33 = vpop.permute.xlu0 %2889  ;;  %v8538_v15 = vpop.permute.xlu1 %3015 }
 0x8ae   : > { %12631 = vst [vmem:[#allocation58_spill] sm:$0xff] %v8538_v15 }
 0x8af   : > { %4670 = vrot.lane.b32.xlu0 %v8490_v13, %s12620_s17  ;;  %3317 = vrot.lane.b32.xlu1 %v8490_v13, %s12625_s23 }
 0x8b1   : > { %v8544_v8 = vpop.permute.xlu0 %2959  ;;  %v8546_v37 = vpop.permute.xlu1 %3085 }
 0x8b2   : > { %12632 = vst [vmem:[#allocation59_spill] sm:$0xff] %v8546_v37 }
 0x8b3   : > { %5261 = vrot.lane.b32.xlu0 %v8490_v13, %s12621_s19  ;;  %3527 = vrot.lane.b32.xlu1 %v8490_v13, %s12072_s28 }
 0x8b5   : > { %v8552_v50 = vpop.permute.xlu0 %3029  ;;  %v8554_v28 = vpop.permute.xlu1 %3231 }
 0x8b6   : > { %12633 = vst [vmem:[#allocation60_spill] sm:$0xff] %v8552_v50  ;;  %12634 = vst [vmem:[#allocation61_spill] sm:$0xff] %v8554_v28 }
 0x8b7   : > { %4600 = vrot.lane.b32.xlu0 %v8490_v13, %s12622_s24  ;;  %3457 = vrot.lane.b32.xlu1 %v8490_v13, %s12616_s27 }
 0x8b9   : > { %v8560_v25 = vpop.permute.xlu0 %3099  ;;  %v8562_v45 = vpop.permute.xlu1 %3301 }
 0x8ba   : > { %12635 = vst [vmem:[#allocation62_spill] sm:$0xff] %v8560_v25  ;;  %12636 = vst [vmem:[#allocation63_spill] sm:$0xff] %v8562_v45 }
 0x8bb   : > { %5191 = vrot.lane.b32.xlu0 %v8490_v13, %s12623_s29  ;;  %4065 = vrot.lane.b32.xlu1 %v8490_v13, %s12628_s2 }
 0x8bd   : > { %v8570_v1 = vpop.permute.xlu0 %3245  ;;  %v8572_v41 = vpop.permute.xlu1 %3371 }
 0x8be   : > { %12637 = vst [vmem:[#allocation64_spill] sm:$0xff] %v8570_v1 }
 0x8bf   : > { %3515 = vrot.lane.b32.xlu0 %v8568_v9, %s12072_s28  ;;  %3995 = vrot.lane.b32.xlu1 %v8490_v13, %s12617_s15 }
 0x8c1   : > { %v8578_v18 = vpop.permute.xlu0 %3315  ;;  %v8580_v12 = vpop.permute.xlu1 %3441 }
 0x8c2   : > { %12638 = vst [vmem:[#allocation65_spill] sm:$0xff] %v8578_v18  ;;  %12639 = vst [vmem:[#allocation66_spill] sm:$0xff] %v8580_v12 }
 0x8c3   : > { %4053 = vrot.lane.b32.xlu0 %v8568_v9, %s12628_s2  ;;  %2809 = vrot.lane.b32.xlu1 %v8568_v9, %s6480_s18 }
 0x8c5   : > { %v8588_v29 = vpop.permute.xlu0 %3455  ;;  %v8590_v54 = vpop.permute.xlu1 %3979 }
 0x8c6   : > { %12640 = vst [vmem:[#allocation67_spill] sm:$0xff] %v8588_v29  ;;  %12641 = vst [vmem:[#allocation68_spill] sm:$0xff] %v8590_v54 }
 0x8c7   : > { %2823 = vrot.lane.b32.xlu0 %v8586_v56, %s6480_s18  ;;  %2879 = vrot.lane.b32.xlu1 %v8568_v9, %s12627_s1 }
 0x8c9   : > { %v8596_v34 = vpop.permute.xlu0 %3993  ;;  %v8598_v27 = vpop.permute.xlu1 %4203 }
 0x8ca   : > { %12642 = vst [vmem:[#allocation69_spill] sm:$0xff] %v8596_v34  ;;  %12643 = vst [vmem:[#allocation70_spill] sm:$0xff] %v8598_v27 }
 0x8cb   : > { %2893 = vrot.lane.b32.xlu0 %v8586_v56, %s12627_s1  ;;  %2949 = vrot.lane.b32.xlu1 %v8568_v9, %s12624_s0 }
 0x8cd   : > { %v8604_v6 = vpop.permute.xlu0 %4217  ;;  %v8606_v36 = vpop.permute.xlu1 %4133 }
 0x8ce   : > { %12644 = vst [vmem:[#allocation71_spill] sm:$0xff] %v8604_v6  ;;  %12645 = vst [vmem:[#allocation72_spill] sm:$0xff] %v8606_v36 }
 0x8cf   : > { %2963 = vrot.lane.b32.xlu0 %v8586_v56, %s12624_s0  ;;  %3019 = vrot.lane.b32.xlu1 %v8568_v9, %s12612_s20 }
 0x8d1   : > { %v8612_v59 = vpop.permute.xlu0 %4147  ;;  %v8614_v47 = vpop.permute.xlu1 %4654 }
 0x8d2   : > { %12646 = vst [vmem:[#allocation73_spill] sm:$0xff] %v8612_v59  ;;  %12647 = vst [vmem:[#allocation74_spill] sm:$0xff] %v8614_v47 }
 0x8d3   : > { %3033 = vrot.lane.b32.xlu0 %v8586_v56, %s12612_s20  ;;  %3089 = vrot.lane.b32.xlu1 %v8568_v9, %s12613_s30 }
 0x8d5   : > { %v8620_v3 = vpop.permute.xlu0 %4668  ;;  %v8622_v39 = vpop.permute.xlu1 %5245 }
 0x8d6   : > { %12648 = vst [vmem:[#allocation75_spill] sm:$0xff] %v8620_v3  ;;  %12649 = vst [vmem:[#allocation76_spill] sm:$0xff] %v8622_v39 }
 0x8d7   : > { %3103 = vrot.lane.b32.xlu0 %v8586_v56, %s12613_s30  ;;  %3235 = vrot.lane.b32.xlu1 %v8568_v9, %s12614_s25 }
 0x8d9   : > { %v8628_v40 = vpop.permute.xlu0 %5259  ;;  %v8630_v51 = vpop.permute.xlu1 %4584 }
 0x8da   : > { %12650 = vst [vmem:[#allocation77_spill] sm:$0xff] %v8628_v40  ;;  %12651 = vst [vmem:[#allocation78_spill] sm:$0xff] %v8630_v51 }
 0x8db   : > { %3249 = vrot.lane.b32.xlu0 %v8586_v56, %s12614_s25  ;;  %3305 = vrot.lane.b32.xlu1 %v8568_v9, %s12625_s23 }
 0x8dd   : > { %v8636_v47 = vpop.permute.xlu0 %4598  ;;  %v8638_v3 = vpop.permute.xlu1 %5175 }
 0x8de   : > { %12652 = vst [vmem:[#allocation79_spill] sm:$0xff] %v8636_v47  ;;  %12653 = vst [vmem:[#allocation80_spill] sm:$0xff] %v8638_v3 }
 0x8df   : > { %3319 = vrot.lane.b32.xlu0 %v8586_v56, %s12625_s23  ;;  %3375 = vrot.lane.b32.xlu1 %v8568_v9, %s12615_s14 }
 0x8e1   : > { %v8644_v39 = vpop.permute.xlu0 %5189  ;;  %v8646_v40 = vpop.permute.xlu1 %3385 }
 0x8e2   : > { %12654 = vst [vmem:[#allocation81_spill] sm:$0xff] %v8644_v39 }
 0x8e3   : > { %3389 = vrot.lane.b32.xlu0 %v8586_v56, %s12615_s14  ;;  %3445 = vrot.lane.b32.xlu1 %v8568_v9, %s12616_s27 }
 0x8e5   : > { %v8652_v51 = vpop.permute.xlu0 %2807  ;;  %v8654_v47 = vpop.permute.xlu1 %3525 }
 0x8e6   : > { %12655 = vst [vmem:[#allocation82_spill] sm:$0xff] %v8654_v47 }
 0x8e7   : > { %3459 = vrot.lane.b32.xlu0 %v8586_v56, %s12616_s27  ;;  %3983 = vrot.lane.b32.xlu1 %v8568_v9, %s12617_s15 }
 0x8e9   : > { %v8660_v3 = vpop.permute.xlu0 %2877  ;;  %v8662_v39 = vpop.permute.xlu1 %4063 }
 0x8ea   : > { %12656 = vst [vmem:[#allocation83_spill] sm:$0xff] %v8662_v39 }
 0x8eb   : > { %3997 = vrot.lane.b32.xlu0 %v8586_v56, %s12617_s15  ;;  %4207 = vrot.lane.b32.xlu1 %v8568_v9, %s12618_s26 }
 0x8ed   : > { %v2948_v60 = vpop.permute.xlu0 %2947  ;;  %v8668_v59 = vpop.permute.xlu1 %4205 }
 0x8ee   : > { %12657 = vst [vmem:[#allocation84_spill] sm:$0xff] %v8668_v59 }
 0x8ef   : > { %4221 = vrot.lane.b32.xlu0 %v8586_v56, %s12618_s26  ;;  %4137 = vrot.lane.b32.xlu1 %v8568_v9, %s12619_s13 }
 0x8f1   : > { %v8674_v36 = vpop.permute.xlu0 %3017  ;;  %v8676_v26 = vpop.permute.xlu1 %4135 }
 0x8f2   : > { %12658 = vst [vmem:[#allocation85_spill] sm:$0xff] %v8674_v36  ;;  %12659 = vst [vmem:[#allocation86_spill] sm:$0xff] %v8676_v26  ;;  %v2768_v26 = vpop.f32.mrf.mxu0 }
 0x8f3   : > { %4151 = vrot.lane.b32.xlu0 %v8586_v56, %s12619_s13  ;;  %4588 = vrot.lane.b32.xlu1 %v8568_v9, %s12622_s24  ;;  %v2769_v54 = vadd.f32 %v2768_v26, %v8492_v21 }
 0x8f5   : > { %v8682_v31 = vpop.permute.xlu0 %3087  ;;  %v8684_v6 = vpop.permute.xlu1 %4656 }
 0x8f6   : > { %12660 = vst [vmem:[#allocation87_spill] sm:$0xff] %v8682_v31  ;;  %12661 = vst [vmem:[#allocation88_spill] sm:$0xff] %v8684_v6 }
 0x8f7   : > { %4602 = vrot.lane.b32.xlu0 %v8586_v56, %s12622_s24  ;;  %5179 = vrot.lane.b32.xlu1 %v8568_v9, %s12623_s29 }
 0x8f9   : > { %v8690_v27 = vpop.permute.xlu0 %3233  ;;  %v8692_v59 = vpop.permute.xlu1 %5247 }
 0x8fa   : > { %12662 = vst [vmem:[#allocation89_spill] sm:$0xff] %v8690_v27  ;;  %12663 = vst [vmem:[#allocation90_spill] sm:$0xff] %v8692_v59  ;;  %v8707_v59 = vmax.f32 %v2769_v54, 0.0 }
 0x8fb   : > { %5193 = vrot.lane.b32.xlu0 %v8586_v56, %s12623_s29  ;;  %4518 = vrot.lane.b32.xlu1 %v8568_v9, %s12626_s16 }
 0x8fd   : > { %v8699_v6 = vpop.permute.xlu0 %3303  ;;  %v8701_v34 = vpop.permute.xlu1 %4586 }
 0x8fe   : > { %12664 = vst [vmem:[#allocation91_spill] sm:$0xff] %v8699_v6  ;;  %12665 = vst [vmem:[#allocation92_spill] sm:$0xff] %v8701_v34 }
 0x8ff   : > { %4532 = vrot.lane.b32.xlu0 %v8586_v56, %s12626_s16  ;;  %3529 = vrot.lane.b32.xlu1 %v8586_v56, %s12072_s28 }
 0x901   : > { %v3374_v10 = vpop.permute.xlu0 %3373  ;;  %v8709_v39 = vpop.permute.xlu1 %5177 }
 0x902   : > { %12666 = vst [vmem:[#allocation93_spill] sm:$0xff] %v8709_v39 }
 0x903   : > { %2811 = vrot.lane.b32.xlu0 %v8707_v59, %s6480_s18  ;;  %4067 = vrot.lane.b32.xlu1 %v8586_v56, %s12628_s2 }
 0x905   : > { %v8715_v26 = vpop.permute.xlu0 %3443  ;;  %v8717_v34 = vpop.permute.xlu1 %4516 }
 0x906   : > { %12667 = vst [vmem:[#allocation94_spill] sm:$0xff] %v8715_v26  ;;  %12668 = vst [vmem:[#allocation95_spill] sm:$0xff] %v8717_v34  ;;  %v2770_v26 = vpop.f32.mrf.mxu0 }
 0x907   : > { %2881 = vrot.lane.b32.xlu0 %v8707_v59, %s12627_s1  ;;  %4209 = vrot.lane.b32.xlu1 %v8707_v59, %s12618_s26 }
 0x909   : > { %v8723_v54 = vpop.permute.xlu0 %3513  ;;  %v8725_v35 = vpop.permute.xlu1 %2821 }
 0x90a   : > { %12669 = vst [vmem:[#allocation96_spill] sm:$0xff] %v8723_v54 }
 0x90b   : > { %2951 = vrot.lane.b32.xlu0 %v8707_v59, %s12624_s0  ;;  %4139 = vrot.lane.b32.xlu1 %v8707_v59, %s12619_s13 }
 0x90d   : > { %v8731_v39 = vpop.permute.xlu0 %3981  ;;  %v8733_v42 = vpop.permute.xlu1 %2891 }
 0x90e   : > { %12670 = vst [vmem:[#allocation97_spill] sm:$0xff] %v8731_v39 }
 0x90f   : > { %3021 = vrot.lane.b32.xlu0 %v8707_v59, %s12612_s20  ;;  %4590 = vrot.lane.b32.xlu1 %v8707_v59, %s12622_s24 }
 0x911   : > { %v8739_v34 = vpop.permute.xlu0 %4051  ;;  %v2962_v12 = vpop.permute.xlu1 %2961 }
 0x912   : > { %12671 = vst [vmem:[#allocation98_spill] sm:$0xff] %v8739_v34  ;;  %v2981_v29 = vsel %vm12672_vm2, %v2962_v12, %v2948_v60  ;;  %v2974_v46 = vsel %vm12673_vm6, %v2948_v60, %v2962_v12  ;;  %v2973_v34 = vsel %vm12672_vm2, %v8530_v43, %v8544_v8  ;;  %v2771_v12 = vadd.f32 %v2770_v26, %v8492_v21  ;;  %vm12677_vm6 = vmmov %vm12672_vm2 }
 0x913   : > { %3091 = vrot.lane.b32.xlu0 %v8707_v59, %s12613_s30  ;;  %5181 = vrot.lane.b32.xlu1 %v8707_v59, %s12623_s29  ;;  %v2980_v32 = vsel %vm12677_vm6, %v8544_v8, %v8530_v43  ;;  %v3406_v43 = vsel %vm12678_vm0, %v8646_v40, %v8572_v41  ;;  %vm12817_vm2 = vcmp.lt.s32.totalorder %v6893_v24, 33 }
 0x914   : > { %5950 = vmatprep.subr.msk.mxu1 %vm12674_vm10, %v2974_v46  ;;  %vm12818_vm6 = vmmov %vm12817_vm2 }
 0x915   : > { %5951 = vmatpush1.msk.msra.mxu1 %vm12675_vm7, %v2981_v29  ;;  %v3388_v39 = vpop.permute.xlu0 %3387  ;;  %v8757_v60 = vpop.permute.xlu1 %3031  ;;  %vm12823_vm8 = vmmov %vm12817_vm2 }
 0x916   : > { %12676 = vst [vmem:[#allocation99_spill] sm:$0xff] %v8757_v60  ;;  %v3407_v46 = vsel %vm12678_vm0, %v3388_v39, %v3374_v10  ;;  %5952 = vmatprep.subr.msk.mxu1 %vm12674_vm10, %v2973_v34  ;;  %v3400_v29 = vsel %vm12679_vm5, %v3374_v10, %v3388_v39  ;;  %vm12681_vm5 = vmmov %vm12678_vm0  ;;  %v8788_v10 = vmax.f32 %v2771_v12, 0.0  ;;  %vm12821_vm0 = vnez %v12463_v0 }
 0x917   : > { %5953 = vmatpush1.msk.msra.mxu1 %vm12675_vm7, %v2980_v32  ;;  %3237 = vrot.lane.b32.xlu0 %v8707_v59, %s12614_s25  ;;  %v3399_v39 = vsel %vm12681_vm5, %v8572_v41, %v8646_v40  ;;  %vm12820_vm5 = vnez %v12465_v14 }
 0x918   : > { %5880 = vmatprep.subr.msk.mxu0 %vm12589_vm1, %v3400_v29  ;;  %4520 = vrot.lane.b32.xlu1 %v8707_v59, %s12626_s16 }
 0x919   : > { %5881 = vmatpush1.msk.msra.mxu0 %vm7423_vm12, %v3407_v46  ;;  %v8780_v21 = vpop.permute.xlu0 %4219  ;;  %v8786_v32 = vpop.permute.xlu1 %3101 }
 0x91a   : > { %12680 = vst [vmem:[#allocation100_spill] sm:$0xff] %v8780_v21  ;;  %12682 = vst [vmem:[#allocation101_spill] sm:$0xff] %v8786_v32  ;;  %5882 = vmatprep.subr.msk.mxu0 %vm12589_vm1, %v3399_v39 }
 0x91b   : > { %5883 = vmatpush1.msk.msra.mxu0 %vm7423_vm12, %v3406_v43  ;;  %3307 = vrot.lane.b32.xlu0 %v8707_v59, %s12625_s23 }
 0x91c   : > { %2825 = vrot.lane.b32.xlu1 %v8788_v10, %s6480_s18 }
 0x91d   : > { %v8802_v8 = vpop.permute.xlu0 %4149  ;;  %v8804_v34 = vpop.permute.xlu1 %3247 }
 0x91e   : > { %12683 = vst [vmem:[#allocation102_spill] sm:$0xff] %v8802_v8  ;;  %12684 = vst [vmem:[#allocation103_spill] sm:$0xff] %v8804_v34 }
 0x91f   : > { %3377 = vrot.lane.b32.xlu0 %v8707_v59, %s12615_s14 }
 0x920   : > { %2895 = vrot.lane.b32.xlu1 %v8788_v10, %s12627_s1 }
 0x921   : > { %v8810_v40 = vpop.permute.xlu0 %4670  ;;  %v8812_v41 = vpop.permute.xlu1 %3317 }
 0x922   : > { %12685 = vst [vmem:[#allocation104_spill] sm:$0xff] %v8810_v40  ;;  %12686 = vst [vmem:[#allocation105_spill] sm:$0xff] %v8812_v41 }
 0x923   : > { %3447 = vrot.lane.b32.xlu0 %v8707_v59, %s12616_s27 }
 0x924   : > { %2965 = vrot.lane.b32.xlu1 %v8788_v10, %s12624_s0 }
 0x925   : > { %v8818_v26 = vpop.permute.xlu0 %5261  ;;  %v8820_v12 = vpop.permute.xlu1 %3527 }
 0x926   : > { %12687 = vst [vmem:[#allocation106_spill] sm:$0xff] %v8818_v26  ;;  %12688 = vst [vmem:[#allocation107_spill] sm:$0xff] %v8820_v12 }
 0x927   : > { %3517 = vrot.lane.b32.xlu0 %v8707_v59, %s12072_s28 }
 0x928   : > { %3035 = vrot.lane.b32.xlu1 %v8788_v10, %s12612_s20 }
 0x929   : > { %v8826_v46 = vpop.permute.xlu0 %4600  ;;  %v8828_v29 = vpop.permute.xlu1 %3457 }
 0x92a   : > { %12689 = vst [vmem:[#allocation108_spill] sm:$0xff] %v8826_v46  ;;  %12690 = vst [vmem:[#allocation109_spill] sm:$0xff] %v8828_v29 }
 0x92b   : > { %4055 = vrot.lane.b32.xlu0 %v8707_v59, %s12628_s2 }
 0x92c   : > { %3105 = vrot.lane.b32.xlu1 %v8788_v10, %s12613_s30 }
 0x92d   : > { %v8834_v39 = vpop.permute.xlu0 %5191  ;;  %v8836_v43 = vpop.permute.xlu1 %4065 }
 0x92e   : > { %12691 = vst [vmem:[#allocation110_spill] sm:$0xff] %v8834_v39  ;;  %12692 = vst [vmem:[#allocation111_spill] sm:$0xff] %v8836_v43 }
 0x92f   : > { %3985 = vrot.lane.b32.xlu0 %v8707_v59, %s12617_s15 }
 0x930   : > { %3251 = vrot.lane.b32.xlu1 %v8788_v10, %s12614_s25 }
 0x931   : > { %v8842_v26 = vpop.permute.xlu0 %3515  ;;  %v8844_v46 = vpop.permute.xlu1 %3995 }
 0x932   : > { %12693 = vst [vmem:[#allocation112_spill] sm:$0xff] %v8842_v26  ;;  %12694 = vst [vmem:[#allocation113_spill] sm:$0xff] %v8844_v46 }
 0x933   : > { %4223 = vrot.lane.b32.xlu0 %v8788_v10, %s12618_s26 }
 0x934   : > { %3321 = vrot.lane.b32.xlu1 %v8788_v10, %s12625_s23 }
 0x935   : > { %v8850_v40 = vpop.permute.xlu0 %4053  ;;  %v8852_v39 = vpop.permute.xlu1 %2809 }
 0x936   : > { %12695 = vst [vmem:[#allocation114_spill] sm:$0xff] %v8850_v40  ;;  %v2774_v40 = vpop.f32.mrf.mxu0 }
 0x937   : > { %4153 = vrot.lane.b32.xlu0 %v8788_v10, %s12619_s13  ;;  %v2775_v58 = vadd.f32 %v2774_v40, %v8494_v57 }
 0x938   : > { %3391 = vrot.lane.b32.xlu1 %v8788_v10, %s12615_s14  ;;  %v2776_v47 = vpop.f32.mrf.mxu0 }
 0x939   : > { %v8858_v8 = vpop.permute.xlu0 %2823  ;;  %v8860_v21 = vpop.permute.xlu1 %2879  ;;  %v2777_v40 = vadd.f32 %v2776_v47, %v8494_v57 }
 0x93b   : > { %4604 = vrot.lane.b32.xlu0 %v8788_v10, %s12622_s24 }
 0x93c   : > { %3531 = vrot.lane.b32.xlu1 %v8788_v10, %s12072_s28 }
 0x93d   : > { %v8866_v46 = vpop.permute.xlu0 %2893  ;;  %v8868_v43 = vpop.permute.xlu1 %2949 }
 0x93e   : > { %12696 = vst [vmem:[#allocation115_spill] sm:$0xff] %v8868_v43  ;;  %v8883_v43 = vmax.f32 %v2775_v58, 0.0  ;;  %v8902_v58 = vmax.f32 %v2777_v40, 0.0 }
 0x93f   : > { %5195 = vrot.lane.b32.xlu0 %v8788_v10, %s12623_s29 }
 0x940   : > { %3461 = vrot.lane.b32.xlu1 %v8788_v10, %s12616_s27 }
 0x941   : > { %v8875_v17 = vpop.permute.xlu0 %2963  ;;  %v8877_v29 = vpop.permute.xlu1 %3019 }
 0x942   : > { %12697 = vst [vmem:[#allocation116_spill] sm:$0xff] %v8875_v17  ;;  %12698 = vst [vmem:[#allocation117_spill] sm:$0xff] %v8877_v29 }
 0x943   : > { %4534 = vrot.lane.b32.xlu0 %v8788_v10, %s12626_s16 }
 0x944   : > { %4069 = vrot.lane.b32.xlu1 %v8788_v10, %s12628_s2 }
 0x945   : > { %v8885_v30 = vpop.permute.xlu0 %3033  ;;  %v8887_v63 = vpop.permute.xlu1 %3089 }
 0x946   : > { %12699 = vst [vmem:[#allocation118_spill] sm:$0xff] %v8885_v30  ;;  %12700 = vst [vmem:[#allocation119_spill] sm:$0xff] %v8887_v63 }
 0x947   : > { %4057 = vrot.lane.b32.xlu0 %v8883_v43, %s12628_s2 }
 0x948   : > { %3999 = vrot.lane.b32.xlu1 %v8788_v10, %s12617_s15 }
 0x949   : > { %v8894_v17 = vpop.permute.xlu0 %3103  ;;  %v8896_v54 = vpop.permute.xlu1 %3235 }
 0x94a   : > { %12701 = vst [vmem:[#allocation120_spill] sm:$0xff] %v8894_v17  ;;  %12702 = vst [vmem:[#allocation121_spill] sm:$0xff] %v8896_v54 }
 0x94b   : > { %3987 = vrot.lane.b32.xlu0 %v8883_v43, %s12617_s15 }
 0x94c   : > { %2813 = vrot.lane.b32.xlu1 %v8883_v43, %s6480_s18 }
 0x94d   : > { %v8904_v12 = vpop.permute.xlu0 %3249  ;;  %v8906_v44 = vpop.permute.xlu1 %3305 }
 0x94e   : > { %12703 = vst [vmem:[#allocation122_spill] sm:$0xff] %v8904_v12 }
 0x94f   : > { %2827 = vrot.lane.b32.xlu0 %v8902_v58, %s6480_s18 }
 0x950   : > { %2883 = vrot.lane.b32.xlu1 %v8883_v43, %s12627_s1 }
 0x951   : > { %v8912_v47 = vpop.permute.xlu0 %3319  ;;  %v8914_v57 = vpop.permute.xlu1 %3375 }
 0x952   : > { %12704 = vst [vmem:[#allocation123_spill] sm:$0xff] %v8914_v57 }
 0x953   : > { %2897 = vrot.lane.b32.xlu0 %v8902_v58, %s12627_s1 }
 0x954   : > { %2953 = vrot.lane.b32.xlu1 %v8883_v43, %s12624_s0 }
 0x955   : > { %v8920_v40 = vpop.permute.xlu0 %3389  ;;  %v8922_v22 = vpop.permute.xlu1 %3445 }
 0x956   : > { %12705 = vst [vmem:[#allocation124_spill] sm:$0xff] %v8920_v40  ;;  %12706 = vst [vmem:[#allocation125_spill] sm:$0xff] %v8922_v22 }
 0x957   : > { %2967 = vrot.lane.b32.xlu0 %v8902_v58, %s12624_s0 }
 0x958   : > { %3023 = vrot.lane.b32.xlu1 %v8883_v43, %s12612_s20 }
 0x959   : > { %v8928_v26 = vpop.permute.xlu0 %3459  ;;  %v8930_v15 = vpop.permute.xlu1 %3983 }
 0x95a   : > { %12707 = vst [vmem:[#allocation126_spill] sm:$0xff] %v8928_v26  ;;  %12708 = vst [vmem:[#allocation127_spill] sm:$0xff] %v8930_v15 }
 0x95b   : > { %3037 = vrot.lane.b32.xlu0 %v8902_v58, %s12612_s20 }
 0x95c   : > { %3093 = vrot.lane.b32.xlu1 %v8883_v43, %s12613_s30 }
 0x95d   : > { %v8936_v57 = vpop.permute.xlu0 %3997  ;;  %v8938_v40 = vpop.permute.xlu1 %4207 }
 0x95e   : > { %12709 = vst [vmem:[#allocation128_spill] sm:$0xff] %v8936_v57  ;;  %12710 = vst [vmem:[#allocation129_spill] sm:$0xff] %v8938_v40 }
 0x95f   : > { %3107 = vrot.lane.b32.xlu0 %v8902_v58, %s12613_s30 }
 0x960   : > { %3239 = vrot.lane.b32.xlu1 %v8883_v43, %s12614_s25 }
 0x961   : > { %v8944_v22 = vpop.permute.xlu0 %4221  ;;  %v8946_v26 = vpop.permute.xlu1 %4137 }
 0x962   : > { %12711 = vst [vmem:[#allocation130_spill] sm:$0xff] %v8944_v22  ;;  %12712 = vst [vmem:[#allocation131_spill] sm:$0xff] %v8946_v26 }
 0x963   : > { %3253 = vrot.lane.b32.xlu0 %v8902_v58, %s12614_s25 }
 0x964   : > { %3309 = vrot.lane.b32.xlu1 %v8883_v43, %s12625_s23 }
 0x965   : > { %v8952_v15 = vpop.permute.xlu0 %4151  ;;  %v8954_v57 = vpop.permute.xlu1 %4588 }
 0x966   : > { %12713 = vst [vmem:[#allocation132_spill] sm:$0xff] %v8952_v15  ;;  %12714 = vst [vmem:[#allocation133_spill] sm:$0xff] %v8954_v57 }
 0x967   : > { %3323 = vrot.lane.b32.xlu0 %v8902_v58, %s12625_s23 }
 0x968   : > { %3379 = vrot.lane.b32.xlu1 %v8883_v43, %s12615_s14 }
 0x969   : > { %v8960_v40 = vpop.permute.xlu0 %4602  ;;  %v8962_v22 = vpop.permute.xlu1 %5179 }
 0x96a   : > { %12715 = vst [vmem:[#allocation134_spill] sm:$0xff] %v8960_v40  ;;  %12716 = vst [vmem:[#allocation135_spill] sm:$0xff] %v8962_v22 }
 0x96b   : > { %3393 = vrot.lane.b32.xlu0 %v8902_v58, %s12615_s14 }
 0x96c   : > { %3449 = vrot.lane.b32.xlu1 %v8883_v43, %s12616_s27 }
 0x96d   : > { %v8968_v26 = vpop.permute.xlu0 %5193  ;;  %v8970_v15 = vpop.permute.xlu1 %4518 }
 0x96e   : > { %12717 = vst [vmem:[#allocation136_spill] sm:$0xff] %v8968_v26  ;;  %12718 = vst [vmem:[#allocation137_spill] sm:$0xff] %v8970_v15 }
 0x96f   : > { %3463 = vrot.lane.b32.xlu0 %v8902_v58, %s12616_s27 }
 0x970   : > { %3519 = vrot.lane.b32.xlu1 %v8883_v43, %s12072_s28 }
 0x971   : > { %v8976_v57 = vpop.permute.xlu0 %4532  ;;  %v8978_v40 = vpop.permute.xlu1 %3529 }
 0x972   : > { %12719 = vst [vmem:[#allocation138_spill] sm:$0xff] %v8976_v57  ;;  %12720 = vst [vmem:[#allocation139_spill] sm:$0xff] %v8978_v40 }
 0x973   : > { %3533 = vrot.lane.b32.xlu0 %v8902_v58, %s12072_s28  ;;  %s12723_s28 = smov 110  }
 0x974   : > { %4141 = vrot.lane.b32.xlu1 %v8883_v43, %s12619_s13 }
 0x975   : > { %v8984_v22 = vpop.permute.xlu0 %2811  ;;  %v8986_v26 = vpop.permute.xlu1 %4067 }
 0x976   : > { %12721 = vst [vmem:[#allocation140_spill] sm:$0xff] %v8986_v26 }
 0x977   : > { %4155 = vrot.lane.b32.xlu0 %v8902_v58, %s12619_s13 }
 0x978   : > { %4211 = vrot.lane.b32.xlu1 %v8883_v43, %s12618_s26 }
 0x979   : > { %v8992_v15 = vpop.permute.xlu0 %2881  ;;  %v8994_v57 = vpop.permute.xlu1 %4209 }
 0x97a   : > { %12722 = vst [vmem:[#allocation141_spill] sm:$0xff] %v8994_v57 }
 0x97b   : > { %4225 = vrot.lane.b32.xlu0 %v8902_v58, %s12618_s26 }
 0x97c   : > { %4802 = vrot.lane.b32.xlu1 %v8883_v43, %s12723_s28 }
 0x97d   : > { %v9000_v40 = vpop.permute.xlu0 %2951  ;;  %v9002_v50 = vpop.permute.xlu1 %4139 }
 0x97e   : > { %12724 = vst [vmem:[#allocation142_spill] sm:$0xff] %v9000_v40  ;;  %12725 = vst [vmem:[#allocation143_spill] sm:$0xff] %v9002_v50  ;;  %v2780_v50 = vpop.f32.mrf.mxu0 }
 0x97f   : > { %4816 = vrot.lane.b32.xlu0 %v8902_v58, %s12723_s28  ;;  %v2781_v60 = vadd.f32 %v2780_v50, %v8504_v38 }
 0x980   : > { %4592 = vrot.lane.b32.xlu1 %v8883_v43, %s12622_s24 }
 0x981   : > { %v9008_v26 = vpop.permute.xlu0 %3021  ;;  %v9010_v36 = vpop.permute.xlu1 %4590 }
 0x982   : > { %12726 = vst [vmem:[#allocation144_spill] sm:$0xff] %v9008_v26  ;;  %12727 = vst [vmem:[#allocation145_spill] sm:$0xff] %v9010_v36 }
 0x983   : > { %4606 = vrot.lane.b32.xlu0 %v8902_v58, %s12622_s24 }
 0x984   : > { %5183 = vrot.lane.b32.xlu1 %v8883_v43, %s12623_s29 }
 0x985   : > { %v9016_v57 = vpop.permute.xlu0 %3091  ;;  %v9018_v40 = vpop.permute.xlu1 %5181 }
 0x986   : > { %12728 = vst [vmem:[#allocation146_spill] sm:$0xff] %v9018_v40  ;;  %v9033_v40 = vmax.f32 %v2781_v60, 0.0 }
 0x987   : > { %5197 = vrot.lane.b32.xlu0 %v8902_v58, %s12623_s29 }
 0x988   : > { %4522 = vrot.lane.b32.xlu1 %v8883_v43, %s12626_s16 }
 0x989   : > { %v9025_v36 = vpop.permute.xlu0 %3237 }
 0x98a   : > { %12729 = vst [vmem:[#allocation147_spill] sm:$0xff] %v9025_v36  ;;  %v9027_v28 = vpop.permute.xlu1 %4520 }
 0x98b   : > { %12730 = vst [vmem:[#allocation148_spill] sm:$0xff] %v9027_v28  ;;  %4536 = vrot.lane.b32.xlu0 %v8902_v58, %s12626_s16 }
 0x98c   : > { %4071 = vrot.lane.b32.xlu1 %v8902_v58, %s12628_s2 }
 0x98d   : > { %v9035_v1 = vpop.permute.xlu0 %3307 }
 0x98e   : > { %v9037_v29 = vpop.permute.xlu1 %2825 }
 0x98f   : > { %2815 = vrot.lane.b32.xlu0 %v9033_v40, %s6480_s18 }
 0x990   : > { %4001 = vrot.lane.b32.xlu1 %v8902_v58, %s12617_s15 }
 0x991   : > { %v9043_v50 = vpop.permute.xlu0 %3377 }
 0x992   : > { %12731 = vst [vmem:[#allocation149_spill] sm:$0xff] %v9043_v50  ;;  %v9045_v28 = vpop.permute.xlu1 %2895 }
 0x993   : > { %2885 = vrot.lane.b32.xlu0 %v9033_v40, %s12627_s1 }
 0x994   : > { %3521 = vrot.lane.b32.xlu1 %v9033_v40, %s12732_s3 }
 0x995   : > { %v9051_v60 = vpop.permute.xlu0 %3447 }
 0x996   : > { %12733 = vst [vmem:[#allocation150_spill] sm:$0xff] %v9051_v60  ;;  %v9053_v30 = vpop.permute.xlu1 %2965 }
 0x997   : > { %12734 = vst [vmem:[#allocation151_spill] sm:$0xff] %v9053_v30  ;;  %2955 = vrot.lane.b32.xlu0 %v9033_v40, %s12624_s0 }
 0x998   : > { %4143 = vrot.lane.b32.xlu1 %v9033_v40, %s12619_s13 }
 0x999   : > { %v9059_v27 = vpop.permute.xlu0 %3517 }
 0x99a   : > { %12735 = vst [vmem:[#allocation152_spill] sm:$0xff] %v9059_v27  ;;  %v9061_v50 = vpop.permute.xlu1 %3035 }
 0x99b   : > { %12736 = vst [vmem:[#allocation153_spill] sm:$0xff] %v9061_v50  ;;  %3025 = vrot.lane.b32.xlu0 %v9033_v40, %s12612_s20  ;;  %v2782_v50 = vpop.f32.mrf.mxu0 }
 0x99c   : > { %4213 = vrot.lane.b32.xlu1 %v9033_v40, %s12618_s26  ;;  %v2783_v54 = vadd.f32 %v2782_v50, %v8504_v38 }
 0x99d   : > { %v9067_v34 = vpop.permute.xlu0 %4055  ;;  %v2786_v52 = vpop.f32.mrf.mxu0 }
 0x99e   : > { %12737 = vst [vmem:[#allocation154_spill] sm:$0xff] %v9067_v34  ;;  %v9069_v60 = vpop.permute.xlu1 %3105  ;;  %v9102_v36 = vmax.f32 %v2783_v54, 0.0 }
 0x99f   : > { %3095 = vrot.lane.b32.xlu0 %v9033_v40, %s12613_s30 }
 0x9a0   : > { %4804 = vrot.lane.b32.xlu1 %v9033_v40, %s12723_s28 }
 0x9a1   : > { %v9075_v30 = vpop.permute.xlu0 %3985 }
 0x9a2   : > { %12738 = vst [vmem:[#allocation155_spill] sm:$0xff] %v9075_v30  ;;  %v9077_v27 = vpop.permute.xlu1 %3251 }
 0x9a3   : > { %12739 = vst [vmem:[#allocation156_spill] sm:$0xff] %v9077_v27  ;;  %3241 = vrot.lane.b32.xlu0 %v9033_v40, %s12614_s25 }
 0x9a4   : > { %4594 = vrot.lane.b32.xlu1 %v9033_v40, %s12622_s24 }
 0x9a5   : > { %v9083_v26 = vpop.permute.xlu0 %4223 }
 0x9a6   : > { %12740 = vst [vmem:[#allocation157_spill] sm:$0xff] %v9083_v26  ;;  %v9085_v34 = vpop.permute.xlu1 %3321 }
 0x9a7   : > { %3311 = vrot.lane.b32.xlu0 %v9033_v40, %s12625_s23 }
 0x9a8   : > { %5185 = vrot.lane.b32.xlu1 %v9033_v40, %s12623_s29 }
 0x9a9   : > { %v9091_v30 = vpop.permute.xlu0 %4153 }
 0x9aa   : > { %12741 = vst [vmem:[#allocation158_spill] sm:$0xff] %v9091_v30  ;;  %v9094_v12 = vpop.permute.xlu1 %3391 }
 0x9ab   : > { %12742 = vst [vmem:[#allocation159_spill] sm:$0xff] %v9094_v12  ;;  %3381 = vrot.lane.b32.xlu0 %v9033_v40, %s12615_s14 }
 0x9ac   : > { %4524 = vrot.lane.b32.xlu1 %v9033_v40, %s12626_s16 }
 0x9ad   : > { %v9100_v26 = vpop.permute.xlu0 %4604 }
 0x9ae   : > { %12743 = vst [vmem:[#allocation160_spill] sm:$0xff] %v9100_v26  ;;  %v9104_v27 = vpop.permute.xlu1 %3531 }
 0x9af   : > { %12744 = vst [vmem:[#allocation161_spill] sm:$0xff] %v9104_v27  ;;  %3451 = vrot.lane.b32.xlu0 %v9033_v40, %s12616_s27 }
 0x9b0   : > { %2829 = vrot.lane.b32.xlu1 %v9102_v36, %s6480_s18 }
 0x9b1   : > { %v9110_v38 = vpop.permute.xlu0 %5195 }
 0x9b2   : > { %12745 = vst [vmem:[#allocation162_spill] sm:$0xff] %v9110_v38  ;;  %v9112_v50 = vpop.permute.xlu1 %3461 }
 0x9b3   : > { %12746 = vst [vmem:[#allocation163_spill] sm:$0xff] %v9112_v50  ;;  %4059 = vrot.lane.b32.xlu0 %v9033_v40, %s12628_s2 }
 0x9b4   : > { %2899 = vrot.lane.b32.xlu1 %v9102_v36, %s12627_s1 }
 0x9b5   : > { %v9118_v54 = vpop.permute.xlu0 %4534 }
 0x9b6   : > { %12747 = vst [vmem:[#allocation164_spill] sm:$0xff] %v9118_v54  ;;  %v9120_v26 = vpop.permute.xlu1 %4069 }
 0x9b7   : > { %12748 = vst [vmem:[#allocation165_spill] sm:$0xff] %v9120_v26  ;;  %3989 = vrot.lane.b32.xlu0 %v9033_v40, %s12617_s15 }
 0x9b8   : > { %2969 = vrot.lane.b32.xlu1 %v9102_v36, %s12624_s0 }
 0x9b9   : > { %v9126_v30 = vpop.permute.xlu0 %4057 }
 0x9ba   : > { %12749 = vst [vmem:[#allocation166_spill] sm:$0xff] %v9126_v30  ;;  %v9128_v38 = vpop.permute.xlu1 %3999 }
 0x9bb   : > { %12750 = vst [vmem:[#allocation167_spill] sm:$0xff] %v9128_v38  ;;  %3535 = vrot.lane.b32.xlu0 %v9102_v36, %s12732_s3 }
 0x9bc   : > { %3039 = vrot.lane.b32.xlu1 %v9102_v36, %s12612_s20 }
 0x9bd   : > { %v9134_v12 = vpop.permute.xlu0 %3987 }
 0x9be   : > { %12751 = vst [vmem:[#allocation168_spill] sm:$0xff] %v9134_v12  ;;  %v9136_v54 = vpop.permute.xlu1 %2813 }
 0x9bf   : > { %4157 = vrot.lane.b32.xlu0 %v9102_v36, %s12619_s13 }
 0x9c0   : > { %3109 = vrot.lane.b32.xlu1 %v9102_v36, %s12613_s30 }
 0x9c1   : > { %v9142_v26 = vpop.permute.xlu0 %2827 }
 0x9c2   : > { %v9144_v30 = vpop.permute.xlu1 %2883 }
 0x9c3   : > { %4227 = vrot.lane.b32.xlu0 %v9102_v36, %s12618_s26 }
 0x9c4   : > { %3255 = vrot.lane.b32.xlu1 %v9102_v36, %s12614_s25 }
 0x9c5   : > { %v9150_v38 = vpop.permute.xlu0 %2897 }
 0x9c6   : > { %v9152_v12 = vpop.permute.xlu1 %2953 }
 0x9c7   : > { %12752 = vst [vmem:[#allocation169_spill] sm:$0xff] %v9152_v12  ;;  %4818 = vrot.lane.b32.xlu0 %v9102_v36, %s12723_s28 }
 0x9c8   : > { %3325 = vrot.lane.b32.xlu1 %v9102_v36, %s12625_s23 }
 0x9c9   : > { %v9158_v50 = vpop.permute.xlu0 %2967 }
 0x9ca   : > { %12753 = vst [vmem:[#allocation170_spill] sm:$0xff] %v9158_v50  ;;  %v9160_v27 = vpop.permute.xlu1 %3023  ;;  %v2787_v50 = vadd.f32 %v2786_v52, %v8506_v49 }
 0x9cb   : > { %12754 = vst [vmem:[#allocation171_spill] sm:$0xff] %v9160_v27  ;;  %4608 = vrot.lane.b32.xlu0 %v9102_v36, %s12622_s24 }
 0x9cc   : > { %3395 = vrot.lane.b32.xlu1 %v9102_v36, %s12615_s14 }
 0x9cd   : > { %v9166_v48 = vpop.permute.xlu0 %3037 }
 0x9ce   : > { %12755 = vst [vmem:[#allocation172_spill] sm:$0xff] %v9166_v48  ;;  %v9168_v12 = vpop.permute.xlu1 %3093  ;;  %v9183_v48 = vmax.f32 %v2787_v50, 0.0 }
 0x9cf   : > { %12756 = vst [vmem:[#allocation173_spill] sm:$0xff] %v9168_v12  ;;  %5199 = vrot.lane.b32.xlu0 %v9102_v36, %s12623_s29 }
 0x9d0   : > { %3465 = vrot.lane.b32.xlu1 %v9102_v36, %s12616_s27 }
 0x9d1   : > { %v9175_v27 = vpop.permute.xlu0 %3107 }
 0x9d2   : > { %12757 = vst [vmem:[#allocation174_spill] sm:$0xff] %v9175_v27  ;;  %v9177_v4 = vpop.permute.xlu1 %3239  ;;  %v2788_v27 = vpop.f32.mrf.mxu0 }
 0x9d3   : > { %12758 = vst [vmem:[#allocation175_spill] sm:$0xff] %v9177_v4  ;;  %4538 = vrot.lane.b32.xlu0 %v9102_v36, %s12626_s16  ;;  %v2789_v50 = vadd.f32 %v2788_v27, %v8506_v49 }
 0x9d4   : > { %4073 = vrot.lane.b32.xlu1 %v9102_v36, %s12628_s2 }
 0x9d5   : > { %v9185_v12 = vpop.permute.xlu0 %3253  ;;  %v9210_v31 = vmax.f32 %v2789_v50, 0.0 }
 0x9d6   : > { %12759 = vst [vmem:[#allocation176_spill] sm:$0xff] %v9185_v12  ;;  %v9187_v37 = vpop.permute.xlu1 %3309 }
 0x9d7   : > { %3453 = vrot.lane.b32.xlu0 %v9183_v48, %s12616_s27 }
 0x9d8   : > { %4003 = vrot.lane.b32.xlu1 %v9102_v36, %s12617_s15 }
 0x9d9   : > { %v9193_v52 = vpop.permute.xlu0 %3323 }
 0x9da   : > { %v9195_v4 = vpop.permute.xlu1 %3379 }
 0x9db   : > { %12760 = vst [vmem:[#allocation177_spill] sm:$0xff] %v9195_v4  ;;  %4061 = vrot.lane.b32.xlu0 %v9183_v48, %s12628_s2 }
 0x9dc   : > { %2817 = vrot.lane.b32.xlu1 %v9183_v48, %s6480_s18 }
 0x9dd   : > { %v9202_v12 = vpop.permute.xlu0 %3393 }
 0x9de   : > { %12761 = vst [vmem:[#allocation178_spill] sm:$0xff] %v9202_v12  ;;  %v9204_v25 = vpop.permute.xlu1 %3449 }
 0x9df   : > { %12762 = vst [vmem:[#allocation179_spill] sm:$0xff] %v9204_v25  ;;  %3991 = vrot.lane.b32.xlu0 %v9183_v48, %s12617_s15 }
 0x9e0   : > { %2887 = vrot.lane.b32.xlu1 %v9183_v48, %s12627_s1 }
 0x9e1   : > { %v9212_v4 = vpop.permute.xlu0 %3463 }
 0x9e2   : > { %12763 = vst [vmem:[#allocation180_spill] sm:$0xff] %v9212_v4  ;;  %v9214_v32 = vpop.permute.xlu1 %3519 }
 0x9e3   : > { %12764 = vst [vmem:[#allocation181_spill] sm:$0xff] %v9214_v32  ;;  %2831 = vrot.lane.b32.xlu0 %v9210_v31, %s6480_s18 }
 0x9e4   : > { %2957 = vrot.lane.b32.xlu1 %v9183_v48, %s12624_s0 }
 0x9e5   : > { %v9220_v49 = vpop.permute.xlu0 %3533 }
 0x9e6   : > { %12765 = vst [vmem:[#allocation182_spill] sm:$0xff] %v9220_v49  ;;  %v9222_v27 = vpop.permute.xlu1 %4141 }
 0x9e7   : > { %12766 = vst [vmem:[#allocation183_spill] sm:$0xff] %v9222_v27  ;;  %2901 = vrot.lane.b32.xlu0 %v9210_v31, %s12627_s1  ;;  %s12803_s1 = smov 94  }
 0x9e8   : > { %3027 = vrot.lane.b32.xlu1 %v9183_v48, %s12612_s20 }
 0x9e9   : > { %v9228_v50 = vpop.permute.xlu0 %4155 }
 0x9ea   : > { %12767 = vst [vmem:[#allocation184_spill] sm:$0xff] %v9228_v50  ;;  %v9230_v12 = vpop.permute.xlu1 %4211 }
 0x9eb   : > { %12768 = vst [vmem:[#allocation185_spill] sm:$0xff] %v9230_v12  ;;  %2971 = vrot.lane.b32.xlu0 %v9210_v31, %s12624_s0  ;;  %s12780_s0 = smov 98  }
 0x9ec   : > { %3097 = vrot.lane.b32.xlu1 %v9183_v48, %s12613_s30 }
 0x9ed   : > { %v9236_v32 = vpop.permute.xlu0 %4225 }
 0x9ee   : > { %12769 = vst [vmem:[#allocation186_spill] sm:$0xff] %v9236_v32  ;;  %v9238_v49 = vpop.permute.xlu1 %4802 }
 0x9ef   : > { %12770 = vst [vmem:[#allocation187_spill] sm:$0xff] %v9238_v49  ;;  %3041 = vrot.lane.b32.xlu0 %v9210_v31, %s12612_s20 }
 0x9f0   : > { %3243 = vrot.lane.b32.xlu1 %v9183_v48, %s12614_s25 }
 0x9f1   : > { %v9244_v27 = vpop.permute.xlu0 %4816 }
 0x9f2   : > { %12771 = vst [vmem:[#allocation188_spill] sm:$0xff] %v9244_v27  ;;  %v9246_v50 = vpop.permute.xlu1 %4592 }
 0x9f3   : > { %12772 = vst [vmem:[#allocation189_spill] sm:$0xff] %v9246_v50  ;;  %3111 = vrot.lane.b32.xlu0 %v9210_v31, %s12613_s30 }
 0x9f4   : > { %3313 = vrot.lane.b32.xlu1 %v9183_v48, %s12625_s23 }
 0x9f5   : > { %v9252_v12 = vpop.permute.xlu0 %4606 }
 0x9f6   : > { %12773 = vst [vmem:[#allocation190_spill] sm:$0xff] %v9252_v12  ;;  %v9254_v32 = vpop.permute.xlu1 %5183 }
 0x9f7   : > { %12774 = vst [vmem:[#allocation191_spill] sm:$0xff] %v9254_v32  ;;  %3257 = vrot.lane.b32.xlu0 %v9210_v31, %s12614_s25 }
 0x9f8   : > { %3383 = vrot.lane.b32.xlu1 %v9183_v48, %s12615_s14 }
 0x9f9   : > { %v9260_v49 = vpop.permute.xlu0 %5197 }
 0x9fa   : > { %12775 = vst [vmem:[#allocation192_spill] sm:$0xff] %v9260_v49  ;;  %v9262_v27 = vpop.permute.xlu1 %4522 }
 0x9fb   : > { %12776 = vst [vmem:[#allocation193_spill] sm:$0xff] %v9262_v27  ;;  %3327 = vrot.lane.b32.xlu0 %v9210_v31, %s12625_s23  ;;  %s5879_s23 = sshll.u32 %s13407_s22, 5 }
 0x9fc   : > { %3523 = vrot.lane.b32.xlu1 %v9183_v48, %s12732_s3  ;;  %s472_s30 = scalar_lea.vmem %s11762_s12, %s5879_s23 }
 0x9fd   : > { %v9268_v50 = vpop.permute.xlu0 %4536 }
 0x9fe   : > { %12777 = vst [vmem:[#allocation194_spill] sm:$0xff] %v9268_v50  ;;  %v9270_v12 = vpop.permute.xlu1 %4071 }
 0x9ff   : > { %12778 = vst [vmem:[#allocation195_spill] sm:$0xff] %v9270_v12  ;;  %4530 = vrot.lane.b32.xlu0 %v8490_v13, %s12626_s16 }
 0xa00   : > { %4145 = vrot.lane.b32.xlu1 %v9183_v48, %s12619_s13 }
 0xa01   : > { %v9276_v32 = vpop.permute.xlu0 %2815 }
 0xa02   : > { %v9278_v49 = vpop.permute.xlu1 %4001 }
 0xa03   : > { %12779 = vst [vmem:[#allocation196_spill] sm:$0xff] %v9278_v49  ;;  %5129 = vrot.lane.b32.xlu0 %v9102_v36, %s12780_s0 }
 0xa04   : > { %4215 = vrot.lane.b32.xlu1 %v9183_v48, %s12618_s26 }
 0xa05   : > { %v9284_v27 = vpop.permute.xlu0 %2885 }
 0xa06   : > { %v9286_v50 = vpop.permute.xlu1 %3521 }
 0xa07   : > { %12781 = vst [vmem:[#allocation197_spill] sm:$0xff] %v9286_v50  ;;  %3397 = vrot.lane.b32.xlu0 %v9210_v31, %s12615_s14 }
 0xa08   : > { %4806 = vrot.lane.b32.xlu1 %v9183_v48, %s12723_s28 }
 0xa09   : > { %v9292_v12 = vpop.permute.xlu0 %2955 }
 0xa0a   : > { %12782 = vst [vmem:[#allocation198_spill] sm:$0xff] %v9292_v12  ;;  %v9294_v25 = vpop.permute.xlu1 %4143 }
 0xa0b   : > { %12783 = vst [vmem:[#allocation199_spill] sm:$0xff] %v9294_v25  ;;  %4528 = vrot.lane.b32.xlu0 %v8390_v2, %s12626_s16 }
 0xa0c   : > { %4596 = vrot.lane.b32.xlu1 %v9183_v48, %s12622_s24 }
 0xa0d   : > { %v9300_v49 = vpop.permute.xlu0 %3025 }
 0xa0e   : > { %12784 = vst [vmem:[#allocation200_spill] sm:$0xff] %v9300_v49  ;;  %v9302_v4 = vpop.permute.xlu1 %4213 }
 0xa0f   : > { %12785 = vst [vmem:[#allocation201_spill] sm:$0xff] %v9302_v4  ;;  %5127 = vrot.lane.b32.xlu0 %v8902_v58, %s12780_s0 }
 0xa10   : > { %5187 = vrot.lane.b32.xlu1 %v9183_v48, %s12623_s29 }
 0xa11   : > { %v9308_v50 = vpop.permute.xlu0 %3095 }
 0xa12   : > { %12786 = vst [vmem:[#allocation202_spill] sm:$0xff] %v9308_v50  ;;  %v9310_v12 = vpop.permute.xlu1 %4804 }
 0xa13   : > { %12787 = vst [vmem:[#allocation203_spill] sm:$0xff] %v9310_v12  ;;  %4814 = vrot.lane.b32.xlu0 %v8788_v10, %s12723_s28 }
 0xa14   : > { %4526 = vrot.lane.b32.xlu1 %v9183_v48, %s12626_s16 }
 0xa15   : > { %v9316_v25 = vpop.permute.xlu0 %3241 }
 0xa16   : > { %12788 = vst [vmem:[#allocation204_spill] sm:$0xff] %v9316_v25  ;;  %v9318_v49 = vpop.permute.xlu1 %4594 }
 0xa17   : > { %12789 = vst [vmem:[#allocation205_spill] sm:$0xff] %v9318_v49  ;;  %5125 = vrot.lane.b32.xlu0 %v8788_v10, %s12780_s0 }
 0xa18   : > { %5117 = vrot.lane.b32.xlu1 %v9183_v48, %s12780_s0 }
 0xa19   : > { %v9324_v4 = vpop.permute.xlu0 %3311 }
 0xa1a   : > { %v9326_v50 = vpop.permute.xlu1 %5185 }
 0xa1b   : > { %12790 = vst [vmem:[#allocation206_spill] sm:$0xff] %v9326_v50  ;;  %4812 = vrot.lane.b32.xlu0 %v8586_v56, %s12723_s28 }
 0xa1c   : > { %5115 = vrot.lane.b32.xlu1 %v9033_v40, %s12780_s0 }
 0xa1d   : > { %v9332_v12 = vpop.permute.xlu0 %3381 }
 0xa1e   : > { %12791 = vst [vmem:[#allocation207_spill] sm:$0xff] %v9332_v12  ;;  %v9334_v25 = vpop.permute.xlu1 %4524 }
 0xa1f   : > { %12792 = vst [vmem:[#allocation208_spill] sm:$0xff] %v9334_v25  ;;  %5123 = vrot.lane.b32.xlu0 %v8586_v56, %s12780_s0 }
 0xa20   : > { %3467 = vrot.lane.b32.xlu1 %v9210_v31, %s12616_s27 }
 0xa21   : > { %v9340_v49 = vpop.permute.xlu0 %3451 }
 0xa22   : > { %12793 = vst [vmem:[#allocation209_spill] sm:$0xff] %v9340_v49  ;;  %v9342_v45 = vpop.permute.xlu1 %2829 }
 0xa23   : > { %4810 = vrot.lane.b32.xlu0 %v8490_v13, %s12723_s28 }
 0xa24   : > { %4514 = vrot.lane.b32.xlu1 %v8380_v62, %s12626_s16 }
 0xa25   : > { %v9348_v50 = vpop.permute.xlu0 %4059 }
 0xa26   : > { %12794 = vst [vmem:[#allocation210_spill] sm:$0xff] %v9348_v50  ;;  %v9350_v12 = vpop.permute.xlu1 %2899 }
 0xa27   : > { %5121 = vrot.lane.b32.xlu0 %v8490_v13, %s12780_s0 }
 0xa28   : > { %5113 = vrot.lane.b32.xlu1 %v8883_v43, %s12780_s0 }
 0xa29   : > { %v9356_v25 = vpop.permute.xlu0 %3989 }
 0xa2a   : > { %12795 = vst [vmem:[#allocation211_spill] sm:$0xff] %v9356_v25  ;;  %v9358_v49 = vpop.permute.xlu1 %2969 }
 0xa2b   : > { %12796 = vst [vmem:[#allocation212_spill] sm:$0xff] %v9358_v49  ;;  %4808 = vrot.lane.b32.xlu0 %v8390_v2, %s12723_s28  ;;  %v3583_v49 = vld [vmem:[#allocation10 + $0x38] sm:$0xff] }
 0xa2c   : > { %4800 = vrot.lane.b32.xlu1 %v8707_v59, %s12723_s28  ;;  %3729 = vmatprep.mubr.f32.mxu0 %v3583_v49 }
 0xa2d   : > { %v9364_v18 = vpop.permute.xlu0 %3535 }
 0xa2e   : > { %12797 = vst [vmem:[#allocation213_spill] sm:$0xff] %v9364_v18  ;;  %v9366_v50 = vpop.permute.xlu1 %3039 }
 0xa2f   : > { %12798 = vst [vmem:[#allocation214_spill] sm:$0xff] %v9366_v50  ;;  %3537 = vrot.lane.b32.xlu0 %v9210_v31, %s12732_s3  ;;  %s12805_s3 = smov 111  }
 0xa30   : > { %5111 = vrot.lane.b32.xlu1 %v8707_v59, %s12780_s0 }
 0xa31   : > { %v9372_v63 = vpop.permute.xlu0 %4157 }
 0xa32   : > { %12799 = vst [vmem:[#allocation215_spill] sm:$0xff] %v9372_v63  ;;  %v9374_v25 = vpop.permute.xlu1 %3109 }
 0xa33   : > { %12800 = vst [vmem:[#allocation216_spill] sm:$0xff] %v9374_v25  ;;  %5119 = vrot.lane.b32.xlu0 %v8390_v2, %s12780_s0 }
 0xa34   : > { %4798 = vrot.lane.b32.xlu1 %v8568_v9, %s12723_s28 }
 0xa35   : > { %v9380_v18 = vpop.permute.xlu0 %4227 }
 0xa36   : > { %12801 = vst [vmem:[#allocation217_spill] sm:$0xff] %v9380_v18  ;;  %v9382_v50 = vpop.permute.xlu1 %3255 }
 0xa37   : > { %12802 = vst [vmem:[#allocation218_spill] sm:$0xff] %v9382_v50  ;;  %5405 = vrot.lane.b32.xlu0 %v8788_v10, %s12803_s1  ;;  %v3156_v50 = vld [vmem:[#allocation10 + $0x8] sm:$0xff] }
 0xa38   : > { %5109 = vrot.lane.b32.xlu1 %v8568_v9, %s12780_s0  ;;  %3889 = vmatprep.mubr.f32.mxu1 %v3156_v50 }
 0xa39   : > { %v9388_v63 = vpop.permute.xlu0 %4818 }
 0xa3a   : > { %12804 = vst [vmem:[#allocation219_spill] sm:$0xff] %v9388_v63  ;;  %v9390_v25 = vpop.permute.xlu1 %3325 }
 0xa3b   : > { %4748 = vrot.lane.b32.xlu0 %v9102_v36, %s12805_s3 }
 0xa3c   : > { %4796 = vrot.lane.b32.xlu1 %v8452_v16, %s12723_s28 }
 0xa3d   : > { %v9396_v18 = vpop.permute.xlu0 %4608 }
 0xa3e   : > { %12806 = vst [vmem:[#allocation220_spill] sm:$0xff] %v9396_v18  ;;  %v9398_v49 = vpop.permute.xlu1 %3395 }
 0xa3f   : > { %12807 = vst [vmem:[#allocation221_spill] sm:$0xff] %v9398_v49  ;;  %5403 = vrot.lane.b32.xlu0 %v8586_v56, %s12803_s1 }
 0xa40   : > { %5107 = vrot.lane.b32.xlu1 %v8452_v16, %s12780_s0 }
 0xa41   : > { %v9404_v63 = vpop.permute.xlu0 %5199 }
 0xa42   : > { %12808 = vst [vmem:[#allocation222_spill] sm:$0xff] %v9404_v63  ;;  %v9406_v17 = vpop.permute.xlu1 %3465 }
 0xa43   : > { %12809 = vst [vmem:[#allocation223_spill] sm:$0xff] %v9406_v17  ;;  %4746 = vrot.lane.b32.xlu0 %v8902_v58, %s12805_s3 }
 0xa44   : > { %4794 = vrot.lane.b32.xlu1 %v8380_v62, %s12723_s28 }
 0xa45   : > { %v9412_v18 = vpop.permute.xlu0 %4538 }
 0xa46   : > { %12810 = vst [vmem:[#allocation224_spill] sm:$0xff] %v9412_v18  ;;  %v9414_v49 = vpop.permute.xlu1 %4073 }
 0xa47   : > { %12811 = vst [vmem:[#allocation225_spill] sm:$0xff] %v9414_v49  ;;  %5401 = vrot.lane.b32.xlu0 %v8490_v13, %s12803_s1 }
 0xa48   : > { %4075 = vrot.lane.b32.xlu1 %v9210_v31, %s12628_s2  ;;  %s12819_s2 = smov 95  }
 0xa49   : > { %v9420_v63 = vpop.permute.xlu0 %3453 }
 0xa4a   : > { %12812 = vst [vmem:[#allocation226_spill] sm:$0xff] %v9420_v63  ;;  %v9422_v50 = vpop.permute.xlu1 %4003 }
 0xa4b   : > { %12813 = vst [vmem:[#allocation227_spill] sm:$0xff] %v9422_v50  ;;  %4744 = vrot.lane.b32.xlu0 %v8788_v10, %s12805_s3 }
 0xa4c   : > { %5105 = vrot.lane.b32.xlu1 %v8380_v62, %s12780_s0 }
 0xa4d   : > { %v9428_v17 = vpop.permute.xlu0 %4061 }
 0xa4e   : > { %12814 = vst [vmem:[#allocation228_spill] sm:$0xff] %v9428_v17  ;;  %v2818_v18 = vpop.permute.xlu1 %2817 }
 0xa4f   : > { %5399 = vrot.lane.b32.xlu0 %v8390_v2, %s12803_s1 }
 0xa50   : > { %4736 = vrot.lane.b32.xlu1 %v9183_v48, %s12805_s3 }
 0xa51   : > { %v9434_v49 = vpop.permute.xlu0 %3991 }
 0xa52   : > { %12815 = vst [vmem:[#allocation229_spill] sm:$0xff] %v9434_v49  ;;  %v2888_v63 = vpop.permute.xlu1 %2887 }
 0xa53   : > { %4742 = vrot.lane.b32.xlu0 %v8586_v56, %s12805_s3 }
 0xa54   : > { %5391 = vrot.lane.b32.xlu1 %v8707_v59, %s12803_s1 }
 0xa55   : > { %v2832_v50 = vpop.permute.xlu0 %2831 }
 0xa56   : > { %v9440_v6 = vpop.permute.xlu1 %2957 }
 0xa57   : > { %12816 = vst [vmem:[#allocation230_spill] sm:$0xff] %v9440_v6  ;;  %4740 = vrot.lane.b32.xlu0 %v8490_v13, %s12805_s3  ;;  %v2908_v6 = vsel %vm12817_vm2, %v9284_v27, %v9350_v12 }
 0xa58   : > { %4005 = vrot.lane.b32.xlu1 %v9210_v31, %s12617_s15 }
 0xa59   : > { %v2902_v17 = vpop.permute.xlu0 %2901 }
 0xa5a   : > { %v2916_v49 = vsel %vm12817_vm2, %v2902_v17, %v2888_v63  ;;  %v9448_v41 = vpop.permute.xlu1 %3027  ;;  %v2909_v55 = vsel %vm12818_vm6, %v2888_v63, %v2902_v17  ;;  %vm12822_vm6 = vmmov %vm12817_vm2 }
 0xa5b   : > { %5339 = vrot.lane.b32.xlu0 %v9102_v36, %s12819_s2  ;;  %5954 = vmatprep.subr.msk.mxu1 %vm12820_vm5, %v2909_v55  ;;  %v2915_v17 = vsel %vm12822_vm6, %v9350_v12, %v9284_v27  ;;  %v2914_v12 = vsel %vm12817_vm2, %v9150_v38, %v9144_v30  ;;  %vm12825_vm6 = vmmov %vm12817_vm2 }
 0xa5c   : > { %4734 = vrot.lane.b32.xlu1 %v9033_v40, %s12805_s3  ;;  %5955 = vmatpush1.msk.msra.mxu1 %vm12821_vm0, %v2916_v49  ;;  %v2907_v49 = vsel %vm12823_vm8, %v9144_v30, %v9150_v38  ;;  %vm12824_vm8 = vmmov %vm12817_vm2  ;;  %v2913_v30 = vsel %vm12825_vm6, %v9045_v28, %v8992_v15 }
 0xa5d   : > { %v9468_v63 = vpop.permute.xlu0 %2971  ;;  %5956 = vmatprep.subr.msk.mxu1 %vm12820_vm5, %v2908_v6  ;;  %v2906_v6 = vsel %vm12824_vm8, %v8992_v15, %v9045_v28  ;;  %vm12826_vm8 = vmmov %vm12817_vm2 }
 0xa5e   : > { %v9472_v55 = vpop.permute.xlu1 %3097  ;;  %5957 = vmatpush1.msk.msra.mxu1 %vm12821_vm0, %v2915_v17  ;;  %v2905_v17 = vsel %vm12817_vm2, %v8860_v21, %v8866_v46  ;;  %v2912_v15 = vsel %vm12826_vm8, %v8866_v46, %v8860_v21  ;;  %vm12827_vm6 = vmmov %vm12817_vm2  ;;  %v2911_v21 = vsel %vm12817_vm2, %v8733_v42, %v8660_v3 }
 0xa5f   : > { %4738 = vrot.lane.b32.xlu0 %v8390_v2, %s12805_s3  ;;  %5958 = vmatprep.subr.msk.mxu1 %vm12820_vm5, %v2907_v49  ;;  %v2904_v28 = vsel %vm12827_vm6, %v8660_v3, %v8733_v42  ;;  %vm12828_vm8 = vmmov %vm12817_vm2 }
 0xa60   : > { %5389 = vrot.lane.b32.xlu1 %v8568_v9, %s12803_s1  ;;  %5959 = vmatpush1.msk.msra.mxu1 %vm12821_vm0, %v2914_v12  ;;  %v2903_v12 = vsel %vm12828_vm8, %v8522_v23, %v8536_v33  ;;  %vm12829_vm6 = vmmov %vm12817_vm2  ;;  %vm12830_vm2 = vcmp.lt.s32.totalorder %v6893_v24, 34 }
 0xa61   : > { %v9500_v38 = vpop.permute.xlu0 %3041  ;;  %5960 = vmatprep.subr.msk.mxu1 %vm12820_vm5, %v2906_v6  ;;  %v2910_v6 = vsel %vm12829_vm6, %v8536_v33, %v8522_v23  ;;  %v2839_v3 = vsel %vm12830_vm2, %v2818_v18, %v2832_v50  ;;  %vm12831_vm8 = vmmov %vm12830_vm2  ;;  %vm12832_vm6 = vnez %v12469_v7 }
 0xa62   : > { %v9504_v27 = vpop.permute.xlu1 %3243  ;;  %5961 = vmatpush1.msk.msra.mxu1 %vm12821_vm0, %v2913_v30  ;;  %v2846_v42 = vsel %vm12831_vm8, %v2832_v50, %v2818_v18 }
 0xa63   : > { %5337 = vrot.lane.b32.xlu0 %v8902_v58, %s12819_s2  ;;  %5962 = vmatprep.subr.msk.mxu1 %vm12820_vm5, %v2905_v17 }
 0xa64   : > { %4732 = vrot.lane.b32.xlu1 %v8883_v43, %s12805_s3  ;;  %5963 = vmatpush1.msk.msra.mxu1 %vm12821_vm0, %v2912_v15 }
 0xa65   : > { %v9532_v46 = vpop.permute.xlu0 %3111  ;;  %5964 = vmatprep.subr.msk.mxu1 %vm12820_vm5, %v2904_v28 }
 0xa66   : > { %v3314_v49 = vpop.permute.xlu1 %3313  ;;  %5965 = vmatpush1.msk.msra.mxu1 %vm12821_vm0, %v2911_v21 }
 0xa67   : > { %5335 = vrot.lane.b32.xlu0 %v8788_v10, %s12819_s2  ;;  %5966 = vmatprep.subr.msk.mxu1 %vm12820_vm5, %v2903_v12  ;;  %vm12833_vm5 = vnez %v12467_v20 }
 0xa68   : > { %5387 = vrot.lane.b32.xlu1 %v8452_v16, %s12803_s1  ;;  %5967 = vmatpush1.msk.msra.mxu1 %vm12821_vm0, %v2910_v6  ;;  %vm12834_vm0 = vmmov %vm12830_vm2 }
 0xa69   : > { %v9558_v30 = vpop.permute.xlu0 %3257  ;;  %5968 = vmatprep.subr.msk.mxu1 %vm12832_vm6, %v2839_v3  ;;  %v2838_v0 = vsel %vm12834_vm0, %v9276_v32, %v9342_v45  ;;  %vm12835_vm2 = vmmov %vm12834_vm0  ;;  %v12853_v3 = vld [vmem:[#allocation55_spill] sm:$0xff] }
 0xa6a   : > { %v9562_v23 = vpop.permute.xlu1 %3383  ;;  %5969 = vmatpush1.msk.msra.mxu1 %vm12833_vm5, %v2846_v42  ;;  %v2845_v14 = vsel %vm12835_vm2, %v9342_v45, %v9276_v32  ;;  %vm12836_vm8 = vmmov %vm12834_vm0  ;;  %v2844_v45 = vsel %vm12834_vm0, %v9142_v26, %v9136_v54  ;;  %vm12837_vm2 = vcmp.lt.s32.totalorder %v6893_v24, 17 }
 0xa6b   : > { %4159 = vrot.lane.b32.xlu0 %v9210_v31, %s12619_s13  ;;  %5970 = vmatprep.subr.msk.mxu1 %vm12832_vm6, %v2838_v0  ;;  %v2837_v33 = vsel %vm12836_vm8, %v9136_v54, %v9142_v26  ;;  %vm12838_vm11 = vmmov %vm12837_vm2  ;;  %v2843_v54 = vsel %vm12834_vm0, %v9037_v29, %v8984_v22 }
 0xa6c   : > { %4730 = vrot.lane.b32.xlu1 %v8707_v59, %s12805_s3  ;;  %5971 = vmatpush1.msk.msra.mxu1 %vm12833_vm5, %v2845_v14  ;;  %vm12839_vm8 = vmmov %vm12834_vm0 }
 0xa6d   : > { %v3328_v18 = vpop.permute.xlu0 %3327  ;;  %5972 = vmatprep.subr.msk.mxu1 %vm12832_vm6, %v2837_v33  ;;  %v2836_v26 = vsel %vm12839_vm8, %v8984_v22, %v9037_v29  ;;  %vm12842_vm8 = vmmov %vm12834_vm0 }
 0xa6e   : > { %v3342_v32 = vsel %vm12837_vm2, %v3328_v18, %v3314_v49  ;;  %v9594_v50 = vpop.permute.xlu1 %3523  ;;  %5973 = vmatpush1.msk.msra.mxu1 %vm12833_vm5, %v2844_v45  ;;  %v3335_v17 = vsel %vm12838_vm11, %v3314_v49, %v3328_v18  ;;  %vm12840_vm11 = vmmov %vm12837_vm2  ;;  %v2842_v29 = vsel %vm12842_vm8, %v8858_v8, %v8852_v39  ;;  %v12861_v18 = vld [vmem:[#allocation65_spill] sm:$0xff] }
 0xa6f   : > { %4678 = vrot.lane.b32.xlu0 %v9102_v36, %s12620_s17  ;;  %5884 = vmatprep.subr.msk.mxu0 %vm12605_vm9, %v3335_v17  ;;  %v3334_v28 = vsel %vm12840_vm11, %v9324_v4, %v9390_v25  ;;  %vm12841_vm2 = vmmov %vm12834_vm0 }
 0xa70   : > { %5385 = vrot.lane.b32.xlu1 %v8380_v62, %s12803_s1  ;;  %5974 = vmatprep.subr.msk.mxu1 %vm12832_vm6, %v2836_v26  ;;  %v2835_v22 = vsel %vm12841_vm2, %v8852_v39, %v8858_v8  ;;  %vm12843_vm0 = vmmov %vm12840_vm11  ;;  %v12864_v26 = vld [vmem:[#allocation101_spill] sm:$0xff] }
 0xa71   : > { %5885 = vmatpush1.msk.msra.mxu0 %vm12604_vm14, %v3342_v32  ;;  %5975 = vmatpush1.msk.msra.mxu1 %vm12833_vm5, %v2843_v54  ;;  %v9620_v15 = vpop.permute.xlu0 %4530  ;;  %v3341_v21 = vsel %vm12843_vm0, %v9390_v25, %v9324_v4  ;;  %vm12844_vm11 = vmmov %vm12843_vm0  ;;  %v2834_v25 = vsel %vm12841_vm2, %v8652_v51, %v8725_v35  ;;  %v3340_v39 = vsel %vm12843_vm0, %v9193_v52, %v9187_v37  ;;  %v12862_v32 = vld [vmem:[#allocation63_spill] sm:$0xff] }
 0xa72   : > { %5886 = vmatprep.subr.msk.mxu0 %vm12605_vm9, %v3334_v28  ;;  %5976 = vmatprep.subr.msk.mxu1 %vm12832_vm6, %v2835_v22  ;;  %v9642_v49 = vpop.permute.xlu1 %4145  ;;  %v3333_v4 = vsel %vm12844_vm11, %v9187_v37, %v9193_v52  ;;  %vm12845_vm8 = vmmov %vm12841_vm2  ;;  %v3339_v6 = vsel %vm12843_vm0, %v9085_v34, %v9035_v1  ;;  %v12865_v54 = vld [vmem:[#allocation87_spill] sm:$0xff] }
 0xa73   : > { %5887 = vmatpush1.msk.msra.mxu0 %vm12604_vm14, %v3341_v21  ;;  %5977 = vmatpush1.msk.msra.mxu1 %vm12833_vm5, %v2842_v29  ;;  %v2841_v8 = vsel %vm12845_vm8, %v8725_v35, %v8652_v51  ;;  %vm12846_vm11 = vmmov %vm12843_vm0  ;;  %v2833_v35 = vsel %vm12841_vm2, %v8514_v53, %v8528_v19 }
 0xa74   : > { %5333 = vrot.lane.b32.xlu0 %v8586_v56, %s12819_s2  ;;  %4728 = vrot.lane.b32.xlu1 %v8568_v9, %s12805_s3  ;;  %v3332_v51 = vsel %vm12846_vm11, %v9035_v1, %v9085_v34  ;;  %vm12847_vm8 = vmmov %vm12841_vm2 }
 0xa75   : > { %5888 = vmatprep.subr.msk.mxu0 %vm12605_vm9, %v3333_v4  ;;  %5978 = vmatprep.subr.msk.mxu1 %vm12832_vm6, %v2834_v25  ;;  %v9672_v12 = vpop.permute.xlu0 %5129  ;;  %v2840_v52 = vsel %vm12847_vm8, %v8528_v19, %v8514_v53  ;;  %vm12848_vm11 = vmmov %vm12843_vm0  ;;  %vm12852_vm8 = vnez %v12458_v11  ;;  %v12868_v25 = vld [vmem:[#allocation62_spill] sm:$0xff] }
 0xa76   : > { %5889 = vmatpush1.msk.msra.mxu0 %vm12604_vm14, %v3340_v39  ;;  %5979 = vmatpush1.msk.msra.mxu1 %vm12833_vm5, %v2841_v8  ;;  %v9686_v37 = vpop.permute.xlu1 %4215  ;;  %v3331_v53 = vsel %vm12848_vm11, %v8906_v44, %v8912_v47  ;;  %v12869_v8 = vld [vmem:[#allocation59_spill] sm:$0xff] }
 0xa77   : > { %5890 = vmatprep.subr.msk.mxu0 %vm12605_vm9, %v3332_v51  ;;  %5980 = vmatprep.subr.msk.mxu1 %vm12832_vm6, %v2833_v35  ;;  %vm12849_vm6 = vcmp.lt.s32.totalorder %v6893_v24, 30  ;;  %v12873_v51 = vld [vmem:[#allocation46_spill] sm:$0xff] }
 0xa78   : > { %5891 = vmatpush1.msk.msra.mxu0 %vm12604_vm14, %v3339_v6  ;;  %5981 = vmatpush1.msk.msra.mxu1 %vm12833_vm5, %v2840_v52  ;;  %v3116_v7 = vsel %vm12849_vm6, %v9016_v57, %v9069_v60  ;;  %vm12850_vm5 = vmmov %vm12843_vm0  ;;  %vm12854_vm0 = vnez %v12853_v3  ;;  %v12875_v52 = vld [vmem:[#allocation45_spill] sm:$0xff] }
 0xa79   : > { %4676 = vrot.lane.b32.xlu0 %v8902_v58, %s12620_s17  ;;  %5327 = vrot.lane.b32.xlu1 %v9183_v48, %s12819_s2  ;;  %v9716_v19 = vpop.permute.xlu0 %3397  ;;  %v3338_v20 = vsel %vm12850_vm5, %v8912_v47, %v8906_v44  ;;  %vm12851_vm2 = vmmov %vm12849_vm6  ;;  %v12855_v44 = vld [vmem:[#allocation105_spill] sm:$0xff]  ;;  %v12856_v47 = vld [vmem:[#allocation91_spill] sm:$0xff]  ;;  %v3336_v29 = vsel %vm12850_vm5, %v12861_v18, %v12862_v32 }
 0xa7a   : > { %v3123_v1 = vsel %vm12851_vm2, %v9069_v60, %v9016_v57  ;;  %5892 = vmatprep.subr.msk.mxu0 %vm12605_vm9, %v3331_v53  ;;  %5982 = vmatprep.subr.msk.mxu1 %vm12852_vm8, %v3116_v7  ;;  %v9730_v34 = vpop.permute.xlu1 %4806  ;;  %vm12857_vm11 = vmmov %vm12850_vm5  ;;  %v12858_v57 = vld [vmem:[#allocation120_spill] sm:$0xff]  ;;  %v12859_v60 = vld [vmem:[#allocation119_spill] sm:$0xff]  ;;  %v3337_v14 = vsel %vm12850_vm5, %v12855_v44, %v12856_v47  ;;  %v3121_v21 = vsel %vm12851_vm2, %v12864_v26, %v12865_v54 }
 0xa7b   : > { %5893 = vmatpush1.msk.msra.mxu0 %vm12604_vm14, %v3338_v20  ;;  %5983 = vmatpush2.msk.msra.mxu1 %vm12854_vm0, %v3123_v1  ;;  %v3330_v42 = vsel %vm12857_vm11, %v12856_v47, %v12855_v44  ;;  %vm12860_vm6 = vmmov %vm12851_vm2  ;;  %v3122_v33 = vsel %vm12851_vm2, %v12858_v57, %v12859_v60  ;;  %v12882_v44 = vld [vmem:[#allocation54_spill] sm:$0xff]  ;;  %v12884_v47 = vld [vmem:[#allocation53_spill] sm:$0xff] }
 0xa7c   : > { %v3115_v0 = vsel %vm12860_vm6, %v12859_v60, %v12858_v57  ;;  %5894 = vmatprep.subr.msk.mxu0 %vm12605_vm9, %v3330_v42  ;;  %vm12863_vm11 = vmmov %vm12850_vm5  ;;  %vm12874_vm5 = vnez %v12873_v51  ;;  %v12886_v42 = vld [vmem:[#allocation176_spill] sm:$0xff]  ;;  %v12887_v57 = vld [vmem:[#allocation175_spill] sm:$0xff] }
 0xa7d   : > { %5984 = vmatprep.subr.msk.mxu1 %vm12852_vm8, %v3115_v0  ;;  %5895 = vmatpush1.msk.msra.mxu0 %vm12604_vm14, %v3337_v14  ;;  %v9760_v45 = vpop.permute.xlu0 %4528  ;;  %v3329_v17 = vsel %vm12863_vm11, %v12862_v32, %v12861_v18  ;;  %vm12866_vm6 = vmmov %vm12851_vm2  ;;  %vm12867_vm11 = vcmp.lt.s32.totalorder %v6893_v24, 18  ;;  %v12888_v0 = vld [vmem:[#allocation214_spill] sm:$0xff]  ;;  %v12889_v14 = vld [vmem:[#allocation200_spill] sm:$0xff] }
 0xa7e   : > { %5985 = vmatpush2.msk.msra.mxu1 %vm12854_vm0, %v3122_v33  ;;  %5331 = vrot.lane.b32.xlu0 %v8490_v13, %s12819_s2  ;;  %v3114_v28 = vsel %vm12866_vm6, %v12865_v54, %v12864_v26  ;;  %v9774_v22 = vpop.permute.xlu1 %4596  ;;  %v3265_v4 = vsel %vm12867_vm11, %v9504_v27, %v9558_v30  ;;  %vm12870_vm6 = vmmov %vm12851_vm2  ;;  %v12893_v26 = vld [vmem:[#allocation147_spill] sm:$0xff]  ;;  %v12917_v51 = vld [vmem:[#allocation152_spill] sm:$0xff] }
 0xa7f   : > { %4726 = vrot.lane.b32.xlu1 %v8452_v16, %s12805_s3  ;;  %5896 = vmatprep.subr.msk.mxu0 %vm12605_vm9, %v3329_v17  ;;  %v3113_v5 = vsel %vm12870_vm6, %v12869_v8, %v12868_v25  ;;  %vm12871_vm9 = vmmov %vm12851_vm2  ;;  %vm12876_vm2 = vnez %v12875_v52  ;;  %vm12879_vm6 = vcmp.lt.s32.totalorder %v6893_v24, 31  ;;  %v12892_v17 = vld [vmem:[#allocation156_spill] sm:$0xff] }
 0xa80   : > { %5986 = vmatprep.subr.msk.mxu1 %vm12852_vm8, %v3114_v28  ;;  %5897 = vmatpush1.msk.msra.mxu0 %vm12604_vm14, %v3336_v29  ;;  %v3120_v39 = vsel %vm12871_vm9, %v12868_v25, %v12869_v8  ;;  %vm12872_vm14 = vmmov %vm12867_vm11  ;;  %v3049_v7 = vsel %vm12879_vm6, %v9448_v41, %v9500_v38  ;;  %v12894_v28 = vld [vmem:[#allocation172_spill] sm:$0xff]  ;;  %v12895_v29 = vld [vmem:[#allocation171_spill] sm:$0xff] }
 0xa81   : > { %5987 = vmatpush2.msk.msra.mxu1 %vm12854_vm0, %v3121_v21  ;;  %v3272_v61 = vsel %vm12872_vm14, %v9558_v30, %v9504_v27  ;;  %5898 = vmatprep.subr.msk.mxu0 %vm12874_vm5, %v3265_v4  ;;  %v9812_v35 = vpop.permute.xlu0 %5127  ;;  %v12877_v27 = vld [vmem:[#allocation218_spill] sm:$0xff]  ;;  %v12878_v30 = vld [vmem:[#allocation204_spill] sm:$0xff]  ;;  %vm12880_vm9 = vmmov %vm12867_vm11 }
 0xa82   : > { %5988 = vmatprep.subr.msk.mxu1 %vm12852_vm8, %v3113_v5  ;;  %5899 = vmatpush1.msk.msra.mxu0 %vm12876_vm2, %v3272_v61  ;;  %v9818_v6 = vpop.permute.xlu1 %5187  ;;  %v3264_v53 = vsel %vm12867_vm11, %v12878_v30, %v12877_v27  ;;  %v3271_v20 = vsel %vm12880_vm9, %v12877_v27, %v12878_v30  ;;  %vm12881_vm14 = vmmov %vm12879_vm6  ;;  %vm12883_vm11 = vnez %v12882_v44  ;;  %vm12885_vm6 = vnez %v12884_v47  ;;  %v12898_v5 = vld [vmem:[#allocation122_spill] sm:$0xff]  ;;  %v12900_v27 = vld [vmem:[#allocation153_spill] sm:$0xff] }
 0xa83   : > { %5989 = vmatpush2.msk.msra.mxu1 %vm12854_vm0, %v3120_v39  ;;  %4229 = vrot.lane.b32.xlu0 %v9210_v31, %s12618_s26  ;;  %v3056_v1 = vsel %vm12881_vm14, %v9500_v38, %v9448_v41  ;;  %v3263_v60 = vsel %vm12880_vm9, %v12887_v57, %v12886_v42  ;;  %v3048_v41 = vsel %vm12881_vm14, %v12889_v14, %v12888_v0  ;;  %vm12890_vm3 = vmmov %vm12880_vm9  ;;  %v12899_v39 = vld [vmem:[#allocation121_spill] sm:$0xff]  ;;  %v12901_v30 = vld [vmem:[#allocation144_spill] sm:$0xff] }
 0xa84   : > { %5325 = vrot.lane.b32.xlu1 %v9033_v40, %s12819_s2  ;;  %5900 = vmatprep.subr.msk.mxu0 %vm12874_vm5, %v3264_v53  ;;  %v3270_v33 = vsel %vm12890_vm3, %v12886_v42, %v12887_v57  ;;  %vm12891_vm15 = vmmov %vm12881_vm14  ;;  %v3262_v54 = vsel %vm12890_vm3, %v12893_v26, %v12892_v17  ;;  %v3054_v25 = vsel %vm12881_vm14, %v12894_v28, %v12895_v29  ;;  %v12904_v42 = vld [vmem:[#allocation103_spill] sm:$0xff]  ;;  %v12905_v57 = vld [vmem:[#allocation89_spill] sm:$0xff] }
 0xa85   : > { %5990 = vmatprep.subr.msk.mxu1 %vm12883_vm11, %v3049_v7  ;;  %5901 = vmatpush1.msk.msra.mxu0 %vm12876_vm2, %v3271_v20  ;;  %v9856_v38 = vpop.permute.xlu0 %4814  ;;  %v3055_v18 = vsel %vm12891_vm15, %v12888_v0, %v12889_v14  ;;  %vm12896_vm15 = vmmov %vm12881_vm14  ;;  %v3261_v61 = vsel %vm12890_vm3, %v12899_v39, %v12898_v5  ;;  %v12906_v0 = vld [vmem:[#allocation118_spill] sm:$0xff]  ;;  %v12907_v14 = vld [vmem:[#allocation117_spill] sm:$0xff] }
 0xa86   : > { %5991 = vmatpush2.msk.msra.mxu1 %vm12885_vm6, %v3056_v1  ;;  %5902 = vmatprep.subr.msk.mxu0 %vm12874_vm5, %v3263_v60  ;;  %v9870_v32 = vpop.permute.xlu1 %4526  ;;  %v3047_v21 = vsel %vm12896_vm15, %v12895_v29, %v12894_v28  ;;  %vm12897_vm9 = vmmov %vm12890_vm3  ;;  %v3053_v1 = vsel %vm12881_vm14, %v12900_v27, %v12901_v30  ;;  %v3260_v60 = vsel %vm12890_vm3, %v12905_v57, %v12904_v42  ;;  %v12911_v28 = vld [vmem:[#allocation61_spill] sm:$0xff] }
 0xa87   : > { %5992 = vmatprep.subr.msk.mxu1 %vm12883_vm11, %v3048_v41  ;;  %5903 = vmatpush1.msk.msra.mxu0 %vm12876_vm2, %v3270_v33  ;;  %v3269_v4 = vsel %vm12897_vm9, %v12892_v17, %v12893_v26  ;;  %vm12902_vm15 = vmmov %vm12881_vm14  ;;  %v3052_v17 = vsel %vm12881_vm14, %v12906_v0, %v12907_v14 }
 0xa88   : > { %5993 = vmatpush2.msk.msra.mxu1 %vm12885_vm6, %v3055_v18  ;;  %4820 = vrot.lane.b32.xlu0 %v9210_v31, %s12723_s28  ;;  %v3046_v53 = vsel %vm12902_vm15, %v12901_v30, %v12900_v27  ;;  %vm12903_vm9 = vmmov %vm12890_vm3  ;;  %v12916_v27 = vld [vmem:[#allocation161_spill] sm:$0xff] }
 0xa89   : > { %4724 = vrot.lane.b32.xlu1 %v8380_v62, %s12805_s3  ;;  %5904 = vmatprep.subr.msk.mxu0 %vm12874_vm5, %v3262_v54  ;;  %v9900_v8 = vpop.permute.xlu0 %5125  ;;  %v3268_v20 = vsel %vm12903_vm9, %v12898_v5, %v12899_v39  ;;  %vm12908_vm15 = vmmov %vm12881_vm14  ;;  %v12910_v54 = vld [vmem:[#allocation64_spill] sm:$0xff] }
 0xa8a   : > { %5994 = vmatprep.subr.msk.mxu1 %vm12883_vm11, %v3047_v21  ;;  %5905 = vmatpush1.msk.msra.mxu0 %vm12876_vm2, %v3269_v4  ;;  %v9914_v7 = vpop.permute.xlu1 %5117  ;;  %v3045_v41 = vsel %vm12908_vm15, %v12907_v14, %v12906_v0  ;;  %vm12909_vm9 = vmmov %vm12890_vm3  ;;  %v3259_v29 = vsel %vm12890_vm3, %v12911_v28, %v12910_v54  ;;  %v12912_v21 = vld [vmem:[#allocation99_spill] sm:$0xff]  ;;  %v12913_v4 = vld [vmem:[#allocation85_spill] sm:$0xff] }
 0xa8b   : > { %5995 = vmatpush2.msk.msra.mxu1 %vm12885_vm6, %v3054_v25  ;;  %5906 = vmatprep.subr.msk.mxu0 %vm12874_vm5, %v3261_v61  ;;  %v3267_v18 = vsel %vm12909_vm9, %v12904_v42, %v12905_v57  ;;  %vm12914_vm15 = vmmov %vm12881_vm14  ;;  %v3051_v39 = vsel %vm12881_vm14, %v12912_v21, %v12913_v4  ;;  %v12926_v0 = vld [vmem:[#allocation43_spill] sm:$0xff] }
 0xa8c   : > { %5996 = vmatprep.subr.msk.mxu1 %vm12883_vm11, %v3046_v53  ;;  %5907 = vmatpush1.msk.msra.mxu0 %vm12876_vm2, %v3268_v20  ;;  %v3044_v25 = vsel %vm12914_vm15, %v12913_v4, %v12912_v21  ;;  %vm12915_vm9 = vmmov %vm12890_vm3  ;;  %v12919_v53 = vld [vmem:[#allocation60_spill] sm:$0xff]  ;;  %v12920_v20 = vld [vmem:[#allocation58_spill] sm:$0xff] }
 0xa8d   : > { %5997 = vmatpush2.msk.msra.mxu1 %vm12885_vm6, %v3053_v1  ;;  %4610 = vrot.lane.b32.xlu0 %v9210_v31, %s12622_s24  ;;  %v9944_v33 = vpop.permute.xlu0 %4812  ;;  %v3266_v5 = vsel %vm12915_vm9, %v12910_v54, %v12911_v28  ;;  %v12928_v14 = vld [vmem:[#allocation139_spill] sm:$0xff]  ;;  %v12970_v28 = vld [vmem:[#allocation180_spill] sm:$0xff] }
 0xa8e   : > { %5323 = vrot.lane.b32.xlu1 %v8883_v43, %s12819_s2  ;;  %5908 = vmatprep.subr.msk.mxu0 %vm12874_vm5, %v3260_v60  ;;  %v9958_v26 = vpop.permute.xlu1 %5115  ;;  %v12924_v60 = vld [vmem:[#allocation44_spill] sm:$0xff] }
 0xa8f   : > { %5998 = vmatprep.subr.msk.mxu1 %vm12883_vm11, %v3045_v41  ;;  %5909 = vmatpush1.msk.msra.mxu0 %vm12876_vm2, %v3267_v18  ;;  %vm12925_vm9 = vnez %v12924_v60  ;;  %v12929_v41 = vld [vmem:[#allocation112_spill] sm:$0xff] }
 0xa90   : > { %5999 = vmatpush2.msk.msra.mxu1 %vm12885_vm6, %v3052_v17  ;;  %5910 = vmatprep.subr.msk.mxu0 %vm12874_vm5, %v3259_v29  ;;  %vm12918_vm5 = vcmp.lt.s32.totalorder %v6893_v24, 14  ;;  %v12930_v17 = vld [vmem:[#allocation230_spill] sm:$0xff] }
 0xa91   : > { %6000 = vmatprep.subr.msk.mxu1 %vm12883_vm11, %v3044_v25  ;;  %5911 = vmatpush1.msk.msra.mxu0 %vm12876_vm2, %v3266_v5  ;;  %v9988_v61 = vpop.permute.xlu0 %5123  ;;  %v3542_v30 = vsel %vm12918_vm5, %v12917_v51, %v12916_v27  ;;  %vm12921_vm2 = vmmov %vm12881_vm14  ;;  %vm12927_vm14 = vnez %v12926_v0  ;;  %v3541_v18 = vsel %vm12918_vm5, %v12929_v41, %v12928_v14  ;;  %v12937_v25 = vld [vmem:[#allocation96_spill] sm:$0xff] }
 0xa92   : > { %6001 = vmatpush2.msk.msra.mxu1 %vm12885_vm6, %v3051_v39  ;;  %4674 = vrot.lane.b32.xlu0 %v8788_v10, %s12620_s17  ;;  %v3043_v52 = vsel %vm12921_vm2, %v12920_v20, %v12919_v53  ;;  %v3468_v1 = vpop.permute.xlu1 %3467  ;;  %vm12922_vm3 = vmmov %vm12921_vm2  ;;  %vm12931_vm2 = vcmp.lt.s32.totalorder %v6893_v24, 32  ;;  %v12939_v39 = vld [vmem:[#allocation212_spill] sm:$0xff] }
 0xa93   : > { %4666 = vrot.lane.b32.xlu1 %v9183_v48, %s12620_s17  ;;  %v3050_v42 = vsel %vm12922_vm3, %v12919_v53, %v12920_v20  ;;  %vm12923_vm15 = vmmov %vm12918_vm5  ;;  %5912 = vmatprep.subr.msk.mxu0 %vm12925_vm9, %v3542_v30  ;;  %v2979_v54 = vsel %vm12931_vm2, %v12930_v17, %v9468_v63  ;;  %v12942_v20 = vld [vmem:[#allocation82_spill] sm:$0xff] }
 0xa94   : > { %v3549_v57 = vsel %vm12923_vm15, %v12916_v27, %v12917_v51  ;;  %6002 = vmatprep.subr.msk.mxu1 %vm12883_vm11, %v3043_v52  ;;  %vm12932_vm11 = vmmov %vm12918_vm5  ;;  %v12940_v27 = vld [vmem:[#allocation198_spill] sm:$0xff]  ;;  %v12943_v52 = vld [vmem:[#allocation56_spill] sm:$0xff] }
 0xa95   : > { %5913 = vmatpush2.msk.msra.mxu0 %vm12927_vm14, %v3549_v57  ;;  %6003 = vmatpush2.msk.msra.mxu1 %vm12885_vm6, %v3050_v42  ;;  %v3548_v44 = vsel %vm12932_vm11, %v12928_v14, %v12929_v41  ;;  %vm12933_vm3 = vmmov %vm12931_vm2  ;;  %v10038_v29 = vpop.permute.xlu0 %4810  ;;  %v2985_v53 = vsel %vm12931_vm2, %v12939_v39, %v12940_v27  ;;  %v12945_v57 = vld [vmem:[#allocation170_spill] sm:$0xff]  ;;  %v12946_v14 = vld [vmem:[#allocation169_spill] sm:$0xff] }
 0xa96   : > { %v2986_v47 = vsel %vm12933_vm3, %v9468_v63, %v12930_v17  ;;  %5914 = vmatprep.subr.msk.mxu0 %vm12925_vm9, %v3541_v18  ;;  %6004 = vmatprep.subr.msk.mxu1 %vm12674_vm10, %v2979_v54  ;;  %v10044_v4 = vpop.permute.xlu1 %4514  ;;  %v12936_v63 = vld [vmem:[#allocation107_spill] sm:$0xff]  ;;  %vm12938_vm6 = vmmov %vm12918_vm5 }
 0xa97   : > { %5915 = vmatpush2.msk.msra.mxu0 %vm12927_vm14, %v3548_v44  ;;  %6005 = vmatpush2.msk.msra.mxu1 %vm12675_vm7, %v2986_v47  ;;  %v3540_v5 = vsel %vm12938_vm6, %v12937_v25, %v12936_v63  ;;  %vm12941_vm15 = vmmov %vm12931_vm2  ;;  %v3547_v30 = vsel %vm12918_vm5, %v12936_v63, %v12937_v25  ;;  %v12950_v44 = vld [vmem:[#allocation226_spill] sm:$0xff] }
 0xa98   : > { %5201 = vrot.lane.b32.xlu0 %v9210_v31, %s12623_s29  ;;  %5321 = vrot.lane.b32.xlu1 %v8707_v59, %s12819_s2  ;;  %v2978_v51 = vsel %vm12941_vm15, %v12940_v27, %v12939_v39  ;;  %vm12944_vm11 = vmmov %vm12918_vm5  ;;  %v12956_v27 = vld [vmem:[#allocation142_spill] sm:$0xff] }
 0xa99   : > { %5916 = vmatprep.subr.msk.mxu0 %vm12925_vm9, %v3540_v5  ;;  %6006 = vmatprep.subr.msk.mxu1 %vm12674_vm10, %v2978_v51  ;;  %v3539_v42 = vsel %vm12944_vm11, %v12943_v52, %v12942_v20  ;;  %vm12947_vm3 = vmmov %vm12931_vm2  ;;  %v10082_v18 = vpop.permute.xlu0 %5121  ;;  %vm12953_vm11 = vcmp.lt.s32.totalorder %v6893_v24, 98 }
 0xa9a   : > { %5917 = vmatpush2.msk.msra.mxu0 %vm12927_vm14, %v3547_v30  ;;  %6007 = vmatpush2.msk.msra.mxu1 %vm12675_vm7, %v2985_v53  ;;  %v2977_v41 = vsel %vm12947_vm3, %v12946_v14, %v12945_v57  ;;  %vm12948_vm6 = vmmov %vm12918_vm5  ;;  %vm12951_vm5 = vcmp.lt.s32.totalorder %v6893_v24, 15  ;;  %v5114_v63 = vpop.permute.xlu1 %5113 }
 0xa9b   : > { %v3546_v17 = vsel %vm12948_vm6, %v12942_v20, %v12943_v52  ;;  %vm12949_vm15 = vmmov %vm12931_vm2  ;;  %5918 = vmatprep.subr.msk.mxu0 %vm12925_vm9, %v3539_v42  ;;  %6008 = vmatprep.subr.msk.mxu1 %vm12674_vm10, %v2977_v41  ;;  %v3475_v47 = vsel %vm12951_vm5, %v12950_v44, %v3468_v1  ;;  %v10109_v5 = vsel %vm12953_vm11, %v5114_v63, %v9812_v35  ;;  %v12960_v20 = vld [vmem:[#allocation115_spill] sm:$0xff]  ;;  %v12961_v52 = vld [vmem:[#allocation116_spill] sm:$0xff] }
 0xa9c   : > { %v2984_v54 = vsel %vm12949_vm15, %v12945_v57, %v12946_v14  ;;  %vm12952_vm2 = vmmov %vm12951_vm5  ;;  %5919 = vmatpush2.msk.msra.mxu0 %vm12927_vm14, %v3546_v17  ;;  %5329 = vrot.lane.b32.xlu0 %v8390_v2, %s12819_s2  ;;  %v12964_v14 = vld [vmem:[#allocation223_spill] sm:$0xff]  ;;  %v12965_v41 = vld [vmem:[#allocation209_spill] sm:$0xff] }
 0xa9d   : > { %v3482_v25 = vsel %vm12952_vm2, %v3468_v1, %v12950_v44  ;;  %6009 = vmatpush2.msk.msra.mxu1 %vm12675_vm7, %v2984_v54  ;;  %vm12954_vm3 = vmmov %vm12953_vm11  ;;  %4664 = vrot.lane.b32.xlu1 %v9033_v40, %s12620_s17  ;;  %v12955_v1 = vld [vmem:[#allocation151_spill] sm:$0xff]  ;;  %v3474_v17 = vsel %vm12952_vm2, %v12965_v41, %v12964_v14 }
 0xa9e   : > { %v10114_v39 = vsel %vm12954_vm3, %v9812_v35, %v5114_v63  ;;  %vm12957_vm6 = vmmov %vm12949_vm15  ;;  %5920 = vmatprep.subr.msk.mxu0 %vm12499_vm13, %v3475_v47  ;;  %v10132_v35 = vpop.permute.xlu0 %4808  ;;  %v4801_v44 = vpop.permute.xlu1 %4800 }
 0xa9f   : > { %v2976_v51 = vsel %vm12957_vm6, %v12956_v27, %v12955_v1  ;;  %vm12958_vm15 = vmmov %vm12957_vm6  ;;  %5921 = vmatpush2.msk.msra.mxu0 %vm12498_vm4, %v3482_v25 }
 0xaa0   : > { %v2983_v30 = vsel %vm12958_vm15, %v12955_v1, %v12956_v27  ;;  %6010 = vmatprep.subr.msk.mxu1 %vm12674_vm10, %v2976_v51  ;;  %vm12962_vm5 = vmmov %vm12957_vm6  ;;  %5922 = vmatprep.subr.msk.mxu0 %vm12499_vm13, %v3474_v17  ;;  %vm12968_vm6 = vcmp.lt.s32.totalorder %v6893_v24, 110  ;;  %v3155_v1 = vld [vmem:[#allocation10] sm:$0xff]  ;;  %v12971_v51 = vld [vmem:[#allocation179_spill] sm:$0xff] }
 0xaa1   : > { %v2982_v42 = vsel %vm12962_vm5, %v12961_v52, %v12960_v20  ;;  %6011 = vmatpush2.msk.msra.mxu1 %vm12675_vm7, %v2983_v30  ;;  %vm12966_vm11 = vmmov %vm12962_vm5  ;;  %v10161_v63 = vsel %vm12968_vm6, %v4801_v44, %v9856_v38  ;;  %v3159_v27 = vld [vmem:[#allocation10 + $0x20] sm:$0xf]  ;;  %4540 = vrot.lane.b32.xlu0 %v9210_v31, %s12626_s16 }
 0xaa2   : > { %v2975_v54 = vsel %vm12966_vm11, %v12960_v20, %v12961_v52  ;;  %vm12967_vm3 = vmmov %vm12952_vm2  ;;  %5319 = vrot.lane.b32.xlu1 %v8568_v9, %s12819_s2  ;;  %v10180_v30 = vpop.permute.xlu0 %3537  ;;  %v5112_v20 = vpop.permute.xlu1 %5111  ;;  %v12974_v52 = vld [vmem:[#allocation163_spill] sm:$0xff] }
 0xaa3   : > { %v3481_v47 = vsel %vm12967_vm3, %v12964_v14, %v12965_v41  ;;  %6012 = vmatprep.subr.msk.mxu1 %vm12674_vm10, %v2975_v54  ;;  %vm12969_vm15 = vmmov %vm12968_vm6 }
 0xaa4   : > { %v10166_v25 = vsel %vm12969_vm15, %v9856_v38, %v4801_v44  ;;  %5923 = vmatpush2.msk.msra.mxu0 %vm12498_vm4, %v3481_v47  ;;  %6013 = vmatpush2.msk.msra.mxu1 %vm12675_vm7, %v2982_v42  ;;  %vm12972_vm10 = vmmov %vm12952_vm2  ;;  %v12975_v42 = vld [vmem:[#allocation150_spill] sm:$0xff]  ;;  %v3158_v44 = vld [vmem:[#allocation10 + $0x18] sm:$0xf] }
 0xaa5   : > { %v3473_v38 = vsel %vm12972_vm10, %v12971_v51, %v12970_v28  ;;  %vm12973_vm5 = vmmov %vm12952_vm2  ;;  %3890 = vmatmul.mubr.f32.vlgmr.msra.gmra.mxu1 %v3155_v1  ;;  %v3479_v54 = vsel %vm12967_vm3, %v12974_v52, %v12975_v42  ;;  %4672 = vrot.lane.b32.xlu0 %v8586_v56, %s12620_s17  ;;  %v12979_v47 = vld [vmem:[#allocation126_spill] sm:$0xff]  ;;  %v12980_v1 = vld [vmem:[#allocation125_spill] sm:$0xff] }
 0xaa6   : > { %v3480_v21 = vsel %vm12973_vm5, %v12970_v28, %v12971_v51  ;;  %5924 = vmatprep.subr.msk.mxu0 %vm12499_vm13, %v3473_v38  ;;  %vm12976_vm7 = vmmov %vm12952_vm2  ;;  %vm12977_vm2 = vcmp.lt.s32.totalorder %v6893_v24, 98  ;;  %3895 = vmatprep.mubr.f32.mxu1 %v3159_v27  ;;  %v10218_v27 = vpop.permute.xlu0 %5119  ;;  %v4799_v51 = vpop.permute.xlu1 %4798  ;;  %v12983_v38 = vld [vmem:[#allocation109_spill] sm:$0xff]  ;;  %vm12986_vm5 = vcmp.lt.s32.totalorder %v6893_v24, 110 }
 0xaa7   : > { %5925 = vmatpush2.msk.msra.mxu0 %vm12498_vm4, %v3480_v21  ;;  %v3472_v14 = vsel %vm12976_vm7, %v12975_v42, %v12974_v52  ;;  %v10197_v41 = vsel %vm12977_vm2, %v5112_v20, %v9900_v8  ;;  %vm12978_vm11 = vmmov %vm12977_vm2  ;;  %4662 = vrot.lane.b32.xlu1 %v8883_v43, %s12620_s17  ;;  %v12984_v21 = vld [vmem:[#allocation94_spill] sm:$0xff]  ;;  %v10237_v52 = vsel %vm12986_vm5, %v4799_v51, %v9944_v33 }
 0xaa8   : > { %v10202_v17 = vsel %vm12978_vm11, %v9900_v8, %v5112_v20  ;;  %5926 = vmatprep.subr.msk.mxu0 %vm12499_vm13, %v3472_v14  ;;  %vm12981_vm6 = vmmov %vm12967_vm3 }
 0xaa9   : > { %5927 = vmatpush2.msk.msra.mxu0 %vm12498_vm4, %v3479_v54  ;;  %v3471_v8 = vsel %vm12981_vm6, %v12980_v1, %v12979_v47  ;;  %vm12982_vm15 = vmmov %vm12967_vm3  ;;  %3896 = vmatmul.mubr.f32.gmra.mxu1 %v3158_v44  ;;  %v12989_v54 = vmov 0.0   ;;  %vm12994_vm6 = vcmp.lt.s32.totalorder %v6893_v24, 16 }
 0xaaa   : > { %v3478_v28 = vsel %vm12982_vm15, %v12979_v47, %v12980_v1  ;;  %5928 = vmatprep.subr.msk.mxu0 %vm12499_vm13, %v3471_v8  ;;  %vm12985_vm10 = vmmov %vm12967_vm3  ;;  %4497 = vmatprep.mubr.f32.mxu1 %v12989_v54  ;;  %v12990_v47 = vld [vmem:[#allocation67_spill] sm:$0xff]  ;;  %v10259_v1 = vpop.permute.xlu0 %5405  ;;  %vm12995_vm15 = vcmp.lt.s32.totalorder %v6893_v24, 98 }
 0xaab   : > { %5929 = vmatpush2.msk.msra.mxu0 %vm12498_vm4, %v3478_v28  ;;  %v3470_v20 = vsel %vm12985_vm10, %v12984_v21, %v12983_v38  ;;  %vm12987_vm7 = vmmov %vm12986_vm5  ;;  %5131 = vrot.lane.b32.xlu0 %v9210_v31, %s12780_s0  ;;  %v5110_v28 = vpop.permute.xlu1 %5109 }
 0xaac   : > { %v10242_v42 = vsel %vm12987_vm7, %v9944_v33, %v4799_v51  ;;  %vm12988_vm2 = vmmov %vm12967_vm3  ;;  %5930 = vmatprep.subr.msk.mxu0 %vm12499_vm13, %v3470_v20  ;;  %v12991_v33 = vld [vmem:[#allocation66_spill] sm:$0xff]  ;;  %5317 = vrot.lane.b32.xlu1 %v8452_v16, %s12819_s2  ;;  %v3405_v51 = vsel %vm12994_vm6, %v9562_v23, %v9716_v19 }
 0xaad   : > { %v3477_v14 = vsel %vm12988_vm2, %v12983_v38, %v12984_v21  ;;  %vm12992_vm11 = vmmov %vm12988_vm2  ;;  %v10278_v38 = vsel %vm12995_vm15, %v5110_v28, %v9988_v61 }
 0xaae   : > { %5931 = vmatpush2.msk.msra.mxu0 %vm12498_vm4, %v3477_v14  ;;  %v3469_v44 = vsel %vm12992_vm11, %v12991_v33, %v12990_v47  ;;  %vm12993_vm3 = vmmov %vm12988_vm2  ;;  %v13000_v14 = vld [vmem:[#allocation221_spill] sm:$0xff]  ;;  %vm13007_vm2 = vcmp.lt.s32.totalorder %v6893_v24, 110 }
 0xaaf   : > { %v3476_v8 = vsel %vm12993_vm3, %v12990_v47, %v12991_v33  ;;  %5932 = vmatprep.subr.msk.mxu0 %vm12499_vm13, %v3469_v44  ;;  %vm12996_vm10 = vmmov %vm12995_vm15  ;;  %5269 = vrot.lane.b32.xlu0 %v9102_v36, %s12621_s19  ;;  %v13001_v47 = vld [vmem:[#allocation207_spill] sm:$0xff]  ;;  %v10299_v33 = vpop.permute.xlu0 %4748  ;;  %v13004_v44 = vld [vmem:[#allocation178_spill] sm:$0xff] }
 0xab0   : > { %5933 = vmatpush2.msk.msra.mxu0 %vm12498_vm4, %v3476_v8  ;;  %v10283_v21 = vsel %vm12996_vm10, %v9988_v61, %v5110_v28  ;;  %vm12997_vm13 = vmmov %vm12994_vm6  ;;  %4660 = vrot.lane.b32.xlu1 %v8707_v59, %s12620_s17  ;;  %v13005_v8 = vld [vmem:[#allocation177_spill] sm:$0xff] }
 0xab1   : > { %v3412_v53 = vsel %vm12997_vm13, %v9716_v19, %v9562_v23  ;;  %5934 = vmatprep.subr.msk.mxu0 %vm12589_vm1, %v3405_v51  ;;  %vm13002_vm4 = vmmov %vm12994_vm6  ;;  %v4797_v19 = vpop.permute.xlu1 %4796  ;;  %vm13018_vm13 = vcmp.lt.s32.totalorder %v6893_v24, 98 }
 0xab2   : > { %5935 = vmatpush2.msk.msra.mxu0 %vm7423_vm12, %v3412_v53  ;;  %v3404_v61 = vsel %vm13002_vm4, %v13001_v47, %v13000_v14  ;;  %vm13003_vm5 = vmmov %vm13002_vm4  ;;  %v10318_v51 = vsel %vm13007_vm2, %v4797_v19, %v10038_v29 }
 0xab3   : > { %v3411_v23 = vsel %vm13003_vm5, %v13000_v14, %v13001_v47  ;;  %5936 = vmatprep.subr.msk.mxu0 %vm12589_vm1, %v3404_v61  ;;  %vm13006_vm7 = vmmov %vm13002_vm4  ;;  %13008 = vst [vmem:[#allocation55_spill] sm:$0xff] %v10318_v51  ;;  %5267 = vrot.lane.b32.xlu0 %v8902_v58, %s12621_s19  ;;  %v13011_v47 = vld [vmem:[#allocation159_spill] sm:$0xff]  ;;  %v13012_v61 = vld [vmem:[#allocation149_spill] sm:$0xff] }
 0xab4   : > { %5937 = vmatpush2.msk.msra.mxu0 %vm7423_vm12, %v3411_v23  ;;  %v3403_v28 = vsel %vm13006_vm7, %v13005_v8, %v13004_v44  ;;  %vm13009_vm11 = vmmov %vm13007_vm2  ;;  %v10339_v23 = vpop.permute.xlu0 %5403  ;;  %5315 = vrot.lane.b32.xlu1 %v8380_v62, %s12819_s2  ;;  %v3582_v51 = vld [vmem:[#allocation10 + $0x30] sm:$0xff]  ;;  %vm13022_vm7 = vcmp.lt.s32.totalorder %v6893_v24, 14 }
 0xab5   : > { %v10323_v53 = vsel %vm13009_vm11, %v10038_v29, %v4797_v19  ;;  %vm13010_vm3 = vmmov %vm13002_vm4  ;;  %5938 = vmatprep.subr.msk.mxu0 %vm12589_vm1, %v3403_v28  ;;  %v13016_v28 = vld [vmem:[#allocation123_spill] sm:$0xff] }
 0xab6   : > { %v3410_v14 = vsel %vm13010_vm3, %v13004_v44, %v13005_v8  ;;  %vm13013_vm6 = vmmov %vm13010_vm3  ;;  %v5108_v44 = vpop.permute.xlu1 %5107  ;;  %v13015_v8 = vld [vmem:[#allocation124_spill] sm:$0xff] }
 0xab7   : > { %5939 = vmatpush2.msk.msra.mxu0 %vm7423_vm12, %v3410_v14  ;;  %v3402_v29 = vsel %vm13013_vm6, %v13012_v61, %v13011_v47  ;;  %vm13014_vm15 = vmmov %vm13010_vm3  ;;  %4750 = vrot.lane.b32.xlu0 %v9210_v31, %s12805_s3 }
 0xab8   : > { %v3409_v19 = vsel %vm13014_vm15, %v13011_v47, %v13012_v61  ;;  %5940 = vmatprep.subr.msk.mxu0 %vm12589_vm1, %v3402_v29  ;;  %vm13017_vm10 = vmmov %vm13010_vm3  ;;  %v10358_v47 = vsel %vm13018_vm13, %v5108_v44, %v10082_v18  ;;  %4658 = vrot.lane.b32.xlu1 %v8568_v9, %s12620_s17 }
 0xab9   : > { %5941 = vmatpush2.msk.msra.mxu0 %vm7423_vm12, %v3409_v19  ;;  %v3401_v14 = vsel %vm13017_vm10, %v13016_v28, %v13015_v8  ;;  %13019 = vst [vmem:[#allocation105_spill] sm:$0xff] %v10358_v47  ;;  %vm13020_vm4 = vmmov %vm13018_vm13  ;;  %v3586_v19 = vld [vmem:[#allocation10 + $0x50] sm:$0xf]  ;;  %v10375_v47 = vpop.permute.xlu0 %4746  ;;  %vm13033_vm10 = vcmp.lt.s32.totalorder %v6893_v24, 30  ;;  %vm3658_vm13 = vcmask 195584  }
 0xaba   : > { %v10363_v61 = vsel %vm13020_vm4, %v10082_v18, %v5108_v44  ;;  %vm13021_vm5 = vmmov %vm13010_vm3  ;;  %5942 = vmatprep.subr.msk.mxu0 %vm12589_vm1, %v3401_v14  ;;  %v3545_v18 = vsel %vm13022_vm7, %v9594_v50, %v10180_v30  ;;  %v4795_v57 = vpop.permute.xlu1 %4794 }
 0xabb   : > { %v3408_v29 = vsel %vm13021_vm5, %v13015_v8, %v13016_v28  ;;  %vm13023_vm1 = vmmov %vm13022_vm7  ;;  %v10397_v8 = vsel %vm13007_vm2, %v10132_v35, %v4795_v57  ;;  %v13026_v28 = vld [vmem:[#allocation197_spill] sm:$0xff]  ;;  %5265 = vrot.lane.b32.xlu0 %v8788_v10, %s12621_s19 }
 0xabc   : > { %5943 = vmatpush2.msk.msra.mxu0 %vm7423_vm12, %v3408_v29  ;;  %v3552_v20 = vsel %vm13023_vm1, %v10180_v30, %v9594_v50  ;;  %vm13024_vm12 = vmmov %vm13007_vm2  ;;  %v3585_v30 = vld [vmem:[#allocation10 + $0x48] sm:$0xf]  ;;  %5257 = vrot.lane.b32.xlu1 %v9183_v48, %s12621_s19  ;;  %vm13048_vm2 = vcmp.lt.s32.totalorder %v6893_v24, 1 }
 0xabd   : > { %3730 = vmatmul.mubr.f32.vlgmr.msra.gmra.mxu0 %v3582_v51  ;;  %5944 = vmatprep.subr.msk.mxu0 %vm12925_vm9, %v3545_v18  ;;  %v10392_v44 = vsel %vm13024_vm12, %v4795_v57, %v10132_v35  ;;  %v13025_v51 = vld [vmem:[#allocation213_spill] sm:$0xff]  ;;  %vm13027_vm11 = vmmov %vm13023_vm1  ;;  %v10413_v35 = vpop.permute.xlu0 %5401  ;;  %v13029_v29 = vld [vmem:[#allocation182_spill] sm:$0xff] }
 0xabe   : > { %3735 = vmatprep.mubr.f32.mxu0 %v3586_v19  ;;  %5945 = vmatpush1.msk.msra.mxu0 %vm12927_vm14, %v3552_v20  ;;  %v3544_v50 = vsel %vm13027_vm11, %v13026_v28, %v13025_v51  ;;  %vm13028_vm3 = vmmov %vm13023_vm1  ;;  %v13030_v19 = vld [vmem:[#allocation181_spill] sm:$0xff]  ;;  %v4076_v57 = vpop.permute.xlu1 %4075 }
 0xabf   : > { %v3551_v14 = vsel %vm13028_vm3, %v13025_v51, %v13026_v28  ;;  %5946 = vmatprep.subr.msk.mxu0 %vm12925_vm9, %v3544_v50  ;;  %vm13031_vm6 = vmmov %vm13023_vm1  ;;  %v3119_v51 = vsel %vm13033_vm10, %v9472_v55, %v9532_v46  ;;  %v3584_v28 = vld [vmem:[#allocation10 + $0x40] sm:$0xff]  ;;  %5341 = vrot.lane.b32.xlu0 %v9210_v31, %s12819_s2 }
 0xac0   : > { %5947 = vmatpush1.msk.msra.mxu0 %vm12927_vm14, %v3551_v14  ;;  %v3543_v18 = vsel %vm13031_vm6, %v13030_v19, %v13029_v29  ;;  %vm13032_vm15 = vmmov %vm13023_vm1  ;;  %5255 = vrot.lane.b32.xlu1 %v9033_v40, %s12621_s19 }
 0xac1   : > { %v3550_v20 = vsel %vm13032_vm15, %v13029_v29, %v13030_v19  ;;  %3736 = vmatmul.mubr.f32.gmra.mxu0 %v3585_v30  ;;  %5948 = vmatprep.subr.msk.mxu0 %vm12925_vm9, %v3543_v18  ;;  %v10440_v60 = vpop.permute.xlu0 %4744  ;;  %vm13034_vm9 = vmmov %vm13033_vm10  ;;  %v13036_v29 = vld [vmem:[#allocation216_spill] sm:$0xff]  ;;  %v13037_v19 = vld [vmem:[#allocation202_spill] sm:$0xff] }
 0xac2   : > { %5949 = vmatpush1.msk.msra.mxu0 %vm12927_vm14, %v3550_v20  ;;  %3806 = vmatprep.mubr.f32.mxu0 %v12989_v54  ;;  %v5106_v0 = vpop.permute.xlu1 %5105  ;;  %v3126_v50 = vsel %vm13034_vm9, %v9532_v46, %v9472_v55  ;;  %vm13035_vm14 = vmmov %vm13020_vm4  ;;  %v3587_v46 = vld [vmem:[#allocation10 + $0x58] sm:$0xf]  ;;  %v13040_v20 = vld [vmem:[#allocation174_spill] sm:$0xff] }
 0xac3   : > { %6014 = vmatprep.subr.msk.mxu0 %vm12852_vm8, %v3119_v51  ;;  %v10452_v30 = vsel %vm13035_vm14, %v5106_v0, %v10218_v27  ;;  %v10457_v14 = vsel %vm13020_vm4, %v10218_v27, %v5106_v0  ;;  %vm13038_vm5 = vmmov %vm13034_vm9  ;;  %5409 = vrot.lane.b32.xlu0 %v9102_v36, %s12803_s1  ;;  %v13041_v51 = vld [vmem:[#allocation173_spill] sm:$0xff]  ;;  %vm13063_vm4 = vcmp.lt.s32.totalorder %v6893_v24, 111 }
 0xac4   : > { %v3118_v55 = vsel %vm13038_vm5, %v13037_v19, %v13036_v29  ;;  %vm13039_vm7 = vmmov %vm13038_vm5  ;;  %5253 = vrot.lane.b32.xlu1 %v8883_v43, %s12621_s19 }
 0xac5   : > { %5866 = vmatmul.mubr.msk.f32.vlgmr.msra.gmra.mxu0 %vm3658_vm13, %v3584_v28  ;;  %v3125_v18 = vsel %vm13039_vm7, %v13036_v29, %v13037_v19  ;;  %v10474_v27 = vpop.permute.xlu0 %5399  ;;  %vm13042_vm1 = vmmov %vm13038_vm5  ;;  %v3157_v29 = vld [vmem:[#allocation10 + $0x10] sm:$0xff] }
 0xac6   : > { %6015 = vmatpush1.msk.msra.mxu0 %vm12854_vm0, %v3126_v50  ;;  %3812 = vmatprep.mubr.f32.mxu0 %v12989_v54  ;;  %v3117_v28 = vsel %vm13042_vm1, %v13041_v51, %v13040_v20  ;;  %v10484_v0 = vpop.permute.xlu1 %4736  ;;  %vm13043_vm12 = vmmov %vm13042_vm1 }
 0xac7   : > { %6016 = vmatprep.subr.msk.mxu0 %vm12852_vm8, %v3118_v55  ;;  %v3124_v50 = vsel %vm13043_vm12, %v13040_v20, %v13041_v51  ;;  %4680 = vrot.lane.b32.xlu0 %v9210_v31, %s12620_s17  ;;  %v3160_v55 = vld [vmem:[#allocation10 + $0x28] sm:$0xf]  ;;  %v13047_v20 = vld [vmem:[#allocation228_spill] sm:$0xff]  ;;  %vm13049_vm11 = vmmov %vm13048_vm2 }
 0xac8   : > { %6017 = vmatpush1.msk.msra.mxu0 %vm12854_vm0, %v3125_v18  ;;  %5397 = vrot.lane.b32.xlu1 %v9183_v48, %s12803_s1  ;;  %v4275_v18 = vld [vmem:[#allocation10 + $0x68] sm:$0xff]  ;;  %v4083_v51 = vsel %vm13048_vm2, %v13047_v20, %v4076_v57  ;;  %vm13056_vm15 = vmmov %vm13048_vm2 }
 0xac9   : > { %6018 = vmatprep.subr.msk.mxu0 %vm12852_vm8, %v3117_v28  ;;  %5867 = vmatmul.mubr.msk.f32.gmra.mxu0 %vm3658_vm13, %v3587_v46  ;;  %v10499_v19 = vpop.permute.xlu0 %4742  ;;  %vm13044_vm8 = vcmp.lt.s32.totalorder %v6893_v24, 94  ;;  %v13052_v28 = vld [vmem:[#allocation41_spill] sm:$0xff]  ;;  %vm13057_vm10 = vmmov %vm13048_vm2 }
 0xaca   : > { %6019 = vmatpush1.msk.msra.mxu0 %vm12854_vm0, %v3124_v50  ;;  %3966 = vmatprep.mubr.f32.mxu0 %v12989_v54  ;;  %v5392_v11 = vpop.permute.xlu1 %5391  ;;  %vm13045_vm0 = vmmov %vm13044_vm8  ;;  %vm13053_vm6 = vnez %v13052_v28  ;;  %v13054_v50 = vld [vmem:[#allocation225_spill] sm:$0xff] }
 0xacb   : > { %4356 = vmatprep.subr.mxu0 %v8490_v13  ;;  %v10507_v3 = vsel %vm13044_vm8, %v5392_v11, %v10259_v1  ;;  %v10512_v13 = vsel %vm13045_vm0, %v10259_v1, %v5392_v11  ;;  %5263 = vrot.lane.b32.xlu0 %v8586_v56, %s12621_s19  ;;  %v13050_v1 = vld [vmem:[#allocation42_spill] sm:$0xff]  ;;  %vm13061_vm9 = vmmov %vm13048_vm2 }
 0xacc   : > { %5251 = vrot.lane.b32.xlu1 %v8707_v59, %s12621_s19  ;;  %vm13051_vm3 = vnez %v13050_v1  ;;  %vm13062_vm14 = vmmov %vm13048_vm2  ;;  %v13092_v1 = vld [vmem:[#allocation40_spill] sm:$0xff] }
 0xacd   : > { %5868 = vmatmul.mubr.msk.f32.vlgmr.msra.gmra.mxu0 %vm3658_vm13, %v3157_v29  ;;  %v10519_v46 = vpop.permute.xlu0 %4740  ;;  %v13055_v29 = vld [vmem:[#allocation210_spill] sm:$0xff]  ;;  %vm13065_vm5 = vmmov %vm13063_vm4 }
 0xace   : > { %4357 = vmatpush1.msra.mxu0 %v8452_v16  ;;  %3972 = vmatprep.mubr.f32.mxu0 %v12989_v54  ;;  %13046 = vst [vmem:[#allocation91_spill] sm:$0xff] %v10519_v46  ;;  %v4006_v16 = vpop.permute.xlu1 %4005  ;;  %v4089_v11 = vsel %vm13057_vm10, %v13054_v50, %v13055_v29  ;;  %vm13068_vm7 = vmmov %vm13048_vm2  ;;  %vm13084_vm10 = vcmp.lt.s32.totalorder %v6893_v24, 2  ;;  %v13086_v46 = vld [vmem:[#allocation57_spill] sm:$0xff] }
 0xacf   : > { %4358 = vmatprep.subr.mxu0 %v8390_v2  ;;  %v4090_v2 = vsel %vm13049_vm11, %v4076_v57, %v13047_v20  ;;  %5271 = vrot.lane.b32.xlu0 %v9210_v31, %s12621_s19  ;;  %v13060_v20 = vld [vmem:[#allocation166_spill] sm:$0xff]  ;;  %vm13069_vm1 = vmmov %vm13048_vm2 }
 0xad0   : > { %4359 = vmatpush1.msra.mxu0 %v8380_v62  ;;  %v4082_v62 = vsel %vm13056_vm15, %v13055_v29, %v13054_v50  ;;  %5395 = vrot.lane.b32.xlu1 %v9033_v40, %s12803_s1  ;;  %vm13073_vm12 = vmmov %vm13069_vm1 }
 0xad1   : > { %6020 = vmatprep.subr.msk.mxu0 %vm13051_vm3, %v4083_v51  ;;  %5869 = vmatmul.mubr.msk.f32.gmra.mxu0 %vm3658_vm13, %v3160_v55  ;;  %v10547_v57 = vpop.permute.xlu0 %5339  ;;  %v13059_v55 = vld [vmem:[#allocation195_spill] sm:$0xff]  ;;  %vm13074_vm8 = vmmov %vm13069_vm1 }
 0xad2   : > { %6021 = vmatpush1.msk.msra.mxu0 %vm13053_vm6, %v4090_v2  ;;  %4420 = vmatprep.mubr.f32.mxu0 %v4275_v18  ;;  %13058 = vst [vmem:[#allocation120_spill] sm:$0xff] %v10547_v57  ;;  %v4081_v18 = vsel %vm13061_vm9, %v13060_v20, %v13059_v55  ;;  %v4735_v51 = vpop.permute.xlu1 %4734  ;;  %v4088_v2 = vsel %vm13062_vm14, %v13059_v55, %v13060_v20  ;;  %vm13076_vm2 = vmmov %vm13045_vm0  ;;  %v13079_v57 = vld [vmem:[#allocation98_spill] sm:$0xff] }
 0xad3   : > { %6022 = vmatprep.subr.msk.mxu0 %vm13051_vm3, %v4082_v62  ;;  %v10566_v50 = vsel %vm13063_vm4, %v4735_v51, %v10299_v33  ;;  %v10571_v29 = vsel %vm13065_vm5, %v10299_v33, %v4735_v51  ;;  %v13066_v62 = vld [vmem:[#allocation165_spill] sm:$0xff]  ;;  %5411 = vrot.lane.b32.xlu0 %v9210_v31, %s12803_s1  ;;  %v13072_v51 = vld [vmem:[#allocation114_spill] sm:$0xff]  ;;  %vm13080_vm11 = vmmov %vm13069_vm1 }
 0xad4   : > { %6023 = vmatpush1.msk.msra.mxu0 %vm13053_vm6, %v4089_v11  ;;  %13064 = vst [vmem:[#allocation119_spill] sm:$0xff] %v10566_v50  ;;  %v13067_v11 = vld [vmem:[#allocation154_spill] sm:$0xff]  ;;  %5249 = vrot.lane.b32.xlu1 %v8568_v9, %s12621_s19  ;;  %vm13081_vm15 = vmmov %vm13069_vm1  ;;  %v13098_v50 = vld [vmem:[#allocation211_spill] sm:$0xff] }
 0xad5   : > { %6024 = vmatprep.subr.msk.mxu0 %vm13051_vm3, %v4081_v18  ;;  %v4080_v55 = vsel %vm13068_vm7, %v13067_v11, %v13066_v62  ;;  %v4087_v20 = vsel %vm13069_vm1, %v13066_v62, %v13067_v11  ;;  %v10587_v33 = vpop.permute.xlu0 %4738  ;;  %v13071_v18 = vld [vmem:[#allocation140_spill] sm:$0xff]  ;;  %vm13087_vm9 = vmmov %vm13069_vm1  ;;  %vm13093_vm7 = vnez %v13092_v1 }
 0xad6   : > { %6025 = vmatpush1.msk.msra.mxu0 %vm13053_vm6, %v4088_v2  ;;  %13070 = vst [vmem:[#allocation65_spill] sm:$0xff] %v10587_v33  ;;  %v4079_v2 = vsel %vm13073_vm12, %v13072_v51, %v13071_v18  ;;  %v5390_v62 = vpop.permute.xlu1 %5389  ;;  %v4086_v11 = vsel %vm13074_vm8, %v13071_v18, %v13072_v51  ;;  %v13078_v33 = vld [vmem:[#allocation111_spill] sm:$0xff]  ;;  %vm13088_vm14 = vmmov %vm13069_vm1 }
 0xad7   : > { %6026 = vmatprep.subr.msk.mxu0 %vm13051_vm3, %v4080_v55  ;;  %v10606_v55 = vsel %vm13045_vm0, %v5390_v62, %v10339_v23  ;;  %v4078_v18 = vsel %vm13080_vm11, %v13079_v57, %v13078_v33  ;;  %v4085_v51 = vsel %vm13081_vm15, %v13078_v33, %v13079_v57  ;;  %5407 = vrot.lane.b32.xlu0 %v8902_v58, %s12803_s1  ;;  %v5697_v33 = vld [vmem:[%s11761_s11 + $0x8] sm:$0xf]  ;;  %vm13090_vm5 = vmmov %vm13063_vm4 }
 0xad8   : > { %6027 = vmatpush1.msk.msra.mxu0 %vm13053_vm6, %v4087_v20  ;;  %13075 = vst [vmem:[#allocation63_spill] sm:$0xff] %v10606_v55  ;;  %v10611_v20 = vsel %vm13076_vm2, %v10339_v23, %v5390_v62  ;;  %5393 = vrot.lane.b32.xlu1 %v8883_v43, %s12803_s1  ;;  %vm13101_vm8 = vmmov %vm13045_vm0 }
 0xad9   : > { %6028 = vmatprep.subr.msk.mxu0 %vm13051_vm3, %v4079_v2  ;;  %13077 = vst [vmem:[#allocation101_spill] sm:$0xff] %v10611_v20  ;;  %v10627_v23 = vpop.permute.xlu0 %5337  ;;  %v13083_v2 = vld [vmem:[#allocation229_spill] sm:$0xff] }
 0xada   : > { %6029 = vmatpush1.msk.msra.mxu0 %vm13053_vm6, %v4086_v11  ;;  %13082 = vst [vmem:[#allocation87_spill] sm:$0xff] %v10627_v23  ;;  %v4013_v62 = vsel %vm13084_vm10, %v13083_v2, %v4006_v16  ;;  %v13085_v11 = vld [vmem:[#allocation83_spill] sm:$0xff]  ;;  %v5696_v23 = vld [vmem:[%s11761_s11] sm:$0xff] }
 0xadb   : > { %6030 = vmatprep.subr.msk.mxu0 %vm13051_vm3, %v4078_v18  ;;  %v4077_v57 = vsel %vm13087_vm9, %v13086_v46, %v13085_v11  ;;  %v4733_v18 = vpop.permute.xlu1 %4732  ;;  %5705 = vperm.xlu0 %6295, %v5697_v33   ;;  %v13103_v33 = vld [vmem:[#allocation168_spill] sm:$0xff]  ;;  %vm13110_vm9 = vmmov %vm13063_vm4 }
 0xadc   : > { %6031 = vmatpush1.msk.msra.mxu0 %vm13053_vm6, %v4085_v51  ;;  %v4084_v51 = vsel %vm13088_vm14, %v13085_v11, %v13086_v46  ;;  %v10655_v55 = vsel %vm13063_vm4, %v4733_v18, %v10375_v47  ;;  %v10660_v20 = vsel %vm13090_vm5, %v10375_v47, %v4733_v18  ;;  %5700 = vperm.xlu1 %6296, %v5696_v23   ;;  %v13102_v23 = vld [vmem:[#allocation196_spill] sm:$0xff]  ;;  %vm13111_vm14 = vmmov %vm13063_vm4 }
 0xadd   : > { %6032 = vmatprep.subr.msk.mxu0 %vm13051_vm3, %v4077_v57  ;;  %13089 = vst [vmem:[#allocation62_spill] sm:$0xff] %v10655_v55  ;;  %vm13091_vm3 = vmmov %vm13084_vm10  ;;  %v10669_v11 = vpop.permute.xlu0 %5335  ;;  %v13095_v57 = vld [vmem:[#allocation39_spill] sm:$0xff] }
 0xade   : > { %6033 = vmatpush1.msk.msra.mxu0 %vm13053_vm6, %v4084_v51  ;;  %v4020_v46 = vsel %vm13091_vm3, %v4006_v16, %v13083_v2  ;;  %13094 = vst [vmem:[#allocation59_spill] sm:$0xff] %v10669_v11  ;;  %vm13096_vm1 = vnez %v13095_v57  ;;  %v13097_v55 = vld [vmem:[#allocation227_spill] sm:$0xff]  ;;  %vm13099_vm12 = vmmov %vm13091_vm3  ;;  %v13138_v57 = vld [vmem:[#allocation33_spill] sm:$0xff] }
 0xadf   : > { %6034 = vmatprep.subr.msk.mxu0 %vm13093_vm7, %v4013_v62  ;;  %v4012_v47 = vsel %vm13099_vm12, %v13098_v50, %v13097_v55  ;;  %v5388_v28 = vpop.permute.xlu1 %5387  ;;  %vm13100_vm6 = vmmov %vm13091_vm3  ;;  %v13107_v51 = vld [vmem:[#allocation155_spill] sm:$0xff] }
 0xae0   : > { %6035 = vmatpush1.msk.msra.mxu0 %vm13096_vm1, %v4020_v46  ;;  %v4019_v16 = vsel %vm13100_vm6, %v13097_v55, %v13098_v50  ;;  %v10686_v2 = vsel %vm13101_vm8, %v5388_v28, %v10413_v35  ;;  %v10691_v62 = vsel %vm13045_vm0, %v10413_v35, %v5388_v28  ;;  %vm13104_vm2 = vmmov %vm13091_vm3  ;;  %v13106_v35 = vld [vmem:[#allocation167_spill] sm:$0xff] }
 0xae1   : > { %6036 = vmatprep.subr.msk.mxu0 %vm13093_vm7, %v4012_v47  ;;  %v4011_v50 = vsel %vm13104_vm2, %v13103_v33, %v13102_v23  ;;  %vm13105_vm11 = vmmov %vm13104_vm2  ;;  %v4160_v18 = vpop.permute.xlu0 %4159 }
 0xae2   : > { %6037 = vmatpush1.msk.msra.mxu0 %vm13096_vm1, %v4019_v16  ;;  %v4018_v55 = vsel %vm13105_vm11, %v13102_v23, %v13103_v33  ;;  %vm13108_vm15 = vmmov %vm13104_vm2  ;;  %v13112_v33 = vld [vmem:[#allocation128_spill] sm:$0xff]  ;;  %vm13131_vm11 = vcmp.lt.s32.totalorder %v6893_v24, 126 }
 0xae3   : > { %6038 = vmatprep.subr.msk.mxu0 %vm13093_vm7, %v4011_v50  ;;  %v4010_v46 = vsel %vm13108_vm15, %v13107_v51, %v13106_v35  ;;  %v4731_v47 = vpop.permute.xlu1 %4730  ;;  %vm13109_vm10 = vmmov %vm13104_vm2  ;;  %v13113_v50 = vld [vmem:[#allocation127_spill] sm:$0xff] }
 0xae4   : > { %6039 = vmatpush1.msk.msra.mxu0 %vm13096_vm1, %v4018_v55  ;;  %v4017_v28 = vsel %vm13109_vm10, %v13106_v35, %v13107_v51  ;;  %v10720_v16 = vsel %vm13110_vm9, %v4731_v47, %v10440_v60  ;;  %v10725_v23 = vsel %vm13111_vm14, %v10440_v60, %v4731_v47  ;;  %vm13114_vm4 = vmmov %vm13104_vm2  ;;  %v13117_v60 = vld [vmem:[#allocation113_spill] sm:$0xff] }
 0xae5   : > { %6040 = vmatprep.subr.msk.mxu0 %vm13093_vm7, %v4010_v46  ;;  %v4009_v55 = vsel %vm13114_vm4, %v13113_v50, %v13112_v33  ;;  %vm13115_vm5 = vmmov %vm13104_vm2  ;;  %v10739_v51 = vpop.permute.xlu0 %4678  ;;  %v13118_v46 = vld [vmem:[#allocation97_spill] sm:$0xff] }
 0xae6   : > { %6041 = vmatpush1.msk.msra.mxu0 %vm13096_vm1, %v4017_v28  ;;  %v4016_v35 = vsel %vm13115_vm5, %v13112_v33, %v13113_v50  ;;  %13116 = vst [vmem:[#allocation46_spill] sm:$0xff] %v10739_v51  ;;  %vm13119_vm3 = vmmov %vm13104_vm2 }
 0xae7   : > { %6042 = vmatprep.subr.msk.mxu0 %vm13093_vm7, %v4009_v55  ;;  %v4008_v47 = vsel %vm13119_vm3, %v13118_v46, %v13117_v60  ;;  %v5386_v28 = vpop.permute.xlu1 %5385  ;;  %vm13120_vm12 = vmmov %vm13104_vm2  ;;  %v13125_v55 = vld [vmem:[#allocation69_spill] sm:$0xff] }
 0xae8   : > { %6043 = vmatpush1.msk.msra.mxu0 %vm13096_vm1, %v4016_v35  ;;  %v4015_v11 = vsel %vm13120_vm12, %v13117_v60, %v13118_v46  ;;  %vm13121_vm6 = vmmov %vm13045_vm0  ;;  %v13126_v35 = vld [vmem:[#allocation68_spill] sm:$0xff] }
 0xae9   : > { %6044 = vmatprep.subr.msk.mxu0 %vm13093_vm7, %v4008_v47  ;;  %v10756_v33 = vsel %vm13121_vm6, %v5386_v28, %v10474_v27  ;;  %vm13123_vm8 = vmmov %vm13045_vm0  ;;  %v13130_v47 = vld [vmem:[#allocation157_spill] sm:$0xff]  ;;  %vm13154_vm6 = vcmp.lt.s32.totalorder %v6893_v24, 127 }
 0xaea   : > { %13122 = vst [vmem:[#allocation45_spill] sm:$0xff] %v10756_v33  ;;  %v10761_v50 = vsel %vm13123_vm8, %v10474_v27, %v5386_v28  ;;  %6045 = vmatpush1.msk.msra.mxu0 %vm13096_vm1, %v4015_v11  ;;  %vm13127_vm0 = vmmov %vm13104_vm2  ;;  %v13129_v27 = vld [vmem:[#allocation141_spill] sm:$0xff]  ;;  %v10781_v28 = vpop.permute.xlu0 %5333 }
 0xaeb   : > { %13124 = vst [vmem:[#allocation218_spill] sm:$0xff] %v10761_v50  ;;  %v4007_v60 = vsel %vm13127_vm0, %v13126_v35, %v13125_v55  ;;  %vm13128_vm2 = vmmov %vm13127_vm0  ;;  %v4241_v11 = vsel %vm13131_vm11, %v13130_v47, %v13129_v27  ;;  %v10783_v51 = vpop.permute.xlu1 %4728 }
 0xaec   : > { %v4014_v46 = vsel %vm13128_vm2, %v13125_v55, %v13126_v35  ;;  %6046 = vmatprep.subr.msk.mxu0 %vm13093_vm7, %v4007_v60  ;;  %13132 = vst [vmem:[#allocation204_spill] sm:$0xff] %v10781_v28  ;;  %vm13133_vm15 = vmmov %vm13131_vm11  ;;  %v13134_v35 = vld [vmem:[#allocation34_spill] sm:$0xff]  ;;  %v13140_v60 = vld [vmem:[#allocation129_spill] sm:$0xff] }
 0xaed   : > { %6047 = vmatpush1.msk.msra.mxu0 %vm13096_vm1, %v4014_v46  ;;  %v4234_v55 = vsel %vm13133_vm15, %v13129_v27, %v13130_v47  ;;  %vm13135_vm10 = vnez %v13134_v35  ;;  %vm13136_vm7 = vmmov %vm13110_vm9  ;;  %vm13139_vm1 = vnez %v13138_v57  ;;  %v13141_v46 = vld [vmem:[#allocation130_spill] sm:$0xff]  ;;  %v13144_v47 = vld [vmem:[#allocation84_spill] sm:$0xff] }
 0xaee   : > { %6048 = vmatprep.subr.msk.mxu0 %vm13135_vm10, %v4241_v11  ;;  %v10795_v1 = vsel %vm13136_vm7, %v10783_v51, %v10499_v19  ;;  %vm13142_vm9 = vmmov %vm13131_vm11  ;;  %v13145_v11 = vld [vmem:[#allocation100_spill] sm:$0xff]  ;;  %v13204_v57 = vld [vmem:[#allocation74_spill] sm:$0xff] }
 0xaef   : > { %13137 = vst [vmem:[#allocation54_spill] sm:$0xff] %v10795_v1  ;;  %6049 = vmatpush2.msk.msra.mxu0 %vm13139_vm1, %v4234_v55  ;;  %v4240_v28 = vsel %vm13142_vm9, %v13141_v46, %v13140_v60  ;;  %vm13143_vm14 = vmmov %vm13142_vm9 }
 0xaf0   : > { %v4233_v27 = vsel %vm13143_vm14, %v13140_v60, %v13141_v46  ;;  %6050 = vmatprep.subr.msk.mxu0 %vm13135_vm10, %v4240_v28  ;;  %vm13146_vm4 = vmmov %vm13142_vm9  ;;  %v10821_v60 = vpop.permute.xlu0 %4676  ;;  %v10823_v46 = vpop.permute.xlu1 %5327  ;;  %v13150_v28 = vld [vmem:[#allocation70_spill] sm:$0xff] }
 0xaf1   : > { %6051 = vmatpush2.msk.msra.mxu0 %vm13139_vm1, %v4233_v27  ;;  %v4239_v55 = vsel %vm13146_vm4, %v13145_v11, %v13144_v47  ;;  %vm13147_vm5 = vmmov %vm13146_vm4  ;;  %13148 = vst [vmem:[#allocation53_spill] sm:$0xff] %v10821_v60  ;;  %v13151_v27 = vld [vmem:[#allocation71_spill] sm:$0xff] }
 0xaf2   : > { %v4232_v1 = vsel %vm13147_vm5, %v13144_v47, %v13145_v11  ;;  %6052 = vmatprep.subr.msk.mxu0 %vm13135_vm10, %v4239_v55  ;;  %13149 = vst [vmem:[#allocation176_spill] sm:$0xff] %v10823_v46  ;;  %vm13152_vm3 = vmmov %vm13146_vm4  ;;  %v4174_v11 = vsel %vm13154_vm6, %v4160_v18, %v9642_v49  ;;  %v13156_v55 = vld [vmem:[#allocation32_spill] sm:$0xff]  ;;  %v13158_v60 = vld [vmem:[#allocation31_spill] sm:$0xff] }
 0xaf3   : > { %6053 = vmatpush2.msk.msra.mxu0 %vm13139_vm1, %v4232_v1  ;;  %v4238_v33 = vsel %vm13152_vm3, %v13151_v27, %v13150_v28  ;;  %vm13153_vm12 = vmmov %vm13152_vm3  ;;  %vm13157_vm0 = vnez %v13156_v55  ;;  %vm13159_vm2 = vnez %v13158_v60  ;;  %v13196_v55 = vld [vmem:[#allocation88_spill] sm:$0xff] }
 0xaf4   : > { %v4231_v47 = vsel %vm13153_vm12, %v13150_v28, %v13151_v27  ;;  %6054 = vmatprep.subr.msk.mxu0 %vm13135_vm10, %v4238_v33  ;;  %vm13155_vm8 = vmmov %vm13154_vm6  ;;  %v13160_v28 = vld [vmem:[#allocation199_spill] sm:$0xff]  ;;  %v10853_v46 = vpop.permute.xlu0 %5331  ;;  %v10855_v50 = vpop.permute.xlu1 %4726 }
 0xaf5   : > { %6055 = vmatpush2.msk.msra.mxu0 %vm13139_vm1, %v4231_v47  ;;  %v4167_v1 = vsel %vm13155_vm8, %v9642_v49, %v4160_v18  ;;  %v13161_v27 = vld [vmem:[#allocation215_spill] sm:$0xff]  ;;  %vm13162_vm11 = vmmov %vm13154_vm6  ;;  %13163 = vst [vmem:[#allocation175_spill] sm:$0xff] %v10853_v46  ;;  %v13167_v47 = vld [vmem:[#allocation184_spill] sm:$0xff] }
 0xaf6   : > { %6056 = vmatprep.subr.msk.mxu0 %vm13157_vm0, %v4174_v11  ;;  %v4173_v33 = vsel %vm13162_vm11, %v13161_v27, %v13160_v28  ;;  %13164 = vst [vmem:[#allocation214_spill] sm:$0xff] %v10855_v50  ;;  %vm13165_vm15 = vmmov %vm13154_vm6  ;;  %v13166_v18 = vld [vmem:[#allocation183_spill] sm:$0xff] }
 0xaf7   : > { %6057 = vmatpush2.msk.msra.mxu0 %vm13159_vm2, %v4167_v1  ;;  %v4166_v49 = vsel %vm13165_vm15, %v13160_v28, %v13161_v27  ;;  %vm13168_vm7 = vmmov %vm13154_vm6  ;;  %v13170_v28 = vld [vmem:[#allocation143_spill] sm:$0xff]  ;;  %v13171_v27 = vld [vmem:[#allocation158_spill] sm:$0xff] }
 0xaf8   : > { %6058 = vmatprep.subr.msk.mxu0 %vm13157_vm0, %v4173_v33  ;;  %v4172_v11 = vsel %vm13168_vm7, %v13167_v47, %v13166_v18  ;;  %vm13169_vm9 = vmmov %vm13154_vm6 }
 0xaf9   : > { %6059 = vmatpush2.msk.msra.mxu0 %vm13159_vm2, %v4166_v49  ;;  %v4165_v1 = vsel %vm13169_vm9, %v13166_v18, %v13167_v47  ;;  %vm13172_vm14 = vmmov %vm13154_vm6  ;;  %v4230_v18 = vpop.permute.xlu0 %4229  ;;  %v10887_v47 = vpop.permute.xlu1 %5325 }
 0xafa   : > { %6060 = vmatprep.subr.msk.mxu0 %vm13157_vm0, %v4172_v11  ;;  %v4171_v33 = vsel %vm13172_vm14, %v13171_v27, %v13170_v28  ;;  %vm13173_vm4 = vmmov %vm13154_vm6  ;;  %13174 = vst [vmem:[#allocation200_spill] sm:$0xff] %v10887_v47  ;;  %v13175_v11 = vld [vmem:[#allocation131_spill] sm:$0xff]  ;;  %v4237_v50 = vsel %vm13152_vm3, %v9686_v37, %v4230_v18 }
 0xafb   : > { %6061 = vmatpush2.msk.msra.mxu0 %vm13159_vm2, %v4165_v1  ;;  %v4164_v49 = vsel %vm13173_vm4, %v13170_v28, %v13171_v27  ;;  %v13176_v1 = vld [vmem:[#allocation132_spill] sm:$0xff]  ;;  %vm13177_vm5 = vmmov %vm13173_vm4 }
 0xafc   : > { %6062 = vmatprep.subr.msk.mxu0 %vm13157_vm0, %v4171_v33  ;;  %v4170_v46 = vsel %vm13177_vm5, %v13176_v1, %v13175_v11  ;;  %vm13178_vm12 = vmmov %vm13152_vm3  ;;  %v13180_v33 = vld [vmem:[#allocation86_spill] sm:$0xff] }
 0xafd   : > { %6063 = vmatpush2.msk.msra.mxu0 %vm13159_vm2, %v4164_v49  ;;  %v4244_v28 = vsel %vm13178_vm12, %v4230_v18, %v9686_v37  ;;  %vm13179_vm6 = vmmov %vm13173_vm4  ;;  %v13181_v49 = vld [vmem:[#allocation102_spill] sm:$0xff]  ;;  %v13183_v37 = vld [vmem:[#allocation201_spill] sm:$0xff] }
 0xafe   : > { %v4163_v27 = vsel %vm13179_vm6, %v13175_v11, %v13176_v1  ;;  %6064 = vmatprep.subr.msk.mxu0 %vm13157_vm0, %v4170_v46  ;;  %6070 = vmatprep.subr.msk.mxu1 %vm13135_vm10, %v4244_v28  ;;  %vm13182_vm8 = vmmov %vm13173_vm4  ;;  %v13184_v18 = vld [vmem:[#allocation217_spill] sm:$0xff]  ;;  %vm13208_vm6 = vcmp.lt.s32.totalorder %v6893_v24, 113 }
 0xaff   : > { %6065 = vmatpush2.msk.msra.mxu0 %vm13159_vm2, %v4163_v27  ;;  %v4169_v47 = vsel %vm13182_vm8, %v13181_v49, %v13180_v33  ;;  %6071 = vmatpush1.msk.msra.mxu1 %vm13139_vm1, %v4237_v50  ;;  %vm13185_vm11 = vmmov %vm13152_vm3  ;;  %v13188_v50 = vld [vmem:[#allocation72_spill] sm:$0xff]  ;;  %v13189_v28 = vld [vmem:[#allocation73_spill] sm:$0xff] }
 0xb00   : > { %v4243_v11 = vsel %vm13185_vm11, %v13184_v18, %v13183_v37  ;;  %vm13186_vm15 = vmmov %vm13173_vm4  ;;  %6066 = vmatprep.subr.msk.mxu0 %vm13157_vm0, %v4169_v47  ;;  %vm13211_vm11 = vcmp.lt.s32.totalorder %v6893_v24, 110 }
 0xb01   : > { %v4162_v46 = vsel %vm13186_vm15, %v13180_v33, %v13181_v49  ;;  %vm13187_vm7 = vmmov %vm13152_vm3  ;;  %6072 = vmatprep.subr.msk.mxu1 %vm13135_vm10, %v4243_v11  ;;  %v4821_v33 = vpop.permute.xlu0 %4820  ;;  %v10939_v49 = vpop.permute.xlu1 %4724 }
 0xb02   : > { %v4236_v1 = vsel %vm13187_vm7, %v13183_v37, %v13184_v18  ;;  %6067 = vmatpush2.msk.msra.mxu0 %vm13159_vm2, %v4162_v46  ;;  %vm13190_vm9 = vmmov %vm13173_vm4  ;;  %v13192_v37 = vld [vmem:[#allocation185_spill] sm:$0xff]  ;;  %v13193_v18 = vld [vmem:[#allocation186_spill] sm:$0xff] }
 0xb03   : > { %v4168_v27 = vsel %vm13190_vm9, %v13189_v28, %v13188_v50  ;;  %6073 = vmatpush1.msk.msra.mxu1 %vm13139_vm1, %v4236_v1  ;;  %vm13191_vm14 = vmmov %vm13173_vm4  ;;  %v4276_v1 = vld [vmem:[#allocation10 + $0x70] sm:$0xff] }
 0xb04   : > { %v4161_v47 = vsel %vm13191_vm14, %v13188_v50, %v13189_v28  ;;  %6068 = vmatprep.subr.msk.mxu0 %vm13157_vm0, %v4168_v27  ;;  %vm13194_vm4 = vmmov %vm13152_vm3  ;;  %v13197_v50 = vld [vmem:[#allocation104_spill] sm:$0xff]  ;;  %vm13198_vm0 = vcmp.lt.s32.totalorder %v6893_v24, 112  ;;  %v13199_v27 = vld [vmem:[#allocation30_spill] sm:$0xff] }
 0xb05   : > { %v4242_v11 = vsel %vm13194_vm4, %v13193_v18, %v13192_v37  ;;  %vm13195_vm5 = vmmov %vm13152_vm3  ;;  %6069 = vmatpush2.msk.msra.mxu0 %vm13159_vm2, %v4161_v47  ;;  %v4690_v28 = vsel %vm13198_vm0, %v13197_v50, %v13196_v55  ;;  %vm13200_vm3 = vnez %v13199_v27  ;;  %v4611_v35 = vpop.permute.xlu0 %4610  ;;  %v10972_v60 = vpop.permute.xlu1 %5323  ;;  %v13205_v47 = vld [vmem:[#allocation75_spill] sm:$0xff] }
 0xb06   : > { %v4235_v46 = vsel %vm13195_vm5, %v13192_v37, %v13193_v18  ;;  %6074 = vmatprep.subr.msk.mxu1 %vm13135_vm10, %v4242_v11  ;;  %4410 = vmatprep.subr.mxu0 %v9210_v31  ;;  %vm13201_vm10 = vmmov %vm13198_vm0  ;;  %v4274_v18 = vld [vmem:[#allocation10 + $0x60] sm:$0xff] }
 0xb07   : > { %6075 = vmatpush1.msk.msra.mxu1 %vm13139_vm1, %v4235_v46  ;;  %4411 = vmatpush2.msra.mxu0 %v9183_v48  ;;  %v4683_v31 = vsel %vm13201_vm10, %v13196_v55, %v13197_v50  ;;  %v13202_v48 = vld [vmem:[#allocation29_spill] sm:$0xff]  ;;  %vm13206_vm2 = vmmov %vm13198_vm0  ;;  %v13209_v46 = vld [vmem:[#allocation38_spill] sm:$0xff] }
 0xb08   : > { %6076 = vmatprep.subr.msk.mxu1 %vm13200_vm3, %v4690_v28  ;;  %4412 = vmatprep.subr.mxu0 %v9102_v36  ;;  %vm13203_vm1 = vnez %v13202_v48  ;;  %v4689_v36 = vsel %vm13206_vm2, %v13205_v47, %v13204_v57  ;;  %vm13207_vm12 = vmmov %vm13198_vm0  ;;  %vm13210_vm8 = vnez %v13209_v46  ;;  %v13213_v55 = vld [vmem:[#allocation26_spill] sm:$0xff]  ;;  %v13216_v50 = vld [vmem:[#allocation25_spill] sm:$0xff] }
 0xb09   : > { %5870 = vmatmul.mubr.msk.f32.vlgmr.msra.gmra.mxu1 %vm3658_vm13, %v4276_v1  ;;  %4413 = vmatpush2.msra.mxu0 %v9033_v40  ;;  %v4682_v37 = vsel %vm13207_vm12, %v13204_v57, %v13205_v47  ;;  %v4625_v40 = vsel %vm13208_vm6, %v4611_v35, %v9774_v22  ;;  %v11001_v11 = vpop.permute.xlu0 %4674  ;;  %vm13212_vm15 = vmmov %vm13211_vm11  ;;  %vm13214_vm7 = vnez %v13213_v55  ;;  %vm13217_vm14 = vnez %v13216_v50  ;;  %v13218_v28 = vld [vmem:[#allocation203_spill] sm:$0xff]  ;;  %v4277_v57 = vld [vmem:[#allocation10 + $0x78] sm:$0xf] }
 0xb0a   : > { %4414 = vmatprep.subr.mxu0 %v8902_v58  ;;  %6077 = vmatpush1.msk.msra.mxu1 %vm13203_vm1, %v4683_v31  ;;  %v4279_v58 = vld [vmem:[#allocation10 + $0x88] sm:$0xf]  ;;  %v4828_v1 = vsel %vm13212_vm15, %v9730_v34, %v4821_v33  ;;  %vm13215_vm9 = vmmov %vm13208_vm6  ;;  %v13219_v31 = vld [vmem:[#allocation219_spill] sm:$0xff] }
 0xb0b   : > { %4415 = vmatpush2.msra.mxu0 %v8883_v43  ;;  %6078 = vmatprep.subr.msk.mxu1 %vm13200_vm3, %v4689_v36  ;;  %v11004_v43 = vpop.permute.xlu1 %4666  ;;  %vm13220_vm4 = vmmov %vm13211_vm11  ;;  %v13349_v50 = vld [vmem:[#allocation18_spill] sm:$0xff] }
 0xb0c   : > { %4416 = vmatprep.subr.mxu0 %v8788_v10  ;;  %6079 = vmatpush1.msk.msra.mxu1 %vm13203_vm1, %v4682_v37  ;;  %v4278_v10 = vld [vmem:[#allocation10 + $0x80] sm:$0xf]  ;;  %vm13221_vm5 = vmmov %vm13220_vm4 }
 0xb0d   : > { %4417 = vmatpush2.msra.mxu0 %v8707_v59  ;;  %4503 = vmatprep.mubr.f32.mxu1 %v12989_v54  ;;  %v4835_v59 = vsel %vm13211_vm11, %v4821_v33, %v9730_v34  ;;  %v4827_v34 = vsel %vm13221_vm5, %v13218_v28, %v13219_v31  ;;  %v13222_v33 = vld [vmem:[#allocation37_spill] sm:$0xff]  ;;  %vm13226_vm10 = vmmov %vm13208_vm6  ;;  %v5202_v36 = vpop.permute.xlu0 %5201  ;;  %vm13233_vm11 = vcmp.lt.s32.totalorder %v6893_v24, 96 }
 0xb0e   : > { %4418 = vmatprep.subr.mxu0 %v8586_v56  ;;  %6080 = vmatprep.subr.msk.mxu1 %vm13210_vm8, %v4625_v40  ;;  %v4618_v56 = vsel %vm13215_vm9, %v9774_v22, %v4611_v35  ;;  %vm13223_vm0 = vnez %v13222_v33  ;;  %v13224_v22 = vld [vmem:[#allocation205_spill] sm:$0xff]  ;;  %v13225_v35 = vld [vmem:[#allocation220_spill] sm:$0xff]  ;;  %vm13229_vm2 = vmmov %vm13220_vm4 }
 0xb0f   : > { %4419 = vmatpush2.msra.mxu0 %v8568_v9  ;;  %5871 = vmatmul.mubr.msk.f32.gmra.mxu1 %vm3658_vm13, %v4279_v58  ;;  %v4834_v9 = vsel %vm13220_vm4, %v13219_v31, %v13218_v28  ;;  %v4624_v47 = vsel %vm13226_vm10, %v13225_v35, %v13224_v22  ;;  %v11040_v37 = vpop.permute.xlu1 %5321  ;;  %v13227_v58 = vld [vmem:[#allocation187_spill] sm:$0xff]  ;;  %v13228_v40 = vld [vmem:[#allocation188_spill] sm:$0xff]  ;;  %vm13230_vm12 = vmmov %vm13229_vm2 }
 0xb10   : > { %4421 = vmatmul.mubr.f32.vlgmr.msra.gmra.mxu0 %v4274_v18  ;;  %6140 = vmatprep.subr.msk.mxu0 %vm13214_vm7, %v4835_v59  ;;  %v4833_v18 = vsel %vm13229_vm2, %v13228_v40, %v13227_v58  ;;  %v4617_v59 = vsel %vm13208_vm6, %v13224_v22, %v13225_v35  ;;  %v13234_v31 = vld [vmem:[#allocation189_spill] sm:$0xff]  ;;  %vm13236_vm15 = vmmov %vm13208_vm6  ;;  %v13238_v35 = vld [vmem:[#allocation16_spill] sm:$0xff] }
 0xb11   : > { %6141 = vmatpush1.msk.msra.mxu0 %vm13217_vm14, %v4828_v1  ;;  %4426 = vmatprep.mubr.f32.mxu0 %v4278_v10  ;;  %v4826_v10 = vsel %vm13230_vm12, %v13227_v58, %v13228_v40  ;;  %v13231_v1 = vld [vmem:[#allocation90_spill] sm:$0xff]  ;;  %vm13237_vm9 = vmmov %vm13208_vm6  ;;  %vm13239_vm4 = vnez %v13238_v35  ;;  %v13241_v58 = vld [vmem:[#allocation160_spill] sm:$0xff] }
 0xb12   : > { %6142 = vmatprep.subr.msk.mxu0 %vm13214_vm7, %v4834_v9  ;;  %6081 = vmatpush1.msk.msra.mxu1 %vm13223_vm0, %v4618_v56  ;;  %v13232_v56 = vld [vmem:[#allocation106_spill] sm:$0xff]  ;;  %vm13242_vm5 = vmmov %vm13208_vm6  ;;  %v13306_v35 = vld [vmem:[#allocation80_spill] sm:$0xff] }
 0xb13   : > { %6143 = vmatpush1.msk.msra.mxu0 %vm13217_vm14, %v4827_v34  ;;  %6082 = vmatprep.subr.msk.mxu1 %vm13210_vm8, %v4624_v47  ;;  %v5281_v28 = vsel %vm13233_vm11, %v13232_v56, %v13231_v1  ;;  %v13235_v9 = vld [vmem:[#allocation190_spill] sm:$0xff]  ;;  %v13240_v47 = vld [vmem:[#allocation145_spill] sm:$0xff]  ;;  %vm13243_vm10 = vmmov %vm13233_vm11 }
 0xb14   : > { %4427 = vmatmul.mubr.f32.gmra.mxu0 %v4277_v57  ;;  %6144 = vmatprep.subr.msk.mxu0 %vm13214_vm7, %v4833_v18  ;;  %v4623_v34 = vsel %vm13236_vm15, %v13235_v9, %v13234_v31  ;;  %v4867_v57 = vld [vmem:[#allocation10 + $0xa0] sm:$0xff]  ;;  %v4616_v22 = vsel %vm13237_vm9, %v13234_v31, %v13235_v9  ;;  %v4622_v40 = vsel %vm13242_vm5, %v13241_v58, %v13240_v47  ;;  %v11087_v18 = vpop.permute.xlu0 %5329  ;;  %vm13244_vm2 = vmmov %vm13242_vm5  ;;  %v13245_v31 = vld [vmem:[#allocation15_spill] sm:$0xff]  ;;  %vm13255_vm5 = vcmp.lt.s32.totalorder %v6893_v24, 97 }
 0xb15   : > { %6145 = vmatpush1.msk.msra.mxu0 %vm13217_vm14, %v4826_v10  ;;  %6083 = vmatpush1.msk.msra.mxu1 %vm13223_vm0, %v4617_v59  ;;  %v11089_v10 = vpop.permute.xlu1 %4664  ;;  %v5274_v59 = vsel %vm13243_vm10, %v13231_v1, %v13232_v56  ;;  %vm13246_vm12 = vnez %v13245_v31  ;;  %v13247_v9 = vld [vmem:[#allocation76_spill] sm:$0xff]  ;;  %vm13249_vm6 = vmmov %vm13243_vm10  ;;  %v13250_v1 = vld [vmem:[#allocation133_spill] sm:$0xff] }
 0xb16   : > { %6146 = vmatprep.subr.msk.mxu0 %vm13239_vm4, %v5281_v28  ;;  %6084 = vmatprep.subr.msk.mxu1 %vm13210_vm8, %v4623_v34  ;;  %v4615_v28 = vsel %vm13244_vm2, %v13240_v47, %v13241_v58  ;;  %v13248_v34 = vld [vmem:[#allocation77_spill] sm:$0xff]  ;;  %v13251_v56 = vld [vmem:[#allocation134_spill] sm:$0xff]  ;;  %vm13252_vm11 = vmmov %vm13244_vm2 }
 0xb17   : > { %5088 = vmatprep.mubr.f32.mxu0 %v12989_v54  ;;  %6085 = vmatpush1.msk.msra.mxu1 %vm13223_vm0, %v4616_v22  ;;  %v5280_v22 = vsel %vm13249_vm6, %v13248_v34, %v13247_v9  ;;  %v4621_v47 = vsel %vm13252_vm11, %v13251_v56, %v13250_v1  ;;  %vm13253_vm15 = vmmov %vm13249_vm6  ;;  %v13265_v54 = vld [vmem:[#allocation222_spill] sm:$0xff]  ;;  %v13272_v31 = vld [vmem:[#allocation191_spill] sm:$0xff] }
 0xb18   : > { %5872 = vmatmul.mubr.msk.f32.vlgmr.msra.gmra.mxu0 %vm3658_vm13, %v4867_v57  ;;  %6086 = vmatprep.subr.msk.mxu1 %vm13210_vm8, %v4622_v40  ;;  %v5273_v57 = vsel %vm13253_vm15, %v13247_v9, %v13248_v34  ;;  %vm13254_vm9 = vmmov %vm13244_vm2  ;;  %v5216_v40 = vsel %vm13255_vm5, %v5202_v36, %v9818_v6 }
 0xb19   : > { %6147 = vmatpush1.msk.msra.mxu0 %vm13246_vm12, %v5274_v59  ;;  %6087 = vmatpush1.msk.msra.mxu1 %vm13223_vm0, %v4615_v28  ;;  %v4614_v58 = vsel %vm13254_vm9, %v13250_v1, %v13251_v56  ;;  %v13256_v59 = vld [vmem:[#allocation92_spill] sm:$0xff]  ;;  %vm13258_vm10 = vmmov %vm13244_vm2  ;;  %v4541_v56 = vpop.permute.xlu0 %4540 }
 0xb1a   : > { %6148 = vmatprep.subr.msk.mxu0 %vm13239_vm4, %v5280_v22  ;;  %6088 = vmatprep.subr.msk.mxu1 %vm13210_vm8, %v4621_v47  ;;  %v13257_v28 = vld [vmem:[#allocation108_spill] sm:$0xff]  ;;  %vm13259_vm6 = vmmov %vm13255_vm5  ;;  %v11148_v47 = vpop.permute.xlu1 %5319 }
 0xb1b   : > { %6149 = vmatpush1.msk.msra.mxu0 %vm13246_vm12, %v5273_v57  ;;  %6089 = vmatpush1.msk.msra.mxu1 %vm13223_vm0, %v4614_v58  ;;  %v4620_v9 = vsel %vm13258_vm10, %v13257_v28, %v13256_v59  ;;  %v4613_v34 = vsel %vm13244_vm2, %v13256_v59, %v13257_v28  ;;  %v5209_v22 = vsel %vm13259_vm6, %v9818_v6, %v5202_v36  ;;  %v13260_v1 = vld [vmem:[#allocation20_spill] sm:$0xff]  ;;  %v13262_v57 = vld [vmem:[#allocation19_spill] sm:$0xff]  ;;  %v13264_v58 = vld [vmem:[#allocation206_spill] sm:$0xff] }
 0xb1c   : > { %vm13261_vm11 = vnez %v13260_v1  ;;  %6090 = vmatprep.subr.msk.mxu1 %vm13210_vm8, %v4620_v9  ;;  %vm13263_vm15 = vnez %v13262_v57  ;;  %vm13266_vm9 = vmmov %vm13255_vm5  ;;  %vm13267_vm5 = vcmp.lt.s32.totalorder %v6893_v24, 114  ;;  %v13268_v36 = vld [vmem:[#allocation78_spill] sm:$0xff] }
 0xb1d   : > { %6150 = vmatprep.subr.msk.mxu0 %vm13261_vm11, %v5216_v40  ;;  %v5215_v59 = vsel %vm13266_vm9, %v13265_v54, %v13264_v58  ;;  %6091 = vmatpush1.msk.msra.mxu1 %vm13223_vm0, %v4613_v34  ;;  %v4555_v6 = vsel %vm13267_vm5, %v4541_v56, %v9870_v32  ;;  %v13269_v40 = vld [vmem:[#allocation79_spill] sm:$0xff]  ;;  %vm13270_vm10 = vmmov %vm13244_vm2  ;;  %v11196_v46 = vpop.permute.xlu0 %4672 }
 0xb1e   : > { %6151 = vmatpush1.msk.msra.mxu0 %vm13263_vm15, %v5209_v22  ;;  %v4619_v28 = vsel %vm13270_vm10, %v13269_v40, %v13268_v36  ;;  %v4612_v9 = vsel %vm13244_vm2, %v13268_v36, %v13269_v40  ;;  %v5208_v22 = vsel %vm13259_vm6, %v13264_v58, %v13265_v54  ;;  %vm13271_vm9 = vmmov %vm13267_vm5  ;;  %v13273_v36 = vld [vmem:[#allocation192_spill] sm:$0xff]  ;;  %13278 = vst [vmem:[#allocation156_spill] sm:$0xff] %v11196_v46  ;;  %v13280_v58 = vld [vmem:[#allocation162_spill] sm:$0xff] }
 0xb1f   : > { %6152 = vmatprep.subr.msk.mxu0 %vm13261_vm11, %v5215_v59  ;;  %v4548_v34 = vsel %vm13271_vm9, %v9870_v32, %v4541_v56  ;;  %6092 = vmatprep.subr.msk.mxu1 %vm13210_vm8, %v4619_v28  ;;  %vm13274_vm5 = vmmov %vm13259_vm6  ;;  %v13276_v32 = vld [vmem:[#allocation36_spill] sm:$0xff]  ;;  %v13279_v56 = vld [vmem:[#allocation146_spill] sm:$0xff] }
 0xb20   : > { %6153 = vmatpush1.msk.msra.mxu0 %vm13263_vm15, %v5208_v22  ;;  %v5214_v40 = vsel %vm13274_vm5, %v13273_v36, %v13272_v31  ;;  %6093 = vmatpush1.msk.msra.mxu1 %vm13223_vm0, %v4612_v9  ;;  %vm13275_vm10 = vmmov %vm13274_vm5  ;;  %vm13277_vm8 = vnez %v13276_v32  ;;  %v13282_v59 = vld [vmem:[#allocation35_spill] sm:$0xff]  ;;  %v13285_v28 = vld [vmem:[#allocation224_spill] sm:$0xff]  ;;  %v11210_v22 = vpop.permute.xlu1 %4662 }
 0xb21   : > { %v5207_v54 = vsel %vm13275_vm10, %v13272_v31, %v13273_v36  ;;  %6154 = vmatprep.subr.msk.mxu0 %vm13261_vm11, %v5214_v40  ;;  %6094 = vmatprep.subr.msk.mxu1 %vm13277_vm8, %v4555_v6  ;;  %vm13281_vm0 = vmmov %vm13274_vm5  ;;  %vm13283_vm2 = vnez %v13282_v59  ;;  %v13284_v31 = vld [vmem:[#allocation208_spill] sm:$0xff] }
 0xb22   : > { %6155 = vmatpush1.msk.msra.mxu0 %vm13263_vm15, %v5207_v54  ;;  %v5213_v33 = vsel %vm13281_vm0, %v13280_v58, %v13279_v56  ;;  %6095 = vmatpush1.msk.msra.mxu1 %vm13283_vm2, %v4548_v34  ;;  %vm13286_vm6 = vmmov %vm13271_vm9  ;;  %v13289_v34 = vld [vmem:[#allocation135_spill] sm:$0xff]  ;;  %v13290_v40 = vld [vmem:[#allocation136_spill] sm:$0xff] }
 0xb23   : > { %v4554_v9 = vsel %vm13286_vm6, %v13285_v28, %v13284_v31  ;;  %vm13287_vm9 = vmmov %vm13281_vm0  ;;  %6156 = vmatprep.subr.msk.mxu0 %vm13261_vm11, %v5213_v33  ;;  %v13351_v59 = vld [vmem:[#allocation200_spill] sm:$0xff] }
 0xb24   : > { %v5206_v6 = vsel %vm13287_vm9, %v13279_v56, %v13280_v58  ;;  %vm13288_vm5 = vmmov %vm13286_vm6  ;;  %6096 = vmatprep.subr.msk.mxu1 %vm13277_vm8, %v4554_v9  ;;  %v13292_v56 = vld [vmem:[#allocation193_spill] sm:$0xff]  ;;  %v13293_v58 = vld [vmem:[#allocation194_spill] sm:$0xff]  ;;  %v5132_v9 = vpop.permute.xlu0 %5131 }
 0xb25   : > { %v4547_v36 = vsel %vm13288_vm5, %v13284_v31, %v13285_v28  ;;  %6157 = vmatpush1.msk.msra.mxu0 %vm13263_vm15, %v5206_v6  ;;  %vm13291_vm10 = vmmov %vm13281_vm0  ;;  %v13297_v6 = vld [vmem:[#allocation93_spill] sm:$0xff] }
 0xb26   : > { %v5212_v54 = vsel %vm13291_vm10, %v13290_v40, %v13289_v34  ;;  %6097 = vmatpush1.msk.msra.mxu1 %vm13283_vm2, %v4547_v36  ;;  %vm13294_vm0 = vmmov %vm13288_vm5  ;;  %v13298_v36 = vld [vmem:[#allocation110_spill] sm:$0xff] }
 0xb27   : > { %v4553_v31 = vsel %vm13294_vm0, %v13293_v58, %v13292_v56  ;;  %vm13295_vm6 = vmmov %vm13287_vm9  ;;  %6158 = vmatprep.subr.msk.mxu0 %vm13261_vm11, %v5212_v54 }
 0xb28   : > { %v5205_v33 = vsel %vm13295_vm6, %v13289_v34, %v13290_v40  ;;  %vm13296_vm9 = vmmov %vm13294_vm0  ;;  %6098 = vmatprep.subr.msk.mxu1 %vm13277_vm8, %v4553_v31  ;;  %v13300_v40 = vld [vmem:[#allocation148_spill] sm:$0xff] }
 0xb29   : > { %v4546_v28 = vsel %vm13296_vm9, %v13292_v56, %v13293_v58  ;;  %6159 = vmatpush1.msk.msra.mxu0 %vm13263_vm15, %v5205_v33  ;;  %vm13299_vm5 = vmmov %vm13295_vm6  ;;  %v13301_v56 = vld [vmem:[#allocation164_spill] sm:$0xff]  ;;  %v11260_v58 = vpop.permute.xlu1 %5317 }
 0xb2a   : > { %v5211_v34 = vsel %vm13299_vm5, %v13298_v36, %v13297_v6  ;;  %6099 = vmatpush1.msk.msra.mxu1 %vm13283_vm2, %v4546_v28  ;;  %vm13302_vm10 = vmmov %vm13294_vm0 }
 0xb2b   : > { %v4552_v54 = vsel %vm13302_vm10, %v13301_v56, %v13300_v40  ;;  %vm13303_vm0 = vmmov %vm13299_vm5  ;;  %6160 = vmatprep.subr.msk.mxu0 %vm13261_vm11, %v5211_v34  ;;  %v13310_v34 = vld [vmem:[#allocation138_spill] sm:$0xff] }
 0xb2c   : > { %v5204_v31 = vsel %vm13303_vm0, %v13297_v6, %v13298_v36  ;;  %vm13304_vm6 = vmmov %vm13296_vm9  ;;  %6100 = vmatprep.subr.msk.mxu1 %vm13277_vm8, %v4552_v54  ;;  %vm13305_vm9 = vcmp.lt.s32.totalorder %v6893_v24, 98  ;;  %v13307_v6 = vld [vmem:[#allocation81_spill] sm:$0xff] }
 0xb2d   : > { %v4545_v33 = vsel %vm13304_vm6, %v13300_v40, %v13301_v56  ;;  %6161 = vmatpush1.msk.msra.mxu0 %vm13263_vm15, %v5204_v31  ;;  %v5146_v28 = vsel %vm13305_vm9, %v5132_v9, %v9914_v7  ;;  %vm13308_vm5 = vmmov %vm13303_vm0  ;;  %v13309_v40 = vld [vmem:[#allocation137_spill] sm:$0xff]  ;;  %v5203_v54 = vsel %vm13303_vm0, %v13306_v35, %v13307_v6  ;;  %v5139_v46 = vsel %vm13305_vm9, %v9914_v7, %v5132_v9  ;;  %v11314_v7 = vpop.permute.xlu1 %4660  ;;  %v13315_v9 = vld [vmem:[#allocation28_spill] sm:$0xff] }
 0xb2e   : > { %v5210_v36 = vsel %vm13308_vm5, %v13307_v6, %v13306_v35  ;;  %6101 = vmatpush1.msk.msra.mxu1 %vm13283_vm2, %v4545_v33  ;;  %vm13311_vm10 = vmmov %vm13304_vm6  ;;  %v4544_v31 = vsel %vm13304_vm6, %v13309_v40, %v13310_v34  ;;  %v11304_v33 = vpop.permute.xlu0 %5269  ;;  %v13312_v35 = vld [vmem:[#allocation95_spill] sm:$0xff] }
 0xb2f   : > { %v4551_v56 = vsel %vm13311_vm10, %v13310_v34, %v13309_v40  ;;  %6162 = vmatprep.subr.msk.mxu0 %vm13261_vm11, %v5210_v36  ;;  %vm13313_vm5 = vmmov %vm13304_vm6  ;;  %vm13316_vm10 = vnez %v13315_v9  ;;  %v13319_v40 = vld [vmem:[#allocation27_spill] sm:$0xff]  ;;  %v13352_v34 = vld [vmem:[#allocation120_spill] sm:$0xff] }
 0xb30   : > { %6102 = vmatprep.subr.msk.mxu1 %vm13277_vm8, %v4551_v56  ;;  %6163 = vmatpush1.msk.msra.mxu0 %vm13263_vm15, %v5203_v54  ;;  %v4550_v6 = vsel %vm13313_vm5, %v9620_v15, %v13312_v35  ;;  %vm13314_vm11 = vmmov %vm13313_vm5  ;;  %vm13320_vm6 = vnez %v13319_v40  ;;  %v13354_v54 = vld [vmem:[#allocation65_spill] sm:$0xff]  ;;  %v13362_v40 = vld [vmem:[#allocation87_spill] sm:$0xff] }
 0xb31   : > { %6103 = vmatpush1.msk.msra.mxu1 %vm13283_vm2, %v4544_v31  ;;  %v4543_v1 = vsel %vm13314_vm11, %v13312_v35, %v9620_v15  ;;  %6164 = vmatprep.subr.msk.mxu0 %vm13316_vm10, %v5146_v28  ;;  %vm13317_vm15 = vmmov %vm13305_vm9  ;;  %v5138_v15 = vsel %vm13305_vm9, %v9958_v26, %v9672_v12  ;;  %v13356_v35 = vld [vmem:[#allocation17_spill] sm:$0xff] }
 0xb32   : > { %6104 = vmatprep.subr.msk.mxu1 %vm13277_vm8, %v4550_v6  ;;  %v5145_v57 = vsel %vm13317_vm15, %v9672_v12, %v9958_v26  ;;  %vm13318_vm0 = vmmov %vm13313_vm5  ;;  %6165 = vmatpush1.msk.msra.mxu0 %vm13320_vm6, %v5139_v46  ;;  %v11348_v46 = vpop.permute.xlu0 %5267  ;;  %v11354_v12 = vpop.permute.xlu1 %5315 }
 0xb33   : > { %v4549_v36 = vsel %vm13318_vm0, %v9760_v45, %v10044_v4  ;;  %6105 = vmatpush1.msk.msra.mxu1 %vm13283_vm2, %v4543_v1  ;;  %vm13321_vm5 = vmmov %vm13318_vm0  ;;  %6166 = vmatprep.subr.msk.mxu0 %vm13316_vm10, %v5145_v57 }
 0xb34   : > { %v4542_v28 = vsel %vm13321_vm5, %v10044_v4, %v9760_v45  ;;  %6106 = vmatprep.subr.msk.mxu1 %vm13277_vm8, %v4549_v36  ;;  %6167 = vmatpush1.msk.msra.mxu0 %vm13320_vm6, %v5138_v15  ;;  %v13322_v4 = vld [vmem:[#allocation55_spill] sm:$0xff]  ;;  %vm13323_vm8 = vcmp.lt.s32.totalorder %v6893_v24, 111 }
 0xb35   : > { %6107 = vmatpush1.msk.msra.mxu1 %vm13283_vm2, %v4542_v28  ;;  %6168 = vmatprep.subr.msk.mxu0 %vm13316_vm10, %v10114_v39  ;;  %vm13325_vm2 = vmmov %vm13323_vm8  ;;  %v13365_v28 = vld [vmem:[#allocation59_spill] sm:$0xff] }
 0xb36   : > { %6108 = vmatprep.subr.msk.mxu1 %vm13214_vm7, %v10166_v25  ;;  %6169 = vmatpush1.msk.msra.mxu0 %vm13320_vm6, %v10109_v5  ;;  %v4751_v45 = vpop.permute.xlu0 %4750  ;;  %v11380_v26 = vpop.permute.xlu1 %4658  ;;  %vm13338_vm15 = vmmov %vm13325_vm2 }
 0xb37   : > { %6109 = vmatpush2.msk.msra.mxu1 %vm13217_vm14, %v10161_v63  ;;  %6170 = vmatprep.subr.msk.mxu0 %vm13316_vm10, %v10202_v17  ;;  %v4765_v39 = vsel %vm13323_vm8, %v4751_v45, %v10484_v0  ;;  %v13324_v63 = vld [vmem:[#allocation105_spill] sm:$0xff]  ;;  %v13326_v17 = vld [vmem:[#allocation24_spill] sm:$0xff]  ;;  %vm13342_vm0 = vmmov %vm13325_vm2  ;;  %vm13350_vm8 = vnez %v13349_v50 }
 0xb38   : > { %6110 = vmatprep.subr.msk.mxu1 %vm13214_vm7, %v10242_v42  ;;  %6171 = vmatpush1.msk.msra.mxu0 %vm13320_vm6, %v10197_v41  ;;  %v4758_v41 = vsel %vm13325_vm2, %v10484_v0, %v4751_v45  ;;  %v13330_v42 = vld [vmem:[#allocation22_spill] sm:$0xff]  ;;  %v4761_v0 = vsel %vm13338_vm15, %v10499_v19, %v10783_v51  ;;  %vm13347_vm9 = vmmov %vm13342_vm0 }
 0xb39   : > { %6111 = vmatpush2.msk.msra.mxu1 %vm13217_vm14, %v10237_v52  ;;  %6172 = vmatprep.subr.msk.mxu0 %vm13316_vm10, %v10283_v21  ;;  %v13328_v52 = vld [vmem:[#allocation23_spill] sm:$0xff]  ;;  %v13332_v21 = vld [vmem:[#allocation21_spill] sm:$0xff]  ;;  %vm13355_vm15 = vmmov %vm13342_vm0 }
 0xb3a   : > { %6112 = vmatprep.subr.msk.mxu1 %vm13214_vm7, %v10323_v53  ;;  %6173 = vmatpush1.msk.msra.mxu0 %vm13320_vm6, %v10278_v38  ;;  %v11400_v5 = vpop.permute.xlu0 %5265  ;;  %v11411_v25 = vpop.permute.xlu1 %5257  ;;  %vm13329_vm11 = vnez %v13328_v52  ;;  %v13334_v53 = vld [vmem:[#allocation119_spill] sm:$0xff]  ;;  %v4759_v31 = vsel %vm13355_vm15, %v13354_v54, %v10939_v49 }
 0xb3b   : > { %6113 = vmatpush2.msk.msra.mxu1 %vm13217_vm14, %v13322_v4  ;;  %6174 = vmatprep.subr.msk.mxu0 %vm13316_vm10, %v10363_v61  ;;  %v13367_v4 = vld [vmem:[#allocation46_spill] sm:$0xff] }
 0xb3c   : > { %6114 = vmatprep.subr.msk.mxu1 %vm13214_vm7, %v10397_v8  ;;  %6175 = vmatpush1.msk.msra.mxu0 %vm13320_vm6, %v13324_v63  ;;  %vm13327_vm7 = vnez %v13326_v17  ;;  %v13336_v8 = vld [vmem:[#allocation63_spill] sm:$0xff]  ;;  %v13371_v17 = vld [vmem:[#allocation204_spill] sm:$0xff] }
 0xb3d   : > { %6115 = vmatpush2.msk.msra.mxu1 %vm13217_vm14, %v10392_v44  ;;  %6176 = vmatprep.subr.msk.mxu0 %vm13316_vm10, %v10457_v14  ;;  %vm13331_vm14 = vnez %v13330_v42  ;;  %vm13333_vm10 = vnez %v13332_v21  ;;  %v13335_v44 = vld [vmem:[#allocation101_spill] sm:$0xff]  ;;  %v5461_v42 = vld [vmem:[#allocation10 + $0xe8] sm:$0xf] }
 0xb3e   : > { %6116 = vmatprep.subr.msk.mxu1 %vm13327_vm7, %v4765_v39  ;;  %6177 = vmatpush1.msk.msra.mxu0 %vm13320_vm6, %v10452_v30  ;;  %v5342_v38 = vpop.permute.xlu0 %5341  ;;  %v11438_v61 = vpop.permute.xlu1 %5255  ;;  %v13337_v30 = vld [vmem:[#allocation62_spill] sm:$0xff]  ;;  %vm13344_vm6 = vcmp.lt.s32.totalorder %v6893_v24, 95 }
 0xb3f   : > { %6117 = vmatpush2.msk.msra.mxu1 %vm13329_vm11, %v4758_v41  ;;  %6178 = vmatprep.subr.msk.mxu0 %vm13331_vm14, %v10512_v13  ;;  %v13339_v13 = vld [vmem:[#allocation218_spill] sm:$0xff]  ;;  %vm13348_vm5 = vmmov %vm13344_vm6 }
 0xb40   : > { %6118 = vmatprep.subr.msk.mxu1 %vm13327_vm7, %v10571_v29  ;;  %6179 = vmatpush2.msk.msra.mxu0 %vm13333_vm10, %v10507_v3  ;;  %v13340_v29 = vld [vmem:[#allocation214_spill] sm:$0xff]  ;;  %vm13353_vm2 = vmmov %vm13348_vm5 }
 0xb41   : > { %6119 = vmatpush2.msk.msra.mxu1 %vm13329_vm11, %v13334_v53  ;;  %6180 = vmatprep.subr.msk.mxu0 %vm13331_vm14, %v13335_v44  ;;  %v5355_v56 = vsel %vm13353_vm2, %v13352_v34, %v13351_v59 }
 0xb42   : > { %6120 = vmatprep.subr.msk.mxu1 %vm13327_vm7, %v10660_v20  ;;  %6181 = vmatpush2.msk.msra.mxu0 %vm13333_vm10, %v13336_v8  ;;  %v11458_v14 = vpop.permute.xlu0 %5409  ;;  %v11470_v3 = vpop.permute.xlu1 %5253  ;;  %v13341_v20 = vld [vmem:[#allocation91_spill] sm:$0xff] }
 0xb43   : > { %6121 = vmatpush2.msk.msra.mxu1 %vm13329_vm11, %v13337_v30  ;;  %6182 = vmatprep.subr.msk.mxu0 %vm13331_vm14, %v10691_v62  ;;  %v4760_v19 = vsel %vm13342_vm0, %v13341_v20, %v13340_v29  ;;  %v13343_v62 = vld [vmem:[#allocation176_spill] sm:$0xff]  ;;  %v4753_v51 = vsel %vm13347_vm9, %v13340_v29, %v13341_v20  ;;  %vm13357_vm0 = vnez %v13356_v35  ;;  %vm13359_vm9 = vmmov %vm13353_vm2  ;;  %v13377_v8 = vld [vmem:[#allocation175_spill] sm:$0xff] }
 0xb44   : > { %6122 = vmatprep.subr.msk.mxu1 %vm13327_vm7, %v10725_v23  ;;  %6183 = vmatpush2.msk.msra.mxu0 %vm13333_vm10, %v10686_v2  ;;  %v5356_v2 = vsel %vm13344_vm6, %v5342_v38, %v13343_v62  ;;  %v13345_v23 = vld [vmem:[#allocation45_spill] sm:$0xff]  ;;  %v5349_v55 = vsel %vm13348_vm5, %v13343_v62, %v5342_v38  ;;  %vm13358_vm6 = vcmp.lt.s32.totalorder %v6893_v24, 112  ;;  %v5348_v9 = vsel %vm13359_vm9, %v13351_v59, %v13352_v34  ;;  %vm13360_vm5 = vmmov %vm13355_vm15  ;;  %v13383_v20 = vld [vmem:[#allocation156_spill] sm:$0xff] }
 0xb45   : > { %6123 = vmatpush2.msk.msra.mxu1 %vm13329_vm11, %v10720_v16  ;;  %6184 = vmatprep.subr.msk.mxu0 %vm13331_vm14, %v13339_v13  ;;  %v13346_v16 = vld [vmem:[#allocation54_spill] sm:$0xff]  ;;  %v4752_v57 = vsel %vm13360_vm5, %v10939_v49, %v13354_v54  ;;  %vm13361_vm2 = vmmov %vm13358_vm6  ;;  %v13373_v38 = vld [vmem:[#allocation53_spill] sm:$0xff] }
 0xb46   : > { %6124 = vmatprep.subr.msk.mxu1 %vm13327_vm7, %v4761_v0  ;;  %6185 = vmatpush2.msk.msra.mxu0 %vm13333_vm10, %v13345_v23  ;;  %v4681_v32 = vpop.permute.xlu0 %4680  ;;  %v11516_v1 = vpop.permute.xlu1 %5397  ;;  %vm13363_vm15 = vmmov %vm13359_vm9 }
 0xb47   : > { %6125 = vmatpush2.msk.msra.mxu1 %vm13329_vm11, %v13346_v16  ;;  %6186 = vmatprep.subr.msk.mxu0 %vm13350_vm8, %v5356_v2  ;;  %v4695_v6 = vsel %vm13358_vm6, %v4681_v32, %v11004_v43  ;;  %v4688_v36 = vsel %vm13361_vm2, %v11004_v43, %v4681_v32  ;;  %v5354_v15 = vsel %vm13363_vm15, %v13362_v40, %v10972_v60  ;;  %vm13364_vm6 = vmmov %vm13359_vm9  ;;  %v4865_v16 = vld [vmem:[#allocation10 + $0x90] sm:$0xff]  ;;  %v4870_v32 = vld [vmem:[#allocation10 + $0xb8] sm:$0xf] }
 0xb48   : > { %6126 = vmatprep.subr.msk.mxu1 %vm13327_vm7, %v4760_v19  ;;  %6187 = vmatpush2.msk.msra.mxu0 %vm13357_vm0, %v5349_v55  ;;  %v5347_v49 = vsel %vm13364_vm6, %v10972_v60, %v13362_v40  ;;  %vm13369_vm9 = vmmov %vm13364_vm6 }
 0xb49   : > { %6127 = vmatpush2.msk.msra.mxu1 %vm13329_vm11, %v4753_v51  ;;  %6188 = vmatprep.subr.msk.mxu0 %vm13350_vm8, %v5355_v56  ;;  %v5346_v63 = vsel %vm13369_vm9, %v11040_v37, %v13365_v28  ;;  %vm13370_vm5 = vmmov %vm13361_vm2  ;;  %v13397_v56 = vmov 0.0  }
 0xb4a   : > { %6128 = vmatprep.subr.msk.mxu1 %vm13327_vm7, %v4759_v31  ;;  %6189 = vmatpush2.msk.msra.mxu0 %vm13357_vm0, %v5348_v9  ;;  %v11549_v43 = vpop.permute.xlu0 %5263  ;;  %vm13366_vm7 = vmmov %vm13364_vm6  ;;  %v11563_v60 = vpop.permute.xlu1 %5251  ;;  %v4687_v41 = vsel %vm13370_vm5, %v11089_v10, %v13367_v4 }
 0xb4b   : > { %6129 = vmatpush2.msk.msra.mxu1 %vm13329_vm11, %v4752_v57  ;;  %6190 = vmatprep.subr.msk.mxu0 %vm13350_vm8, %v5354_v15  ;;  %v5353_v45 = vsel %vm13366_vm7, %v13365_v28, %v11040_v37  ;;  %vm13368_vm11 = vmmov %vm13361_vm2  ;;  %v5458_v57 = vld [vmem:[#allocation10 + $0xd0] sm:$0xff] }
 0xb4c   : > { %6130 = vmatprep.subr.msk.mxu1 %vm13200_vm3, %v4695_v6  ;;  %v4694_v39 = vsel %vm13368_vm11, %v13367_v4, %v11089_v10  ;;  %6191 = vmatpush2.msk.msra.mxu0 %vm13357_vm0, %v5347_v49  ;;  %vm13372_vm2 = vmmov %vm13364_vm6  ;;  %v5457_v6 = vld [vmem:[#allocation10 + $0xc8] sm:$0xff] }
 0xb4d   : > { %6131 = vmatpush2.msk.msra.mxu1 %vm13203_vm1, %v4688_v36  ;;  %6192 = vmatprep.subr.msk.mxu0 %vm13350_vm8, %v5353_v45  ;;  %v5352_v52 = vsel %vm13372_vm2, %v13371_v17, %v11148_v47  ;;  %vm13374_vm15 = vmmov %vm13370_vm5  ;;  %v5460_v36 = vld [vmem:[#allocation10 + $0xe0] sm:$0xf] }
 0xb4e   : > { %6132 = vmatprep.subr.msk.mxu1 %vm13200_vm3, %v4694_v39  ;;  %v4693_v37 = vsel %vm13374_vm15, %v13373_v38, %v11210_v22  ;;  %6193 = vmatpush2.msk.msra.mxu0 %vm13357_vm0, %v5346_v63  ;;  %vm13375_vm6 = vmmov %vm13372_vm2  ;;  %v5272_v44 = vpop.permute.xlu0 %5271 }
 0xb4f   : > { %6133 = vmatpush2.msk.msra.mxu1 %vm13203_vm1, %v4687_v41  ;;  %v5345_v10 = vsel %vm13375_vm6, %v11148_v47, %v13371_v17  ;;  %vm13376_vm7 = vmmov %vm13370_vm5  ;;  %6194 = vmatprep.subr.msk.mxu0 %vm13350_vm8, %v5352_v52 }
 0xb50   : > { %v4686_v53 = vsel %vm13376_vm7, %v11210_v22, %v13373_v38  ;;  %6134 = vmatprep.subr.msk.mxu1 %vm13200_vm3, %v4693_v37  ;;  %vm13378_vm11 = vmmov %vm13372_vm2  ;;  %6195 = vmatpush2.msk.msra.mxu0 %vm13357_vm0, %v5345_v10  ;;  %v5396_v22 = vpop.permute.xlu1 %5395 }
 0xb51   : > { %v5351_v30 = vsel %vm13378_vm11, %v13377_v8, %v11260_v58  ;;  %vm13379_vm9 = vmmov %vm13370_vm5  ;;  %6135 = vmatpush2.msk.msra.mxu1 %vm13203_vm1, %v4686_v53  ;;  %5094 = vmatprep.mubr.f32.mxu0 %v13397_v56 }
 0xb52   : > { %v4692_v47 = vsel %vm13379_vm9, %v11001_v11, %v11314_v7  ;;  %vm13380_vm5 = vmmov %vm13372_vm2  ;;  %6196 = vmatprep.subr.msk.mxu0 %vm13350_vm8, %v5351_v30  ;;  %v5412_v23 = vpop.permute.xlu0 %5411  ;;  %5873 = vmatmul.mubr.msk.f32.gmra.mxu0 %vm3658_vm13, %v4870_v32 }
 0xb53   : > { %v5344_v0 = vsel %vm13380_vm5, %v11260_v58, %v13377_v8  ;;  %vm13381_vm2 = vmmov %vm13376_vm7  ;;  %6136 = vmatprep.subr.msk.mxu1 %vm13200_vm3, %v4692_v47  ;;  %vm13385_vm7 = vcmp.lt.s32.totalorder %v6893_v24, 96  ;;  %5602 = vmatprep.mubr.f32.mxu0 %v5457_v6 }
 0xb54   : > { %v4685_v13 = vsel %vm13381_vm2, %v11314_v7, %v11001_v11  ;;  %vm13382_vm15 = vmmov %vm13380_vm5  ;;  %6197 = vmatpush2.msk.msra.mxu0 %vm13357_vm0, %v5344_v0  ;;  %v5286_v11 = vsel %vm13385_vm7, %v5272_v44, %v11411_v25  ;;  %v4866_v7 = vld [vmem:[#allocation10 + $0x98] sm:$0xff] }
 0xb55   : > { %v5350_v29 = vsel %vm13382_vm15, %v11087_v18, %v11354_v12  ;;  %vm13384_vm6 = vmmov %vm13381_vm2  ;;  %6137 = vmatpush2.msk.msra.mxu1 %vm13203_vm1, %v4685_v13  ;;  %5011 = vmatprep.mubr.f32.mxu1 %v4866_v7 }
 0xb56   : > { %v4691_v58 = vsel %vm13384_vm6, %v13383_v20, %v11380_v26  ;;  %vm13386_vm11 = vmmov %vm13380_vm5  ;;  %6198 = vmatprep.subr.msk.mxu0 %vm13350_vm8, %v5350_v29 }
 0xb57   : > { %v5343_v19 = vsel %vm13386_vm11, %v11354_v12, %v11087_v18  ;;  %vm13387_vm9 = vmmov %vm13381_vm2  ;;  %6138 = vmatprep.subr.msk.mxu1 %vm13200_vm3, %v4691_v58  ;;  %vm13389_vm2 = vcmp.lt.s32.totalorder %v6893_v24, 94  ;;  %v5250_v12 = vpop.permute.xlu1 %5249  ;;  %v5459_v24 = vld [vmem:[#allocation10 + $0xd8] sm:$0xf] }
 0xb58   : > { %v4684_v62 = vsel %vm13387_vm9, %v11380_v26, %v13383_v20  ;;  %vm13388_vm5 = vmmov %vm13385_vm7  ;;  %6199 = vmatpush2.msk.msra.mxu0 %vm13357_vm0, %v5343_v19  ;;  %v5426_v18 = vsel %vm13389_vm2, %v5412_v23, %v11516_v1 }
 0xb59   : > { %v5279_v2 = vsel %vm13388_vm5, %v11411_v25, %v5272_v44  ;;  %6139 = vmatpush2.msk.msra.mxu1 %vm13203_vm1, %v4684_v62  ;;  %6200 = vmatprep.subr.msk.mxu0 %vm13239_vm4, %v5286_v11  ;;  %v4869_v25 = vld [vmem:[#allocation10 + $0xb0] sm:$0xf]  ;;  %vm13391_vm3 = vmmov %vm13388_vm5 }
 0xb5a   : > { %v5285_v27 = vsel %vm13391_vm3, %v11304_v33, %v11438_v61  ;;  %6201 = vmatpush2.msk.msra.mxu0 %vm13246_vm12, %v5279_v2  ;;  %5012 = vmatmul.mubr.f32.vlgmr.msra.gmra.mxu1 %v4865_v16  ;;  %vm13393_vm1 = vmmov %vm13391_vm3 }
 0xb5b   : > { %v5278_v48 = vsel %vm13393_vm1, %v11438_v61, %v11304_v33  ;;  %vm13394_vm8 = vmmov %vm13389_vm2  ;;  %6202 = vmatprep.subr.msk.mxu0 %vm13239_vm4, %v5285_v27  ;;  %6210 = vmatprep.subr.msk.mxu1 %vm13331_vm14, %v5426_v18  ;;  %v5408_v33 = vpop.permute.xlu0 %5407  ;;  %v4868_v61 = vld [vmem:[#allocation10 + $0xa8] sm:$0xf]  ;;  %v5394_v59 = vpop.permute.xlu1 %5393 }
 0xb5c   : > { %v5419_v55 = vsel %vm13394_vm8, %v11516_v1, %v5412_v23  ;;  %vm13395_vm0 = vmmov %vm13393_vm1  ;;  %6203 = vmatpush2.msk.msra.mxu0 %vm13246_vm12, %v5278_v48  ;;  %5017 = vmatprep.mubr.f32.mxu1 %v4869_v25 }
 0xb5d   : > { %v5284_v50 = vsel %vm13395_vm0, %v11348_v46, %v11470_v3  ;;  %vm13396_vm15 = vmmov %vm13395_vm0  ;;  %6211 = vmatpush1.msk.msra.mxu1 %vm13333_vm10, %v5419_v55 }
 0xb5e   : > { %v5277_v34 = vsel %vm13396_vm15, %v11470_v3, %v11348_v46  ;;  %6204 = vmatprep.subr.msk.mxu0 %vm13239_vm4, %v5284_v50  ;;  %vm13398_vm6 = vmmov %vm13395_vm0  ;;  %5018 = vmatmul.mubr.f32.gmra.mxu1 %v4868_v61 }
 0xb5f   : > { %6205 = vmatpush2.msk.msra.mxu0 %vm13246_vm12, %v5277_v34  ;;  %v5283_v54 = vsel %vm13398_vm6, %v11400_v5, %v11563_v60  ;;  %vm13399_vm7 = vmmov %vm13389_vm2  ;;  %5679 = vmatprep.mubr.f32.mxu1 %v13397_v56 }
 0xb60   : > { %v5425_v46 = vsel %vm13399_vm7, %v11458_v14, %v5396_v22  ;;  %vm13400_vm11 = vmmov %vm13389_vm2  ;;  %6206 = vmatprep.subr.msk.mxu0 %vm13239_vm4, %v5283_v54 }
 0xb61   : > { %v5424_v3 = vsel %vm13400_vm11, %v5408_v33, %v5394_v59  ;;  %vm13401_vm9 = vmmov %vm13395_vm0  ;;  %6212 = vmatprep.subr.msk.mxu1 %vm13331_vm14, %v5425_v46 }
 0xb62   : > { %v5276_v31 = vsel %vm13401_vm9, %v11563_v60, %v11400_v5  ;;  %vm13402_vm5 = vmmov %vm13389_vm2 }
 0xb63   : > { %v5418_v35 = vsel %vm13402_vm5, %v5396_v22, %v11458_v14  ;;  %vm13403_vm2 = vmmov %vm13395_vm0  ;;  %6207 = vmatpush2.msk.msra.mxu0 %vm13246_vm12, %v5276_v31  ;;  %v5456_v14 = vld [vmem:[#allocation10 + $0xc0] sm:$0xff] }
 0xb64   : > { %v5282_v1 = vsel %vm13403_vm2, %v11549_v43, %v5250_v12  ;;  %vm13404_vm3 = vmmov %vm13402_vm5  ;;  %6213 = vmatpush1.msk.msra.mxu1 %vm13333_vm10, %v5418_v35 }
 0xb65   : > { %v5417_v9 = vsel %vm13404_vm3, %v5394_v59, %v5408_v33  ;;  %vm13405_vm1 = vmmov %vm13395_vm0  ;;  %6208 = vmatprep.subr.msk.mxu0 %vm13239_vm4, %v5282_v1  ;;  %6214 = vmatprep.subr.msk.mxu1 %vm13331_vm14, %v5424_v3  ;;  %v3891_v60 = vpop.f32.mrf.mxu1 }
 0xb66   : > { %v5275_v5 = vsel %vm13405_vm1, %v5250_v12, %v11549_v43  ;;  %6215 = vmatpush1.msk.msra.mxu1 %vm13333_vm10, %v5417_v9 }
 0xb67   : > { %6209 = vmatpush2.msk.msra.mxu0 %vm13246_vm12, %v5275_v5  ;;  %5874 = vmatmul.mubr.msk.f32.vlgmr.msra.gmra.mxu1 %vm3658_vm13, %v5458_v57  ;;  %v3893_v41 = vpop.f32.mrf.mxu1  ;;  %v5701_v57 = vpop.permute.xlu1 %5700 }
 0xb68   : > { %5603 = vmatmul.mubr.f32.vlgmr.msra.gmra.mxu0 %v5456_v14  ;;  %5685 = vmatprep.mubr.f32.mxu1 %v13397_v56 }
 0xb69   : > { %5608 = vmatprep.mubr.f32.mxu0 %v5460_v36  ;;  %v3897_v52 = vpop.f32.mrf.mxu1 }
 0xb6b   : > { %5875 = vmatmul.mubr.msk.f32.gmra.mxu1 %vm3658_vm13, %v5461_v42  ;;  %v3899_v10 = vpop.f32.mrf.mxu1 }
 0xb6c   : > { %5609 = vmatmul.mubr.f32.gmra.mxu0 %v5459_v24 }
 0xb7d   : > { %v3731_v40 = vpop.f32.mrf.mxu0 }
 0xb7f   : > { %v3733_v15 = vpop.f32.mrf.mxu0 }
 0xb81   : > { %v3737_v49 = vpop.f32.mrf.mxu0 }
 0xb83   : > { %v3739_v43 = vpop.f32.mrf.mxu0 }
 0xb85   : > { %v3808_v28 = vpop.f32.mrf.mxu0 }
 0xb86   : > { %v3809_v20 = vadd.f32 %v3808_v28, %v3731_v40 }
 0xb87   : > { %v3810_v21 = vpop.f32.mrf.mxu0 }
 0xb88   : > { %v3811_v7 = vadd.f32 %v3810_v21, %v3733_v15  ;;  %v3892_v23 = vadd.f32 %v3891_v60, %v3809_v20 }
 0xb89   : > { %v3814_v45 = vpop.f32.mrf.mxu0 }
 0xb8a   : > { %v3815_v19 = vadd.f32 %v3814_v45, %v3737_v49  ;;  %v3894_v26 = vadd.f32 %v3893_v41, %v3811_v7 }
 0xb8b   : > { %v3816_v4 = vpop.f32.mrf.mxu0 }
 0xb8c   : > { %v3817_v18 = vadd.f32 %v3816_v4, %v3739_v43  ;;  %v3898_v48 = vadd.f32 %v3897_v52, %v3815_v19 }
 0xb8d   : > { %v3968_v39 = vpop.f32.mrf.mxu0 }
 0xb8e   : > { %v3969_v25 = vadd.f32 %v3968_v39, %v3892_v23  ;;  %v3900_v59 = vadd.f32 %v3899_v10, %v3817_v18 }
 0xb8f   : > { %v3970_v63 = vpop.f32.mrf.mxu0 }
 0xb90   : > { %v3971_v33 = vadd.f32 %v3970_v63, %v3894_v26 }
 0xb91   : > { %v3974_v17 = vpop.f32.mrf.mxu0 }
 0xb92   : > { %v3975_v34 = vadd.f32 %v3974_v17, %v3898_v48 }
 0xb93   : > { %v3976_v38 = vpop.f32.mrf.mxu0 }
 0xb94   : > { %v3977_v1 = vadd.f32 %v3976_v38, %v3900_v59  ;;  %v5706_v38 = vpop.permute.xlu0 %5705 }
 0xbc9   : > { %v4499_v53 = vpop.f32.mrf.mxu1 }
 0xbcb   : > { %v4501_v8 = vpop.f32.mrf.mxu1 }
 0xbcf   : > { %v4505_v47 = vpop.f32.mrf.mxu1 }
 0xbd0   : > { %v4422_v37 = vpop.f32.mrf.mxu0 }
 0xbd1   : > { %v4507_v0 = vpop.f32.mrf.mxu1  ;;  %v4500_v16 = vadd.f32 %v4499_v53, %v4422_v37 }
 0xbd2   : > { %v4424_v44 = vpop.f32.mrf.mxu0 }
 0xbd3   : > { %v4502_v27 = vadd.f32 %v4501_v8, %v4424_v44  ;;  %v4510_v61 = vadd.f32 %v4500_v16, %v3969_v25 }
 0xbd4   : > { %v4428_v30 = vpop.f32.mrf.mxu0 }
 0xbd5   : > { %v4506_v55 = vadd.f32 %v4505_v47, %v4428_v30  ;;  %v4511_v3 = vadd.f32 %v4502_v27, %v3971_v33 }
 0xbd6   : > { %v4430_v22 = vpop.f32.mrf.mxu0 }
 0xbd7   : > { %v4508_v56 = vadd.f32 %v4507_v0, %v4430_v22  ;;  %v4512_v9 = vadd.f32 %v4506_v55, %v3975_v34 }
 0xbd8   : > { %v5090_v13 = vpop.f32.mrf.mxu0 }
 0xbd9   : > { %v4513_v15 = vadd.f32 %v4508_v56, %v3977_v1 }
 0xbda   : > { %v5092_v11 = vpop.f32.mrf.mxu0 }
 0xc12   : > { %v5096_v2 = vpop.f32.mrf.mxu0 }
 0xc14   : > { %v5098_v50 = vpop.f32.mrf.mxu0 }
 0xc1a   : > { %v5013_v29 = vpop.f32.mrf.mxu1 }
 0xc1b   : > { %v5091_v51 = vadd.f32 %v5090_v13, %v5013_v29 }
 0xc1c   : > { %v5015_v58 = vpop.f32.mrf.mxu1 }
 0xc1d   : > { %v5093_v32 = vadd.f32 %v5092_v11, %v5015_v58  ;;  %v5101_v31 = vadd.f32 %v5091_v51, %v4510_v61 }
 0xc1e   : > { %v5019_v62 = vpop.f32.mrf.mxu1 }
 0xc1f   : > { %v5097_v35 = vadd.f32 %v5096_v2, %v5019_v62  ;;  %v5102_v36 = vadd.f32 %v5093_v32, %v4511_v3 }
 0xc20   : > { %v5021_v12 = vpop.f32.mrf.mxu1 }
 0xc21   : > { %v5099_v24 = vadd.f32 %v5098_v50, %v5021_v12  ;;  %v5103_v28 = vadd.f32 %v5097_v35, %v4512_v9 }
 0xc23   : > { %v5104_v63 = vadd.f32 %v5099_v24, %v4513_v15 }
 0xc27   : > { %v5681_v46 = vpop.f32.mrf.mxu1 }
 0xc28   : > { %v5604_v54 = vpop.f32.mrf.mxu0 }
 0xc29   : > { %v5682_v6 = vadd.f32 %v5681_v46, %v5604_v54  ;;  %v5683_v14 = vpop.f32.mrf.mxu1 }
 0xc2a   : > { %v5606_v5 = vpop.f32.mrf.mxu0 }
 0xc2b   : > { %v5692_v42 = vadd.f32 %v5682_v6, %v5101_v31  ;;  %v5684_v40 = vadd.f32 %v5683_v14, %v5606_v5  ;;  %v5687_v43 = vpop.f32.mrf.mxu1 }
 0xc2c   : > { %v5610_v49 = vpop.f32.mrf.mxu0 }
 0xc2d   : > { %v5708_v21 = vadd.f32 %v5701_v57, %v5692_v42  ;;  %v5693_v45 = vadd.f32 %v5684_v40, %v5102_v36  ;;  %v5688_v4 = vadd.f32 %v5687_v43, %v5610_v49  ;;  %v5689_v60 = vpop.f32.mrf.mxu1 }
 0xc2e   : > { %v5612_v39 = vpop.f32.mrf.mxu0 }
 0xc2f   : > { %5712 = vst [vmem:[%s472_s30] sm:$0xff] %v5708_v21  ;;  %v5709_v41 = vadd.f32 %v5701_v57, %v5693_v45  ;;  %v5694_v17 = vadd.f32 %v5688_v4, %v5103_v28  ;;  %v5690_v52 = vadd.f32 %v5689_v60, %v5612_v39 }
 0xc31   : > { %5713 = vst [vmem:[%s472_s30 + $0x8] sm:$0xff] %v5709_v41  ;;  %v5710_v37 = vadd.f32 %v5706_v38, %v5694_v17  ;;  %v5695_v10 = vadd.f32 %v5690_v52, %v5104_v63 }
 0xc33   : > { %5714 = vst [vmem:[%s472_s30 + $0x10] sm:$0xf] %v5710_v37  ;;  %v5711_v53 = vadd.f32 %v5706_v38, %v5695_v10 }
 0xc35   : > { %5715 = vst [vmem:[%s472_s30 + $0x18] sm:$0xf] %v5711_v53 }
 0xc36 PF: > { %s25_s21 = sadd.s32 1, %s6445_s21  }
 0xc37   : > { %p22_p2 = scmp.ge.s32.totalorder %s25_s21, 4  }
 0xc39   :  { %24 = sbr.rel (!%p22_p2) target bundleno = 8 (0x8), region = 124 }
 0xc3e   :  { %5737 = vsyncpa [#allocation6], 1 }
 0xc3f   :  { %5739 = vsyncpa [#allocation6 + $0x1], 1 }
 0xc40   :  { %5740 = vsyncpa [#allocation8], 1 }
 0xc41   :  { %5741 = vsyncpa [#allocation11], 1 }

</bundles_post_ra>
